<compile_context>
chip_gen: v6e
topology: v6e:2x2x1
jax: 0.10.0
libtpu: 0.0.40
codegen_flags: <defaults>
</compile_context>

<pallas_src>
import math
import functools
import numpy as np

import jax
import jax.numpy as jnp
from jax.experimental import pallas as pl
from jax.experimental.pallas import tpu as pltpu

# ----------------------- small synthetic CLIP config -----------------------
B = 2               # batch of images
IMG = 16            # image spatial size
CIN = 3             # image channels
PATCH = 8           # patch size  -> (16/8)^2 = 4 patches
VIS_WIDTH = 32      # visual transformer width
VIS_HEADS = 4
VIS_LAYERS = 1
EMBED_DIM = 32      # shared CLIP embedding dim (visual.output_dim == vis_dim)
CTX_DIM = 32        # text transformer width (ln_final.weight.shape[0])
TXT_HEADS = 4
TXT_LAYERS = 1
N_CLS = 3           # number of class names
N_CTX = 4           # "a photo of a" -> 4 context tokens
SEQ_LEN = 8         # SOS + 4 ctx + name + '.' + EOS
META_HIDDEN = EMBED_DIM // 16   # meta_net bottleneck (= 2)

F32 = jnp.float32
BF16 = jnp.bfloat16
L2_EPS = 1e-12


# ------------------------------- helpers ------------------------------------
def _vmem_specs(n):
    return [pl.BlockSpec(memory_space=pltpu.MemorySpace.VMEM) for _ in range(n)]


def _ln(x, g, b, eps=1e-5):
    """Row-wise LayerNorm in f32 (g, b are (1, D))."""
    m = jnp.mean(x, axis=-1, keepdims=True)
    v = jnp.mean(jnp.square(x - m), axis=-1, keepdims=True)
    return (x - m) * jax.lax.rsqrt(v + eps) * g + b


def _block_cost(Bt, S, D, H):
    M = Bt * S
    Dh = D // H
    flops = (2 * M * D * 3 * D            # qkv projections
             + 2 * 2 * Bt * H * S * S * Dh  # scores + p@v
             + 2 * M * D * D              # output projection
             + 2 * 2 * M * D * 4 * D)     # MLP
    trans = Bt * H * S * S + M * 4 * D    # softmax exp + gelu exp
    bytes_acc = 2 * M * D * 4 + 2 * (3 * D * D + D * D + 8 * D * D)
    return pl.CostEstimate(flops=flops, transcendentals=trans,
                           bytes_accessed=bytes_acc)


# ------------------------------- Pallas kernels -----------------------------
def _residual_block_kernel(num_heads, causal,
                           x_ref, ln1_g, ln1_b, wqkv, bqkv, wo, bo,
                           ln2_g, ln2_b, w1, b1, w2, b2, o_ref):
    """One full CLIP ResidualAttentionBlock (pre-LN), fused.

    x:      (Bt, S, D)  f32
    wqkv:   (3, H, D, Dh) bf16   per-head q/k/v projection weights
    bqkv:   (3, H, 1, Dh) f32
    wo:     (H, Dh, D)  bf16     per-head rows of the output projection
    """
    Bt, S, D = x_ref.shape
    Dh = D // num_heads
    scale = 1.0 / math.sqrt(Dh)

    x = x_ref[...]                                           # (Bt, S, D) f32
    h = _ln(x, ln1_g[...], ln1_b[...])
    h2d = h.reshape(Bt * S, D).astype(BF16)

    if causal:
        row = jax.lax.broadcasted_iota(jnp.int32, (S, S), 0)
        col = jax.lax.broadcasted_iota(jnp.int32, (S, S), 1)
        neg = jnp.where(col > row, -1e9, 0.0).astype(F32)    # (S, S)

    # ---- multi-head attention, heads unrolled (no lane slicing of values) --
    attn = jnp.zeros((Bt * S, D), F32)
    for hd in range(num_heads):
        q = jnp.dot(h2d, wqkv[0, hd, :, :], preferred_element_type=F32) + bqkv[0, hd, :, :]
        k = jnp.dot(h2d, wqkv[1, hd, :, :], preferred_element_type=F32) + bqkv[1, hd, :, :]
        v = jnp.dot(h2d, wqkv[2, hd, :, :], preferred_element_type=F32) + bqkv[2, hd, :, :]
        q = q.reshape(Bt, S, Dh)
        k = k.reshape(Bt, S, Dh)
        v = v.reshape(Bt, S, Dh)

        s = jnp.einsum("bqd,bkd->bqk", q.astype(BF16), k.astype(BF16),
                       preferred_element_type=F32) * scale
        if causal:
            s = s + neg[None, :, :]
        s_max = jnp.max(s, axis=-1, keepdims=True)
        e = jnp.exp(s - s_max)
        p = e * pl.reciprocal(jnp.sum(e, axis=-1, keepdims=True), approx=True)

        o_h = jnp.einsum("bqk,bkd->bqd", p.astype(BF16), v.astype(BF16),
                         preferred_element_type=F32)          # (Bt, S, Dh)
        # out_proj(concat_h o_h) == sum_h o_h @ wo[h]
        attn = attn + jnp.dot(o_h.reshape(Bt * S, Dh).astype(BF16), wo[hd, :, :],
                              preferred_element_type=F32)
    attn = attn + bo[...]
    x1 = x + attn.reshape(Bt, S, D)

    # ---- MLP with QuickGELU -------------------------------------------------
    h = _ln(x1, ln2_g[...], ln2_b[...])
    m = jnp.dot(h.reshape(Bt * S, D).astype(BF16), w1[...],
                preferred_element_type=F32) + b1[...]
    m = m * pl.reciprocal(1.0 + jnp.exp(-1.702 * m), approx=True)   # QuickGELU
    m = jnp.dot(m.astype(BF16), w2[...], preferred_element_type=F32) + b2[...]

    o_ref[...] = (x1 + m.reshape(Bt, S, D)).astype(o_ref.dtype)


def residual_block(x, p, num_heads, causal):
    Bt, S, D = x.shape
    kernel = functools.partial(_residual_block_kernel, num_heads, causal)
    return pl.pallas_call(
        kernel,
        out_shape=jax.ShapeDtypeStruct((Bt, S, D), F32),
        in_specs=_vmem_specs(13),
        out_specs=pl.BlockSpec(memory_space=pltpu.MemorySpace.VMEM),
        cost_estimate=_block_cost(Bt, S, D, num_heads),
    )(x.astype(F32), p["ln1_g"], p["ln1_b"], p["wqkv"], p["bqkv"], p["wo"],
      p["bo"], p["ln2_g"], p["ln2_b"], p["w1"], p["b1"], p["w2"], p["b2"])


def _visual_stem_kernel(x_ref, w_ref, cls_ref, pos_ref, g_ref, b_ref, o_ref):
    """patch-projection (conv1, no bias) + class token + pos-emb + ln_pre."""
    Bn, NP, PD = x_ref.shape
    W = w_ref.shape[1]
    g = g_ref[...]
    b = b_ref[...]

    xp = jnp.dot(x_ref[...].reshape(Bn * NP, PD).astype(BF16), w_ref[...],
                 preferred_element_type=F32).reshape(Bn, NP, W)
    xp = xp + pos_ref[pl.ds(1, NP), :][None, :, :]

    cls = cls_ref[...] + pos_ref[pl.ds(0, 1), :]              # (1, W)
    cls = jnp.broadcast_to(cls[None, :, :], (Bn, 1, W))

    o_ref[:, pl.ds(0, 1), :] = _ln(cls, g, b).astype(o_ref.dtype)
    o_ref[:, pl.ds(1, NP), :] = _ln(xp, g, b).astype(o_ref.dtype)


def _visual_tail_kernel(x_ref, g_ref, b_ref, proj_ref, o_ref):
    """ln_post on the class token + visual projection + L2 normalize."""
    f = _ln(x_ref[...], g_ref[...], b_ref[...])
    f = jnp.dot(f.astype(BF16), proj_ref[...], preferred_element_type=F32)
    inv = jax.lax.rsqrt(jnp.sum(f * f, axis=-1, keepdims=True) + L2_EPS)
    o_ref[...] = (f * inv).astype(o_ref.dtype)


def _meta_ctx_kernel(imf_ref, w1_ref, b1_ref, w2_ref, b2_ref, ctx_ref, o_ref):
    """meta_net (Linear -> ReLU -> Linear) + ctx shift, fused."""
    h = jnp.dot(imf_ref[...].astype(BF16), w1_ref[...],
                preferred_element_type=F32) + b1_ref[...]
    h = jnp.maximum(h, 0.0)
    bias = jnp.dot(h.astype(BF16), w2_ref[...],
                   preferred_element_type=F32) + b2_ref[...]          # (B, ctx_dim)
    o_ref[...] = (ctx_ref[...][None, :, :] + bias[:, None, :]).astype(o_ref.dtype)


def _text_logits_kernel(eot_ref, g_ref, b_ref, proj_ref, imf_ref, scale_ref, o_ref):
    """ln_final + text projection + L2-norm + scaled logits for ALL (B, n_cls)."""
    M, _ = eot_ref.shape
    Bn = imf_ref.shape[0]
    n_cls = M // Bn

    t = _ln(eot_ref[...], g_ref[...], b_ref[...])
    t = jnp.dot(t.astype(BF16), proj_ref[...], preferred_element_type=F32)  # (M, E)
    t = t * jax.lax.rsqrt(jnp.sum(t * t, axis=-1, keepdims=True) + L2_EPS)
    t = t.reshape(Bn, n_cls, t.shape[-1])

    imf = imf_ref[...]                                                      # (B, E), normalized
    logits = jnp.sum(imf[:, None, :] * t, axis=-1)                          # (B, n_cls)
    o_ref[...] = (scale_ref[0, 0] * logits).astype(o_ref.dtype)


# ---------------------------- model sub-modules -----------------------------
def image_encoder(image, p):
    # image: (B, 3, 16, 16) NCHW -> patches (plain-JAX layout glue)
    Bn = image.shape[0]
    nps = IMG // PATCH
    patches = image.reshape(Bn, CIN, nps, PATCH, nps, PATCH)
    patches = patches.transpose(0, 2, 4, 1, 3, 5).reshape(
        Bn, nps * nps, CIN * PATCH * PATCH)

    x = pl.pallas_call(
        _visual_stem_kernel,
        out_shape=jax.ShapeDtypeStruct((Bn, nps * nps + 1, VIS_WIDTH), F32),
        in_specs=_vmem_specs(6),
        out_specs=pl.BlockSpec(memory_space=pltpu.MemorySpace.VMEM),
    )(patches, p["conv_w"], p["class_emb"], p["pos_emb"],
      p["ln_pre_g"], p["ln_pre_b"])

    for blk in p["blocks"]:
        x = residual_block(x, blk, VIS_HEADS, causal=False)   # no mask for ViT

    cls_tok = x[:, 0, :]                                      # class token
    return pl.pallas_call(                                    # ln_post + proj + L2 norm
        _visual_tail_kernel,
        out_shape=jax.ShapeDtypeStruct((Bn, EMBED_DIM), F32),
        in_specs=_vmem_specs(4),
        out_specs=pl.BlockSpec(memory_space=pltpu.MemorySpace.VMEM),
    )(cls_tok, p["ln_post_g"], p["ln_post_b"], p["proj"])     # (B, E), normalized


def prompt_learner(imf_n, p):
    # meta_net + ctx shift in one kernel; prompt assembly is broadcast glue
    Bn = imf_n.shape[0]
    ctx_shifted = pl.pallas_call(
        _meta_ctx_kernel,
        out_shape=jax.ShapeDtypeStruct((Bn, N_CTX, CTX_DIM), F32),
        in_specs=_vmem_specs(6),
        out_specs=pl.BlockSpec(memory_space=pltpu.MemorySpace.VMEM),
    )(imf_n, p["meta_w1"], p["meta_b1"], p["meta_w2"], p["meta_b2"], p["ctx"])

    suffix_len = p["token_suffix"].shape[1]
    prefix = jnp.broadcast_to(p["token_prefix"][None], (Bn, N_CLS, 1, CTX_DIM))
    suffix = jnp.broadcast_to(p["token_suffix"][None], (Bn, N_CLS, suffix_len, CTX_DIM))
    ctx_b = jnp.broadcast_to(ctx_shifted[:, None], (Bn, N_CLS, N_CTX, CTX_DIM))
    return jnp.concatenate([prefix, ctx_b, suffix], axis=2)   # (B, n_cls, L, D)


def text_encoder(prompts_flat, tokenized_prompts, p):
    # prompts_flat: (B*n_cls, L, ctx_dim) -- single batched pass over ALL prompts
    x = prompts_flat + p["pos_emb"][None]
    for blk in p["blocks"]:
        x = residual_block(x, blk, TXT_HEADS, causal=True)    # causal mask built in-kernel
    M = x.shape[0]
    eot = jnp.argmax(tokenized_prompts, axis=-1)              # EOS position per class
    eot_all = jnp.tile(eot, M // tokenized_prompts.shape[0])
    return x[jnp.arange(M), eot_all]                          # (B*n_cls, ctx_dim), pre-ln_final


def custom_clip_forward(image, params):
    # Eval path of CustomCLIP.forward (label=None).
    # TODO(synk): training-mode F.cross_entropy branch not implemented (eval only).
    logit_scale = jnp.exp(params["logit_scale"]).reshape(1, 1).astype(F32)

    imf_n = image_encoder(image.astype(F32), params["visual"])        # (B, E), L2-normalized
    prompts = prompt_learner(imf_n, params["prompt"])                 # (B, n_cls, L, D)
    prompts_flat = prompts.reshape(-1, SEQ_LEN, CTX_DIM)              # (B*n_cls, L, D)
    eot_x = text_encoder(prompts_flat, params["tokenized_prompts"], params["text"])

    tp = params["text"]
    logits = pl.pallas_call(                                          # ln_final+proj+norm+logits
        _text_logits_kernel,
        out_shape=jax.ShapeDtypeStruct((B, N_CLS), F32),
        in_specs=_vmem_specs(5) + [pl.BlockSpec(memory_space=pltpu.MemorySpace.SMEM)],
        out_specs=pl.BlockSpec(memory_space=pltpu.MemorySpace.VMEM),
    )(eot_x, tp["ln_final_g"], tp["ln_final_b"], tp["text_proj"], imf_n, logit_scale)
    return logits                                                     # (B, n_cls)


# ------------------------------ parameter init ------------------------------
def _nrm(key, shape, std=0.02):
    return (std * jax.random.normal(key, shape)).astype(F32)


def init_block(key, D, H):
    """Standard MHA-block weights, pre-packed into per-head kernel layout."""
    Dh = D // H
    ks = jax.random.split(key, 4)
    in_w = _nrm(ks[0], (D, 3 * D))            # x @ in_w -> (.., 3D) split as (3, H, Dh)
    in_b = jnp.zeros((3 * D,), F32)
    out_w = _nrm(ks[1], (D, D))               # concat-heads @ out_w
    return {
        "ln1_g": jnp.ones((1, D), F32), "ln1_b": jnp.zeros((1, D), F32),
        "wqkv": in_w.reshape(D, 3, H, Dh).transpose(1, 2, 0, 3).astype(BF16),  # (3,H,D,Dh)
        "bqkv": in_b.reshape(3, H, 1, Dh),
        "wo": out_w.reshape(H, Dh, D).astype(BF16),                            # (H,Dh,D)
        "bo": jnp.zeros((1, D), F32),
        "ln2_g": jnp.ones((1, D), F32), "ln2_b": jnp.zeros((1, D), F32),
        "w1": _nrm(ks[2], (D, 4 * D)).astype(BF16), "b1": jnp.zeros((1, 4 * D), F32),
        "w2": _nrm(ks[3], (4 * D, D)).astype(BF16), "b2": jnp.zeros((1, D), F32),
    }


def init_params(key):
    keys = jax.random.split(key, 16)
    patch_dim = CIN * PATCH * PATCH
    suffix_len = SEQ_LEN - 1 - N_CTX

    visual = {
        "conv_w": _nrm(keys[0], (patch_dim, VIS_WIDTH)).astype(BF16),  # conv1 has no bias
        "class_emb": _nrm(keys[1], (1, VIS_WIDTH)),
        "pos_emb": _nrm(keys[2], ((IMG // PATCH) ** 2 + 1, VIS_WIDTH)),
        "ln_pre_g": jnp.ones((1, VIS_WIDTH), F32), "ln_pre_b": jnp.zeros((1, VIS_WIDTH), F32),
        "blocks": [init_block(k, VIS_WIDTH, VIS_HEADS)
                   for k in jax.random.split(keys[3], VIS_LAYERS)],
        "ln_post_g": jnp.ones((1, VIS_WIDTH), F32), "ln_post_b": jnp.zeros((1, VIS_WIDTH), F32),
        "proj": _nrm(keys[4], (VIS_WIDTH, EMBED_DIM)).astype(BF16),
    }

    text = {
        "pos_emb": _nrm(keys[5], (SEQ_LEN, CTX_DIM)),
        "blocks": [init_block(k, CTX_DIM, TXT_HEADS)
                   for k in jax.random.split(keys[6], TXT_LAYERS)],
        "ln_final_g": jnp.ones((1, CTX_DIM), F32), "ln_final_b": jnp.zeros((1, CTX_DIM), F32),
        "text_proj": _nrm(keys[7], (CTX_DIM, EMBED_DIM)).astype(BF16),
    }

    # TODO(synk): clip.tokenize / token_embedding not reproducible here; the
    # frozen prefix/suffix embeddings and ctx vectors are deterministic randoms.
    prompt = {
        "ctx": _nrm(keys[8], (N_CTX, CTX_DIM)),
        "meta_w1": _nrm(keys[9], (EMBED_DIM, META_HIDDEN)).astype(BF16),
        "meta_b1": jnp.zeros((1, META_HIDDEN), F32),
        "meta_w2": _nrm(keys[10], (META_HIDDEN, CTX_DIM)).astype(BF16),
        "meta_b2": jnp.zeros((1, CTX_DIM), F32),
        "token_prefix": _nrm(keys[11], (N_CLS, 1, CTX_DIM)),
        "token_suffix": _nrm(keys[12], (N_CLS, suffix_len, CTX_DIM)),
    }

    # SOS + "a photo of a" + <name_i> + "." + EOS   (EOS=49407 is the max id,
    # so argmax(dim=-1) recovers the EOT position as in CLIP)
    tok = np.zeros((N_CLS, SEQ_LEN), dtype=np.int32)
    for i in range(N_CLS):
        tok[i] = [49406, 320, 1125, 539, 320, 1000 + i, 269, 49407]

    return {
        "visual": visual,
        "text": text,
        "prompt": prompt,
        "tokenized_prompts": jnp.asarray(tok),
        "logit_scale": jnp.asarray(np.log(1.0 / 0.07), dtype=F32),
    }


# ----------------------------------- main -----------------------------------
if __name__ == "__main__":
    key = jax.random.PRNGKey(0)
    k_img, k_par = jax.random.split(key)
    image = jax.random.normal(k_img, (B, CIN, IMG, IMG), dtype=F32)   # NCHW
    params = init_params(k_par)

    fwd = jax.jit(custom_clip_forward)
    logits = jax.block_until_ready(fwd(image, params))

    assert logits.shape == (B, N_CLS), logits.shape
    assert bool(jnp.all(jnp.isfinite(logits)))
    print("KERNEL_OK")
</pallas_src>

<mosaic_0001>
module attributes {stable_mosaic.version = 11 : i64} {
  func.func @_visual_tail_kernel(%arg0: memref<2x32xf32, #tpu.memory_space<vmem>>, %arg1: memref<1x32xf32, #tpu.memory_space<vmem>>, %arg2: memref<1x32xf32, #tpu.memory_space<vmem>>, %arg3: memref<32x32xbf16, #tpu.memory_space<vmem>>, %arg4: memref<2x32xf32, #tpu.memory_space<vmem>>) attributes {dimension_semantics = [], scalar_prefetch = 0 : i64, scratch_operands = 0 : i64, tpu.core_type = #tpu.core_type<tc>} {
    %c0 = arith.constant 0 : index
    %c0_0 = arith.constant 0 : index
    %0 = vector.load %arg0[%c0, %c0_0] : memref<2x32xf32, #tpu.memory_space<vmem>>, vector<2x32xf32>
    %c0_1 = arith.constant 0 : index
    %c0_2 = arith.constant 0 : index
    %1 = vector.load %arg1[%c0_1, %c0_2] : memref<1x32xf32, #tpu.memory_space<vmem>>, vector<1x32xf32>
    %c0_3 = arith.constant 0 : index
    %c0_4 = arith.constant 0 : index
    %2 = vector.load %arg2[%c0_3, %c0_4] : memref<1x32xf32, #tpu.memory_space<vmem>>, vector<1x32xf32>
    %cst = arith.constant dense<0.000000e+00> : vector<2xf32>
    %3 = vector.multi_reduction <add>, %0, %cst [1] : vector<2x32xf32> to vector<2xf32>
    %4 = vector.shape_cast %3 : vector<2xf32> to vector<2x1xf32>
    %cst_5 = arith.constant 3.200000e+01 : f32
    %5 = vector.broadcast %cst_5 : f32 to vector<2x1xf32>
    %6 = arith.divf %4, %5 : vector<2x1xf32>
    %7 = vector.broadcast %6 : vector<2x1xf32> to vector<2x32xf32>
    %8 = arith.subf %0, %7 : vector<2x32xf32>
    %9 = arith.mulf %8, %8 : vector<2x32xf32>
    %cst_6 = arith.constant dense<0.000000e+00> : vector<2xf32>
    %10 = vector.multi_reduction <add>, %9, %cst_6 [1] : vector<2x32xf32> to vector<2xf32>
    %11 = vector.shape_cast %10 : vector<2xf32> to vector<2x1xf32>
    %cst_7 = arith.constant 3.200000e+01 : f32
    %12 = vector.broadcast %cst_7 : f32 to vector<2x1xf32>
    %13 = arith.divf %11, %12 : vector<2x1xf32>
    %14 = vector.broadcast %6 : vector<2x1xf32> to vector<2x32xf32>
    %15 = arith.subf %0, %14 : vector<2x32xf32>
    %cst_8 = arith.constant 9.99999974E-6 : f32
    %16 = vector.broadcast %cst_8 : f32 to vector<2x1xf32>
    %17 = arith.addf %13, %16 : vector<2x1xf32>
    %18 = math.rsqrt %17 : vector<2x1xf32>
    %19 = vector.broadcast %18 : vector<2x1xf32> to vector<2x32xf32>
    %20 = arith.mulf %15, %19 : vector<2x32xf32>
    %21 = vector.broadcast %1 : vector<1x32xf32> to vector<2x32xf32>
    %22 = arith.mulf %20, %21 : vector<2x32xf32>
    %23 = vector.broadcast %2 : vector<1x32xf32> to vector<2x32xf32>
    %24 = arith.addf %22, %23 : vector<2x32xf32>
    %25 = arith.truncf %24 : vector<2x32xf32> to vector<2x32xbf16>
    %c0_9 = arith.constant 0 : index
    %c0_10 = arith.constant 0 : index
    %26 = vector.load %arg3[%c0_9, %c0_10] : memref<32x32xbf16, #tpu.memory_space<vmem>>, vector<32x32xbf16>
    %cst_11 = arith.constant dense<0.000000e+00> : vector<2x32xf32>
    %27 = tpu.matmul %25, %26, %cst_11 {dimension_numbers = #tpu.dot_dimension_numbers<[1], [0], [0], [1], [0, 0, 1, 1], [], []>} : vector<2x32xbf16>, vector<32x32xbf16>, vector<2x32xf32> -> vector<2x32xf32>
    %28 = arith.mulf %27, %27 : vector<2x32xf32>
    %cst_12 = arith.constant dense<0.000000e+00> : vector<2xf32>
    %29 = vector.multi_reduction <add>, %28, %cst_12 [1] : vector<2x32xf32> to vector<2xf32>
    %30 = vector.shape_cast %29 : vector<2xf32> to vector<2x1xf32>
    %cst_13 = arith.constant 9.99999996E-13 : f32
    %31 = vector.broadcast %cst_13 : f32 to vector<2x1xf32>
    %32 = arith.addf %30, %31 : vector<2x1xf32>
    %33 = math.rsqrt %32 : vector<2x1xf32>
    %34 = vector.broadcast %33 : vector<2x1xf32> to vector<2x32xf32>
    %35 = arith.mulf %27, %34 : vector<2x32xf32>
    %c0_14 = arith.constant 0 : index
    %c0_15 = arith.constant 0 : index
    %36 = vector.load %arg4[%c0_14, %c0_15] : memref<2x32xf32, #tpu.memory_space<vmem>>, vector<2x32xf32>
    tpu.vector_store %arg4[%c0_14, %c0_15], %35 {strides = array<i32>} : memref<2x32xf32, #tpu.memory_space<vmem>>, vector<2x32xf32>,
    return
  }
}

module attributes {stable_mosaic.version = 11 : i64} {
  func.func @_residual_block_kernel(%arg0: memref<2x5x32xf32, #tpu.memory_space<vmem>>, %arg1: memref<1x32xf32, #tpu.memory_space<vmem>>, %arg2: memref<1x32xf32, #tpu.memory_space<vmem>>, %arg3: memref<3x4x32x8xbf16, #tpu.memory_space<vmem>>, %arg4: memref<3x4x1x8xf32, #tpu.memory_space<vmem>>, %arg5: memref<4x8x32xbf16, #tpu.memory_space<vmem>>, %arg6: memref<1x32xf32, #tpu.memory_space<vmem>>, %arg7: memref<1x32xf32, #tpu.memory_space<vmem>>, %arg8: memref<1x32xf32, #tpu.memory_space<vmem>>, %arg9: memref<32x128xbf16, #tpu.memory_space<vmem>>, %arg10: memref<1x128xf32, #tpu.memory_space<vmem>>, %arg11: memref<128x32xbf16, #tpu.memory_space<vmem>>, %arg12: memref<1x32xf32, #tpu.memory_space<vmem>>, %arg13: memref<2x5x32xf32, #tpu.memory_space<vmem>>) attributes {dimension_semantics = [], scalar_prefetch = 0 : i64, scratch_operands = 0 : i64, tpu.core_type = #tpu.core_type<tc>} {
    %c0 = arith.constant 0 : index
    %c0_0 = arith.constant 0 : index
    %c0_1 = arith.constant 0 : index
    %0 = vector.load %arg0[%c0, %c0_0, %c0_1] : memref<2x5x32xf32, #tpu.memory_space<vmem>>, vector<2x5x32xf32>
    %c0_2 = arith.constant 0 : index
    %c0_3 = arith.constant 0 : index
    %1 = vector.load %arg1[%c0_2, %c0_3] : memref<1x32xf32, #tpu.memory_space<vmem>>, vector<1x32xf32>
    %c0_4 = arith.constant 0 : index
    %c0_5 = arith.constant 0 : index
    %2 = vector.load %arg2[%c0_4, %c0_5] : memref<1x32xf32, #tpu.memory_space<vmem>>, vector<1x32xf32>
    %cst = arith.constant dense<0.000000e+00> : vector<2x5xf32>
    %3 = vector.multi_reduction <add>, %0, %cst [2] : vector<2x5x32xf32> to vector<2x5xf32>
    %4 = vector.shape_cast %3 : vector<2x5xf32> to vector<2x5x1xf32>
    %cst_6 = arith.constant 3.200000e+01 : f32
    %5 = vector.broadcast %cst_6 : f32 to vector<2x5x1xf32>
    %6 = arith.divf %4, %5 : vector<2x5x1xf32>
    %7 = vector.broadcast %6 : vector<2x5x1xf32> to vector<2x5x32xf32>
    %8 = arith.subf %0, %7 : vector<2x5x32xf32>
    %9 = arith.mulf %8, %8 : vector<2x5x32xf32>
    %cst_7 = arith.constant dense<0.000000e+00> : vector<2x5xf32>
    %10 = vector.multi_reduction <add>, %9, %cst_7 [2] : vector<2x5x32xf32> to vector<2x5xf32>
    %11 = vector.shape_cast %10 : vector<2x5xf32> to vector<2x5x1xf32>
    %cst_8 = arith.constant 3.200000e+01 : f32
    %12 = vector.broadcast %cst_8 : f32 to vector<2x5x1xf32>
    %13 = arith.divf %11, %12 : vector<2x5x1xf32>
    %14 = vector.broadcast %6 : vector<2x5x1xf32> to vector<2x5x32xf32>
    %15 = arith.subf %0, %14 : vector<2x5x32xf32>
    %cst_9 = arith.constant 9.99999974E-6 : f32
    %16 = vector.broadcast %cst_9 : f32 to vector<2x5x1xf32>
    %17 = arith.addf %13, %16 : vector<2x5x1xf32>
    %18 = math.rsqrt %17 : vector<2x5x1xf32>
    %19 = vector.broadcast %18 : vector<2x5x1xf32> to vector<2x5x32xf32>
    %20 = arith.mulf %15, %19 : vector<2x5x32xf32>
    %21 = vector.shape_cast %1 : vector<1x32xf32> to vector<1x1x32xf32>
    %22 = vector.broadcast %21 : vector<1x1x32xf32> to vector<2x5x32xf32>
    %23 = arith.mulf %20, %22 : vector<2x5x32xf32>
    %24 = vector.shape_cast %2 : vector<1x32xf32> to vector<1x1x32xf32>
    %25 = vector.broadcast %24 : vector<1x1x32xf32> to vector<2x5x32xf32>
    %26 = arith.addf %23, %25 : vector<2x5x32xf32>
    %27 = vector.shape_cast %26 : vector<2x5x32xf32> to vector<10x32xf32>
    %28 = arith.truncf %27 : vector<10x32xf32> to vector<10x32xbf16>
    %cst_10 = arith.constant 0.000000e+00 : f32
    %29 = vector.broadcast %cst_10 : f32 to vector<10x32xf32>
    %c0_11 = arith.constant 0 : index
    %c0_12 = arith.constant 0 : index
    %c0_13 = arith.constant 0 : index
    %c0_14 = arith.constant 0 : index
    %30 = vector.load %arg3[%c0_11, %c0_12, %c0_13, %c0_14] : memref<3x4x32x8xbf16, #tpu.memory_space<vmem>>, vector<1x1x32x8xbf16>
    %31 = vector.shape_cast %30 : vector<1x1x32x8xbf16> to vector<32x8xbf16>
    %cst_15 = arith.constant dense<0.000000e+00> : vector<10x8xf32>
    %32 = tpu.matmul %28, %31, %cst_15 {dimension_numbers = #tpu.dot_dimension_numbers<[1], [0], [0], [1], [0, 0, 1, 1], [], []>} : vector<10x32xbf16>, vector<32x8xbf16>, vector<10x8xf32> -> vector<10x8xf32>
    %c0_16 = arith.constant 0 : index
    %c0_17 = arith.constant 0 : index
    %c0_18 = arith.constant 0 : index
    %c0_19 = arith.constant 0 : index
    %33 = vector.load %arg4[%c0_16, %c0_17, %c0_18, %c0_19] : memref<3x4x1x8xf32, #tpu.memory_space<vmem>>, vector<1x1x1x8xf32>
    %34 = vector.shape_cast %33 : vector<1x1x1x8xf32> to vector<1x8xf32>
    %35 = vector.broadcast %34 : vector<1x8xf32> to vector<10x8xf32>
    %36 = arith.addf %32, %35 : vector<10x8xf32>
    %c1 = arith.constant 1 : index
    %c0_20 = arith.constant 0 : index
    %c0_21 = arith.constant 0 : index
    %c0_22 = arith.constant 0 : index
    %37 = vector.load %arg3[%c1, %c0_20, %c0_21, %c0_22] : memref<3x4x32x8xbf16, #tpu.memory_space<vmem>>, vector<1x1x32x8xbf16>
    %38 = vector.shape_cast %37 : vector<1x1x32x8xbf16> to vector<32x8xbf16>
    %cst_23 = arith.constant dense<0.000000e+00> : vector<10x8xf32>
    %39 = tpu.matmul %28, %38, %cst_23 {dimension_numbers = #tpu.dot_dimension_numbers<[1], [0], [0], [1], [0, 0, 1, 1], [], []>} : vector<10x32xbf16>, vector<32x8xbf16>, vector<10x8xf32> -> vector<10x8xf32>
    %c1_24 = arith.constant 1 : index
    %c0_25 = arith.constant 0 : index
    %c0_26 = arith.constant 0 : index
    %c0_27 = arith.constant 0 : index
    %40 = vector.load %arg4[%c1_24, %c0_25, %c0_26, %c0_27] : memref<3x4x1x8xf32, #tpu.memory_space<vmem>>, vector<1x1x1x8xf32>
    %41 = vector.shape_cast %40 : vector<1x1x1x8xf32> to vector<1x8xf32>
    %42 = vector.broadcast %41 : vector<1x8xf32> to vector<10x8xf32>
    %43 = arith.addf %39, %42 : vector<10x8xf32>
    %c2 = arith.constant 2 : index
    %c0_28 = arith.constant 0 : index
    %c0_29 = arith.constant 0 : index
    %c0_30 = arith.constant 0 : index
    %44 = vector.load %arg3[%c2, %c0_28, %c0_29, %c0_30] : memref<3x4x32x8xbf16, #tpu.memory_space<vmem>>, vector<1x1x32x8xbf16>
    %45 = vector.shape_cast %44 : vector<1x1x32x8xbf16> to vector<32x8xbf16>
    %cst_31 = arith.constant dense<0.000000e+00> : vector<10x8xf32>
    %46 = tpu.matmul %28, %45, %cst_31 {dimension_numbers = #tpu.dot_dimension_numbers<[1], [0], [0], [1], [0, 0, 1, 1], [], []>} : vector<10x32xbf16>, vector<32x8xbf16>, vector<10x8xf32> -> vector<10x8xf32>
    %c2_32 = arith.constant 2 : index
    %c0_33 = arith.constant 0 : index
    %c0_34 = arith.constant 0 : index
    %c0_35 = arith.constant 0 : index
    %47 = vector.load %arg4[%c2_32, %c0_33, %c0_34, %c0_35] : memref<3x4x1x8xf32, #tpu.memory_space<vmem>>, vector<1x1x1x8xf32>
    %48 = vector.shape_cast %47 : vector<1x1x1x8xf32> to vector<1x8xf32>
    %49 = vector.broadcast %48 : vector<1x8xf32> to vector<10x8xf32>
    %50 = arith.addf %46, %49 : vector<10x8xf32>
    %51 = vector.shape_cast %36 : vector<10x8xf32> to vector<2x5x8xf32>
    %52 = vector.shape_cast %43 : vector<10x8xf32> to vector<2x5x8xf32>
    %53 = vector.shape_cast %50 : vector<10x8xf32> to vector<2x5x8xf32>
    %54 = arith.truncf %51 : vector<2x5x8xf32> to vector<2x5x8xbf16>
    %55 = arith.truncf %52 : vector<2x5x8xf32> to vector<2x5x8xbf16>
    "tpu.trace_start"() <{level = 10 : i32, message = "bqd,bkd->bqk"}> : () -> ()
    %cst_36 = arith.constant dense<0.000000e+00> : vector<2x5x5xf32>
    %56 = tpu.matmul %54, %55, %cst_36 {dimension_numbers = #tpu.dot_dimension_numbers<[2], [2], [1], [1], [0, 0, 0, 1, 1, 1], [0], [0]>} : vector<2x5x8xbf16>, vector<2x5x8xbf16>, vector<2x5x5xf32> -> vector<2x5x5xf32>
    "tpu.trace_stop"() : () -> ()
    %cst_37 = arith.constant 0.353553385 : f32
    %57 = vector.broadcast %cst_37 : f32 to vector<2x5x5xf32>
    %58 = arith.mulf %56, %57 : vector<2x5x5xf32>
    %cst_38 = arith.constant dense<0xFF800000> : vector<2x5xf32>
    %59 = vector.multi_reduction <maximumf>, %58, %cst_38 [2] : vector<2x5x5xf32> to vector<2x5xf32>
    %60 = vector.shape_cast %59 : vector<2x5xf32> to vector<2x5x1xf32>
    %61 = vector.broadcast %60 : vector<2x5x1xf32> to vector<2x5x5xf32>
    %62 = arith.subf %58, %61 : vector<2x5x5xf32>
    %63 = math.exp %62 : vector<2x5x5xf32>
    %cst_39 = arith.constant dense<0.000000e+00> : vector<2x5xf32>
    %64 = vector.multi_reduction <add>, %63, %cst_39 [2] : vector<2x5x5xf32> to vector<2x5xf32>
    %65 = vector.shape_cast %64 : vector<2x5xf32> to vector<2x5x1xf32>
    %66 = tpu.reciprocal %65 {approx = true} : vector<2x5x1xf32> -> vector<2x5x1xf32>
    %67 = vector.broadcast %66 : vector<2x5x1xf32> to vector<2x5x5xf32>
    %68 = arith.mulf %63, %67 : vector<2x5x5xf32>
    %69 = arith.truncf %68 : vector<2x5x5xf32> to vector<2x5x5xbf16>
    %70 = arith.truncf %53 : vector<2x5x8xf32> to vector<2x5x8xbf16>
    "tpu.trace_start"() <{level = 10 : i32, message = "bqk,bkd->bqd"}> : () -> ()
    %cst_40 = arith.constant dense<0.000000e+00> : vector<2x5x8xf32>
    %71 = tpu.matmul %69, %70, %cst_40 {dimension_numbers = #tpu.dot_dimension_numbers<[2], [1], [1], [2], [0, 0, 0, 1, 1, 2], [0], [0]>} : vector<2x5x5xbf16>, vector<2x5x8xbf16>, vector<2x5x8xf32> -> vector<2x5x8xf32>
    "tpu.trace_stop"() : () -> ()
    %72 = vector.shape_cast %71 : vector<2x5x8xf32> to vector<10x8xf32>
    %73 = arith.truncf %72 : vector<10x8xf32> to vector<10x8xbf16>
    %c0_41 = arith.constant 0 : index
    %c0_42 = arith.constant 0 : index
    %c0_43 = arith.constant 0 : index
    %74 = vector.load %arg5[%c0_41, %c0_42, %c0_43] : memref<4x8x32xbf16, #tpu.memory_space<vmem>>, vector<1x8x32xbf16>
    %75 = vector.shape_cast %74 : vector<1x8x32xbf16> to vector<8x32xbf16>
    %cst_44 = arith.constant dense<0.000000e+00> : vector<10x32xf32>
    %76 = tpu.matmul %73, %75, %cst_44 {dimension_numbers = #tpu.dot_dimension_numbers<[1], [0], [0], [1], [0, 0, 1, 1], [], []>} : vector<10x8xbf16>, vector<8x32xbf16>, vector<10x32xf32> -> vector<10x32xf32>
    %77 = arith.addf %29, %76 : vector<10x32xf32>
    %c0_45 = arith.constant 0 : index
    %c1_46 = arith.constant 1 : index
    %c0_47 = arith.constant 0 : index
    %c0_48 = arith.constant 0 : index
    %78 = vector.load %arg3[%c0_45, %c1_46, %c0_47, %c0_48] : memref<3x4x32x8xbf16, #tpu.memory_space<vmem>>, vector<1x1x32x8xbf16>
    %79 = vector.shape_cast %78 : vector<1x1x32x8xbf16> to vector<32x8xbf16>
    %cst_49 = arith.constant dense<0.000000e+00> : vector<10x8xf32>
    %80 = tpu.matmul %28, %79, %cst_49 {dimension_numbers = #tpu.dot_dimension_numbers<[1], [0], [0], [1], [0, 0, 1, 1], [], []>} : vector<10x32xbf16>, vector<32x8xbf16>, vector<10x8xf32> -> vector<10x8xf32>
    %c0_50 = arith.constant 0 : index
    %c1_51 = arith.constant 1 : index
    %c0_52 = arith.constant 0 : index
    %c0_53 = arith.constant 0 : index
    %81 = vector.load %arg4[%c0_50, %c1_51, %c0_52, %c0_53] : memref<3x4x1x8xf32, #tpu.memory_space<vmem>>, vector<1x1x1x8xf32>
    %82 = vector.shape_cast %81 : vector<1x1x1x8xf32> to vector<1x8xf32>
    %83 = vector.broadcast %82 : vector<1x8xf32> to vector<10x8xf32>
    %84 = arith.addf %80, %83 : vector<10x8xf32>
    %c1_54 = arith.constant 1 : index
    %c1_55 = arith.constant 1 : index
    %c0_56 = arith.constant 0 : index
    %c0_57 = arith.constant 0 : index
    %85 = vector.load %arg3[%c1_54, %c1_55, %c0_56, %c0_57] : memref<3x4x32x8xbf16, #tpu.memory_space<vmem>>, vector<1x1x32x8xbf16>
    %86 = vector.shape_cast %85 : vector<1x1x32x8xbf16> to vector<32x8xbf16>
    %cst_58 = arith.constant dense<0.000000e+00> : vector<10x8xf32>
    %87 = tpu.matmul %28, %86, %cst_58 {dimension_numbers = #tpu.dot_dimension_numbers<[1], [0], [0], [1], [0, 0, 1, 1], [], []>} : vector<10x32xbf16>, vector<32x8xbf16>, vector<10x8xf32> -> vector<10x8xf32>
    %c1_59 = arith.constant 1 : index
    %c1_60 = arith.constant 1 : index
    %c0_61 = arith.constant 0 : index
    %c0_62 = arith.constant 0 : index
    %88 = vector.load %arg4[%c1_59, %c1_60, %c0_61, %c0_62] : memref<3x4x1x8xf32, #tpu.memory_space<vmem>>, vector<1x1x1x8xf32>
    %89 = vector.shape_cast %88 : vector<1x1x1x8xf32> to vector<1x8xf32>
    %90 = vector.broadcast %89 : vector<1x8xf32> to vector<10x8xf32>
    %91 = arith.addf %87, %90 : vector<10x8xf32>
    %c2_63 = arith.constant 2 : index
    %c1_64 = arith.constant 1 : index
    %c0_65 = arith.constant 0 : index
    %c0_66 = arith.constant 0 : index
    %92 = vector.load %arg3[%c2_63, %c1_64, %c0_65, %c0_66] : memref<3x4x32x8xbf16, #tpu.memory_space<vmem>>, vector<1x1x32x8xbf16>
    %93 = vector.shape_cast %92 : vector<1x1x32x8xbf16> to vector<32x8xbf16>
    %cst_67 = arith.constant dense<0.000000e+00> : vector<10x8xf32>
    %94 = tpu.matmul %28, %93, %cst_67 {dimension_numbers = #tpu.dot_dimension_numbers<[1], [0], [0], [1], [0, 0, 1, 1], [], []>} : vector<10x32xbf16>, vector<32x8xbf16>, vector<10x8xf32> -> vector<10x8xf32>
    %c2_68 = arith.constant 2 : index
    %c1_69 = arith.constant 1 : index
    %c0_70 = arith.constant 0 : index
    %c0_71 = arith.constant 0 : index
    %95 = vector.load %arg4[%c2_68, %c1_69, %c0_70, %c0_71] : memref<3x4x1x8xf32, #tpu.memory_space<vmem>>, vector<1x1x1x8xf32>
    %96 = vector.shape_cast %95 : vector<1x1x1x8xf32> to vector<1x8xf32>
    %97 = vector.broadcast %96 : vector<1x8xf32> to vector<10x8xf32>
    %98 = arith.addf %94, %97 : vector<10x8xf32>
    %99 = vector.shape_cast %84 : vector<10x8xf32> to vector<2x5x8xf32>
    %100 = vector.shape_cast %91 : vector<10x8xf32> to vector<2x5x8xf32>
    %101 = vector.shape_cast %98 : vector<10x8xf32> to vector<2x5x8xf32>
    %102 = arith.truncf %99 : vector<2x5x8xf32> to vector<2x5x8xbf16>
    %103 = arith.truncf %100 : vector<2x5x8xf32> to vector<2x5x8xbf16>
    "tpu.trace_start"() <{level = 10 : i32, message = "bqd,bkd->bqk"}> : () -> ()
    %cst_72 = arith.constant dense<0.000000e+00> : vector<2x5x5xf32>
    %104 = tpu.matmul %102, %103, %cst_72 {dimension_numbers = #tpu.dot_dimension_numbers<[2], [2], [1], [1], [0, 0, 0, 1, 1, 1], [0], [0]>} : vector<2x5x8xbf16>, vector<2x5x8xbf16>, vector<2x5x5xf32> -> vector<2x5x5xf32>
    "tpu.trace_stop"() : () -> ()
    %cst_73 = arith.constant 0.353553385 : f32
    %105 = vector.broadcast %cst_73 : f32 to vector<2x5x5xf32>
    %106 = arith.mulf %104, %105 : vector<2x5x5xf32>
    %cst_74 = arith.constant dense<0xFF800000> : vector<2x5xf32>
    %107 = vector.multi_reduction <maximumf>, %106, %cst_74 [2] : vector<2x5x5xf32> to vector<2x5xf32>
    %108 = vector.shape_cast %107 : vector<2x5xf32> to vector<2x5x1xf32>
    %109 = vector.broadcast %108 : vector<2x5x1xf32> to vector<2x5x5xf32>
    %110 = arith.subf %106, %109 : vector<2x5x5xf32>
    %111 = math.exp %110 : vector<2x5x5xf32>
    %cst_75 = arith.constant dense<0.000000e+00> : vector<2x5xf32>
    %112 = vector.multi_reduction <add>, %111, %cst_75 [2] : vector<2x5x5xf32> to vector<2x5xf32>
    %113 = vector.shape_cast %112 : vector<2x5xf32> to vector<2x5x1xf32>
    %114 = tpu.reciprocal %113 {approx = true} : vector<2x5x1xf32> -> vector<2x5x1xf32>
    %115 = vector.broadcast %114 : vector<2x5x1xf32> to vector<2x5x5xf32>
    %116 = arith.mulf %111, %115 : vector<2x5x5xf32>
    %117 = arith.truncf %116 : vector<2x5x5xf32> to vector<2x5x5xbf16>
    %118 = arith.truncf %101 : vector<2x5x8xf32> to vector<2x5x8xbf16>
    "tpu.trace_start"() <{level = 10 : i32, message = "bqk,bkd->bqd"}> : () -> ()
    %cst_76 = arith.constant dense<0.000000e+00> : vector<2x5x8xf32>
    %119 = tpu.matmul %117, %118, %cst_76 {dimension_numbers = #tpu.dot_dimension_numbers<[2], [1], [1], [2], [0, 0, 0, 1, 1, 2], [0], [0]>} : vector<2x5x5xbf16>, vector<2x5x8xbf16>, vector<2x5x8xf32> -> vector<2x5x8xf32>
    "tpu.trace_stop"() : () -> ()
    %120 = vector.shape_cast %119 : vector<2x5x8xf32> to vector<10x8xf32>
    %121 = arith.truncf %120 : vector<10x8xf32> to vector<10x8xbf16>
    %c1_77 = arith.constant 1 : index
    %c0_78 = arith.constant 0 : index
    %c0_79 = arith.constant 0 : index
    %122 = vector.load %arg5[%c1_77, %c0_78, %c0_79] : memref<4x8x32xbf16, #tpu.memory_space<vmem>>, vector<1x8x32xbf16>
    %123 = vector.shape_cast %122 : vector<1x8x32xbf16> to vector<8x32xbf16>
    %cst_80 = arith.constant dense<0.000000e+00> : vector<10x32xf32>
    %124 = tpu.matmul %121, %123, %cst_80 {dimension_numbers = #tpu.dot_dimension_numbers<[1], [0], [0], [1], [0, 0, 1, 1], [], []>} : vector<10x8xbf16>, vector<8x32xbf16>, vector<10x32xf32> -> vector<10x32xf32>
    %125 = arith.addf %77, %124 : vector<10x32xf32>
    %c0_81 = arith.constant 0 : index
    %c2_82 = arith.constant 2 : index
    %c0_83 = arith.constant 0 : index
    %c0_84 = arith.constant 0 : index
    %126 = vector.load %arg3[%c0_81, %c2_82, %c0_83, %c0_84] : memref<3x4x32x8xbf16, #tpu.memory_space<vmem>>, vector<1x1x32x8xbf16>
    %127 = vector.shape_cast %126 : vector<1x1x32x8xbf16> to vector<32x8xbf16>
    %cst_85 = arith.constant dense<0.000000e+00> : vector<10x8xf32>
    %128 = tpu.matmul %28, %127, %cst_85 {dimension_numbers = #tpu.dot_dimension_numbers<[1], [0], [0], [1], [0, 0, 1, 1], [], []>} : vector<10x32xbf16>, vector<32x8xbf16>, vector<10x8xf32> -> vector<10x8xf32>
    %c0_86 = arith.constant 0 : index
    %c2_87 = arith.constant 2 : index
    %c0_88 = arith.constant 0 : index
    %c0_89 = arith.constant 0 : index
    %129 = vector.load %arg4[%c0_86, %c2_87, %c0_88, %c0_89] : memref<3x4x1x8xf32, #tpu.memory_space<vmem>>, vector<1x1x1x8xf32>
    %130 = vector.shape_cast %129 : vector<1x1x1x8xf32> to vector<1x8xf32>
    %131 = vector.broadcast %130 : vector<1x8xf32> to vector<10x8xf32>
    %132 = arith.addf %128, %131 : vector<10x8xf32>
    %c1_90 = arith.constant 1 : index
    %c2_91 = arith.constant 2 : index
    %c0_92 = arith.constant 0 : index
    %c0_93 = arith.constant 0 : index
    %133 = vector.load %arg3[%c1_90, %c2_91, %c0_92, %c0_93] : memref<3x4x32x8xbf16, #tpu.memory_space<vmem>>, vector<1x1x32x8xbf16>
    %134 = vector.shape_cast %133 : vector<1x1x32x8xbf16> to vector<32x8xbf16>
    %cst_94 = arith.constant dense<0.000000e+00> : vector<10x8xf32>
    %135 = tpu.matmul %28, %134, %cst_94 {dimension_numbers = #tpu.dot_dimension_numbers<[1], [0], [0], [1], [0, 0, 1, 1], [], []>} : vector<10x32xbf16>, vector<32x8xbf16>, vector<10x8xf32> -> vector<10x8xf32>
    %c1_95 = arith.constant 1 : index
    %c2_96 = arith.constant 2 : index
    %c0_97 = arith.constant 0 : index
    %c0_98 = arith.constant 0 : index
    %136 = vector.load %arg4[%c1_95, %c2_96, %c0_97, %c0_98] : memref<3x4x1x8xf32, #tpu.memory_space<vmem>>, vector<1x1x1x8xf32>
    %137 = vector.shape_cast %136 : vector<1x1x1x8xf32> to vector<1x8xf32>
    %138 = vector.broadcast %137 : vector<1x8xf32> to vector<10x8xf32>
    %139 = arith.addf %135, %138 : vector<10x8xf32>
    %c2_99 = arith.constant 2 : index
    %c2_100 = arith.constant 2 : index
    %c0_101 = arith.constant 0 : index
    %c0_102 = arith.constant 0 : index
    %140 = vector.load %arg3[%c2_99, %c2_100, %c0_101, %c0_102] : memref<3x4x32x8xbf16, #tpu.memory_space<vmem>>, vector<1x1x32x8xbf16>
    %141 = vector.shape_cast %140 : vector<1x1x32x8xbf16> to vector<32x8xbf16>
    %cst_103 = arith.constant dense<0.000000e+00> : vector<10x8xf32>
    %142 = tpu.matmul %28, %141, %cst_103 {dimension_numbers = #tpu.dot_dimension_numbers<[1], [0], [0], [1], [0, 0, 1, 1], [], []>} : vector<10x32xbf16>, vector<32x8xbf16>, vector<10x8xf32> -> vector<10x8xf32>
    %c2_104 = arith.constant 2 : index
    %c2_105 = arith.constant 2 : index
    %c0_106 = arith.constant 0 : index
    %c0_107 = arith.constant 0 : index
    %143 = vector.load %arg4[%c2_104, %c2_105, %c0_106, %c0_107] : memref<3x4x1x8xf32, #tpu.memory_space<vmem>>, vector<1x1x1x8xf32>
    %144 = vector.shape_cast %143 : vector<1x1x1x8xf32> to vector<1x8xf32>
    %145 = vector.broadcast %144 : vector<1x8xf32> to vector<10x8xf32>
    %146 = arith.addf %142, %145 : vector<10x8xf32>
    %147 = vector.shape_cast %132 : vector<10x8xf32> to vector<2x5x8xf32>
    %148 = vector.shape_cast %139 : vector<10x8xf32> to vector<2x5x8xf32>
    %149 = vector.shape_cast %146 : vector<10x8xf32> to vector<2x5x8xf32>
    %150 = arith.truncf %147 : vector<2x5x8xf32> to vector<2x5x8xbf16>
    %151 = arith.truncf %148 : vector<2x5x8xf32> to vector<2x5x8xbf16>
    "tpu.trace_start"() <{level = 10 : i32, message = "bqd,bkd->bqk"}> : () -> ()
    %cst_108 = arith.constant dense<0.000000e+00> : vector<2x5x5xf32>
    %152 = tpu.matmul %150, %151, %cst_108 {dimension_numbers = #tpu.dot_dimension_numbers<[2], [2], [1], [1], [0, 0, 0, 1, 1, 1], [0], [0]>} : vector<2x5x8xbf16>, vector<2x5x8xbf16>, vector<2x5x5xf32> -> vector<2x5x5xf32>
    "tpu.trace_stop"() : () -> ()
    %cst_109 = arith.constant 0.353553385 : f32
    %153 = vector.broadcast %cst_109 : f32 to vector<2x5x5xf32>
    %154 = arith.mulf %152, %153 : vector<2x5x5xf32>
    %cst_110 = arith.constant dense<0xFF800000> : vector<2x5xf32>
    %155 = vector.multi_reduction <maximumf>, %154, %cst_110 [2] : vector<2x5x5xf32> to vector<2x5xf32>
    %156 = vector.shape_cast %155 : vector<2x5xf32> to vector<2x5x1xf32>
    %157 = vector.broadcast %156 : vector<2x5x1xf32> to vector<2x5x5xf32>
    %158 = arith.subf %154, %157 : vector<2x5x5xf32>
    %159 = math.exp %158 : vector<2x5x5xf32>
    %cst_111 = arith.constant dense<0.000000e+00> : vector<2x5xf32>
    %160 = vector.multi_reduction <add>, %159, %cst_111 [2] : vector<2x5x5xf32> to vector<2x5xf32>
    %161 = vector.shape_cast %160 : vector<2x5xf32> to vector<2x5x1xf32>
    %162 = tpu.reciprocal %161 {approx = true} : vector<2x5x1xf32> -> vector<2x5x1xf32>
    %163 = vector.broadcast %162 : vector<2x5x1xf32> to vector<2x5x5xf32>
    %164 = arith.mulf %159, %163 : vector<2x5x5xf32>
    %165 = arith.truncf %164 : vector<2x5x5xf32> to vector<2x5x5xbf16>
    %166 = arith.truncf %149 : vector<2x5x8xf32> to vector<2x5x8xbf16>
    "tpu.trace_start"() <{level = 10 : i32, message = "bqk,bkd->bqd"}> : () -> ()
    %cst_112 = arith.constant dense<0.000000e+00> : vector<2x5x8xf32>
    %167 = tpu.matmul %165, %166, %cst_112 {dimension_numbers = #tpu.dot_dimension_numbers<[2], [1], [1], [2], [0, 0, 0, 1, 1, 2], [0], [0]>} : vector<2x5x5xbf16>, vector<2x5x8xbf16>, vector<2x5x8xf32> -> vector<2x5x8xf32>
    "tpu.trace_stop"() : () -> ()
    %168 = vector.shape_cast %167 : vector<2x5x8xf32> to vector<10x8xf32>
    %169 = arith.truncf %168 : vector<10x8xf32> to vector<10x8xbf16>
    %c2_113 = arith.constant 2 : index
    %c0_114 = arith.constant 0 : index
    %c0_115 = arith.constant 0 : index
    %170 = vector.load %arg5[%c2_113, %c0_114, %c0_115] : memref<4x8x32xbf16, #tpu.memory_space<vmem>>, vector<1x8x32xbf16>
    %171 = vector.shape_cast %170 : vector<1x8x32xbf16> to vector<8x32xbf16>
    %cst_116 = arith.constant dense<0.000000e+00> : vector<10x32xf32>
    %172 = tpu.matmul %169, %171, %cst_116 {dimension_numbers = #tpu.dot_dimension_numbers<[1], [0], [0], [1], [0, 0, 1, 1], [], []>} : vector<10x8xbf16>, vector<8x32xbf16>, vector<10x32xf32> -> vector<10x32xf32>
    %173 = arith.addf %125, %172 : vector<10x32xf32>
    %c0_117 = arith.constant 0 : index
    %c3 = arith.constant 3 : index
    %c0_118 = arith.constant 0 : index
    %c0_119 = arith.constant 0 : index
    %174 = vector.load %arg3[%c0_117, %c3, %c0_118, %c0_119] : memref<3x4x32x8xbf16, #tpu.memory_space<vmem>>, vector<1x1x32x8xbf16>
    %175 = vector.shape_cast %174 : vector<1x1x32x8xbf16> to vector<32x8xbf16>
    %cst_120 = arith.constant dense<0.000000e+00> : vector<10x8xf32>
    %176 = tpu.matmul %28, %175, %cst_120 {dimension_numbers = #tpu.dot_dimension_numbers<[1], [0], [0], [1], [0, 0, 1, 1], [], []>} : vector<10x32xbf16>, vector<32x8xbf16>, vector<10x8xf32> -> vector<10x8xf32>
    %c0_121 = arith.constant 0 : index
    %c3_122 = arith.constant 3 : index
    %c0_123 = arith.constant 0 : index
    %c0_124 = arith.constant 0 : index
    %177 = vector.load %arg4[%c0_121, %c3_122, %c0_123, %c0_124] : memref<3x4x1x8xf32, #tpu.memory_space<vmem>>, vector<1x1x1x8xf32>
    %178 = vector.shape_cast %177 : vector<1x1x1x8xf32> to vector<1x8xf32>
    %179 = vector.broadcast %178 : vector<1x8xf32> to vector<10x8xf32>
    %180 = arith.addf %176, %179 : vector<10x8xf32>
    %c1_125 = arith.constant 1 : index
    %c3_126 = arith.constant 3 : index
    %c0_127 = arith.constant 0 : index
    %c0_128 = arith.constant 0 : index
    %181 = vector.load %arg3[%c1_125, %c3_126, %c0_127, %c0_128] : memref<3x4x32x8xbf16, #tpu.memory_space<vmem>>, vector<1x1x32x8xbf16>
    %182 = vector.shape_cast %181 : vector<1x1x32x8xbf16> to vector<32x8xbf16>
    %cst_129 = arith.constant dense<0.000000e+00> : vector<10x8xf32>
    %183 = tpu.matmul %28, %182, %cst_129 {dimension_numbers = #tpu.dot_dimension_numbers<[1], [0], [0], [1], [0, 0, 1, 1], [], []>} : vector<10x32xbf16>, vector<32x8xbf16>, vector<10x8xf32> -> vector<10x8xf32>
    %c1_130 = arith.constant 1 : index
    %c3_131 = arith.constant 3 : index
    %c0_132 = arith.constant 0 : index
    %c0_133 = arith.constant 0 : index
    %184 = vector.load %arg4[%c1_130, %c3_131, %c0_132, %c0_133] : memref<3x4x1x8xf32, #tpu.memory_space<vmem>>, vector<1x1x1x8xf32>
    %185 = vector.shape_cast %184 : vector<1x1x1x8xf32> to vector<1x8xf32>
    %186 = vector.broadcast %185 : vector<1x8xf32> to vector<10x8xf32>
    %187 = arith.addf %183, %186 : vector<10x8xf32>
    %c2_134 = arith.constant 2 : index
    %c3_135 = arith.constant 3 : index
    %c0_136 = arith.constant 0 : index
    %c0_137 = arith.constant 0 : index
    %188 = vector.load %arg3[%c2_134, %c3_135, %c0_136, %c0_137] : memref<3x4x32x8xbf16, #tpu.memory_space<vmem>>, vector<1x1x32x8xbf16>
    %189 = vector.shape_cast %188 : vector<1x1x32x8xbf16> to vector<32x8xbf16>
    %cst_138 = arith.constant dense<0.000000e+00> : vector<10x8xf32>
    %190 = tpu.matmul %28, %189, %cst_138 {dimension_numbers = #tpu.dot_dimension_numbers<[1], [0], [0], [1], [0, 0, 1, 1], [], []>} : vector<10x32xbf16>, vector<32x8xbf16>, vector<10x8xf32> -> vector<10x8xf32>
    %c2_139 = arith.constant 2 : index
    %c3_140 = arith.constant 3 : index
    %c0_141 = arith.constant 0 : index
    %c0_142 = arith.constant 0 : index
    %191 = vector.load %arg4[%c2_139, %c3_140, %c0_141, %c0_142] : memref<3x4x1x8xf32, #tpu.memory_space<vmem>>, vector<1x1x1x8xf32>
    %192 = vector.shape_cast %191 : vector<1x1x1x8xf32> to vector<1x8xf32>
    %193 = vector.broadcast %192 : vector<1x8xf32> to vector<10x8xf32>
    %194 = arith.addf %190, %193 : vector<10x8xf32>
    %195 = vector.shape_cast %180 : vector<10x8xf32> to vector<2x5x8xf32>
    %196 = vector.shape_cast %187 : vector<10x8xf32> to vector<2x5x8xf32>
    %197 = vector.shape_cast %194 : vector<10x8xf32> to vector<2x5x8xf32>
    %198 = arith.truncf %195 : vector<2x5x8xf32> to vector<2x5x8xbf16>
    %199 = arith.truncf %196 : vector<2x5x8xf32> to vector<2x5x8xbf16>
    "tpu.trace_start"() <{level = 10 : i32, message = "bqd,bkd->bqk"}> : () -> ()
    %cst_143 = arith.constant dense<0.000000e+00> : vector<2x5x5xf32>
    %200 = tpu.matmul %198, %199, %cst_143 {dimension_numbers = #tpu.dot_dimension_numbers<[2], [2], [1], [1], [0, 0, 0, 1, 1, 1], [0], [0]>} : vector<2x5x8xbf16>, vector<2x5x8xbf16>, vector<2x5x5xf32> -> vector<2x5x5xf32>
    "tpu.trace_stop"() : () -> ()
    %cst_144 = arith.constant 0.353553385 : f32
    %201 = vector.broadcast %cst_144 : f32 to vector<2x5x5xf32>
    %202 = arith.mulf %200, %201 : vector<2x5x5xf32>
    %cst_145 = arith.constant dense<0xFF800000> : vector<2x5xf32>
    %203 = vector.multi_reduction <maximumf>, %202, %cst_145 [2] : vector<2x5x5xf32> to vector<2x5xf32>
    %204 = vector.shape_cast %203 : vector<2x5xf32> to vector<2x5x1xf32>
    %205 = vector.broadcast %204 : vector<2x5x1xf32> to vector<2x5x5xf32>
    %206 = arith.subf %202, %205 : vector<2x5x5xf32>
    %207 = math.exp %206 : vector<2x5x5xf32>
    %cst_146 = arith.constant dense<0.000000e+00> : vector<2x5xf32>
    %208 = vector.multi_reduction <add>, %207, %cst_146 [2] : vector<2x5x5xf32> to vector<2x5xf32>
    %209 = vector.shape_cast %208 : vector<2x5xf32> to vector<2x5x1xf32>
    %210 = tpu.reciprocal %209 {approx = true} : vector<2x5x1xf32> -> vector<2x5x1xf32>
    %211 = vector.broadcast %210 : vector<2x5x1xf32> to vector<2x5x5xf32>
    %212 = arith.mulf %207, %211 : vector<2x5x5xf32>
    %213 = arith.truncf %212 : vector<2x5x5xf32> to vector<2x5x5xbf16>
    %214 = arith.truncf %197 : vector<2x5x8xf32> to vector<2x5x8xbf16>
    "tpu.trace_start"() <{level = 10 : i32, message = "bqk,bkd->bqd"}> : () -> ()
    %cst_147 = arith.constant dense<0.000000e+00> : vector<2x5x8xf32>
    %215 = tpu.matmul %213, %214, %cst_147 {dimension_numbers = #tpu.dot_dimension_numbers<[2], [1], [1], [2], [0, 0, 0, 1, 1, 2], [0], [0]>} : vector<2x5x5xbf16>, vector<2x5x8xbf16>, vector<2x5x8xf32> -> vector<2x5x8xf32>
    "tpu.trace_stop"() : () -> ()
    %216 = vector.shape_cast %215 : vector<2x5x8xf32> to vector<10x8xf32>
    %217 = arith.truncf %216 : vector<10x8xf32> to vector<10x8xbf16>
    %c3_148 = arith.constant 3 : index
    %c0_149 = arith.constant 0 : index
    %c0_150 = arith.constant 0 : index
    %218 = vector.load %arg5[%c3_148, %c0_149, %c0_150] : memref<4x8x32xbf16, #tpu.memory_space<vmem>>, vector<1x8x32xbf16>
    %219 = vector.shape_cast %218 : vector<1x8x32xbf16> to vector<8x32xbf16>
    %cst_151 = arith.constant dense<0.000000e+00> : vector<10x32xf32>
    %220 = tpu.matmul %217, %219, %cst_151 {dimension_numbers = #tpu.dot_dimension_numbers<[1], [0], [0], [1], [0, 0, 1, 1], [], []>} : vector<10x8xbf16>, vector<8x32xbf16>, vector<10x32xf32> -> vector<10x32xf32>
    %221 = arith.addf %173, %220 : vector<10x32xf32>
    %c0_152 = arith.constant 0 : index
    %c0_153 = arith.constant 0 : index
    %222 = vector.load %arg6[%c0_152, %c0_153] : memref<1x32xf32, #tpu.memory_space<vmem>>, vector<1x32xf32>
    %223 = vector.broadcast %222 : vector<1x32xf32> to vector<10x32xf32>
    %224 = arith.addf %221, %223 : vector<10x32xf32>
    %225 = vector.shape_cast %224 : vector<10x32xf32> to vector<2x5x32xf32>
    %226 = arith.addf %0, %225 : vector<2x5x32xf32>
    %c0_154 = arith.constant 0 : index
    %c0_155 = arith.constant 0 : index
    %227 = vector.load %arg7[%c0_154, %c0_155] : memref<1x32xf32, #tpu.memory_space<vmem>>, vector<1x32xf32>
    %c0_156 = arith.constant 0 : index
    %c0_157 = arith.constant 0 : index
    %228 = vector.load %arg8[%c0_156, %c0_157] : memref<1x32xf32, #tpu.memory_space<vmem>>, vector<1x32xf32>
    %cst_158 = arith.constant dense<0.000000e+00> : vector<2x5xf32>
    %229 = vector.multi_reduction <add>, %226, %cst_158 [2] : vector<2x5x32xf32> to vector<2x5xf32>
    %230 = vector.shape_cast %229 : vector<2x5xf32> to vector<2x5x1xf32>
    %cst_159 = arith.constant 3.200000e+01 : f32
    %231 = vector.broadcast %cst_159 : f32 to vector<2x5x1xf32>
    %232 = arith.divf %230, %231 : vector<2x5x1xf32>
    %233 = vector.broadcast %232 : vector<2x5x1xf32> to vector<2x5x32xf32>
    %234 = arith.subf %226, %233 : vector<2x5x32xf32>
    %235 = arith.mulf %234, %234 : vector<2x5x32xf32>
    %cst_160 = arith.constant dense<0.000000e+00> : vector<2x5xf32>
    %236 = vector.multi_reduction <add>, %235, %cst_160 [2] : vector<2x5x32xf32> to vector<2x5xf32>
    %237 = vector.shape_cast %236 : vector<2x5xf32> to vector<2x5x1xf32>
    %cst_161 = arith.constant 3.200000e+01 : f32
    %238 = vector.broadcast %cst_161 : f32 to vector<2x5x1xf32>
    %239 = arith.divf %237, %238 : vector<2x5x1xf32>
    %240 = vector.broadcast %232 : vector<2x5x1xf32> to vector<2x5x32xf32>
    %241 = arith.subf %226, %240 : vector<2x5x32xf32>
    %cst_162 = arith.constant 9.99999974E-6 : f32
    %242 = vector.broadcast %cst_162 : f32 to vector<2x5x1xf32>
    %243 = arith.addf %239, %242 : vector<2x5x1xf32>
    %244 = math.rsqrt %243 : vector<2x5x1xf32>
    %245 = vector.broadcast %244 : vector<2x5x1xf32> to vector<2x5x32xf32>
    %246 = arith.mulf %241, %245 : vector<2x5x32xf32>
    %247 = vector.shape_cast %227 : vector<1x32xf32> to vector<1x1x32xf32>
    %248 = vector.broadcast %247 : vector<1x1x32xf32> to vector<2x5x32xf32>
    %249 = arith.mulf %246, %248 : vector<2x5x32xf32>
    %250 = vector.shape_cast %228 : vector<1x32xf32> to vector<1x1x32xf32>
    %251 = vector.broadcast %250 : vector<1x1x32xf32> to vector<2x5x32xf32>
    %252 = arith.addf %249, %251 : vector<2x5x32xf32>
    %253 = vector.shape_cast %252 : vector<2x5x32xf32> to vector<10x32xf32>
    %254 = arith.truncf %253 : vector<10x32xf32> to vector<10x32xbf16>
    %c0_163 = arith.constant 0 : index
    %c0_164 = arith.constant 0 : index
    %255 = vector.load %arg9[%c0_163, %c0_164] : memref<32x128xbf16, #tpu.memory_space<vmem>>, vector<32x128xbf16>
    %cst_165 = arith.constant dense<0.000000e+00> : vector<10x128xf32>
    %256 = tpu.matmul %254, %255, %cst_165 {dimension_numbers = #tpu.dot_dimension_numbers<[1], [0], [0], [1], [0, 0, 1, 1], [], []>} : vector<10x32xbf16>, vector<32x128xbf16>, vector<10x128xf32> -> vector<10x128xf32>
    %c0_166 = arith.constant 0 : index
    %c0_167 = arith.constant 0 : index
    %257 = vector.load %arg10[%c0_166, %c0_167] : memref<1x128xf32, #tpu.memory_space<vmem>>, vector<1x128xf32>
    %258 = vector.broadcast %257 : vector<1x128xf32> to vector<10x128xf32>
    %259 = arith.addf %256, %258 : vector<10x128xf32>
    %cst_168 = arith.constant -1.702000e+00 : f32
    %260 = vector.broadcast %cst_168 : f32 to vector<10x128xf32>
    %261 = arith.mulf %260, %259 : vector<10x128xf32>
    %262 = math.exp %261 : vector<10x128xf32>
    %cst_169 = arith.constant 1.000000e+00 : f32
    %263 = vector.broadcast %cst_169 : f32 to vector<10x128xf32>
    %264 = arith.addf %263, %262 : vector<10x128xf32>
    %265 = tpu.reciprocal %264 {approx = true} : vector<10x128xf32> -> vector<10x128xf32>
    %266 = arith.mulf %259, %265 : vector<10x128xf32>
    %267 = arith.truncf %266 : vector<10x128xf32> to vector<10x128xbf16>
    %c0_170 = arith.constant 0 : index
    %c0_171 = arith.constant 0 : index
    %268 = vector.load %arg11[%c0_170, %c0_171] : memref<128x32xbf16, #tpu.memory_space<vmem>>, vector<128x32xbf16>
    %cst_172 = arith.constant dense<0.000000e+00> : vector<10x32xf32>
    %269 = tpu.matmul %267, %268, %cst_172 {dimension_numbers = #tpu.dot_dimension_numbers<[1], [0], [0], [1], [0, 0, 1, 1], [], []>} : vector<10x128xbf16>, vector<128x32xbf16>, vector<10x32xf32> -> vector<10x32xf32>
    %c0_173 = arith.constant 0 : index
    %c0_174 = arith.constant 0 : index
    %270 = vector.load %arg12[%c0_173, %c0_174] : memref<1x32xf32, #tpu.memory_space<vmem>>, vector<1x32xf32>
    %271 = vector.broadcast %270 : vector<1x32xf32> to vector<10x32xf32>
    %272 = arith.addf %269, %271 : vector<10x32xf32>
    %273 = vector.shape_cast %272 : vector<10x32xf32> to vector<2x5x32xf32>
    %274 = arith.addf %226, %273 : vector<2x5x32xf32>
    %c0_175 = arith.constant 0 : index
    %c0_176 = arith.constant 0 : index
    %c0_177 = arith.constant 0 : index
    %275 = vector.load %arg13[%c0_175, %c0_176, %c0_177] : memref<2x5x32xf32, #tpu.memory_space<vmem>>, vector<2x5x32xf32>
    tpu.vector_store %arg13[%c0_175, %c0_176, %c0_177], %274 {strides = array<i32>} : memref<2x5x32xf32, #tpu.memory_space<vmem>>, vector<2x5x32xf32>,
    return
  }
}

module attributes {stable_mosaic.version = 11 : i64} {
  func.func @_visual_stem_kernel(%arg0: memref<2x4x192xf32, #tpu.memory_space<vmem>>, %arg1: memref<192x32xbf16, #tpu.memory_space<vmem>>, %arg2: memref<1x32xf32, #tpu.memory_space<vmem>>, %arg3: memref<5x32xf32, #tpu.memory_space<vmem>>, %arg4: memref<1x32xf32, #tpu.memory_space<vmem>>, %arg5: memref<1x32xf32, #tpu.memory_space<vmem>>, %arg6: memref<2x5x32xf32, #tpu.memory_space<vmem>>) attributes {dimension_semantics = [], scalar_prefetch = 0 : i64, scratch_operands = 0 : i64, tpu.core_type = #tpu.core_type<tc>} {
    %c0 = arith.constant 0 : index
    %c0_0 = arith.constant 0 : index
    %0 = vector.load %arg4[%c0, %c0_0] : memref<1x32xf32, #tpu.memory_space<vmem>>, vector<1x32xf32>
    %c0_1 = arith.constant 0 : index
    %c0_2 = arith.constant 0 : index
    %1 = vector.load %arg5[%c0_1, %c0_2] : memref<1x32xf32, #tpu.memory_space<vmem>>, vector<1x32xf32>
    %c0_3 = arith.constant 0 : index
    %c0_4 = arith.constant 0 : index
    %c0_5 = arith.constant 0 : index
    %2 = vector.load %arg0[%c0_3, %c0_4, %c0_5] : memref<2x4x192xf32, #tpu.memory_space<vmem>>, vector<2x4x192xf32>
    %3 = vector.shape_cast %2 : vector<2x4x192xf32> to vector<8x192xf32>
    %4 = arith.truncf %3 : vector<8x192xf32> to vector<8x192xbf16>
    %c0_6 = arith.constant 0 : index
    %c0_7 = arith.constant 0 : index
    %5 = vector.load %arg1[%c0_6, %c0_7] : memref<192x32xbf16, #tpu.memory_space<vmem>>, vector<192x32xbf16>
    %cst = arith.constant dense<0.000000e+00> : vector<8x32xf32>
    %6 = tpu.matmul %4, %5, %cst {dimension_numbers = #tpu.dot_dimension_numbers<[1], [0], [0], [1], [0, 0, 1, 1], [], []>} : vector<8x192xbf16>, vector<192x32xbf16>, vector<8x32xf32> -> vector<8x32xf32>
    %7 = vector.shape_cast %6 : vector<8x32xf32> to vector<2x4x32xf32>
    %c1 = arith.constant 1 : index
    %c0_8 = arith.constant 0 : index
    %8 = vector.load %arg3[%c1, %c0_8] : memref<5x32xf32, #tpu.memory_space<vmem>>, vector<4x32xf32>
    %9 = vector.shape_cast %8 : vector<4x32xf32> to vector<1x4x32xf32>
    %10 = vector.broadcast %9 : vector<1x4x32xf32> to vector<2x4x32xf32>
    %11 = arith.addf %7, %10 : vector<2x4x32xf32>
    %c0_9 = arith.constant 0 : index
    %c0_10 = arith.constant 0 : index
    %12 = vector.load %arg2[%c0_9, %c0_10] : memref<1x32xf32, #tpu.memory_space<vmem>>, vector<1x32xf32>
    %c0_11 = arith.constant 0 : index
    %c0_12 = arith.constant 0 : index
    %13 = vector.load %arg3[%c0_11, %c0_12] : memref<5x32xf32, #tpu.memory_space<vmem>>, vector<1x32xf32>
    %14 = arith.addf %12, %13 : vector<1x32xf32>
    %15 = vector.shape_cast %14 : vector<1x32xf32> to vector<1x1x32xf32>
    %16 = vector.shape_cast %15 : vector<1x1x32xf32> to vector<1x1x32xf32>
    %17 = vector.broadcast %16 : vector<1x1x32xf32> to vector<2x1x32xf32>
    %cst_13 = arith.constant dense<0.000000e+00> : vector<2x1xf32>
    %18 = vector.multi_reduction <add>, %17, %cst_13 [2] : vector<2x1x32xf32> to vector<2x1xf32>
    %19 = vector.shape_cast %18 : vector<2x1xf32> to vector<2x1x1xf32>
    %cst_14 = arith.constant 3.200000e+01 : f32
    %20 = vector.broadcast %cst_14 : f32 to vector<2x1x1xf32>
    %21 = arith.divf %19, %20 : vector<2x1x1xf32>
    %22 = vector.broadcast %21 : vector<2x1x1xf32> to vector<2x1x32xf32>
    %23 = arith.subf %17, %22 : vector<2x1x32xf32>
    %24 = arith.mulf %23, %23 : vector<2x1x32xf32>
    %cst_15 = arith.constant dense<0.000000e+00> : vector<2x1xf32>
    %25 = vector.multi_reduction <add>, %24, %cst_15 [2] : vector<2x1x32xf32> to vector<2x1xf32>
    %26 = vector.shape_cast %25 : vector<2x1xf32> to vector<2x1x1xf32>
    %cst_16 = arith.constant 3.200000e+01 : f32
    %27 = vector.broadcast %cst_16 : f32 to vector<2x1x1xf32>
    %28 = arith.divf %26, %27 : vector<2x1x1xf32>
    %29 = vector.broadcast %21 : vector<2x1x1xf32> to vector<2x1x32xf32>
    %30 = arith.subf %17, %29 : vector<2x1x32xf32>
    %cst_17 = arith.constant 9.99999974E-6 : f32
    %31 = vector.broadcast %cst_17 : f32 to vector<2x1x1xf32>
    %32 = arith.addf %28, %31 : vector<2x1x1xf32>
    %33 = math.rsqrt %32 : vector<2x1x1xf32>
    %34 = vector.broadcast %33 : vector<2x1x1xf32> to vector<2x1x32xf32>
    %35 = arith.mulf %30, %34 : vector<2x1x32xf32>
    %36 = vector.shape_cast %0 : vector<1x32xf32> to vector<1x1x32xf32>
    %37 = vector.broadcast %36 : vector<1x1x32xf32> to vector<2x1x32xf32>
    %38 = arith.mulf %35, %37 : vector<2x1x32xf32>
    %39 = vector.shape_cast %1 : vector<1x32xf32> to vector<1x1x32xf32>
    %40 = vector.broadcast %39 : vector<1x1x32xf32> to vector<2x1x32xf32>
    %41 = arith.addf %38, %40 : vector<2x1x32xf32>
    %c0_18 = arith.constant 0 : index
    %c0_19 = arith.constant 0 : index
    %c0_20 = arith.constant 0 : index
    %42 = vector.load %arg6[%c0_18, %c0_19, %c0_20] : memref<2x5x32xf32, #tpu.memory_space<vmem>>, vector<2x1x32xf32>
    tpu.vector_store %arg6[%c0_18, %c0_19, %c0_20], %41 {strides = array<i32>} : memref<2x5x32xf32, #tpu.memory_space<vmem>>, vector<2x1x32xf32>,
    %cst_21 = arith.constant dense<0.000000e+00> : vector<2x4xf32>
    %43 = vector.multi_reduction <add>, %11, %cst_21 [2] : vector<2x4x32xf32> to vector<2x4xf32>
    %44 = vector.shape_cast %43 : vector<2x4xf32> to vector<2x4x1xf32>
    %cst_22 = arith.constant 3.200000e+01 : f32
    %45 = vector.broadcast %cst_22 : f32 to vector<2x4x1xf32>
    %46 = arith.divf %44, %45 : vector<2x4x1xf32>
    %47 = vector.broadcast %46 : vector<2x4x1xf32> to vector<2x4x32xf32>
    %48 = arith.subf %11, %47 : vector<2x4x32xf32>
    %49 = arith.mulf %48, %48 : vector<2x4x32xf32>
    %cst_23 = arith.constant dense<0.000000e+00> : vector<2x4xf32>
    %50 = vector.multi_reduction <add>, %49, %cst_23 [2] : vector<2x4x32xf32> to vector<2x4xf32>
    %51 = vector.shape_cast %50 : vector<2x4xf32> to vector<2x4x1xf32>
    %cst_24 = arith.constant 3.200000e+01 : f32
    %52 = vector.broadcast %cst_24 : f32 to vector<2x4x1xf32>
    %53 = arith.divf %51, %52 : vector<2x4x1xf32>
    %54 = vector.broadcast %46 : vector<2x4x1xf32> to vector<2x4x32xf32>
    %55 = arith.subf %11, %54 : vector<2x4x32xf32>
    %cst_25 = arith.constant 9.99999974E-6 : f32
    %56 = vector.broadcast %cst_25 : f32 to vector<2x4x1xf32>
    %57 = arith.addf %53, %56 : vector<2x4x1xf32>
    %58 = math.rsqrt %57 : vector<2x4x1xf32>
    %59 = vector.broadcast %58 : vector<2x4x1xf32> to vector<2x4x32xf32>
    %60 = arith.mulf %55, %59 : vector<2x4x32xf32>
    %61 = vector.shape_cast %0 : vector<1x32xf32> to vector<1x1x32xf32>
    %62 = vector.broadcast %61 : vector<1x1x32xf32> to vector<2x4x32xf32>
    %63 = arith.mulf %60, %62 : vector<2x4x32xf32>
    %64 = vector.shape_cast %1 : vector<1x32xf32> to vector<1x1x32xf32>
    %65 = vector.broadcast %64 : vector<1x1x32xf32> to vector<2x4x32xf32>
    %66 = arith.addf %63, %65 : vector<2x4x32xf32>
    %c0_26 = arith.constant 0 : index
    %c1_27 = arith.constant 1 : index
    %c0_28 = arith.constant 0 : index
    %67 = vector.load %arg6[%c0_26, %c1_27, %c0_28] : memref<2x5x32xf32, #tpu.memory_space<vmem>>, vector<2x4x32xf32>
    tpu.vector_store %arg6[%c0_26, %c1_27, %c0_28], %66 {strides = array<i32>} : memref<2x5x32xf32, #tpu.memory_space<vmem>>, vector<2x4x32xf32>,
    return
  }
}

module attributes {stable_mosaic.version = 11 : i64} {
  func.func @_meta_ctx_kernel(%arg0: memref<2x32xf32, #tpu.memory_space<vmem>>, %arg1: memref<32x2xbf16, #tpu.memory_space<vmem>>, %arg2: memref<1x2xf32, #tpu.memory_space<vmem>>, %arg3: memref<2x32xbf16, #tpu.memory_space<vmem>>, %arg4: memref<1x32xf32, #tpu.memory_space<vmem>>, %arg5: memref<4x32xf32, #tpu.memory_space<vmem>>, %arg6: memref<2x4x32xf32, #tpu.memory_space<vmem>>) attributes {dimension_semantics = [], scalar_prefetch = 0 : i64, scratch_operands = 0 : i64, tpu.core_type = #tpu.core_type<tc>} {
    %c0 = arith.constant 0 : index
    %c0_0 = arith.constant 0 : index
    %0 = vector.load %arg0[%c0, %c0_0] : memref<2x32xf32, #tpu.memory_space<vmem>>, vector<2x32xf32>
    %1 = arith.truncf %0 : vector<2x32xf32> to vector<2x32xbf16>
    %c0_1 = arith.constant 0 : index
    %c0_2 = arith.constant 0 : index
    %2 = vector.load %arg1[%c0_1, %c0_2] : memref<32x2xbf16, #tpu.memory_space<vmem>>, vector<32x2xbf16>
    %cst = arith.constant dense<0.000000e+00> : vector<2x2xf32>
    %3 = tpu.matmul %1, %2, %cst {dimension_numbers = #tpu.dot_dimension_numbers<[1], [0], [0], [1], [0, 0, 1, 1], [], []>} : vector<2x32xbf16>, vector<32x2xbf16>, vector<2x2xf32> -> vector<2x2xf32>
    %c0_3 = arith.constant 0 : index
    %c0_4 = arith.constant 0 : index
    %4 = vector.load %arg2[%c0_3, %c0_4] : memref<1x2xf32, #tpu.memory_space<vmem>>, vector<1x2xf32>
    %5 = vector.broadcast %4 : vector<1x2xf32> to vector<2x2xf32>
    %6 = arith.addf %3, %5 : vector<2x2xf32>
    %cst_5 = arith.constant 0.000000e+00 : f32
    %7 = vector.broadcast %cst_5 : f32 to vector<2x2xf32>
    %8 = arith.maximumf %6, %7 : vector<2x2xf32>
    %9 = arith.truncf %8 : vector<2x2xf32> to vector<2x2xbf16>
    %c0_6 = arith.constant 0 : index
    %c0_7 = arith.constant 0 : index
    %10 = vector.load %arg3[%c0_6, %c0_7] : memref<2x32xbf16, #tpu.memory_space<vmem>>, vector<2x32xbf16>
    %cst_8 = arith.constant dense<0.000000e+00> : vector<2x32xf32>
    %11 = tpu.matmul %9, %10, %cst_8 {dimension_numbers = #tpu.dot_dimension_numbers<[1], [0], [0], [1], [0, 0, 1, 1], [], []>} : vector<2x2xbf16>, vector<2x32xbf16>, vector<2x32xf32> -> vector<2x32xf32>
    %c0_9 = arith.constant 0 : index
    %c0_10 = arith.constant 0 : index
    %12 = vector.load %arg4[%c0_9, %c0_10] : memref<1x32xf32, #tpu.memory_space<vmem>>, vector<1x32xf32>
    %13 = vector.broadcast %12 : vector<1x32xf32> to vector<2x32xf32>
    %14 = arith.addf %11, %13 : vector<2x32xf32>
    %c0_11 = arith.constant 0 : index
    %c0_12 = arith.constant 0 : index
    %15 = vector.load %arg5[%c0_11, %c0_12] : memref<4x32xf32, #tpu.memory_space<vmem>>, vector<4x32xf32>
    %16 = vector.shape_cast %15 : vector<4x32xf32> to vector<1x4x32xf32>
    %17 = vector.shape_cast %14 : vector<2x32xf32> to vector<2x1x32xf32>
    %18 = vector.broadcast %16 : vector<1x4x32xf32> to vector<2x4x32xf32>
    %19 = vector.broadcast %17 : vector<2x1x32xf32> to vector<2x4x32xf32>
    %20 = arith.addf %18, %19 : vector<2x4x32xf32>
    %c0_13 = arith.constant 0 : index
    %c0_14 = arith.constant 0 : index
    %c0_15 = arith.constant 0 : index
    %21 = vector.load %arg6[%c0_13, %c0_14, %c0_15] : memref<2x4x32xf32, #tpu.memory_space<vmem>>, vector<2x4x32xf32>
    tpu.vector_store %arg6[%c0_13, %c0_14, %c0_15], %20 {strides = array<i32>} : memref<2x4x32xf32, #tpu.memory_space<vmem>>, vector<2x4x32xf32>,
    return
  }
}

module attributes {stable_mosaic.version = 11 : i64} {
  func.func @_residual_block_kernel(%arg0: memref<6x8x32xf32, #tpu.memory_space<vmem>>, %arg1: memref<1x32xf32, #tpu.memory_space<vmem>>, %arg2: memref<1x32xf32, #tpu.memory_space<vmem>>, %arg3: memref<3x4x32x8xbf16, #tpu.memory_space<vmem>>, %arg4: memref<3x4x1x8xf32, #tpu.memory_space<vmem>>, %arg5: memref<4x8x32xbf16, #tpu.memory_space<vmem>>, %arg6: memref<1x32xf32, #tpu.memory_space<vmem>>, %arg7: memref<1x32xf32, #tpu.memory_space<vmem>>, %arg8: memref<1x32xf32, #tpu.memory_space<vmem>>, %arg9: memref<32x128xbf16, #tpu.memory_space<vmem>>, %arg10: memref<1x128xf32, #tpu.memory_space<vmem>>, %arg11: memref<128x32xbf16, #tpu.memory_space<vmem>>, %arg12: memref<1x32xf32, #tpu.memory_space<vmem>>, %arg13: memref<6x8x32xf32, #tpu.memory_space<vmem>>) attributes {dimension_semantics = [], scalar_prefetch = 0 : i64, scratch_operands = 0 : i64, tpu.core_type = #tpu.core_type<tc>} {
    %c0 = arith.constant 0 : index
    %c0_0 = arith.constant 0 : index
    %c0_1 = arith.constant 0 : index
    %0 = vector.load %arg0[%c0, %c0_0, %c0_1] : memref<6x8x32xf32, #tpu.memory_space<vmem>>, vector<6x8x32xf32>
    %c0_2 = arith.constant 0 : index
    %c0_3 = arith.constant 0 : index
    %1 = vector.load %arg1[%c0_2, %c0_3] : memref<1x32xf32, #tpu.memory_space<vmem>>, vector<1x32xf32>
    %c0_4 = arith.constant 0 : index
    %c0_5 = arith.constant 0 : index
    %2 = vector.load %arg2[%c0_4, %c0_5] : memref<1x32xf32, #tpu.memory_space<vmem>>, vector<1x32xf32>
    %cst = arith.constant dense<0.000000e+00> : vector<6x8xf32>
    %3 = vector.multi_reduction <add>, %0, %cst [2] : vector<6x8x32xf32> to vector<6x8xf32>
    %4 = vector.shape_cast %3 : vector<6x8xf32> to vector<6x8x1xf32>
    %cst_6 = arith.constant 3.200000e+01 : f32
    %5 = vector.broadcast %cst_6 : f32 to vector<6x8x1xf32>
    %6 = arith.divf %4, %5 : vector<6x8x1xf32>
    %7 = vector.broadcast %6 : vector<6x8x1xf32> to vector<6x8x32xf32>
    %8 = arith.subf %0, %7 : vector<6x8x32xf32>
    %9 = arith.mulf %8, %8 : vector<6x8x32xf32>
    %cst_7 = arith.constant dense<0.000000e+00> : vector<6x8xf32>
    %10 = vector.multi_reduction <add>, %9, %cst_7 [2] : vector<6x8x32xf32> to vector<6x8xf32>
    %11 = vector.shape_cast %10 : vector<6x8xf32> to vector<6x8x1xf32>
    %cst_8 = arith.constant 3.200000e+01 : f32
    %12 = vector.broadcast %cst_8 : f32 to vector<6x8x1xf32>
    %13 = arith.divf %11, %12 : vector<6x8x1xf32>
    %14 = vector.broadcast %6 : vector<6x8x1xf32> to vector<6x8x32xf32>
    %15 = arith.subf %0, %14 : vector<6x8x32xf32>
    %cst_9 = arith.constant 9.99999974E-6 : f32
    %16 = vector.broadcast %cst_9 : f32 to vector<6x8x1xf32>
    %17 = arith.addf %13, %16 : vector<6x8x1xf32>
    %18 = math.rsqrt %17 : vector<6x8x1xf32>
    %19 = vector.broadcast %18 : vector<6x8x1xf32> to vector<6x8x32xf32>
    %20 = arith.mulf %15, %19 : vector<6x8x32xf32>
    %21 = vector.shape_cast %1 : vector<1x32xf32> to vector<1x1x32xf32>
    %22 = vector.broadcast %21 : vector<1x1x32xf32> to vector<6x8x32xf32>
    %23 = arith.mulf %20, %22 : vector<6x8x32xf32>
    %24 = vector.shape_cast %2 : vector<1x32xf32> to vector<1x1x32xf32>
    %25 = vector.broadcast %24 : vector<1x1x32xf32> to vector<6x8x32xf32>
    %26 = arith.addf %23, %25 : vector<6x8x32xf32>
    %27 = vector.shape_cast %26 : vector<6x8x32xf32> to vector<48x32xf32>
    %28 = arith.truncf %27 : vector<48x32xf32> to vector<48x32xbf16>
    %29 = tpu.iota {dimensions = array<i32: 0>} : vector<8x8xi32>
    %30 = tpu.iota {dimensions = array<i32: 1>} : vector<8x8xi32>
    %31 = arith.cmpi sgt, %30, %29 : vector<8x8xi32>
    %cst_10 = arith.constant -1.000000e+09 : f32
    %cst_11 = arith.constant 0.000000e+00 : f32
    %32 = vector.broadcast %cst_10 : f32 to vector<8x8xf32>
    %33 = vector.broadcast %cst_11 : f32 to vector<8x8xf32>
    %34 = arith.select %31, %32, %33 : vector<8x8xi1>, vector<8x8xf32>
    %cst_12 = arith.constant 0.000000e+00 : f32
    %35 = vector.broadcast %cst_12 : f32 to vector<48x32xf32>
    %c0_13 = arith.constant 0 : index
    %c0_14 = arith.constant 0 : index
    %c0_15 = arith.constant 0 : index
    %c0_16 = arith.constant 0 : index
    %36 = vector.load %arg3[%c0_13, %c0_14, %c0_15, %c0_16] : memref<3x4x32x8xbf16, #tpu.memory_space<vmem>>, vector<1x1x32x8xbf16>
    %37 = vector.shape_cast %36 : vector<1x1x32x8xbf16> to vector<32x8xbf16>
    %cst_17 = arith.constant dense<0.000000e+00> : vector<48x8xf32>
    %38 = tpu.matmul %28, %37, %cst_17 {dimension_numbers = #tpu.dot_dimension_numbers<[1], [0], [0], [1], [0, 0, 1, 1], [], []>} : vector<48x32xbf16>, vector<32x8xbf16>, vector<48x8xf32> -> vector<48x8xf32>
    %c0_18 = arith.constant 0 : index
    %c0_19 = arith.constant 0 : index
    %c0_20 = arith.constant 0 : index
    %c0_21 = arith.constant 0 : index
    %39 = vector.load %arg4[%c0_18, %c0_19, %c0_20, %c0_21] : memref<3x4x1x8xf32, #tpu.memory_space<vmem>>, vector<1x1x1x8xf32>
    %40 = vector.shape_cast %39 : vector<1x1x1x8xf32> to vector<1x8xf32>
    %41 = vector.broadcast %40 : vector<1x8xf32> to vector<48x8xf32>
    %42 = arith.addf %38, %41 : vector<48x8xf32>
    %c1 = arith.constant 1 : index
    %c0_22 = arith.constant 0 : index
    %c0_23 = arith.constant 0 : index
    %c0_24 = arith.constant 0 : index
    %43 = vector.load %arg3[%c1, %c0_22, %c0_23, %c0_24] : memref<3x4x32x8xbf16, #tpu.memory_space<vmem>>, vector<1x1x32x8xbf16>
    %44 = vector.shape_cast %43 : vector<1x1x32x8xbf16> to vector<32x8xbf16>
    %cst_25 = arith.constant dense<0.000000e+00> : vector<48x8xf32>
    %45 = tpu.matmul %28, %44, %cst_25 {dimension_numbers = #tpu.dot_dimension_numbers<[1], [0], [0], [1], [0, 0, 1, 1], [], []>} : vector<48x32xbf16>, vector<32x8xbf16>, vector<48x8xf32> -> vector<48x8xf32>
    %c1_26 = arith.constant 1 : index
    %c0_27 = arith.constant 0 : index
    %c0_28 = arith.constant 0 : index
    %c0_29 = arith.constant 0 : index
    %46 = vector.load %arg4[%c1_26, %c0_27, %c0_28, %c0_29] : memref<3x4x1x8xf32, #tpu.memory_space<vmem>>, vector<1x1x1x8xf32>
    %47 = vector.shape_cast %46 : vector<1x1x1x8xf32> to vector<1x8xf32>
    %48 = vector.broadcast %47 : vector<1x8xf32> to vector<48x8xf32>
    %49 = arith.addf %45, %48 : vector<48x8xf32>
    %c2 = arith.constant 2 : index
    %c0_30 = arith.constant 0 : index
    %c0_31 = arith.constant 0 : index
    %c0_32 = arith.constant 0 : index
    %50 = vector.load %arg3[%c2, %c0_30, %c0_31, %c0_32] : memref<3x4x32x8xbf16, #tpu.memory_space<vmem>>, vector<1x1x32x8xbf16>
    %51 = vector.shape_cast %50 : vector<1x1x32x8xbf16> to vector<32x8xbf16>
    %cst_33 = arith.constant dense<0.000000e+00> : vector<48x8xf32>
    %52 = tpu.matmul %28, %51, %cst_33 {dimension_numbers = #tpu.dot_dimension_numbers<[1], [0], [0], [1], [0, 0, 1, 1], [], []>} : vector<48x32xbf16>, vector<32x8xbf16>, vector<48x8xf32> -> vector<48x8xf32>
    %c2_34 = arith.constant 2 : index
    %c0_35 = arith.constant 0 : index
    %c0_36 = arith.constant 0 : index
    %c0_37 = arith.constant 0 : index
    %53 = vector.load %arg4[%c2_34, %c0_35, %c0_36, %c0_37] : memref<3x4x1x8xf32, #tpu.memory_space<vmem>>, vector<1x1x1x8xf32>
    %54 = vector.shape_cast %53 : vector<1x1x1x8xf32> to vector<1x8xf32>
    %55 = vector.broadcast %54 : vector<1x8xf32> to vector<48x8xf32>
    %56 = arith.addf %52, %55 : vector<48x8xf32>
    %57 = vector.shape_cast %42 : vector<48x8xf32> to vector<6x8x8xf32>
    %58 = vector.shape_cast %49 : vector<48x8xf32> to vector<6x8x8xf32>
    %59 = vector.shape_cast %56 : vector<48x8xf32> to vector<6x8x8xf32>
    %60 = arith.truncf %57 : vector<6x8x8xf32> to vector<6x8x8xbf16>
    %61 = arith.truncf %58 : vector<6x8x8xf32> to vector<6x8x8xbf16>
    "tpu.trace_start"() <{level = 10 : i32, message = "bqd,bkd->bqk"}> : () -> ()
    %cst_38 = arith.constant dense<0.000000e+00> : vector<6x8x8xf32>
    %62 = tpu.matmul %60, %61, %cst_38 {dimension_numbers = #tpu.dot_dimension_numbers<[2], [2], [1], [1], [0, 0, 0, 1, 1, 1], [0], [0]>} : vector<6x8x8xbf16>, vector<6x8x8xbf16>, vector<6x8x8xf32> -> vector<6x8x8xf32>
    "tpu.trace_stop"() : () -> ()
    %cst_39 = arith.constant 0.353553385 : f32
    %63 = vector.broadcast %cst_39 : f32 to vector<6x8x8xf32>
    %64 = arith.mulf %62, %63 : vector<6x8x8xf32>
    %65 = vector.shape_cast %34 : vector<8x8xf32> to vector<1x8x8xf32>
    %66 = vector.broadcast %65 : vector<1x8x8xf32> to vector<6x8x8xf32>
    %67 = arith.addf %64, %66 : vector<6x8x8xf32>
    %cst_40 = arith.constant dense<0xFF800000> : vector<6x8xf32>
    %68 = vector.multi_reduction <maximumf>, %67, %cst_40 [2] : vector<6x8x8xf32> to vector<6x8xf32>
    %69 = vector.shape_cast %68 : vector<6x8xf32> to vector<6x8x1xf32>
    %70 = vector.broadcast %69 : vector<6x8x1xf32> to vector<6x8x8xf32>
    %71 = arith.subf %67, %70 : vector<6x8x8xf32>
    %72 = math.exp %71 : vector<6x8x8xf32>
    %cst_41 = arith.constant dense<0.000000e+00> : vector<6x8xf32>
    %73 = vector.multi_reduction <add>, %72, %cst_41 [2] : vector<6x8x8xf32> to vector<6x8xf32>
    %74 = vector.shape_cast %73 : vector<6x8xf32> to vector<6x8x1xf32>
    %75 = tpu.reciprocal %74 {approx = true} : vector<6x8x1xf32> -> vector<6x8x1xf32>
    %76 = vector.broadcast %75 : vector<6x8x1xf32> to vector<6x8x8xf32>
    %77 = arith.mulf %72, %76 : vector<6x8x8xf32>
    %78 = arith.truncf %77 : vector<6x8x8xf32> to vector<6x8x8xbf16>
    %79 = arith.truncf %59 : vector<6x8x8xf32> to vector<6x8x8xbf16>
    "tpu.trace_start"() <{level = 10 : i32, message = "bqk,bkd->bqd"}> : () -> ()
    %cst_42 = arith.constant dense<0.000000e+00> : vector<6x8x8xf32>
    %80 = tpu.matmul %78, %79, %cst_42 {dimension_numbers = #tpu.dot_dimension_numbers<[2], [1], [1], [2], [0, 0, 0, 1, 1, 2], [0], [0]>} : vector<6x8x8xbf16>, vector<6x8x8xbf16>, vector<6x8x8xf32> -> vector<6x8x8xf32>
    "tpu.trace_stop"() : () -> ()
    %81 = vector.shape_cast %80 : vector<6x8x8xf32> to vector<48x8xf32>
    %82 = arith.truncf %81 : vector<48x8xf32> to vector<48x8xbf16>
    %c0_43 = arith.constant 0 : index
    %c0_44 = arith.constant 0 : index
    %c0_45 = arith.constant 0 : index
    %83 = vector.load %arg5[%c0_43, %c0_44, %c0_45] : memref<4x8x32xbf16, #tpu.memory_space<vmem>>, vector<1x8x32xbf16>
    %84 = vector.shape_cast %83 : vector<1x8x32xbf16> to vector<8x32xbf16>
    %cst_46 = arith.constant dense<0.000000e+00> : vector<48x32xf32>
    %85 = tpu.matmul %82, %84, %cst_46 {dimension_numbers = #tpu.dot_dimension_numbers<[1], [0], [0], [1], [0, 0, 1, 1], [], []>} : vector<48x8xbf16>, vector<8x32xbf16>, vector<48x32xf32> -> vector<48x32xf32>
    %86 = arith.addf %35, %85 : vector<48x32xf32>
    %c0_47 = arith.constant 0 : index
    %c1_48 = arith.constant 1 : index
    %c0_49 = arith.constant 0 : index
    %c0_50 = arith.constant 0 : index
    %87 = vector.load %arg3[%c0_47, %c1_48, %c0_49, %c0_50] : memref<3x4x32x8xbf16, #tpu.memory_space<vmem>>, vector<1x1x32x8xbf16>
    %88 = vector.shape_cast %87 : vector<1x1x32x8xbf16> to vector<32x8xbf16>
    %cst_51 = arith.constant dense<0.000000e+00> : vector<48x8xf32>
    %89 = tpu.matmul %28, %88, %cst_51 {dimension_numbers = #tpu.dot_dimension_numbers<[1], [0], [0], [1], [0, 0, 1, 1], [], []>} : vector<48x32xbf16>, vector<32x8xbf16>, vector<48x8xf32> -> vector<48x8xf32>
    %c0_52 = arith.constant 0 : index
    %c1_53 = arith.constant 1 : index
    %c0_54 = arith.constant 0 : index
    %c0_55 = arith.constant 0 : index
    %90 = vector.load %arg4[%c0_52, %c1_53, %c0_54, %c0_55] : memref<3x4x1x8xf32, #tpu.memory_space<vmem>>, vector<1x1x1x8xf32>
    %91 = vector.shape_cast %90 : vector<1x1x1x8xf32> to vector<1x8xf32>
    %92 = vector.broadcast %91 : vector<1x8xf32> to vector<48x8xf32>
    %93 = arith.addf %89, %92 : vector<48x8xf32>
    %c1_56 = arith.constant 1 : index
    %c1_57 = arith.constant 1 : index
    %c0_58 = arith.constant 0 : index
    %c0_59 = arith.constant 0 : index
    %94 = vector.load %arg3[%c1_56, %c1_57, %c0_58, %c0_59] : memref<3x4x32x8xbf16, #tpu.memory_space<vmem>>, vector<1x1x32x8xbf16>
    %95 = vector.shape_cast %94 : vector<1x1x32x8xbf16> to vector<32x8xbf16>
    %cst_60 = arith.constant dense<0.000000e+00> : vector<48x8xf32>
    %96 = tpu.matmul %28, %95, %cst_60 {dimension_numbers = #tpu.dot_dimension_numbers<[1], [0], [0], [1], [0, 0, 1, 1], [], []>} : vector<48x32xbf16>, vector<32x8xbf16>, vector<48x8xf32> -> vector<48x8xf32>
    %c1_61 = arith.constant 1 : index
    %c1_62 = arith.constant 1 : index
    %c0_63 = arith.constant 0 : index
    %c0_64 = arith.constant 0 : index
    %97 = vector.load %arg4[%c1_61, %c1_62, %c0_63, %c0_64] : memref<3x4x1x8xf32, #tpu.memory_space<vmem>>, vector<1x1x1x8xf32>
    %98 = vector.shape_cast %97 : vector<1x1x1x8xf32> to vector<1x8xf32>
    %99 = vector.broadcast %98 : vector<1x8xf32> to vector<48x8xf32>
    %100 = arith.addf %96, %99 : vector<48x8xf32>
    %c2_65 = arith.constant 2 : index
    %c1_66 = arith.constant 1 : index
    %c0_67 = arith.constant 0 : index
    %c0_68 = arith.constant 0 : index
    %101 = vector.load %arg3[%c2_65, %c1_66, %c0_67, %c0_68] : memref<3x4x32x8xbf16, #tpu.memory_space<vmem>>, vector<1x1x32x8xbf16>
    %102 = vector.shape_cast %101 : vector<1x1x32x8xbf16> to vector<32x8xbf16>
    %cst_69 = arith.constant dense<0.000000e+00> : vector<48x8xf32>
    %103 = tpu.matmul %28, %102, %cst_69 {dimension_numbers = #tpu.dot_dimension_numbers<[1], [0], [0], [1], [0, 0, 1, 1], [], []>} : vector<48x32xbf16>, vector<32x8xbf16>, vector<48x8xf32> -> vector<48x8xf32>
    %c2_70 = arith.constant 2 : index
    %c1_71 = arith.constant 1 : index
    %c0_72 = arith.constant 0 : index
    %c0_73 = arith.constant 0 : index
    %104 = vector.load %arg4[%c2_70, %c1_71, %c0_72, %c0_73] : memref<3x4x1x8xf32, #tpu.memory_space<vmem>>, vector<1x1x1x8xf32>
    %105 = vector.shape_cast %104 : vector<1x1x1x8xf32> to vector<1x8xf32>
    %106 = vector.broadcast %105 : vector<1x8xf32> to vector<48x8xf32>
    %107 = arith.addf %103, %106 : vector<48x8xf32>
    %108 = vector.shape_cast %93 : vector<48x8xf32> to vector<6x8x8xf32>
    %109 = vector.shape_cast %100 : vector<48x8xf32> to vector<6x8x8xf32>
    %110 = vector.shape_cast %107 : vector<48x8xf32> to vector<6x8x8xf32>
    %111 = arith.truncf %108 : vector<6x8x8xf32> to vector<6x8x8xbf16>
    %112 = arith.truncf %109 : vector<6x8x8xf32> to vector<6x8x8xbf16>
    "tpu.trace_start"() <{level = 10 : i32, message = "bqd,bkd->bqk"}> : () -> ()
    %cst_74 = arith.constant dense<0.000000e+00> : vector<6x8x8xf32>
    %113 = tpu.matmul %111, %112, %cst_74 {dimension_numbers = #tpu.dot_dimension_numbers<[2], [2], [1], [1], [0, 0, 0, 1, 1, 1], [0], [0]>} : vector<6x8x8xbf16>, vector<6x8x8xbf16>, vector<6x8x8xf32> -> vector<6x8x8xf32>
    "tpu.trace_stop"() : () -> ()
    %cst_75 = arith.constant 0.353553385 : f32
    %114 = vector.broadcast %cst_75 : f32 to vector<6x8x8xf32>
    %115 = arith.mulf %113, %114 : vector<6x8x8xf32>
    %116 = vector.shape_cast %34 : vector<8x8xf32> to vector<1x8x8xf32>
    %117 = vector.broadcast %116 : vector<1x8x8xf32> to vector<6x8x8xf32>
    %118 = arith.addf %115, %117 : vector<6x8x8xf32>
    %cst_76 = arith.constant dense<0xFF800000> : vector<6x8xf32>
    %119 = vector.multi_reduction <maximumf>, %118, %cst_76 [2] : vector<6x8x8xf32> to vector<6x8xf32>
    %120 = vector.shape_cast %119 : vector<6x8xf32> to vector<6x8x1xf32>
    %121 = vector.broadcast %120 : vector<6x8x1xf32> to vector<6x8x8xf32>
    %122 = arith.subf %118, %121 : vector<6x8x8xf32>
    %123 = math.exp %122 : vector<6x8x8xf32>
    %cst_77 = arith.constant dense<0.000000e+00> : vector<6x8xf32>
    %124 = vector.multi_reduction <add>, %123, %cst_77 [2] : vector<6x8x8xf32> to vector<6x8xf32>
    %125 = vector.shape_cast %124 : vector<6x8xf32> to vector<6x8x1xf32>
    %126 = tpu.reciprocal %125 {approx = true} : vector<6x8x1xf32> -> vector<6x8x1xf32>
    %127 = vector.broadcast %126 : vector<6x8x1xf32> to vector<6x8x8xf32>
    %128 = arith.mulf %123, %127 : vector<6x8x8xf32>
    %129 = arith.truncf %128 : vector<6x8x8xf32> to vector<6x8x8xbf16>
    %130 = arith.truncf %110 : vector<6x8x8xf32> to vector<6x8x8xbf16>
    "tpu.trace_start"() <{level = 10 : i32, message = "bqk,bkd->bqd"}> : () -> ()
    %cst_78 = arith.constant dense<0.000000e+00> : vector<6x8x8xf32>
    %131 = tpu.matmul %129, %130, %cst_78 {dimension_numbers = #tpu.dot_dimension_numbers<[2], [1], [1], [2], [0, 0, 0, 1, 1, 2], [0], [0]>} : vector<6x8x8xbf16>, vector<6x8x8xbf16>, vector<6x8x8xf32> -> vector<6x8x8xf32>
    "tpu.trace_stop"() : () -> ()
    %132 = vector.shape_cast %131 : vector<6x8x8xf32> to vector<48x8xf32>
    %133 = arith.truncf %132 : vector<48x8xf32> to vector<48x8xbf16>
    %c1_79 = arith.constant 1 : index
    %c0_80 = arith.constant 0 : index
    %c0_81 = arith.constant 0 : index
    %134 = vector.load %arg5[%c1_79, %c0_80, %c0_81] : memref<4x8x32xbf16, #tpu.memory_space<vmem>>, vector<1x8x32xbf16>
    %135 = vector.shape_cast %134 : vector<1x8x32xbf16> to vector<8x32xbf16>
    %cst_82 = arith.constant dense<0.000000e+00> : vector<48x32xf32>
    %136 = tpu.matmul %133, %135, %cst_82 {dimension_numbers = #tpu.dot_dimension_numbers<[1], [0], [0], [1], [0, 0, 1, 1], [], []>} : vector<48x8xbf16>, vector<8x32xbf16>, vector<48x32xf32> -> vector<48x32xf32>
    %137 = arith.addf %86, %136 : vector<48x32xf32>
    %c0_83 = arith.constant 0 : index
    %c2_84 = arith.constant 2 : index
    %c0_85 = arith.constant 0 : index
    %c0_86 = arith.constant 0 : index
    %138 = vector.load %arg3[%c0_83, %c2_84, %c0_85, %c0_86] : memref<3x4x32x8xbf16, #tpu.memory_space<vmem>>, vector<1x1x32x8xbf16>
    %139 = vector.shape_cast %138 : vector<1x1x32x8xbf16> to vector<32x8xbf16>
    %cst_87 = arith.constant dense<0.000000e+00> : vector<48x8xf32>
    %140 = tpu.matmul %28, %139, %cst_87 {dimension_numbers = #tpu.dot_dimension_numbers<[1], [0], [0], [1], [0, 0, 1, 1], [], []>} : vector<48x32xbf16>, vector<32x8xbf16>, vector<48x8xf32> -> vector<48x8xf32>
    %c0_88 = arith.constant 0 : index
    %c2_89 = arith.constant 2 : index
    %c0_90 = arith.constant 0 : index
    %c0_91 = arith.constant 0 : index
    %141 = vector.load %arg4[%c0_88, %c2_89, %c0_90, %c0_91] : memref<3x4x1x8xf32, #tpu.memory_space<vmem>>, vector<1x1x1x8xf32>
    %142 = vector.shape_cast %141 : vector<1x1x1x8xf32> to vector<1x8xf32>
    %143 = vector.broadcast %142 : vector<1x8xf32> to vector<48x8xf32>
    %144 = arith.addf %140, %143 : vector<48x8xf32>
    %c1_92 = arith.constant 1 : index
    %c2_93 = arith.constant 2 : index
    %c0_94 = arith.constant 0 : index
    %c0_95 = arith.constant 0 : index
    %145 = vector.load %arg3[%c1_92, %c2_93, %c0_94, %c0_95] : memref<3x4x32x8xbf16, #tpu.memory_space<vmem>>, vector<1x1x32x8xbf16>
    %146 = vector.shape_cast %145 : vector<1x1x32x8xbf16> to vector<32x8xbf16>
    %cst_96 = arith.constant dense<0.000000e+00> : vector<48x8xf32>
    %147 = tpu.matmul %28, %146, %cst_96 {dimension_numbers = #tpu.dot_dimension_numbers<[1], [0], [0], [1], [0, 0, 1, 1], [], []>} : vector<48x32xbf16>, vector<32x8xbf16>, vector<48x8xf32> -> vector<48x8xf32>
    %c1_97 = arith.constant 1 : index
    %c2_98 = arith.constant 2 : index
    %c0_99 = arith.constant 0 : index
    %c0_100 = arith.constant 0 : index
    %148 = vector.load %arg4[%c1_97, %c2_98, %c0_99, %c0_100] : memref<3x4x1x8xf32, #tpu.memory_space<vmem>>, vector<1x1x1x8xf32>
    %149 = vector.shape_cast %148 : vector<1x1x1x8xf32> to vector<1x8xf32>
    %150 = vector.broadcast %149 : vector<1x8xf32> to vector<48x8xf32>
    %151 = arith.addf %147, %150 : vector<48x8xf32>
    %c2_101 = arith.constant 2 : index
    %c2_102 = arith.constant 2 : index
    %c0_103 = arith.constant 0 : index
    %c0_104 = arith.constant 0 : index
    %152 = vector.load %arg3[%c2_101, %c2_102, %c0_103, %c0_104] : memref<3x4x32x8xbf16, #tpu.memory_space<vmem>>, vector<1x1x32x8xbf16>
    %153 = vector.shape_cast %152 : vector<1x1x32x8xbf16> to vector<32x8xbf16>
    %cst_105 = arith.constant dense<0.000000e+00> : vector<48x8xf32>
    %154 = tpu.matmul %28, %153, %cst_105 {dimension_numbers = #tpu.dot_dimension_numbers<[1], [0], [0], [1], [0, 0, 1, 1], [], []>} : vector<48x32xbf16>, vector<32x8xbf16>, vector<48x8xf32> -> vector<48x8xf32>
    %c2_106 = arith.constant 2 : index
    %c2_107 = arith.constant 2 : index
    %c0_108 = arith.constant 0 : index
    %c0_109 = arith.constant 0 : index
    %155 = vector.load %arg4[%c2_106, %c2_107, %c0_108, %c0_109] : memref<3x4x1x8xf32, #tpu.memory_space<vmem>>, vector<1x1x1x8xf32>
    %156 = vector.shape_cast %155 : vector<1x1x1x8xf32> to vector<1x8xf32>
    %157 = vector.broadcast %156 : vector<1x8xf32> to vector<48x8xf32>
    %158 = arith.addf %154, %157 : vector<48x8xf32>
    %159 = vector.shape_cast %144 : vector<48x8xf32> to vector<6x8x8xf32>
    %160 = vector.shape_cast %151 : vector<48x8xf32> to vector<6x8x8xf32>
    %161 = vector.shape_cast %158 : vector<48x8xf32> to vector<6x8x8xf32>
    %162 = arith.truncf %159 : vector<6x8x8xf32> to vector<6x8x8xbf16>
    %163 = arith.truncf %160 : vector<6x8x8xf32> to vector<6x8x8xbf16>
    "tpu.trace_start"() <{level = 10 : i32, message = "bqd,bkd->bqk"}> : () -> ()
    %cst_110 = arith.constant dense<0.000000e+00> : vector<6x8x8xf32>
    %164 = tpu.matmul %162, %163, %cst_110 {dimension_numbers = #tpu.dot_dimension_numbers<[2], [2], [1], [1], [0, 0, 0, 1, 1, 1], [0], [0]>} : vector<6x8x8xbf16>, vector<6x8x8xbf16>, vector<6x8x8xf32> -> vector<6x8x8xf32>
    "tpu.trace_stop"() : () -> ()
    %cst_111 = arith.constant 0.353553385 : f32
    %165 = vector.broadcast %cst_111 : f32 to vector<6x8x8xf32>
    %166 = arith.mulf %164, %165 : vector<6x8x8xf32>
    %167 = vector.shape_cast %34 : vector<8x8xf32> to vector<1x8x8xf32>
    %168 = vector.broadcast %167 : vector<1x8x8xf32> to vector<6x8x8xf32>
    %169 = arith.addf %166, %168 : vector<6x8x8xf32>
    %cst_112 = arith.constant dense<0xFF800000> : vector<6x8xf32>
    %170 = vector.multi_reduction <maximumf>, %169, %cst_112 [2] : vector<6x8x8xf32> to vector<6x8xf32>
    %171 = vector.shape_cast %170 : vector<6x8xf32> to vector<6x8x1xf32>
    %172 = vector.broadcast %171 : vector<6x8x1xf32> to vector<6x8x8xf32>
    %173 = arith.subf %169, %172 : vector<6x8x8xf32>
    %174 = math.exp %173 : vector<6x8x8xf32>
    %cst_113 = arith.constant dense<0.000000e+00> : vector<6x8xf32>
    %175 = vector.multi_reduction <add>, %174, %cst_113 [2] : vector<6x8x8xf32> to vector<6x8xf32>
    %176 = vector.shape_cast %175 : vector<6x8xf32> to vector<6x8x1xf32>
    %177 = tpu.reciprocal %176 {approx = true} : vector<6x8x1xf32> -> vector<6x8x1xf32>
    %178 = vector.broadcast %177 : vector<6x8x1xf32> to vector<6x8x8xf32>
    %179 = arith.mulf %174, %178 : vector<6x8x8xf32>
    %180 = arith.truncf %179 : vector<6x8x8xf32> to vector<6x8x8xbf16>
    %181 = arith.truncf %161 : vector<6x8x8xf32> to vector<6x8x8xbf16>
    "tpu.trace_start"() <{level = 10 : i32, message = "bqk,bkd->bqd"}> : () -> ()
    %cst_114 = arith.constant dense<0.000000e+00> : vector<6x8x8xf32>
    %182 = tpu.matmul %180, %181, %cst_114 {dimension_numbers = #tpu.dot_dimension_numbers<[2], [1], [1], [2], [0, 0, 0, 1, 1, 2], [0], [0]>} : vector<6x8x8xbf16>, vector<6x8x8xbf16>, vector<6x8x8xf32> -> vector<6x8x8xf32>
    "tpu.trace_stop"() : () -> ()
    %183 = vector.shape_cast %182 : vector<6x8x8xf32> to vector<48x8xf32>
    %184 = arith.truncf %183 : vector<48x8xf32> to vector<48x8xbf16>
    %c2_115 = arith.constant 2 : index
    %c0_116 = arith.constant 0 : index
    %c0_117 = arith.constant 0 : index
    %185 = vector.load %arg5[%c2_115, %c0_116, %c0_117] : memref<4x8x32xbf16, #tpu.memory_space<vmem>>, vector<1x8x32xbf16>
    %186 = vector.shape_cast %185 : vector<1x8x32xbf16> to vector<8x32xbf16>
    %cst_118 = arith.constant dense<0.000000e+00> : vector<48x32xf32>
    %187 = tpu.matmul %184, %186, %cst_118 {dimension_numbers = #tpu.dot_dimension_numbers<[1], [0], [0], [1], [0, 0, 1, 1], [], []>} : vector<48x8xbf16>, vector<8x32xbf16>, vector<48x32xf32> -> vector<48x32xf32>
    %188 = arith.addf %137, %187 : vector<48x32xf32>
    %c0_119 = arith.constant 0 : index
    %c3 = arith.constant 3 : index
    %c0_120 = arith.constant 0 : index
    %c0_121 = arith.constant 0 : index
    %189 = vector.load %arg3[%c0_119, %c3, %c0_120, %c0_121] : memref<3x4x32x8xbf16, #tpu.memory_space<vmem>>, vector<1x1x32x8xbf16>
    %190 = vector.shape_cast %189 : vector<1x1x32x8xbf16> to vector<32x8xbf16>
    %cst_122 = arith.constant dense<0.000000e+00> : vector<48x8xf32>
    %191 = tpu.matmul %28, %190, %cst_122 {dimension_numbers = #tpu.dot_dimension_numbers<[1], [0], [0], [1], [0, 0, 1, 1], [], []>} : vector<48x32xbf16>, vector<32x8xbf16>, vector<48x8xf32> -> vector<48x8xf32>
    %c0_123 = arith.constant 0 : index
    %c3_124 = arith.constant 3 : index
    %c0_125 = arith.constant 0 : index
    %c0_126 = arith.constant 0 : index
    %192 = vector.load %arg4[%c0_123, %c3_124, %c0_125, %c0_126] : memref<3x4x1x8xf32, #tpu.memory_space<vmem>>, vector<1x1x1x8xf32>
    %193 = vector.shape_cast %192 : vector<1x1x1x8xf32> to vector<1x8xf32>
    %194 = vector.broadcast %193 : vector<1x8xf32> to vector<48x8xf32>
    %195 = arith.addf %191, %194 : vector<48x8xf32>
    %c1_127 = arith.constant 1 : index
    %c3_128 = arith.constant 3 : index
    %c0_129 = arith.constant 0 : index
    %c0_130 = arith.constant 0 : index
    %196 = vector.load %arg3[%c1_127, %c3_128, %c0_129, %c0_130] : memref<3x4x32x8xbf16, #tpu.memory_space<vmem>>, vector<1x1x32x8xbf16>
    %197 = vector.shape_cast %196 : vector<1x1x32x8xbf16> to vector<32x8xbf16>
    %cst_131 = arith.constant dense<0.000000e+00> : vector<48x8xf32>
    %198 = tpu.matmul %28, %197, %cst_131 {dimension_numbers = #tpu.dot_dimension_numbers<[1], [0], [0], [1], [0, 0, 1, 1], [], []>} : vector<48x32xbf16>, vector<32x8xbf16>, vector<48x8xf32> -> vector<48x8xf32>
    %c1_132 = arith.constant 1 : index
    %c3_133 = arith.constant 3 : index
    %c0_134 = arith.constant 0 : index
    %c0_135 = arith.constant 0 : index
    %199 = vector.load %arg4[%c1_132, %c3_133, %c0_134, %c0_135] : memref<3x4x1x8xf32, #tpu.memory_space<vmem>>, vector<1x1x1x8xf32>
    %200 = vector.shape_cast %199 : vector<1x1x1x8xf32> to vector<1x8xf32>
    %201 = vector.broadcast %200 : vector<1x8xf32> to vector<48x8xf32>
    %202 = arith.addf %198, %201 : vector<48x8xf32>
    %c2_136 = arith.constant 2 : index
    %c3_137 = arith.constant 3 : index
    %c0_138 = arith.constant 0 : index
    %c0_139 = arith.constant 0 : index
    %203 = vector.load %arg3[%c2_136, %c3_137, %c0_138, %c0_139] : memref<3x4x32x8xbf16, #tpu.memory_space<vmem>>, vector<1x1x32x8xbf16>
    %204 = vector.shape_cast %203 : vector<1x1x32x8xbf16> to vector<32x8xbf16>
    %cst_140 = arith.constant dense<0.000000e+00> : vector<48x8xf32>
    %205 = tpu.matmul %28, %204, %cst_140 {dimension_numbers = #tpu.dot_dimension_numbers<[1], [0], [0], [1], [0, 0, 1, 1], [], []>} : vector<48x32xbf16>, vector<32x8xbf16>, vector<48x8xf32> -> vector<48x8xf32>
    %c2_141 = arith.constant 2 : index
    %c3_142 = arith.constant 3 : index
    %c0_143 = arith.constant 0 : index
    %c0_144 = arith.constant 0 : index
    %206 = vector.load %arg4[%c2_141, %c3_142, %c0_143, %c0_144] : memref<3x4x1x8xf32, #tpu.memory_space<vmem>>, vector<1x1x1x8xf32>
    %207 = vector.shape_cast %206 : vector<1x1x1x8xf32> to vector<1x8xf32>
    %208 = vector.broadcast %207 : vector<1x8xf32> to vector<48x8xf32>
    %209 = arith.addf %205, %208 : vector<48x8xf32>
    %210 = vector.shape_cast %195 : vector<48x8xf32> to vector<6x8x8xf32>
    %211 = vector.shape_cast %202 : vector<48x8xf32> to vector<6x8x8xf32>
    %212 = vector.shape_cast %209 : vector<48x8xf32> to vector<6x8x8xf32>
    %213 = arith.truncf %210 : vector<6x8x8xf32> to vector<6x8x8xbf16>
    %214 = arith.truncf %211 : vector<6x8x8xf32> to vector<6x8x8xbf16>
    "tpu.trace_start"() <{level = 10 : i32, message = "bqd,bkd->bqk"}> : () -> ()
    %cst_145 = arith.constant dense<0.000000e+00> : vector<6x8x8xf32>
    %215 = tpu.matmul %213, %214, %cst_145 {dimension_numbers = #tpu.dot_dimension_numbers<[2], [2], [1], [1], [0, 0, 0, 1, 1, 1], [0], [0]>} : vector<6x8x8xbf16>, vector<6x8x8xbf16>, vector<6x8x8xf32> -> vector<6x8x8xf32>
    "tpu.trace_stop"() : () -> ()
    %cst_146 = arith.constant 0.353553385 : f32
    %216 = vector.broadcast %cst_146 : f32 to vector<6x8x8xf32>
    %217 = arith.mulf %215, %216 : vector<6x8x8xf32>
    %218 = vector.shape_cast %34 : vector<8x8xf32> to vector<1x8x8xf32>
    %219 = vector.broadcast %218 : vector<1x8x8xf32> to vector<6x8x8xf32>
    %220 = arith.addf %217, %219 : vector<6x8x8xf32>
    %cst_147 = arith.constant dense<0xFF800000> : vector<6x8xf32>
    %221 = vector.multi_reduction <maximumf>, %220, %cst_147 [2] : vector<6x8x8xf32> to vector<6x8xf32>
    %222 = vector.shape_cast %221 : vector<6x8xf32> to vector<6x8x1xf32>
    %223 = vector.broadcast %222 : vector<6x8x1xf32> to vector<6x8x8xf32>
    %224 = arith.subf %220, %223 : vector<6x8x8xf32>
    %225 = math.exp %224 : vector<6x8x8xf32>
    %cst_148 = arith.constant dense<0.000000e+00> : vector<6x8xf32>
    %226 = vector.multi_reduction <add>, %225, %cst_148 [2] : vector<6x8x8xf32> to vector<6x8xf32>
    %227 = vector.shape_cast %226 : vector<6x8xf32> to vector<6x8x1xf32>
    %228 = tpu.reciprocal %227 {approx = true} : vector<6x8x1xf32> -> vector<6x8x1xf32>
    %229 = vector.broadcast %228 : vector<6x8x1xf32> to vector<6x8x8xf32>
    %230 = arith.mulf %225, %229 : vector<6x8x8xf32>
    %231 = arith.truncf %230 : vector<6x8x8xf32> to vector<6x8x8xbf16>
    %232 = arith.truncf %212 : vector<6x8x8xf32> to vector<6x8x8xbf16>
    "tpu.trace_start"() <{level = 10 : i32, message = "bqk,bkd->bqd"}> : () -> ()
    %cst_149 = arith.constant dense<0.000000e+00> : vector<6x8x8xf32>
    %233 = tpu.matmul %231, %232, %cst_149 {dimension_numbers = #tpu.dot_dimension_numbers<[2], [1], [1], [2], [0, 0, 0, 1, 1, 2], [0], [0]>} : vector<6x8x8xbf16>, vector<6x8x8xbf16>, vector<6x8x8xf32> -> vector<6x8x8xf32>
    "tpu.trace_stop"() : () -> ()
    %234 = vector.shape_cast %233 : vector<6x8x8xf32> to vector<48x8xf32>
    %235 = arith.truncf %234 : vector<48x8xf32> to vector<48x8xbf16>
    %c3_150 = arith.constant 3 : index
    %c0_151 = arith.constant 0 : index
    %c0_152 = arith.constant 0 : index
    %236 = vector.load %arg5[%c3_150, %c0_151, %c0_152] : memref<4x8x32xbf16, #tpu.memory_space<vmem>>, vector<1x8x32xbf16>
    %237 = vector.shape_cast %236 : vector<1x8x32xbf16> to vector<8x32xbf16>
    %cst_153 = arith.constant dense<0.000000e+00> : vector<48x32xf32>
    %238 = tpu.matmul %235, %237, %cst_153 {dimension_numbers = #tpu.dot_dimension_numbers<[1], [0], [0], [1], [0, 0, 1, 1], [], []>} : vector<48x8xbf16>, vector<8x32xbf16>, vector<48x32xf32> -> vector<48x32xf32>
    %239 = arith.addf %188, %238 : vector<48x32xf32>
    %c0_154 = arith.constant 0 : index
    %c0_155 = arith.constant 0 : index
    %240 = vector.load %arg6[%c0_154, %c0_155] : memref<1x32xf32, #tpu.memory_space<vmem>>, vector<1x32xf32>
    %241 = vector.broadcast %240 : vector<1x32xf32> to vector<48x32xf32>
    %242 = arith.addf %239, %241 : vector<48x32xf32>
    %243 = vector.shape_cast %242 : vector<48x32xf32> to vector<6x8x32xf32>
    %244 = arith.addf %0, %243 : vector<6x8x32xf32>
    %c0_156 = arith.constant 0 : index
    %c0_157 = arith.constant 0 : index
    %245 = vector.load %arg7[%c0_156, %c0_157] : memref<1x32xf32, #tpu.memory_space<vmem>>, vector<1x32xf32>
    %c0_158 = arith.constant 0 : index
    %c0_159 = arith.constant 0 : index
    %246 = vector.load %arg8[%c0_158, %c0_159] : memref<1x32xf32, #tpu.memory_space<vmem>>, vector<1x32xf32>
    %cst_160 = arith.constant dense<0.000000e+00> : vector<6x8xf32>
    %247 = vector.multi_reduction <add>, %244, %cst_160 [2] : vector<6x8x32xf32> to vector<6x8xf32>
    %248 = vector.shape_cast %247 : vector<6x8xf32> to vector<6x8x1xf32>
    %cst_161 = arith.constant 3.200000e+01 : f32
    %249 = vector.broadcast %cst_161 : f32 to vector<6x8x1xf32>
    %250 = arith.divf %248, %249 : vector<6x8x1xf32>
    %251 = vector.broadcast %250 : vector<6x8x1xf32> to vector<6x8x32xf32>
    %252 = arith.subf %244, %251 : vector<6x8x32xf32>
    %253 = arith.mulf %252, %252 : vector<6x8x32xf32>
    %cst_162 = arith.constant dense<0.000000e+00> : vector<6x8xf32>
    %254 = vector.multi_reduction <add>, %253, %cst_162 [2] : vector<6x8x32xf32> to vector<6x8xf32>
    %255 = vector.shape_cast %254 : vector<6x8xf32> to vector<6x8x1xf32>
    %cst_163 = arith.constant 3.200000e+01 : f32
    %256 = vector.broadcast %cst_163 : f32 to vector<6x8x1xf32>
    %257 = arith.divf %255, %256 : vector<6x8x1xf32>
    %258 = vector.broadcast %250 : vector<6x8x1xf32> to vector<6x8x32xf32>
    %259 = arith.subf %244, %258 : vector<6x8x32xf32>
    %cst_164 = arith.constant 9.99999974E-6 : f32
    %260 = vector.broadcast %cst_164 : f32 to vector<6x8x1xf32>
    %261 = arith.addf %257, %260 : vector<6x8x1xf32>
    %262 = math.rsqrt %261 : vector<6x8x1xf32>
    %263 = vector.broadcast %262 : vector<6x8x1xf32> to vector<6x8x32xf32>
    %264 = arith.mulf %259, %263 : vector<6x8x32xf32>
    %265 = vector.shape_cast %245 : vector<1x32xf32> to vector<1x1x32xf32>
    %266 = vector.broadcast %265 : vector<1x1x32xf32> to vector<6x8x32xf32>
    %267 = arith.mulf %264, %266 : vector<6x8x32xf32>
    %268 = vector.shape_cast %246 : vector<1x32xf32> to vector<1x1x32xf32>
    %269 = vector.broadcast %268 : vector<1x1x32xf32> to vector<6x8x32xf32>
    %270 = arith.addf %267, %269 : vector<6x8x32xf32>
    %271 = vector.shape_cast %270 : vector<6x8x32xf32> to vector<48x32xf32>
    %272 = arith.truncf %271 : vector<48x32xf32> to vector<48x32xbf16>
    %c0_165 = arith.constant 0 : index
    %c0_166 = arith.constant 0 : index
    %273 = vector.load %arg9[%c0_165, %c0_166] : memref<32x128xbf16, #tpu.memory_space<vmem>>, vector<32x128xbf16>
    %cst_167 = arith.constant dense<0.000000e+00> : vector<48x128xf32>
    %274 = tpu.matmul %272, %273, %cst_167 {dimension_numbers = #tpu.dot_dimension_numbers<[1], [0], [0], [1], [0, 0, 1, 1], [], []>} : vector<48x32xbf16>, vector<32x128xbf16>, vector<48x128xf32> -> vector<48x128xf32>
    %c0_168 = arith.constant 0 : index
    %c0_169 = arith.constant 0 : index
    %275 = vector.load %arg10[%c0_168, %c0_169] : memref<1x128xf32, #tpu.memory_space<vmem>>, vector<1x128xf32>
    %276 = vector.broadcast %275 : vector<1x128xf32> to vector<48x128xf32>
    %277 = arith.addf %274, %276 : vector<48x128xf32>
    %cst_170 = arith.constant -1.702000e+00 : f32
    %278 = vector.broadcast %cst_170 : f32 to vector<48x128xf32>
    %279 = arith.mulf %278, %277 : vector<48x128xf32>
    %280 = math.exp %279 : vector<48x128xf32>
    %cst_171 = arith.constant 1.000000e+00 : f32
    %281 = vector.broadcast %cst_171 : f32 to vector<48x128xf32>
    %282 = arith.addf %281, %280 : vector<48x128xf32>
    %283 = tpu.reciprocal %282 {approx = true} : vector<48x128xf32> -> vector<48x128xf32>
    %284 = arith.mulf %277, %283 : vector<48x128xf32>
    %285 = arith.truncf %284 : vector<48x128xf32> to vector<48x128xbf16>
    %c0_172 = arith.constant 0 : index
    %c0_173 = arith.constant 0 : index
    %286 = vector.load %arg11[%c0_172, %c0_173] : memref<128x32xbf16, #tpu.memory_space<vmem>>, vector<128x32xbf16>
    %cst_174 = arith.constant dense<0.000000e+00> : vector<48x32xf32>
    %287 = tpu.matmul %285, %286, %cst_174 {dimension_numbers = #tpu.dot_dimension_numbers<[1], [0], [0], [1], [0, 0, 1, 1], [], []>} : vector<48x128xbf16>, vector<128x32xbf16>, vector<48x32xf32> -> vector<48x32xf32>
    %c0_175 = arith.constant 0 : index
    %c0_176 = arith.constant 0 : index
    %288 = vector.load %arg12[%c0_175, %c0_176] : memref<1x32xf32, #tpu.memory_space<vmem>>, vector<1x32xf32>
    %289 = vector.broadcast %288 : vector<1x32xf32> to vector<48x32xf32>
    %290 = arith.addf %287, %289 : vector<48x32xf32>
    %291 = vector.shape_cast %290 : vector<48x32xf32> to vector<6x8x32xf32>
    %292 = arith.addf %244, %291 : vector<6x8x32xf32>
    %c0_177 = arith.constant 0 : index
    %c0_178 = arith.constant 0 : index
    %c0_179 = arith.constant 0 : index
    %293 = vector.load %arg13[%c0_177, %c0_178, %c0_179] : memref<6x8x32xf32, #tpu.memory_space<vmem>>, vector<6x8x32xf32>
    tpu.vector_store %arg13[%c0_177, %c0_178, %c0_179], %292 {strides = array<i32>} : memref<6x8x32xf32, #tpu.memory_space<vmem>>, vector<6x8x32xf32>,
    return
  }
}

module attributes {stable_mosaic.version = 11 : i64} {
  func.func @_text_logits_kernel(%arg0: memref<6x32xf32, #tpu.memory_space<vmem>>, %arg1: memref<1x32xf32, #tpu.memory_space<vmem>>, %arg2: memref<1x32xf32, #tpu.memory_space<vmem>>, %arg3: memref<32x32xbf16, #tpu.memory_space<vmem>>, %arg4: memref<2x32xf32, #tpu.memory_space<vmem>>, %arg5: memref<1x1xf32, #tpu.memory_space<smem>>, %arg6: memref<2x3xf32, #tpu.memory_space<vmem>>) attributes {dimension_semantics = [], scalar_prefetch = 0 : i64, scratch_operands = 0 : i64, tpu.core_type = #tpu.core_type<tc>} {
    %c0 = arith.constant 0 : index
    %c0_0 = arith.constant 0 : index
    %0 = vector.load %arg0[%c0, %c0_0] : memref<6x32xf32, #tpu.memory_space<vmem>>, vector<6x32xf32>
    %c0_1 = arith.constant 0 : index
    %c0_2 = arith.constant 0 : index
    %1 = vector.load %arg1[%c0_1, %c0_2] : memref<1x32xf32, #tpu.memory_space<vmem>>, vector<1x32xf32>
    %c0_3 = arith.constant 0 : index
    %c0_4 = arith.constant 0 : index
    %2 = vector.load %arg2[%c0_3, %c0_4] : memref<1x32xf32, #tpu.memory_space<vmem>>, vector<1x32xf32>
    %cst = arith.constant dense<0.000000e+00> : vector<6xf32>
    %3 = vector.multi_reduction <add>, %0, %cst [1] : vector<6x32xf32> to vector<6xf32>
    %4 = vector.shape_cast %3 : vector<6xf32> to vector<6x1xf32>
    %cst_5 = arith.constant 3.200000e+01 : f32
    %5 = vector.broadcast %cst_5 : f32 to vector<6x1xf32>
    %6 = arith.divf %4, %5 : vector<6x1xf32>
    %7 = vector.broadcast %6 : vector<6x1xf32> to vector<6x32xf32>
    %8 = arith.subf %0, %7 : vector<6x32xf32>
    %9 = arith.mulf %8, %8 : vector<6x32xf32>
    %cst_6 = arith.constant dense<0.000000e+00> : vector<6xf32>
    %10 = vector.multi_reduction <add>, %9, %cst_6 [1] : vector<6x32xf32> to vector<6xf32>
    %11 = vector.shape_cast %10 : vector<6xf32> to vector<6x1xf32>
    %cst_7 = arith.constant 3.200000e+01 : f32
    %12 = vector.broadcast %cst_7 : f32 to vector<6x1xf32>
    %13 = arith.divf %11, %12 : vector<6x1xf32>
    %14 = vector.broadcast %6 : vector<6x1xf32> to vector<6x32xf32>
    %15 = arith.subf %0, %14 : vector<6x32xf32>
    %cst_8 = arith.constant 9.99999974E-6 : f32
    %16 = vector.broadcast %cst_8 : f32 to vector<6x1xf32>
    %17 = arith.addf %13, %16 : vector<6x1xf32>
    %18 = math.rsqrt %17 : vector<6x1xf32>
    %19 = vector.broadcast %18 : vector<6x1xf32> to vector<6x32xf32>
    %20 = arith.mulf %15, %19 : vector<6x32xf32>
    %21 = vector.broadcast %1 : vector<1x32xf32> to vector<6x32xf32>
    %22 = arith.mulf %20, %21 : vector<6x32xf32>
    %23 = vector.broadcast %2 : vector<1x32xf32> to vector<6x32xf32>
    %24 = arith.addf %22, %23 : vector<6x32xf32>
    %25 = arith.truncf %24 : vector<6x32xf32> to vector<6x32xbf16>
    %c0_9 = arith.constant 0 : index
    %c0_10 = arith.constant 0 : index
    %26 = vector.load %arg3[%c0_9, %c0_10] : memref<32x32xbf16, #tpu.memory_space<vmem>>, vector<32x32xbf16>
    %cst_11 = arith.constant dense<0.000000e+00> : vector<6x32xf32>
    %27 = tpu.matmul %25, %26, %cst_11 {dimension_numbers = #tpu.dot_dimension_numbers<[1], [0], [0], [1], [0, 0, 1, 1], [], []>} : vector<6x32xbf16>, vector<32x32xbf16>, vector<6x32xf32> -> vector<6x32xf32>
    %28 = arith.mulf %27, %27 : vector<6x32xf32>
    %cst_12 = arith.constant dense<0.000000e+00> : vector<6xf32>
    %29 = vector.multi_reduction <add>, %28, %cst_12 [1] : vector<6x32xf32> to vector<6xf32>
    %30 = vector.shape_cast %29 : vector<6xf32> to vector<6x1xf32>
    %cst_13 = arith.constant 9.99999996E-13 : f32
    %31 = vector.broadcast %cst_13 : f32 to vector<6x1xf32>
    %32 = arith.addf %30, %31 : vector<6x1xf32>
    %33 = math.rsqrt %32 : vector<6x1xf32>
    %34 = vector.broadcast %33 : vector<6x1xf32> to vector<6x32xf32>
    %35 = arith.mulf %27, %34 : vector<6x32xf32>
    %36 = vector.shape_cast %35 : vector<6x32xf32> to vector<2x3x32xf32>
    %c0_14 = arith.constant 0 : index
    %c0_15 = arith.constant 0 : index
    %37 = vector.load %arg4[%c0_14, %c0_15] : memref<2x32xf32, #tpu.memory_space<vmem>>, vector<2x32xf32>
    %38 = vector.shape_cast %37 : vector<2x32xf32> to vector<2x1x32xf32>
    %39 = vector.broadcast %38 : vector<2x1x32xf32> to vector<2x3x32xf32>
    %40 = arith.mulf %39, %36 : vector<2x3x32xf32>
    %cst_16 = arith.constant dense<0.000000e+00> : vector<2x3xf32>
    %41 = vector.multi_reduction <add>, %40, %cst_16 [2] : vector<2x3x32xf32> to vector<2x3xf32>
    %c0_17 = arith.constant 0 : index
    %c0_18 = arith.constant 0 : index
    %42 = memref.load %arg5[%c0_17, %c0_18] : memref<1x1xf32, #tpu.memory_space<smem>>
    %43 = vector.broadcast %42 : f32 to vector<2x3xf32>
    %44 = arith.mulf %43, %41 : vector<2x3xf32>
    %c0_19 = arith.constant 0 : index
    %c0_20 = arith.constant 0 : index
    %45 = vector.load %arg6[%c0_19, %c0_20] : memref<2x3xf32, #tpu.memory_space<vmem>>, vector<2x3xf32>
    tpu.vector_store %arg6[%c0_19, %c0_20], %44 {strides = array<i32>} : memref<2x3xf32, #tpu.memory_space<vmem>>, vector<2x3xf32>,
    return
  }
}

</mosaic_0001>

<bundles_post_ra>
// kernel: custom_clip_forward.8
= control target key start
LH: loop header
LB: loop body
LE: loop exit
PB: predicated region body
PF: predicated region fallthrough
CT: control target
= control target key end

     0   :  { %vm21_vm0 = vcmask 254976   ;;  %v147_v7 = vmov 0.0   ;;  %vm148_vm1 = vmmov 0   ;;  %vm67_vm2 = vcmask 261120   ;;  %s196_s0 = inlined_call_operand.vmem [shape: f32[2,32], index: 0, kind: input, shape index: {}]   ;;  %s197_s3 = inlined_call_operand.vmem [shape: bf16[32,32], index: 3, kind: input, shape index: {}]   ;;  %s198_s1 = inlined_call_operand.vmem [shape: f32[1,32], index: 1, kind: input, shape index: {}]   ;;  %s199_s2 = inlined_call_operand.vmem [shape: f32[1,32], index: 2, kind: input, shape index: {}]   ;;  %s200_s4 = inlined_call_operand.vmem [shape: f32[2,32], index: 4, kind: output, shape index: {}]  }
   0x1   :  { %v18_v0 = vld [vmem:[%s196_s0] sm:$0x3]  ;;  %131 = vmatprep.subr.bf16.mxu0 %v147_v7  ;;  %v141_v8 = vld [vmem:[%s197_s3 + $0x8] sm:$0xff]   ;;  %135 = vmatprep.mubr.msk.bf16.mxu0 %vm148_vm1, %v147_v7 }
   0x2   :  { %v22_v1 = vsel %vm21_vm0, %v18_v0, 0.0  ;;  %132 = vmatpush3.bf16.msra.mxu0 %v141_v8  ;;  %v142_v9 = vld [vmem:[%s197_s3] sm:$0xff]  }
   0x3   :  { %23 = vadd.xlane.f32.xlu0 %v22_v1  ;;  %133 = vmatprep.subr.bf16.mxu0 %v147_v7  ;;  %v123_v14 = vld [vmem:[%s198_s1] ss:$0 sm:$0xff] }
   0x4   :  { %v124_v16 = vld [vmem:[%s199_s2] ss:$0 sm:$0xff] }
   0x6   :  { %134 = vmatpush3.bf16.msra.mxu0 %v142_v9 }
  0x8c   :  { %v24_v2 = vpop.xlane.xlu0 %23 }
  0x8d   :  { %v26_v3 = vmul.f32 0.03125, %v24_v2 }
  0x8f   :  { %v27_v4 = vsub.f32 %v18_v0, %v26_v3 }
  0x91   :  { %v28_v5 = vmul.f32 %v27_v4, %v27_v4 }
  0x93   :  { %v29_v6 = vsel %vm21_vm0, %v28_v5, 0.0 }
  0x94   :  { %30 = vadd.xlane.f32.xlu0 %v29_v6 }
 0x11d   :  { %v31_v10 = vpop.xlane.xlu0 %30 }
 0x11e   :  { %v32_v11 = vmul.f32 0.03125, %v31_v10 }
 0x120   :  { %v33_v12 = vadd.f32 1e-05, %v32_v11 }
 0x122   :  { %143 = vrsqrt.f32 %v33_v12 }
 0x12f   :  { %v144_v13 = vpop.eup %143 }
 0x130   :  { %v35_v15 = vmul.f32 %v144_v13, %v27_v4 }
 0x132   :  { %v42_v17 = vmul.f32 %v123_v14, %v35_v15 }
 0x134   :  { %v49_v18 = vadd.f32 %v124_v16, %v42_v17 }
 0x136   :  { %v50_v19 = vpack.c.bf16 %v49_v18, %v49_v18 }
 0x138   :  { %136 = vmatmul.mubr.msk.bf16.vlgmr.msra.gmra.mxu0 %vm67_vm2, %v50_v19 }
 0x1f8   :  { %v105_v20 = vpop.f32.mrf.mxu0 }
 0x1f9   :  { %v111_v21 = vmul.f32 %v105_v20, %v105_v20 }
 0x1fa   :  { %v137_v22 = vpop.f32.mrf.mxu0 }
 0x1fb   :  { %v112_v23 = vsel %vm21_vm0, %v111_v21, 0.0 }
 0x1fc   :  { %113 = vadd.xlane.f32.xlu1 %v112_v23  ;;  %v108_v24 = vpop.f32.mrf.mxu0 }
 0x1fe   :  { %v138_v25 = vpop.f32.mrf.mxu0 }
 0x285   :  { %v114_v26 = vpop.xlane.xlu1 %113 }
 0x286   :  { %v115_v27 = vadd.f32 1e-12, %v114_v26 }
 0x288   :  { %145 = vrsqrt.f32 %v115_v27 }
 0x295   :  { %v146_v28 = vpop.eup %145 }
 0x296   :  { %v117_v29 = vmul.f32 %v146_v28, %v105_v20 }
 0x298   :  { %118 = vst.msk [vmem:[%s200_s4] sm:$0x3] %vm21_vm0, %v117_v29 }

// kernel: custom_clip_forward.9
= control target key start
LH: loop header
LB: loop body
LE: loop exit
PB: predicated region body
PF: predicated region fallthrough
CT: control target
= control target key end

     0   :  { %v224_v0 = vmov 0.0   ;;  %vm225_vm0 = vmmov 0   ;;  %vm49_vm1 = vcmask 261120   ;;  %vm107_vm2 = vcmask 1040384   ;;  %s289_s1 = inlined_call_operand.vmem [shape: bf16[32,2], index: 1, kind: input, shape index: {}]   ;;  %s290_s0 = inlined_call_operand.vmem [shape: f32[2,32], index: 0, kind: input, shape index: {}]   ;;  %s291_s3 = inlined_call_operand.vmem [shape: bf16[2,32], index: 3, kind: input, shape index: {}]   ;;  %s292_s2 = inlined_call_operand.vmem [shape: f32[1,2], index: 2, kind: input, shape index: {}]   ;;  %s293_s4 = inlined_call_operand.vmem [shape: f32[1,32], index: 4, kind: input, shape index: {}]   ;;  %s294_s5 = inlined_call_operand.vmem [shape: f32[4,32], index: 5, kind: input, shape index: {}]   ;;  %s295_s6 = inlined_call_operand.vmem [shape: f32[2,4,32], index: 6, kind: output, shape index: {}]  }
   0x1   :  { %205 = vmatprep.subr.bf16.mxu0 %v224_v0  ;;  %v222_v1 = vld [vmem:[%s289_s1 + $0x8] sm:$0xff]   ;;  %209 = vmatprep.mubr.msk.bf16.mxu0 %vm225_vm0, %v224_v0  ;;  %v223_v2 = vld [vmem:[%s289_s1] sm:$0xff]   ;;  %vm103_vm3 = vcmask 15360   ;;  %v226_v15 = vmov 1966171168   ;;  %v156_v17 = vlaneseq  ;;  %vm187_vm4 = vcmask 257024  }
   0x2   :  { %213 = vmatprep.subr.bf16.mxu1 %v224_v0  ;;  %215 = vmatprep.mubr.msk.bf16.mxu1 %vm225_vm0, %v224_v0  ;;  %v24_v3 = vld [vmem:[%s290_s0] sm:$0x3]  ;;  %v154_v16 = vunpack.c.l.s4 %v226_v15 }
   0x3   :  { %206 = vmatpush3.bf16.msra.mxu0 %v222_v1  ;;  %v25_v4 = vpack.c.bf16 %v24_v3, %v24_v3  ;;  %v95_v5 = vld [vmem:[%s291_s3] sm:$0x1]  ;;  %v157_v19 = vshrl.u32 %v156_v17, 7 }
   0x4   :  { %207 = vmatprep.subr.bf16.mxu0 %v224_v0  ;;  %v109_v6 = vsel %vm107_vm2, %v95_v5, 0  ;;  %v194_v7 = vld [vmem:[%s292_s2] ss:$0 sm:$0xff]  ;;  %v155_v18 = vunpack.c.0.s8 %v154_v16 }
   0x5   :  { %214 = vmatpush3.bf16.msra.mxu1 %v109_v6  ;;  %v198_v20 = vld [vmem:[%s293_s4] ss:$0 sm:$0xff]  ;;  %v177_v26 = vsub.s32 0, %v157_v19 }
   0x6   :  { %v158_v21 = vsub.s32 %v155_v18, %v157_v19  ;;  %v151_v30 = vld [vmem:[%s294_s5] sm:$0xf] }
   0x7   :  { %208 = vmatpush3.bf16.msra.mxu0 %v223_v2 }
   0xa   :  { %210 = vmatmul.mubr.msk.bf16.vlgmr.msra.gmra.mxu0 %vm49_vm1, %v25_v4 }
  0xca   :  { %v87_v8 = vpop.f32.mrf.mxu0 }
  0xcb   :  { %v88_v9 = vadd.f32 %v194_v7, %v87_v8 }
  0xcc   :  { %v211_v10 = vpop.f32.mrf.mxu0 }
  0xcd   :  { %v93_v11 = vmax.f32 %v88_v9, 0.0 }
  0xce   :  { %v90_v12 = vpop.f32.mrf.mxu0 }
  0xcf   :  { %v94_v13 = vpack.c.bf16 %v93_v11, %v93_v11 }
  0xd0   :  { %v212_v14 = vpop.f32.mrf.mxu0 }
  0xd1   :  { %216 = vmatmul.mubr.msk.bf16.vlgmr.msra.gmra.mxu1 %vm103_vm3, %v94_v13 }
 0x191   :  { %v145_v22 = vpop.f32.mrf.mxu1 }
 0x192   :  { %v146_v23 = vadd.f32 %v198_v20, %v145_v22 }
 0x193   :  { %v217_v24 = vpop.f32.mrf.mxu1 }
 0x194   :  { %v159_v25 = vrot.slane %v146_v23, %v158_v21 }
 0x195   :  { %v148_v27 = vpop.f32.mrf.mxu1 }
 0x196   :  { %v160_v28 = vcombine.high %v159_v25, %v159_v25  ;;  %v167_v29 = vrot.slane %v159_v25, %v158_v21 }
 0x197   :  { %v218_v31 = vpop.f32.mrf.mxu1 }
 0x198   :  { %v174_v32 = vrot.slane %v160_v28, %v158_v21  ;;  %v178_v33 = vrot.slane %v167_v29, %v177_v26 }
 0x19a   :  { %v182_v34 = vrot.slane %v174_v32, %v177_v26  ;;  %v185_v35 = vadd.f32 %v178_v33, %v151_v30 }
 0x19c   :  { %v186_v36 = vadd.f32 %v182_v34, %v151_v30  ;;  %188 = vst.msk [vmem:[%s295_s6] sm:$0xf] %vm187_vm4, %v185_v35 }
 0x19e   :  { %189 = vst.msk [vmem:[%s295_s6 + $0x4] sm:$0xf] %vm187_vm4, %v186_v36 }

// kernel: custom_clip_forward.6
= control target key start
LH: loop header
LB: loop body
LE: loop exit
PB: predicated region body
PF: predicated region fallthrough
CT: control target
= control target key end

     0   :  { %v288_v0 = vmov 0   ;;  %vm185_vm0 = vcmask 253952   ;;  %vm132_vm1 = vcmask 523264   ;;  %vm204_vm2 = vcmask 257024   ;;  %s403_s1 = inlined_call_operand.vmem [shape: bf16[192,32], index: 1, kind: input, shape index: {}]   ;;  %s404_s0 = inlined_call_operand.vmem [shape: f32[2,4,192], index: 0, kind: input, shape index: {}]   ;;  %s405_s2 = inlined_call_operand.vmem [shape: f32[1,32], index: 2, kind: input, shape index: {}]   ;;  %s406_s3 = inlined_call_operand.vmem [shape: f32[5,32], index: 3, kind: input, shape index: {}]   ;;  %s407_s4 = inlined_call_operand.vmem [shape: f32[1,32], index: 4, kind: input, shape index: {}]   ;;  %s408_s5 = inlined_call_operand.vmem [shape: f32[1,32], index: 5, kind: input, shape index: {}]   ;;  %s409_s6 = inlined_call_operand.vmem [shape: f32[2,5,32], index: 6, kind: output, shape index: {}]  }
   0x1   :  { %136 = vmatprep.subr.bf16.mxu0 %v288_v0  ;;  %v267_v1 = vld [vmem:[%s403_s1 + $0x38] sm:$0xff]   ;;  %v268_v2 = vld [vmem:[%s403_s1 + $0x30] sm:$0xff]   ;;  %v269_v3 = vld [vmem:[%s403_s1 + $0x28] sm:$0xff]   ;;  %v232_v60 = vlaneseq }
   0x2   :  { %137 = vmatpush1.bf16.msra.mxu0 %v267_v1  ;;  %v270_v4 = vld [vmem:[%s403_s1 + $0x20] sm:$0xff]   ;;  %v271_v8 = vld [vmem:[%s403_s1 + $0x18] sm:$0xff]   ;;  %v272_v12 = vld [vmem:[%s403_s1 + $0x10] sm:$0xff]  }
   0x3   :  { %138 = vmatprep.subr.bf16.mxu0 %v288_v0  ;;  %v281_v5 = vld [vmem:[%s404_s0 + $0x4] ss:$8 sps:$4 sm:$0xff]   ;;  %v182_v6 = vld [vmem:[%s405_s2] sm:$0x1]  ;;  %v275_v15 = vld [vmem:[%s403_s1 + $0x58] sm:$0xff]   ;;  %v233_v62 = vshrl.u32 %v232_v60, 7 }
   0x4   :  { %v183_v7 = vld [vmem:[%s406_s3] sm:$0x1]  ;;  %v35_v10 = vpack.c.bf16 %v281_v5, %v281_v5  ;;  %v273_v13 = vld [vmem:[%s403_s1 + $0x8] sm:$0xff]   ;;  %v276_v16 = vld [vmem:[%s403_s1 + $0x50] sm:$0xff]  }
   0x5   :  { %v184_v9 = vadd.f32 %v183_v7, %v182_v6  ;;  %v274_v14 = vld [vmem:[%s403_s1] sm:$0xff]   ;;  %v277_v17 = vld [vmem:[%s403_s1 + $0x48] sm:$0xff]   ;;  %v234_v63 = vsub.s32 0, %v233_v62 }
   0x6   :  { %139 = vmatpush1.bf16.msra.mxu0 %v268_v2  ;;  %265 = vmatprep.mubr.msk.bf16.mxu0 %vm132_vm1, %v35_v10  ;;  %v279_v18 = vld [vmem:[%s404_s0] ss:$8 sps:$4 sm:$0xff]  }
   0x7   :  { %140 = vmatprep.subr.bf16.mxu0 %v288_v0  ;;  %v186_v11 = vsel %vm185_vm0, %v184_v9, 0.0  ;;  %v278_v19 = vld [vmem:[%s403_s1 + $0x40] sm:$0xff]   ;;  %v34_v20 = vpack.c.bf16 %v279_v18, %v279_v18 }
   0x8   :  { %187 = vadd.xlane.f32.xlu0 %v186_v11  ;;  %v179_v23 = vld [vmem:[%s406_s3 + $0x1] sm:$0xf]  ;;  %v24_v50 = vld [vmem:[%s407_s4] sm:$0x1] }
   0x9   :  { %v25_v52 = vld [vmem:[%s408_s5] sm:$0x1] }
   0xa   :  { %141 = vmatpush1.bf16.msra.mxu0 %v269_v3  ;;  %v243_v2 = vrot.slane %v25_v52, %v234_v63 }
   0xb   :  { %142 = vmatprep.subr.bf16.mxu0 %v288_v0 }
   0xe   :  { %143 = vmatpush1.bf16.msra.mxu0 %v270_v4 }
   0xf   :  { %144 = vmatprep.subr.bf16.mxu0 %v288_v0 }
  0x12   :  { %145 = vmatpush1.bf16.msra.mxu0 %v271_v8 }
  0x13   :  { %146 = vmatprep.subr.bf16.mxu0 %v288_v0 }
  0x16   :  { %147 = vmatpush1.bf16.msra.mxu0 %v272_v12 }
  0x17   :  { %148 = vmatprep.subr.bf16.mxu0 %v288_v0 }
  0x1a   :  { %149 = vmatpush1.bf16.msra.mxu0 %v273_v13 }
  0x1b   :  { %150 = vmatprep.subr.bf16.mxu0 %v288_v0 }
  0x1e   :  { %151 = vmatpush1.bf16.msra.mxu0 %v274_v14 }
  0x1f   :  { %160 = vmatprep.subr.bf16.mxu0 %v288_v0 }
  0x22   :  { %161 = vmatpush2.bf16.msra.mxu0 %v275_v15 }
  0x23   :  { %162 = vmatprep.subr.bf16.mxu0 %v288_v0 }
  0x26   :  { %163 = vmatpush2.bf16.msra.mxu0 %v276_v16 }
  0x27   :  { %164 = vmatprep.subr.bf16.mxu0 %v288_v0 }
  0x2a   :  { %165 = vmatpush2.bf16.msra.mxu0 %v277_v17 }
  0x2b   :  { %166 = vmatprep.subr.bf16.mxu0 %v288_v0  ;;  %v235_v0 = vrot.slane %v24_v50, %v234_v63 }
  0x2e   :  { %167 = vmatpush2.bf16.msra.mxu0 %v278_v19 }
  0x31   :  { %169 = vmatmul.mubr.bf16.vlgmr.msra.gmra.mxu0 %v34_v20 }
  0x91   :  { %v188_v21 = vpop.xlane.xlu0 %187 }
  0x92   :  { %v190_v22 = vmul.f32 0.03125, %v188_v21 }
  0x94   :  { %v191_v24 = vsub.f32 %v184_v9, %v190_v22 }
  0x96   :  { %v192_v31 = vmul.f32 %v191_v24, %v191_v24 }
  0x98   :  { %v193_v35 = vsel %vm185_vm0, %v192_v31, 0.0 }
  0xf1   :  { %v170_v25 = vpop.f32.mrf.mxu0 }
  0xf2   :  { %v177_v26 = vcombine.high %v170_v25, %v170_v25  ;;  %v180_v27 = vadd.f32 %v179_v23, %v170_v25 }
  0xf3   :  { %v172_v28 = vpop.f32.mrf.mxu0 }
  0xf4   :  { %v205_v29 = vsel %vm204_vm2, %v180_v27, 0.0  ;;  %v181_v30 = vadd.f32 %v179_v23, %v177_v26 }
  0xf5   :  { %206 = vadd.xlane.f32.xlu0 %v205_v29  ;;  %v173_v32 = vpop.f32.mrf.mxu0 }
  0xf6   :  { %v208_v33 = vsel %vm204_vm2, %v181_v30, 0.0 }
  0xf7   :  { %209 = vadd.xlane.f32.xlu1 %v208_v33  ;;  %v174_v34 = vpop.f32.mrf.mxu0 }
  0xfb   :  { %194 = vadd.xlane.f32.xlu1 %v193_v35 }
 0x17e   :  { %v207_v36 = vpop.xlane.xlu0 %206 }
 0x17f   :  { %v211_v37 = vmul.f32 0.03125, %v207_v36 }
 0x180   :  { %v210_v38 = vpop.xlane.xlu1 %209 }
 0x181   :  { %v213_v39 = vsub.f32 %v180_v27, %v211_v37  ;;  %v212_v40 = vmul.f32 0.03125, %v210_v38 }
 0x183   :  { %v214_v41 = vsub.f32 %v181_v30, %v212_v40  ;;  %v215_v42 = vmul.f32 %v213_v39, %v213_v39 }
 0x184   :  { %v195_v43 = vpop.xlane.xlu1 %194 }
 0x185   :  { %v196_v44 = vmul.f32 0.03125, %v195_v43  ;;  %v217_v45 = vsel %vm204_vm2, %v215_v42, 0.0  ;;  %v216_v46 = vmul.f32 %v214_v41, %v214_v41 }
 0x186   :  { %218 = vadd.xlane.f32.xlu0 %v217_v45 }
 0x187   :  { %v197_v47 = vadd.f32 1e-05, %v196_v44  ;;  %v220_v48 = vsel %vm204_vm2, %v216_v46, 0.0 }
 0x188   :  { %221 = vadd.xlane.f32.xlu1 %v220_v48 }
 0x189   :  { %282 = vrsqrt.f32 %v197_v47 }
 0x196   :  { %v283_v49 = vpop.eup %282 }
 0x197   :  { %v199_v51 = vmul.f32 %v283_v49, %v191_v24 }
 0x199   :  { %v200_v53 = vmul.f32 %v199_v51, %v24_v50 }
 0x19b   :  { %v201_v54 = vadd.f32 %v200_v53, %v25_v52 }
 0x19d   :  { %202 = vst.msk [vmem:[%s409_s6] sm:$0x1] %vm185_vm0, %v201_v54  ;;  %203 = vst.msk [vmem:[%s409_s6 + $0x8] sm:$0x1] %vm185_vm0, %v201_v54 }
 0x20f   :  { %v219_v55 = vpop.xlane.xlu0 %218 }
 0x210   :  { %v223_v56 = vmul.f32 0.03125, %v219_v55 }
 0x211   :  { %v222_v57 = vpop.xlane.xlu1 %221 }
 0x212   :  { %v225_v58 = vadd.f32 1e-05, %v223_v56  ;;  %v224_v59 = vmul.f32 0.03125, %v222_v57 }
 0x214   :  { %284 = vrsqrt.f32 %v225_v58  ;;  %v226_v61 = vadd.f32 1e-05, %v224_v59 }
 0x216   :  { %286 = vrsqrt.f32 %v226_v61 }
 0x221   :  { %v285_v1 = vpop.eup %284 }
 0x222   :  { %v229_v3 = vmul.f32 %v285_v1, %v213_v39 }
 0x223   :  { %v287_v4 = vpop.eup %286 }
 0x224   :  { %v237_v5 = vmul.f32 %v235_v0, %v229_v3  ;;  %v230_v6 = vmul.f32 %v287_v4, %v214_v41 }
 0x226   :  { %v245_v7 = vadd.f32 %v243_v2, %v237_v5  ;;  %v238_v8 = vmul.f32 %v235_v0, %v230_v6 }
 0x228   :  { %247 = vst.msk [vmem:[%s409_s6 + $0x1] sm:$0xf] %vm204_vm2, %v245_v7  ;;  %v246_v9 = vadd.f32 %v243_v2, %v238_v8 }
 0x22a   :  { %248 = vst.msk [vmem:[%s409_s6 + $0x9] sm:$0xf] %vm204_vm2, %v246_v9 }

// kernel: tile.8
= control target key start
LH: loop header
LB: loop body
LE: loop exit
PB: predicated region body
PF: predicated region fallthrough
CT: control target
= control target key end

     0   :  { %s22_s0 = inlined_call_operand.vmem [shape: s32[3], index: 0, kind: input, shape index: {}]   ;;  %s23_s1 = inlined_call_operand.vmem [shape: s32[2,3], index: 1, kind: output, shape index: {}]  }
   0x1   :  { %v4_v0 = vld [vmem:[%s22_s0] ss:$0 sm:$0xff] }
   0x2   :  { %5 = vst [vmem:[%s23_s1] sm:$0x3] %v4_v0 }

// kernel: custom_clip_forward.11
= control target key start
LH: loop header
LB: loop body
LE: loop exit
PB: predicated region body
PF: predicated region fallthrough
CT: control target
= control target key end

     0   :  { %vm29_vm0 = vcmask 259072   ;;  %s415_s0 = inlined_call_operand.vmem [shape: f32[6,32], index: 0, kind: input, shape index: {}]   ;;  %s416_s1 = inlined_call_operand.vmem [shape: f32[1,32], index: 1, kind: input, shape index: {}]   ;;  %s417_s2 = inlined_call_operand.vmem [shape: f32[1,32], index: 2, kind: input, shape index: {}]   ;;  %s418_s3 = inlined_call_operand.vmem [shape: bf16[32,32], index: 3, kind: input, shape index: {}]   ;;  %s419_s4 = inlined_call_operand.vmem [shape: f32[2,32], index: 4, kind: input, shape index: {}]   ;;  %s420_s5 = inlined_call_operand.<no memory space> [shape: f32[1,1], index: 5, kind: input, shape index: {}]   ;;  %s421_s6 = inlined_call_operand.hbm [shape: f32[2,3], index: 6, kind: output, shape index: {}]  }
   0x1   :  { %v26_v0 = vld [vmem:[%s415_s0] sm:$0x3f] }
   0x2   :  { %v30_v1 = vsel %vm29_vm0, %v26_v0, 0.0 }
   0x3   :  { %31 = vadd.xlane.f32.xlu0 %v30_v1 }
   0x4   :  { %12 = vsyncpa [#allocation4], 0  ;;  %v321_v7 = vld [vmem:[%s418_s3 + $0x8] sm:$0xff]   ;;  %v349_v8 = vmov 0.0   ;;  %vm350_vm1 = vmmov 0   ;;  %v322_v9 = vld [vmem:[%s418_s3] sm:$0xff]   ;;  %v131_v26 = vlaneseq }
   0x5   :  { %309 = vmatprep.subr.bf16.mxu0 %v349_v8  ;;  %313 = vmatprep.mubr.msk.bf16.mxu0 %vm350_vm1, %v349_v8  ;;  %v300_v14 = vld [vmem:[%s416_s1] ss:$0 sm:$0xff]  ;;  %vm75_vm2 = vcmask 261120   ;;  %v351_v32 = vmov 1966171168   ;;  %vm258_vm3 = vcmask 256000  }
   0x6   :  { %310 = vmatpush3.bf16.msra.mxu0 %v321_v7  ;;  %v301_v16 = vld [vmem:[%s417_s2] ss:$0 sm:$0xff]  ;;  %v132_v27 = vshrl.u32 %v131_v26, 7  ;;  %v272_v28 = vand.u32 127, %v131_v26  ;;  %v129_v33 = vunpack.c.l.s4 %v351_v32  ;;  %s352_s30 = smov [#allocation3]   ;;  %vm281_vm4 = vcmask 1041409  }
   0x7   :  { %311 = vmatprep.subr.bf16.mxu0 %v349_v8  ;;  %v305_v40 = vld.sshfl [vmem:[%s419_s4] sm:$0x11 pattern:$0x75316420]  ;;  %s292_s7 = sshll.u32 %s352_s30, 4  ;;  %vm284_vm5 = vcmask 17408   ;;  %s293_s7 = int_to_ptr.vmem [resolvable:$true] %s292_s7 }
   0x8   :  { %v275_v29 = vsub.s32 %v272_v28, %v132_v27  ;;  %v130_v34 = vunpack.c.0.s8 %v129_v33  ;;  %v183_v47 = vcombine.high %v305_v40, %v305_v40  ;;  %v200_v49 = vsub.s32 0, %v132_v27  ;;  %s327_s8 = scalar_lea.vmem %s293_s7, 32  ;;  %p332_p1 = scmp.lt.s32.totalorder %s293_s7, %s293_s7 }
   0x9   :  { %p328_p0 = scmp.ne.s32.totalorder %s293_s7, %s327_s8  ;;  %p333_p2 = scmp.lt.s32.totalorder %s327_s8, %s327_s8 }
   0xa   :  { %312 = vmatpush3.bf16.msra.mxu0 %v322_v9  ;;  %v133_v35 = vsub.s32 %v130_v34, %v132_v27 }
   0xb   :  { %p334_p3 = por %p333_p2, %p332_p1 }
   0xc   :  { %v190_v48 = vrot.slane %v305_v40, %v133_v35  ;;  %v197_v56 = vrot.slane %v183_v47, %v133_v35 }
   0xd   :  { %p335_p4 = pnand %p334_p3, %p328_p0 }
   0xe   :  { %v201_v58 = vrot.slane %v190_v48, %v200_v49  ;;  %v205_v63 = vrot.slane %v197_v56, %v200_v49 }
  0x8c   :  { %v32_v2 = vpop.xlane.xlu0 %31 }
  0x8d   :  { %v34_v3 = vmul.f32 0.03125, %v32_v2 }
  0x8f   :  { %v35_v4 = vsub.f32 %v26_v0, %v34_v3 }
  0x91   :  { %v36_v5 = vmul.f32 %v35_v4, %v35_v4 }
  0x93   :  { %v37_v6 = vsel %vm29_vm0, %v36_v5, 0.0 }
  0x94   :  { %38 = vadd.xlane.f32.xlu0 %v37_v6  ;;  %v266_v6 = vstv %s420_s5 }
 0x11d   :  { %v39_v10 = vpop.xlane.xlu0 %38 }
 0x11e   :  { %v40_v11 = vmul.f32 0.03125, %v39_v10 }
 0x120   :  { %v41_v12 = vadd.f32 1e-05, %v40_v11 }
 0x122   :  { %323 = vrsqrt.f32 %v41_v12 }
 0x12f   :  { %v324_v13 = vpop.eup %323 }
 0x130   :  { %v43_v15 = vmul.f32 %v324_v13, %v35_v4 }
 0x132   :  { %v50_v17 = vmul.f32 %v300_v14, %v43_v15 }
 0x134   :  { %v57_v18 = vadd.f32 %v301_v16, %v50_v17 }
 0x136   :  { %v58_v19 = vpack.c.bf16 %v57_v18, %v57_v18 }
 0x138   :  { %314 = vmatmul.mubr.msk.bf16.vlgmr.msra.gmra.mxu0 %vm75_vm2, %v58_v19 }
 0x1f8   :  { %v113_v20 = vpop.f32.mrf.mxu0 }
 0x1f9   :  { %v119_v21 = vmul.f32 %v113_v20, %v113_v20 }
 0x1fa   :  { %v315_v22 = vpop.f32.mrf.mxu0 }
 0x1fb   :  { %v120_v23 = vsel %vm29_vm0, %v119_v21, 0.0 }
 0x1fc   :  { %121 = vadd.xlane.f32.xlu1 %v120_v23  ;;  %v116_v24 = vpop.f32.mrf.mxu0 }
 0x1fe   :  { %v316_v25 = vpop.f32.mrf.mxu0 }
 0x285   :  { %v122_v30 = vpop.xlane.xlu1 %121 }
 0x286   :  { %v123_v31 = vadd.f32 1e-12, %v122_v30 }
 0x288   :  { %325 = vrsqrt.f32 %v123_v31 }
 0x295   :  { %v326_v36 = vpop.eup %325 }
 0x296   :  { %v125_v37 = vmul.f32 %v326_v36, %v113_v20 }
 0x298   :  { %v134_v38 = vrot.slane %v125_v37, %v133_v35  ;;  %v127_v39 = vcombine.high %v125_v37, %v125_v37 }
 0x29a   :  { %v142_v41 = vcombine.high %v134_v38, %v134_v38  ;;  %v150_v42 = vrot.slane %v134_v38, %v133_v35  ;;  %v141_v43 = vrot.slane %v127_v39, %v133_v35 }
 0x29c   :  { %v164_v44 = vrot.slane %v142_v41, %v133_v35  ;;  %v172_v45 = vcombine.high %v150_v42, %v150_v42  ;;  %v143_v46 = vcombine.high %v141_v43, %v141_v43  ;;  %v157_v51 = vrot.slane %v141_v43, %v133_v35 }
 0x29e   :  { %v208_v50 = vcombine.low %v150_v42, %v164_v44  ;;  %v171_v52 = vrot.slane %v143_v46, %v133_v35  ;;  %v173_v53 = vcombine.high %v164_v44, %v164_v44  ;;  %v222_v55 = vrot.slane %v172_v45, %v133_v35 }
 0x2a0   :  { %v215_v54 = vrot.slane %v208_v50, %v133_v35  ;;  %v231_v57 = vcombine.low %v173_v53, %v157_v51  ;;  %v245_v61 = vrot.slane %v171_v52, %v133_v35 }
 0x2a2   :  { %v223_v59 = vcombine.low %v215_v54, %v222_v55  ;;  %v238_v60 = vrot.slane %v231_v57, %v133_v35 }
 0x2a4   :  { %v230_v62 = vrot.slane %v223_v59, %v133_v35  ;;  %v246_v0 = vcombine.low %v238_v60, %v245_v61 }
 0x2a6   :  { %v256_v1 = vmul.f32 %v230_v62, %v201_v58  ;;  %v253_v2 = vrot.slane %v246_v0, %v133_v35 }
 0x2a8   :  { %v259_v3 = vsel %vm258_vm3, %v256_v1, 0.0  ;;  %v257_v4 = vmul.f32 %v253_v2, %v205_v63 }
 0x2a9   :  { %260 = vadd.xlane.f32.xlu1 %v259_v3 }
 0x2aa   :  { %v262_v5 = vsel %vm258_vm3, %v257_v4, 0.0 }
 0x2ab   :  { %263 = vadd.xlane.f32.xlu0 %v262_v5 }
 0x332   :  { %v261_v7 = vpop.xlane.xlu1 %260 }
 0x333   :  { %v267_v8 = vmul.f32 %v266_v6, %v261_v7 }
 0x334   :  { %v264_v9 = vpop.xlane.xlu0 %263 }
 0x335   :  { %v268_v10 = vmul.f32 %v266_v6, %v264_v9  ;;  %v276_v11 = vrot.slane %v267_v8, %v275_v29 }
 0x337   :  { %v280_v12 = vrot.slane %v268_v10, %v275_v29 }
 0x339   :  { %v282_v13 = vsel %vm281_vm4, %v280_v12, %v276_v11 }
 0x33a   :  { %285 = vst.msk [vmem:[#allocation3] sm:$0x3] %vm284_vm5, %v282_v13 }
 0x33b   :  { %338 = shalt.err (!%p335_p4)
}
 0x33c   :  { %295 = dma.vmem_to_hbm [thread:$0]  %s293_s7, 32, %s421_s6, [#allocation4]  }
 0x33d   :  { %347 = dma.done.wait [#allocation4], 32  }
 0x33e   :  { %348 = vsyncadd [#allocation4], 4294967264 }
 0x33f   :  { %299 = vsyncpa [#allocation4], 1 }

// kernel: custom_clip_forward.7
= control target key start
LH: loop header
LB: loop body
LE: loop exit
PB: predicated region body
PF: predicated region fallthrough
CT: control target
= control target key end

     0   :  { %vm49_vm0 = vcmask 258048   ;;  %v5821_v15 = vmov 0.0   ;;  %vm5822_vm1 = vmmov 0   ;;  %v5823_v23 = vmov 1966171168   ;;  %s6782_s0 = inlined_call_operand.vmem [shape: f32[2,5,32], index: 0, kind: input, shape index: {}]   ;;  %s6783_s3 = inlined_call_operand.vmem [shape: bf16[3,4,32,8], index: 3, kind: input, shape index: {}]   ;;  %s6784_s1 = inlined_call_operand.vmem [shape: f32[1,32], index: 1, kind: input, shape index: {}]   ;;  %s6785_s2 = inlined_call_operand.vmem [shape: f32[1,32], index: 2, kind: input, shape index: {}]   ;;  %s6786_s4 = inlined_call_operand.vmem [shape: f32[3,4,1,8], index: 4, kind: input, shape index: {}]   ;;  %s6787_s5 = inlined_call_operand.vmem [shape: bf16[4,8,32], index: 5, kind: input, shape index: {}]   ;;  %s6788_s6 = inlined_call_operand.vmem [shape: f32[1,32], index: 6, kind: input, shape index: {}]   ;;  %s6789_s9 = inlined_call_operand.vmem [shape: bf16[32,128], index: 9, kind: input, shape index: {}]   ;;  %s6790_s7 = inlined_call_operand.vmem [shape: f32[1,32], index: 7, kind: input, shape index: {}]   ;;  %s6791_s8 = inlined_call_operand.vmem [shape: f32[1,32], index: 8, kind: input, shape index: {}]   ;;  %s6792_s11 = inlined_call_operand.vmem [shape: bf16[128,32], index: 11, kind: input, shape index: {}]   ;;  %s6793_s10 = inlined_call_operand.vmem [shape: f32[1,128], index: 10, kind: input, shape index: {}]   ;;  %s6794_s12 = inlined_call_operand.vmem [shape: f32[1,32], index: 12, kind: input, shape index: {}]   ;;  %s6795_s13 = inlined_call_operand.vmem [shape: f32[2,5,32], index: 13, kind: output, shape index: {}]  }
   0x1   :  { %v45_v0 = vld [vmem:[%s6782_s0] sm:$0x1f]  ;;  %v46_v1 = vld [vmem:[%s6782_s0 + $0x8] sm:$0x1f]  ;;  %5489 = vmatprep.subr.bf16.mxu0 %v5821_v15  ;;  %5513 = vmatprep.subr.bf16.mxu1 %v5821_v15  ;;  %v97_v24 = vunpack.c.l.s4 %v5823_v23  ;;  %v99_v25 = vlaneseq  ;;  %vm263_vm2 = vcmask 261120   ;;  %vm1029_vm3 = vcmask 1041408  }
   0x2   :  { %v50_v2 = vsel %vm49_vm0, %v45_v0, 0.0  ;;  %v53_v3 = vsel %vm49_vm0, %v46_v1, 0.0  ;;  %v5737_v14 = vld [vmem:[%s6783_s3 + $0x8] sm:$0xff]   ;;  %v5738_v16 = vld [vmem:[%s6783_s3] sm:$0xff]   ;;  %5493 = vmatprep.mubr.msk.bf16.mxu0 %vm5822_vm1, %v5821_v15  ;;  %5515 = vmatprep.mubr.msk.bf16.mxu1 %vm5822_vm1, %v5821_v15  ;;  %vm823_vm4 = vcmask 64512   ;;  %vm1030_vm5 = vcmask 1042432  }
   0x3   :  { %51 = vadd.xlane.f32.xlu0 %v50_v2  ;;  %5490 = vmatpush3.bf16.msra.mxu0 %v5737_v14  ;;  %v98_v26 = vunpack.c.0.s8 %v97_v24  ;;  %v100_v27 = vshrl.u32 %v99_v25, 7  ;;  %v5237_v29 = vld [vmem:[%s6784_s1] ss:$0 sm:$0xff]  ;;  %vm918_vm6 = vcmask 36864   ;;  %vm1025_vm7 = vcmask 39936  }
   0x4   :  { %5491 = vmatprep.subr.bf16.mxu0 %v5821_v15  ;;  %v5238_v31 = vld [vmem:[%s6785_s2] ss:$0 sm:$0xff]  ;;  %vm2295_vm8 = vcmask 1043456  }
   0x5   :  { %v5925_v32 = vsub.s32 %v98_v26, %v100_v27 }
   0x7   :  { %54 = vadd.xlane.f32.xlu0 %v53_v3  ;;  %5492 = vmatpush3.bf16.msra.mxu0 %v5738_v16 }
   0x8   :  { %5497 = vmatprep.subr.bf16.mxu0 %v5821_v15 }
  0x8c   :  { %v52_v4 = vpop.xlane.xlu0 %51 }
  0x8d   :  { %v57_v5 = vmul.f32 0.03125, %v52_v4 }
  0x8f   :  { %v59_v6 = vsub.f32 %v45_v0, %v57_v5 }
  0x90   :  { %v55_v7 = vpop.xlane.xlu0 %54 }
  0x91   :  { %v58_v8 = vmul.f32 0.03125, %v55_v7  ;;  %v61_v9 = vmul.f32 %v59_v6, %v59_v6  ;;  %v5739_v7 = vld [vmem:[%s6783_s3 + $0x48] sm:$0xff]  }
  0x93   :  { %v60_v10 = vsub.f32 %v46_v1, %v58_v8  ;;  %v63_v11 = vsel %vm49_vm0, %v61_v9, 0.0  ;;  %v5740_v9 = vld [vmem:[%s6783_s3 + $0x40] sm:$0xff]  }
  0x94   :  { %64 = vadd.xlane.f32.xlu1 %v63_v11  ;;  %v5742_v11 = vld [vmem:[%s6783_s3 + $0x80] sm:$0xff]  }
  0x95   :  { %v62_v12 = vmul.f32 %v60_v10, %v60_v10 }
  0x97   :  { %v66_v13 = vsel %vm49_vm0, %v62_v12, 0.0  ;;  %v5240_v12 = vld [vmem:[%s6786_s4] ss:$0 sm:$0xff] }
  0x98   :  { %67 = vadd.xlane.f32.xlu1 %v66_v13 }
 0x11d   :  { %v65_v17 = vpop.xlane.xlu1 %64 }
 0x11e   :  { %v69_v18 = vmul.f32 0.03125, %v65_v17 }
 0x120   :  { %v71_v19 = vadd.f32 1e-05, %v69_v18 }
 0x121   :  { %v68_v20 = vpop.xlane.xlu1 %67 }
 0x122   :  { %5771 = vrsqrt.f32 %v71_v19  ;;  %v70_v21 = vmul.f32 0.03125, %v68_v20 }
 0x124   :  { %v72_v22 = vadd.f32 1e-05, %v70_v21 }
 0x126   :  { %5773 = vrsqrt.f32 %v72_v22 }
 0x12f   :  { %v5772_v28 = vpop.eup %5771 }
 0x130   :  { %v75_v30 = vmul.f32 %v5772_v28, %v59_v6 }
 0x132   :  { %v83_v33 = vmul.f32 %v5237_v29, %v75_v30 }
 0x133   :  { %v5774_v34 = vpop.eup %5773 }
 0x134   :  { %v91_v35 = vadd.f32 %v5238_v31, %v83_v33  ;;  %v76_v36 = vmul.f32 %v5774_v34, %v60_v10  ;;  %v5741_v10 = vld [vmem:[%s6783_s3 + $0x88] sm:$0xff]  }
 0x136   :  { %v95_v37 = vcombine.high %v91_v35, %v91_v35  ;;  %v102_v38 = vrot.slane %v91_v35, %v5925_v32  ;;  %v84_v39 = vmul.f32 %v5237_v29, %v76_v36  ;;  %v5249_v29 = vld [vmem:[%s6786_s4 + $0x4] ss:$0 sm:$0xff] }
 0x138   :  { %v110_v40 = vcombine.high %v102_v38, %v102_v38  ;;  %v92_v41 = vadd.f32 %v5238_v31, %v84_v39  ;;  %v109_v42 = vrot.slane %v95_v37, %v5925_v32  ;;  %v117_v43 = vrot.slane %v102_v38, %v5925_v32 }
 0x13a   :  { %v131_v44 = vrot.slane %v110_v40, %v5925_v32  ;;  %v134_v45 = vcombine.high %v92_v41, %v92_v41  ;;  %v141_v46 = vrot.slane %v92_v41, %v5925_v32  ;;  %v124_v51 = vrot.slane %v109_v42, %v5925_v32 }
 0x13c   :  { %v173_v47 = vcombine.low %v117_v43, %v131_v44  ;;  %v5239_v48 = vcombine.high %v117_v43, %v131_v44  ;;  %v148_v49 = vrot.slane %v134_v45, %v5925_v32  ;;  %v149_v50 = vcombine.high %v141_v46, %v141_v46 }
 0x13d   :  { %v156_v52 = vrot.slane %v141_v46, %v5925_v32 }
 0x13e   :  { %v170_v53 = vrot.slane %v149_v50, %v5925_v32  ;;  %v183_v54 = vrot.slane %v173_v47, %v5925_v32  ;;  %v190_v55 = vrot.slane %v5239_v48, %v5925_v32  ;;  %v163_v58 = vrot.slane %v148_v49, %v5925_v32 }
 0x13f   :  { %v171_v56 = vcombine.high %v156_v52, %v156_v52  ;;  %v175_v57 = vcombine.low %v124_v51, %v156_v52  ;;  %v5258_v52 = vld [vmem:[%s6786_s4 + $0x8] ss:$0 sm:$0xff] }
 0x140   :  { %v172_v59 = vcombine.high %v170_v53, %v170_v53  ;;  %v205_v62 = vcombine.low %v183_v54, %v190_v55 }
 0x141   :  { %v176_v60 = vcombine.low %v170_v53, %v171_v56  ;;  %v197_v63 = vrot.slane %v175_v57, %v5925_v32  ;;  %v5824_v53 = vmov 65535  }
 0x142   :  { %v222_v61 = vcombine.low %v172_v59, %v163_v58  ;;  %v213_v3 = vrot.slane %v205_v62, %v5925_v32  ;;  %v6009_v54 = vsel %vm1029_vm3, 4294967295, %v5824_v53 }
 0x143   :  { %v204_v0 = vrot.slane %v176_v60, %v5925_v32 }
 0x144   :  { %v229_v2 = vrot.slane %v222_v61, %v5925_v32 }
 0x145   :  { %v206_v1 = vcombine.low %v197_v63, %v204_v0 }
 0x146   :  { %v236_v6 = vrot.slane %v229_v2, %v5925_v32 }
 0x147   :  { %v220_v4 = vrot.slane %v206_v1, %v5925_v32 }
 0x149   :  { %v221_v5 = vcombine.low %v213_v3, %v220_v4 }
 0x14b   :  { %v5948_v8 = vpack.c.bf16 %v236_v6, %v221_v5 }
 0x14d   :  { %5494 = vmatmul.mubr.msk.bf16.vlgmr.msra.gmra.mxu0 %vm263_vm2, %v5948_v8 }
 0x14e   :  { %5498 = vmatpush3.bf16.msra.mxu0 %v5739_v7  ;;  %5501 = vmatprep.mubr.msk.bf16.mxu0 %vm5822_vm1, %v5821_v15 }
 0x14f   :  { %5499 = vmatprep.subr.bf16.mxu0 %v5821_v15 }
 0x152   :  { %5500 = vmatpush3.bf16.msra.mxu0 %v5740_v9 }
 0x153   :  { %5505 = vmatprep.subr.bf16.mxu0 %v5821_v15 }
 0x155   :  { %5502 = vmatmul.mubr.msk.bf16.vlgmr.msra.gmra.mxu0 %vm263_vm2, %v5948_v8 }
 0x156   :  { %5506 = vmatpush3.bf16.msra.mxu0 %v5741_v10  ;;  %5509 = vmatprep.mubr.msk.bf16.mxu0 %vm5822_vm1, %v5821_v15 }
 0x157   :  { %5507 = vmatprep.subr.bf16.mxu0 %v5821_v15 }
 0x15a   :  { %5508 = vmatpush3.bf16.msra.mxu0 %v5742_v11 }
 0x15b   :  { %5519 = vmatprep.subr.bf16.mxu0 %v5821_v15 }
 0x15d   :  { %5510 = vmatmul.mubr.msk.bf16.vlgmr.msra.gmra.mxu0 %vm263_vm2, %v5948_v8 }
 0x15e   :  { %5521 = vmatprep.mubr.msk.bf16.mxu0 %vm5822_vm1, %v5821_v15 }
 0x20d   :  { %v301_v13 = vpop.f32.mrf.mxu0 }
 0x20e   :  { %v302_v14 = vadd.f32 %v5240_v12, %v301_v13 }
 0x20f   :  { %v5495_v16 = vpop.f32.mrf.mxu0 }
 0x210   :  { %v442_v17 = vcombine.high %v302_v14, %v302_v14  ;;  %v449_v18 = vrot.slane %v302_v14, %v5925_v32 }
 0x211   :  { %v304_v19 = vpop.f32.mrf.mxu0 }
 0x212   :  { %v456_v20 = vrot.slane %v442_v17, %v5925_v32  ;;  %v457_v21 = vcombine.high %v449_v18, %v449_v18  ;;  %v305_v22 = vadd.f32 %v5240_v12, %v304_v19  ;;  %v465_v23 = vrot.slane %v449_v18, %v5925_v32 }
 0x213   :  { %v5496_v24 = vpop.f32.mrf.mxu0 }
 0x214   :  { %v458_v25 = vcombine.high %v456_v20, %v456_v20  ;;  %v5982_v26 = vrot.slane %v456_v20, %v5925_v32  ;;  %v479_v27 = vrot.slane %v457_v21, %v5925_v32  ;;  %v497_v28 = vrot.slane %v305_v22, %v5925_v32 }
 0x215   :  { %v367_v30 = vpop.f32.mrf.mxu0 }
 0x216   :  { %v486_v31 = vrot.slane %v458_v25, %v5925_v32  ;;  %v488_v33 = vcombine.high %v5982_v26, %v5982_v26  ;;  %v659_v34 = vcombine.low %v465_v23, %v479_v27  ;;  %v5262_v35 = vcombine.high %v465_v23, %v479_v27 }
 0x217   :  { %v498_v36 = vcombine.high %v497_v28, %v497_v28  ;;  %v368_v37 = vadd.f32 %v5249_v29, %v367_v30  ;;  %v5503_v38 = vpop.f32.mrf.mxu0  ;;  %v505_v42 = vrot.slane %v497_v28, %v5925_v32  ;;  %v681_v55 = vrot.slane %v5982_v26, %v5925_v32 }
 0x218   :  { %v5993_v39 = vrot.slane %v659_v34, %v5925_v32  ;;  %v5996_v40 = vrot.slane %v5262_v35, %v5925_v32  ;;  %v490_v41 = vcombine.high %v486_v31, %v486_v31  ;;  %v6000_v46 = vcombine.low %v486_v31, %v488_v33 }
 0x219   :  { %v515_v43 = vcombine.high %v368_v37, %v368_v37  ;;  %v522_v44 = vrot.slane %v368_v37, %v5925_v32  ;;  %v370_v45 = vpop.f32.mrf.mxu0  ;;  %v6016_v57 = vrot.slane %v498_v36, %v5925_v32 }
 0x21a   :  { %v6002_v47 = vcombine.low %v490_v41, %v505_v42  ;;  %v371_v48 = vadd.f32 %v5249_v29, %v370_v45  ;;  %v682_v56 = vcombine.low %v5993_v39, %v5996_v40  ;;  %v706_v0 = vrot.slane %v6000_v46, %v5925_v32 }
 0x21b   :  { %v529_v49 = vrot.slane %v515_v43, %v5925_v32  ;;  %v530_v50 = vcombine.high %v522_v44, %v522_v44  ;;  %v5504_v51 = vpop.f32.mrf.mxu0  ;;  %v538_v60 = vrot.slane %v522_v44, %v5925_v32  ;;  %v720_v26 = vrot.slane %v6016_v57, %v5925_v32 }
 0x21c   :  { %v570_v58 = vrot.slane %v371_v48, %v5925_v32  ;;  %v713_v1 = vrot.slane %v6002_v47, %v5925_v32 }
 0x21d   :  { %v531_v59 = vcombine.high %v529_v49, %v529_v49  ;;  %v545_v61 = vrot.slane %v529_v49, %v5925_v32  ;;  %v552_v62 = vrot.slane %v530_v50, %v5925_v32  ;;  %v433_v63 = vpop.f32.mrf.mxu0  ;;  %v735_v57 = vrot.slane %v720_v26, %v5925_v32 }
 0x21e   :  { %v571_v2 = vcombine.high %v570_v58, %v570_v58  ;;  %v434_v3 = vadd.f32 %v5258_v52, %v433_v63  ;;  %v578_v10 = vrot.slane %v570_v58, %v5925_v32  ;;  %v689_v58 = vrot.slane %v682_v56, %v5925_v32 }
 0x21f   :  { %v559_v4 = vrot.slane %v531_v59, %v5925_v32  ;;  %v561_v5 = vcombine.high %v545_v61, %v545_v61  ;;  %v741_v6 = vcombine.low %v538_v60, %v552_v62  ;;  %v5263_v7 = vcombine.high %v538_v60, %v552_v62  ;;  %v5511_v9 = vpop.f32.mrf.mxu0 }
 0x220   :  { %v585_v11 = vrot.slane %v571_v2, %v5925_v32  ;;  %v588_v12 = vcombine.high %v434_v3, %v434_v3  ;;  %v595_v13 = vrot.slane %v434_v3, %v5925_v32  ;;  %v763_v28 = vrot.slane %v545_v61, %v5925_v32 }
 0x221   :  { %v749_v14 = vrot.slane %v741_v6, %v5925_v32  ;;  %v756_v16 = vrot.slane %v5263_v7, %v5925_v32  ;;  %v780_v17 = vcombine.low %v559_v4, %v561_v5  ;;  %v563_v18 = vcombine.high %v559_v4, %v559_v4  ;;  %v436_v19 = vpop.f32.mrf.mxu0 }
 0x222   :  { %v802_v20 = vrot.slane %v585_v11, %v5925_v32  ;;  %v602_v21 = vrot.slane %v588_v12, %v5925_v32  ;;  %v603_v22 = vcombine.high %v595_v13, %v595_v13  ;;  %v611_v23 = vrot.slane %v595_v13, %v5925_v32 }
 0x223   :  { %v781_v24 = vcombine.low %v563_v18, %v578_v10  ;;  %v437_v25 = vadd.f32 %v5258_v52, %v436_v19  ;;  %v5512_v27 = vpop.f32.mrf.mxu0  ;;  %v764_v29 = vcombine.low %v749_v14, %v756_v16  ;;  %v788_v34 = vrot.slane %v780_v17, %v5925_v32 }
 0x224   :  { %v604_v30 = vcombine.high %v602_v21, %v602_v21  ;;  %v618_v31 = vrot.slane %v602_v21, %v5925_v32  ;;  %v625_v33 = vrot.slane %v603_v22, %v5925_v32  ;;  %v778_v38 = vrot.slane %v763_v28, %v5925_v32 }
 0x225   :  { %v795_v35 = vrot.slane %v781_v24, %v5925_v32  ;;  %v643_v36 = vrot.slane %v437_v25, %v5925_v32  ;;  %v771_v37 = vrot.slane %v764_v29, %v5925_v32  ;;  %v721_v59 = vcombine.low %v706_v0, %v713_v1 }
 0x226   :  { %v632_v39 = vrot.slane %v604_v30, %v5925_v32  ;;  %v634_v40 = vcombine.high %v618_v31, %v618_v31  ;;  %v943_v41 = vcombine.low %v611_v23, %v625_v33  ;;  %v5266_v42 = vcombine.high %v611_v23, %v625_v33 }
 0x227   :  { %v965_v43 = vrot.slane %v618_v31, %v5925_v32  ;;  %v644_v44 = vcombine.high %v643_v36, %v643_v36  ;;  %v651_v45 = vrot.slane %v643_v36, %v5925_v32  ;;  %v779_v46 = vcombine.low %v771_v37, %v778_v38 }
 0x228   :  { %v951_v47 = vrot.slane %v943_v41, %v5925_v32  ;;  %v958_v48 = vrot.slane %v5266_v42, %v5925_v32  ;;  %v982_v49 = vcombine.low %v632_v39, %v634_v40  ;;  %v636_v50 = vcombine.high %v632_v39, %v632_v39 }
 0x229   :  { %v658_v51 = vrot.slane %v644_v44, %v5925_v32  ;;  %v821_v52 = vpack.c.bf16 %v779_v46, %v779_v46  ;;  %v803_v53 = vcombine.low %v788_v34, %v795_v35  ;;  %v696_v62 = vrot.slane %v681_v55, %v5925_v32 }
 0x22a   :  { %v966_v60 = vcombine.low %v951_v47, %v958_v48  ;;  %v983_v61 = vcombine.low %v636_v50, %v651_v45  ;;  %v980_v63 = vrot.slane %v965_v43, %v5925_v32  ;;  %v817_v4 = vrot.slane %v802_v20, %v5925_v32 }
 0x22b   :  { %v828_v2 = vsel %vm823_vm4, %v821_v52, 0  ;;  %v810_v3 = vrot.slane %v803_v53, %v5925_v32  ;;  %v990_v5 = vrot.slane %v982_v49, %v5925_v32  ;;  %v1004_v0 = vrot.slane %v658_v51, %v5925_v32  ;;  %v5743_v52 = vld [vmem:[%s6783_s3 + $0x18] sm:$0xff]  }
 0x22c   :  { %v997_v56 = vrot.slane %v983_v61, %v5925_v32  ;;  %5514 = vmatpush3.bf16.xpose.msra.mxu1 %v828_v2  ;;  %v973_v1 = vrot.slane %v966_v60, %v5925_v32  ;;  %v697_v6 = vcombine.low %v689_v58, %v696_v62  ;;  %v728_v10 = vrot.slane %v721_v59, %v5925_v32  ;;  %v5744_v59 = vld [vmem:[%s6783_s3 + $0x10] sm:$0xff]   ;;  %v5745_v61 = vld [vmem:[%s6783_s3 + $0x58] sm:$0xff]  }
 0x22d   :  { %v818_v55 = vcombine.low %v810_v3, %v817_v4  ;;  %5525 = vmatprep.subr.bf16.mxu1 %v5821_v15  ;;  %v6068_v12 = vsel %vm1030_vm5, %v6009_v54, 0  ;;  %v1019_v13 = vrot.slane %v1004_v0, %v5925_v32  ;;  %v5746_v2 = vld [vmem:[%s6783_s3 + $0x50] sm:$0xff]  }
 0x22e   :  { %v1005_v7 = vcombine.low %v990_v5, %v997_v56  ;;  %v981_v9 = vcombine.low %v973_v1, %v980_v63  ;;  %v739_v18 = vpack.c.bf16 %v697_v6, %v697_v6  ;;  %v736_v21 = vcombine.low %v728_v10, %v735_v57  ;;  %v5747_v63 = vld [vmem:[%s6783_s3 + $0x98] sm:$0xff]   ;;  %v5748_v3 = vld [vmem:[%s6783_s3 + $0x90] sm:$0xff]   ;;  %v5275_v57 = vld [vmem:[%s6786_s4 + $0x1] ss:$0 sm:$0xff] }
 0x22f   :  { %v822_v11 = vpack.c.bf16 %v818_v55, %v818_v55 }
 0x230   :  { %v1023_v14 = vpack.c.bf16 %v981_v9, %v981_v9  ;;  %v1012_v16 = vrot.slane %v1005_v7, %v5925_v32  ;;  %v740_v23 = vpack.c.bf16 %v736_v21, %v736_v21 }
 0x231   :  { %v874_v17 = vsel %vm823_vm4, %v822_v11, 0 }
 0x232   :  { %5520 = vmatpush3.bf16.xpose.msra.mxu0 %v874_v17  ;;  %v1034_v19 = vand.u32 %v6068_v12, %v1023_v14  ;;  %v1020_v20 = vcombine.low %v1012_v16, %v1019_v13 }
 0x233   :  { %5516 = vmatmul.mubr.msk.bf16.vlgmr.msra.gmra.mxu1 %vm823_vm4, %v739_v18  ;;  %5531 = vmatprep.subr.bf16.mxu0 %v5821_v15 }
 0x234   :  { %5526 = vmatpush3.bf16.msra.mxu1 %v1034_v19  ;;  %v1024_v54 = vpack.c.bf16 %v1020_v20, %v1020_v20  ;;  %5527 = vmatprep.mubr.msk.bf16.mxu1 %vm5822_vm1, %v5821_v15 }
 0x235   :  { %5537 = vmatprep.subr.bf16.mxu1 %v5821_v15 }
 0x236   :  { %v1080_v22 = vand.u32 %v6068_v12, %v1024_v54 }
 0x239   :  { %5522 = vmatmul.mubr.msk.bf16.vlgmr.msra.gmra.mxu0 %vm823_vm4, %v740_v23 }
 0x23a   :  { %5532 = vmatpush3.bf16.msra.mxu0 %v1080_v22  ;;  %5533 = vmatprep.mubr.msk.bf16.mxu0 %vm5822_vm1, %v5821_v15 }
 0x23b   :  { %5545 = vmatprep.subr.bf16.mxu0 %v5821_v15 }
 0x2f3   :  { %v864_v24 = vpop.f32.mrf.mxu1 }
 0x2f4   :  { %v916_v25 = vmul.f32 0.35355338, %v864_v24 }
 0x2f5   :  { %v5517_v27 = vpop.f32.mrf.mxu1 }
 0x2f6   :  { %v919_v28 = vsel %vm918_vm6, %v916_v25, -inf }
 0x2f7   :  { %920 = vmax.xlane.f32.xlu1 %v919_v28  ;;  %v867_v29 = vpop.f32.mrf.mxu1 }
 0x2f9   :  { %v910_v30 = vpop.f32.mrf.mxu0  ;;  %v5518_v31 = vpop.f32.mrf.mxu1 }
 0x2fa   :  { %v917_v33 = vmul.f32 0.35355338, %v910_v30 }
 0x2fb   :  { %v5523_v34 = vpop.f32.mrf.mxu0 }
 0x2fc   :  { %v922_v35 = vsel %vm918_vm6, %v917_v33, -inf }
 0x2fd   :  { %923 = vmax.xlane.f32.xlu0 %v922_v35  ;;  %v913_v36 = vpop.f32.mrf.mxu0 }
 0x2fe   :  { %v5284_v36 = vld [vmem:[%s6786_s4 + $0x5] ss:$0 sm:$0xff] }
 0x2ff   :  { %v5524_v37 = vpop.f32.mrf.mxu0 }
 0x380   :  { %v921_v38 = vpop.xlane.xlu1 %920 }
 0x381   :  { %v925_v39 = vsub.f32 %v916_v25, %v921_v38 }
 0x383   :  { %v927_v40 = vmul.f32 1.442695, %v925_v39 }
 0x385   :  { %5775 = vpow2.f32 %v927_v40 }
 0x386   :  { %v924_v41 = vpop.xlane.xlu0 %923 }
 0x387   :  { %v926_v42 = vsub.f32 %v917_v33, %v924_v41 }
 0x389   :  { %v929_v43 = vmul.f32 1.442695, %v926_v42 }
 0x38b   :  { %5777 = vpow2.f32 %v929_v43 }
 0x392   :  { %v5776_v44 = vpop.eup %5775 }
 0x393   :  { %v931_v45 = vsel %vm918_vm6, %v5776_v44, 0.0 }
 0x394   :  { %932 = vadd.xlane.f32.xlu1 %v931_v45 }
 0x398   :  { %v5778_v46 = vpop.eup %5777 }
 0x399   :  { %v934_v47 = vsel %vm918_vm6, %v5778_v46, 0.0 }
 0x39a   :  { %935 = vadd.xlane.f32.xlu0 %v934_v47 }
 0x41d   :  { %v933_v48 = vpop.xlane.xlu1 %932 }
 0x41e   :  { %5779 = vrcp.f32 %v933_v48 }
 0x423   :  { %v936_v49 = vpop.xlane.xlu0 %935 }
 0x424   :  { %5781 = vrcp.f32 %v936_v49 }
 0x42b   :  { %v5780_v50 = vpop.eup %5779 }
 0x42c   :  { %v939_v51 = vmul.f32 %v5780_v50, %v5776_v44 }
 0x42e   :  { %v941_v53 = vpack.c.bf16 %v939_v51, %v939_v51 }
 0x430   :  { %5528 = vmatmul.mubr.msk.bf16.vlgmr.msra.gmra.mxu1 %vm1025_vm7, %v941_v53 }
 0x431   :  { %v5782_v58 = vpop.eup %5781  ;;  %5538 = vmatpush3.bf16.msra.mxu1 %v5743_v52  ;;  %5541 = vmatprep.mubr.msk.bf16.mxu1 %vm5822_vm1, %v5821_v15 }
 0x432   :  { %v940_v60 = vmul.f32 %v5782_v58, %v5778_v46  ;;  %5539 = vmatprep.subr.bf16.mxu1 %v5821_v15 }
 0x434   :  { %v942_v62 = vpack.c.bf16 %v940_v60, %v940_v60 }
 0x435   :  { %5540 = vmatpush3.bf16.msra.mxu1 %v5744_v59 }
 0x436   :  { %5534 = vmatmul.mubr.msk.bf16.vlgmr.msra.gmra.mxu0 %vm1025_vm7, %v942_v62  ;;  %5553 = vmatprep.subr.bf16.mxu1 %v5821_v15 }
 0x437   :  { %5546 = vmatpush3.bf16.msra.mxu0 %v5745_v61  ;;  %5549 = vmatprep.mubr.msk.bf16.mxu0 %vm5822_vm1, %v5821_v15 }
 0x438   :  { %5542 = vmatmul.mubr.msk.bf16.vlgmr.msra.gmra.mxu1 %vm263_vm2, %v5948_v8  ;;  %5547 = vmatprep.subr.bf16.mxu0 %v5821_v15 }
 0x439   :  { %5554 = vmatpush3.bf16.msra.mxu1 %v5747_v63  ;;  %5557 = vmatprep.mubr.msk.bf16.mxu1 %vm5822_vm1, %v5821_v15 }
 0x43a   :  { %5555 = vmatprep.subr.bf16.mxu1 %v5821_v15 }
 0x43b   :  { %5548 = vmatpush3.bf16.msra.mxu0 %v5746_v2 }
 0x43c   :  { %5561 = vmatprep.subr.bf16.mxu0 %v5821_v15 }
 0x43d   :  { %5556 = vmatpush3.bf16.msra.mxu1 %v5748_v3 }
 0x43e   :  { %5550 = vmatmul.mubr.msk.bf16.vlgmr.msra.gmra.mxu0 %vm263_vm2, %v5948_v8  ;;  %5567 = vmatprep.subr.bf16.mxu1 %v5821_v15 }
 0x43f   :  { %5563 = vmatprep.mubr.msk.bf16.mxu0 %vm5822_vm1, %v5821_v15 }
 0x440   :  { %5558 = vmatmul.mubr.msk.bf16.vlgmr.msra.gmra.mxu1 %vm263_vm2, %v5948_v8 }
 0x441   :  { %5569 = vmatprep.mubr.msk.bf16.mxu1 %vm5822_vm1, %v5821_v15 }
 0x4f0   :  { %v1070_v4 = vpop.f32.mrf.mxu1 }
 0x4f1   :  { %v1131_v5 = vrot.slane %v1070_v4, %v5925_v32  ;;  %v1124_v56 = vcombine.high %v1070_v4, %v1070_v4 }
 0x4f2   :  { %v5529_v0 = vpop.f32.mrf.mxu1 }
 0x4f3   :  { %v1139_v1 = vcombine.high %v1131_v5, %v1131_v5  ;;  %v1146_v55 = vrot.slane %v1131_v5, %v5925_v32  ;;  %v1138_v7 = vrot.slane %v1124_v56, %v5925_v32 }
 0x4f4   :  { %v1073_v26 = vpop.f32.mrf.mxu1 }
 0x4f5   :  { %v1160_v6 = vrot.slane %v1139_v1, %v5925_v32  ;;  %v1153_v22 = vrot.slane %v1138_v7, %v5925_v32 }
 0x4f6   :  { %v1116_v9 = vpop.f32.mrf.mxu0  ;;  %v5530_v10 = vpop.f32.mrf.mxu1 }
 0x4f7   :  { %v1202_v11 = vcombine.low %v1146_v55, %v1160_v6  ;;  %v5269_v13 = vcombine.high %v1146_v55, %v1160_v6  ;;  %v1163_v14 = vcombine.high %v1116_v9, %v1116_v9  ;;  %v1170_v16 = vrot.slane %v1116_v9, %v5925_v32 }
 0x4f8   :  { %v5535_v17 = vpop.f32.mrf.mxu0  ;;  %v1329_v18 = vpop.f32.mrf.mxu1 }
 0x4f9   :  { %v1212_v19 = vrot.slane %v1202_v11, %v5925_v32  ;;  %v1219_v20 = vrot.slane %v5269_v13, %v5925_v32  ;;  %v1177_v21 = vrot.slane %v1163_v14, %v5925_v32  ;;  %v1178_v54 = vcombine.high %v1170_v16, %v1170_v16 }
 0x4fa   :  { %v1185_v23 = vrot.slane %v1170_v16, %v5925_v32  ;;  %v1119_v24 = vpop.f32.mrf.mxu0  ;;  %v1330_v25 = vadd.f32 %v5275_v57, %v1329_v18  ;;  %v5543_v27 = vpop.f32.mrf.mxu1 }
 0x4fb   :  { %v1199_v28 = vrot.slane %v1178_v54, %v5925_v32  ;;  %v1234_v37 = vcombine.low %v1212_v19, %v1219_v20  ;;  %v1192_v38 = vrot.slane %v1177_v21, %v5925_v32  ;;  %v5293_v19 = vld [vmem:[%s6786_s4 + $0x9] ss:$0 sm:$0xff] }
 0x4fc   :  { %v1200_v29 = vcombine.high %v1185_v23, %v1185_v23  ;;  %v1204_v30 = vcombine.low %v1153_v22, %v1185_v23  ;;  %v1470_v31 = vcombine.high %v1330_v25, %v1330_v25  ;;  %v1477_v33 = vrot.slane %v1330_v25, %v5925_v32  ;;  %v5536_v34 = vpop.f32.mrf.mxu0  ;;  %v1332_v35 = vpop.f32.mrf.mxu1 }
 0x4fd   :  { %v1201_v39 = vcombine.high %v1199_v28, %v1199_v28  ;;  %v1333_v40 = vadd.f32 %v5275_v57, %v1332_v35  ;;  %v1242_v26 = vrot.slane %v1234_v37, %v5925_v32 }
 0x4fe   :  { %v1205_v41 = vcombine.low %v1199_v28, %v1200_v29  ;;  %v1226_v42 = vrot.slane %v1204_v30, %v5925_v32  ;;  %v1484_v43 = vrot.slane %v1470_v31, %v5925_v32  ;;  %v1485_v44 = vcombine.high %v1477_v33, %v1477_v33  ;;  %v1395_v45 = vpop.f32.mrf.mxu0  ;;  %v5544_v46 = vpop.f32.mrf.mxu1 }
 0x4ff   :  { %v1251_v47 = vcombine.low %v1201_v39, %v1192_v38  ;;  %v1493_v48 = vrot.slane %v1477_v33, %v5925_v32  ;;  %v1525_v49 = vrot.slane %v1333_v40, %v5925_v32  ;;  %v1396_v50 = vadd.f32 %v5284_v36, %v1395_v45 }
 0x500   :  { %v1233_v51 = vrot.slane %v1205_v41, %v5925_v32  ;;  %v1486_v52 = vcombine.high %v1484_v43, %v1484_v43  ;;  %v6156_v53 = vrot.slane %v1484_v43, %v5925_v32  ;;  %v1507_v58 = vrot.slane %v1485_v44, %v5925_v32  ;;  %v5551_v59 = vpop.f32.mrf.mxu0  ;;  %v1461_v60 = vpop.f32.mrf.mxu1 }
 0x501   :  { %v1258_v61 = vrot.slane %v1251_v47, %v5925_v32  ;;  %v1543_v62 = vcombine.high %v1396_v50, %v1396_v50  ;;  %v1526_v1 = vcombine.high %v1525_v49, %v1525_v49  ;;  %v1533_v14 = vrot.slane %v1525_v49, %v5925_v32 }
 0x502   :  { %v1235_v63 = vcombine.low %v1226_v42, %v1233_v51  ;;  %v1514_v2 = vrot.slane %v1486_v52, %v5925_v32  ;;  %v1516_v3 = vcombine.high %v6156_v53, %v6156_v53  ;;  %v1687_v4 = vcombine.low %v1493_v48, %v1507_v58  ;;  %v1398_v5 = vpop.f32.mrf.mxu0  ;;  %v5559_v56 = vpop.f32.mrf.mxu1 }
 0x503   :  { %v5297_v0 = vcombine.high %v1493_v48, %v1507_v58  ;;  %v1550_v16 = vrot.slane %v1396_v50, %v5925_v32  ;;  %v6178_v17 = vrot.slane %v1258_v61, %v5925_v32  ;;  %v1557_v18 = vrot.slane %v1543_v62, %v5925_v32 }
 0x504   :  { %v1249_v55 = vrot.slane %v1235_v63, %v5925_v32  ;;  %v6165_v6 = vcombine.low %v1514_v2, %v1516_v3  ;;  %v1518_v7 = vcombine.high %v1514_v2, %v1514_v2  ;;  %v5552_v9 = vpop.f32.mrf.mxu0  ;;  %v1464_v10 = vpop.f32.mrf.mxu1  ;;  %v6168_v11 = vrot.slane %v1687_v4, %v5925_v32 }
 0x505   :  { %v6171_v13 = vrot.slane %v5297_v0, %v5925_v32  ;;  %v1709_v21 = vrot.slane %v6156_v53, %v5925_v32  ;;  %v6187_v54 = vrot.slane %v1526_v1, %v5925_v32  ;;  %v1558_v23 = vcombine.high %v1550_v16, %v1550_v16 }
 0x506   :  { %v6175_v57 = vcombine.low %v1242_v26, %v1249_v55  ;;  %v5560_v20 = vpop.f32.mrf.mxu1  ;;  %v1727_v22 = vcombine.low %v1518_v7, %v1533_v14  ;;  %v1734_v24 = vrot.slane %v6165_v6, %v5925_v32  ;;  %v1559_v25 = vcombine.high %v1557_v18, %v1557_v18 }
 0x507   :  { %v1573_v27 = vrot.slane %v1557_v18, %v5925_v32  ;;  %v1399_v28 = vadd.f32 %v5284_v36, %v1398_v5  ;;  %v1710_v29 = vcombine.low %v6168_v11, %v6171_v13  ;;  %v1566_v30 = vrot.slane %v1550_v16, %v5925_v32 }
 0x508   :  { %v1580_v31 = vrot.slane %v1558_v23, %v5925_v32  ;;  %v1462_v33 = vadd.f32 %v5293_v19, %v1461_v60  ;;  %v1587_v34 = vrot.slane %v1559_v25, %v5925_v32  ;;  %v1465_v38 = vadd.f32 %v5293_v19, %v1464_v10 }
 0x509   :  { %v1589_v35 = vcombine.high %v1573_v27, %v1573_v27  ;;  %v1791_v37 = vrot.slane %v1573_v27, %v5925_v32  ;;  %v1598_v41 = vrot.slane %v1399_v28, %v5925_v32  ;;  %v1741_v36 = vrot.slane %v1727_v22, %v5925_v32 }
 0x50a   :  { %v1769_v39 = vcombine.low %v1566_v30, %v1580_v31  ;;  %v5298_v40 = vcombine.high %v1566_v30, %v1580_v31  ;;  %v1616_v42 = vcombine.high %v1462_v33, %v1462_v33  ;;  %v1591_v44 = vcombine.high %v1587_v34, %v1587_v34 }
 0x50b   :  { %v1808_v43 = vcombine.low %v1587_v34, %v1589_v35  ;;  %v1623_v45 = vrot.slane %v1462_v33, %v5925_v32  ;;  %v1599_v48 = vcombine.high %v1598_v41, %v1598_v41  ;;  %v1606_v49 = vrot.slane %v1598_v41, %v5925_v32 }
 0x50c   :  { %v1777_v46 = vrot.slane %v1769_v39, %v5925_v32  ;;  %v1784_v47 = vrot.slane %v5298_v40, %v5925_v32  ;;  %v1630_v50 = vrot.slane %v1616_v42, %v5925_v32  ;;  %v1671_v53 = vrot.slane %v1465_v38, %v5925_v32 }
 0x50d   :  { %v1631_v51 = vcombine.high %v1623_v45, %v1623_v45  ;;  %v1639_v52 = vrot.slane %v1623_v45, %v5925_v32  ;;  %v1613_v58 = vrot.slane %v1599_v48, %v5925_v32  ;;  %v1809_v59 = vcombine.low %v1591_v44, %v1606_v49 }
 0x50e   :  { %v1792_v60 = vcombine.low %v1777_v46, %v1784_v47  ;;  %v1806_v61 = vrot.slane %v1791_v37, %v5925_v32  ;;  %v1632_v62 = vcombine.high %v1630_v50, %v1630_v50  ;;  %v1646_v63 = vrot.slane %v1630_v50, %v5925_v32 }
 0x50f   :  { %v1653_v2 = vrot.slane %v1631_v51, %v5925_v32  ;;  %v1672_v3 = vcombine.high %v1671_v53, %v1671_v53  ;;  %v1823_v4 = vrot.slane %v1809_v59, %v5925_v32  ;;  %v1830_v5 = vrot.slane %v1613_v58, %v5925_v32 }
 0x510   :  { %v1679_v56 = vrot.slane %v1671_v53, %v5925_v32  ;;  %v1799_v0 = vrot.slane %v1792_v60, %v5925_v32  ;;  %v1660_v1 = vrot.slane %v1632_v62, %v5925_v32  ;;  %v1662_v26 = vcombine.high %v1646_v63, %v1646_v63 }
 0x511   :  { %v1969_v55 = vcombine.low %v1639_v52, %v1653_v2  ;;  %v5301_v6 = vcombine.high %v1639_v52, %v1653_v2  ;;  %v1991_v7 = vrot.slane %v1646_v63, %v5925_v32  ;;  %v1686_v9 = vrot.slane %v1672_v3, %v5925_v32 }
 0x512   :  { %v1807_v10 = vcombine.low %v1799_v0, %v1806_v61  ;;  %v1816_v11 = vrot.slane %v1808_v43, %v5925_v32  ;;  %v2008_v16 = vcombine.low %v1660_v1, %v1662_v26  ;;  %v1664_v18 = vcombine.high %v1660_v1, %v1660_v1 }
 0x513   :  { %v1977_v13 = vrot.slane %v1969_v55, %v5925_v32  ;;  %v1984_v14 = vrot.slane %v5301_v6, %v5925_v32  ;;  %v1717_v19 = vrot.slane %v1710_v29, %v5925_v32  ;;  %v1724_v20 = vrot.slane %v1709_v21, %v5925_v32 }
 0x514   :  { %v1849_v22 = vpack.c.bf16 %v1807_v10, %v1807_v10  ;;  %v1831_v23 = vcombine.low %v1816_v11, %v1823_v4  ;;  %v1749_v25 = vcombine.low %v1734_v24, %v1741_v36  ;;  %v2006_v28 = vrot.slane %v1991_v7, %v5925_v32 }
 0x515   :  { %v1992_v27 = vcombine.low %v1977_v13, %v1984_v14  ;;  %v2009_v30 = vcombine.low %v1664_v18, %v1679_v56  ;;  %v2030_v31 = vrot.slane %v1686_v9, %v5925_v32  ;;  %v1845_v35 = vrot.slane %v1830_v5, %v5925_v32 }
 0x516   :  { %v1855_v33 = vsel %vm823_vm4, %v1849_v22, 0  ;;  %v1838_v34 = vrot.slane %v1831_v23, %v5925_v32  ;;  %v2016_v37 = vrot.slane %v2008_v16, %v5925_v32  ;;  %v1268_v24 = vpack.c.bf16 %v6178_v17, %v6175_v57  ;;  %v5305_v57 = vld [vmem:[%s6787_s5 + $0x4] sm:$0xf] }
 0x517   :  { %v2023_v29 = vrot.slane %v2009_v30, %v5925_v32  ;;  %5562 = vmatpush3.bf16.xpose.msra.mxu0 %v1855_v33  ;;  %v1999_v21 = vrot.slane %v1992_v27, %v5925_v32  ;;  %v1748_v38 = vrot.slane %v6187_v54, %v5925_v32  ;;  %v1725_v40 = vcombine.low %v1717_v19, %v1724_v20  ;;  %v1269_v27 = vld [vmem:[%s6787_s5] sm:$0xf]  ;;  %v5749_v33 = vld [vmem:[%s6783_s3 + $0x68] sm:$0xff]  }
 0x518   :  { %v1846_v39 = vcombine.low %v1838_v34, %v1845_v35  ;;  %5573 = vmatprep.subr.bf16.mxu0 %v5821_v15  ;;  %v1756_v36 = vrot.slane %v1749_v25, %v5925_v32  ;;  %v2045_v44 = vrot.slane %v2030_v31, %v5925_v32  ;;  %v2344_v31 = vsel %vm2295_vm8, %v1269_v27, 0  ;;  %v5750_v34 = vld [vmem:[%s6783_s3 + $0x60] sm:$0xff]  }
 0x519   :  { %v2031_v41 = vcombine.low %v2016_v37, %v2023_v29  ;;  %v2007_v42 = vcombine.low %v1999_v21, %v2006_v28  ;;  %v1763_v47 = vrot.slane %v1748_v38, %v5925_v32  ;;  %v1767_v49 = vpack.c.bf16 %v1725_v40, %v1725_v40 }
 0x51a   :  { %v1850_v43 = vpack.c.bf16 %v1846_v39, %v1846_v39  ;;  %v2297_v17 = vsel %vm2295_vm8, %v5305_v57, 0 }
 0x51b   :  { %v2049_v45 = vpack.c.bf16 %v2007_v42, %v2007_v42  ;;  %v2038_v46 = vrot.slane %v2031_v41, %v5925_v32  ;;  %v1764_v51 = vcombine.low %v1756_v36, %v1763_v47 }
 0x51c   :  { %v1901_v48 = vsel %vm823_vm4, %v1850_v43, 0 }
 0x51d   :  { %5568 = vmatpush3.bf16.xpose.msra.mxu1 %v1901_v48  ;;  %v2055_v54 = vand.u32 %v2049_v45, %v6068_v12  ;;  %v2046_v50 = vcombine.low %v2038_v46, %v2045_v44  ;;  %v1768_v53 = vpack.c.bf16 %v1764_v51, %v1764_v51 }
 0x51e   :  { %5564 = vmatmul.mubr.msk.bf16.vlgmr.msra.gmra.mxu0 %vm823_vm4, %v1767_v49  ;;  %5579 = vmatprep.subr.bf16.mxu1 %v5821_v15 }
 0x51f   :  { %5574 = vmatpush3.bf16.msra.mxu0 %v2055_v54  ;;  %v2050_v52 = vpack.c.bf16 %v2046_v50, %v2046_v50  ;;  %5575 = vmatprep.mubr.msk.bf16.mxu0 %vm5822_vm1, %v5821_v15 }
 0x520   :  { %5585 = vmatprep.subr.bf16.mxu0 %v5821_v15 }
 0x521   :  { %v2101_v58 = vand.u32 %v2050_v52, %v6068_v12 }
 0x524   :  { %5570 = vmatmul.mubr.msk.bf16.vlgmr.msra.gmra.mxu1 %vm823_vm4, %v1768_v53 }
 0x525   :  { %5580 = vmatpush3.bf16.msra.mxu1 %v2101_v58  ;;  %5581 = vmatprep.mubr.msk.bf16.mxu1 %vm5822_vm1, %v5821_v15 }
 0x526   :  { %5591 = vmatprep.subr.bf16.mxu1 %v5821_v15 }
 0x5de   :  { %v1891_v59 = vpop.f32.mrf.mxu0 }
 0x5df   :  { %v1943_v60 = vmul.f32 0.35355338, %v1891_v59 }
 0x5e0   :  { %v5565_v61 = vpop.f32.mrf.mxu0 }
 0x5e1   :  { %v1945_v62 = vsel %vm918_vm6, %v1943_v60, -inf }
 0x5e2   :  { %1946 = vmax.xlane.f32.xlu0 %v1945_v62  ;;  %v1894_v63 = vpop.f32.mrf.mxu0 }
 0x5e4   :  { %v1937_v2 = vpop.f32.mrf.mxu1  ;;  %v5566_v3 = vpop.f32.mrf.mxu0 }
 0x5e5   :  { %v1944_v4 = vmul.f32 0.35355338, %v1937_v2 }
 0x5e6   :  { %v5571_v5 = vpop.f32.mrf.mxu1 }
 0x5e7   :  { %v1948_v56 = vsel %vm918_vm6, %v1944_v4, -inf }
 0x5e8   :  { %1949 = vmax.xlane.f32.xlu1 %v1948_v56  ;;  %v1940_v0 = vpop.f32.mrf.mxu1 }
 0x5ea   :  { %v5572_v1 = vpop.f32.mrf.mxu1 }
 0x66b   :  { %v1947_v26 = vpop.xlane.xlu0 %1946 }
 0x66c   :  { %v1951_v55 = vsub.f32 %v1943_v60, %v1947_v26 }
 0x66e   :  { %v1953_v6 = vmul.f32 1.442695, %v1951_v55 }
 0x670   :  { %5783 = vpow2.f32 %v1953_v6 }
 0x671   :  { %v1950_v7 = vpop.xlane.xlu1 %1949 }
 0x672   :  { %v1952_v9 = vsub.f32 %v1944_v4, %v1950_v7 }
 0x674   :  { %v1955_v10 = vmul.f32 1.442695, %v1952_v9 }
 0x676   :  { %5785 = vpow2.f32 %v1955_v10 }
 0x67d   :  { %v5784_v11 = vpop.eup %5783 }
 0x67e   :  { %v1957_v13 = vsel %vm918_vm6, %v5784_v11, 0.0 }
 0x67f   :  { %1958 = vadd.xlane.f32.xlu0 %v1957_v13 }
 0x683   :  { %v5786_v14 = vpop.eup %5785 }
 0x684   :  { %v1960_v16 = vsel %vm918_vm6, %v5786_v14, 0.0 }
 0x685   :  { %1961 = vadd.xlane.f32.xlu1 %v1960_v16 }
 0x708   :  { %v1959_v18 = vpop.xlane.xlu0 %1958 }
 0x709   :  { %5787 = vrcp.f32 %v1959_v18 }
 0x70e   :  { %v1962_v19 = vpop.xlane.xlu1 %1961 }
 0x70f   :  { %5789 = vrcp.f32 %v1962_v19  ;;  %v5751_v19 = vld [vmem:[%s6783_s3 + $0x28] sm:$0xff]  }
 0x716   :  { %v5788_v20 = vpop.eup %5787 }
 0x717   :  { %v1965_v22 = vmul.f32 %v5788_v20, %v5784_v11  ;;  %v5322_v11 = vld [vmem:[%s6786_s4 + $0x6] ss:$0 sm:$0xff] }
 0x719   :  { %v1967_v23 = vpack.c.bf16 %v1965_v22, %v1965_v22 }
 0x71b   :  { %5576 = vmatmul.mubr.msk.bf16.vlgmr.msra.gmra.mxu0 %vm1025_vm7, %v1967_v23 }
 0x71c   :  { %v5790_v25 = vpop.eup %5789  ;;  %5587 = vmatprep.mubr.msk.bf16.mxu0 %vm5822_vm1, %v5821_v15  ;;  %5586 = vmatpush3.bf16.msra.mxu0 %v2297_v17 }
 0x71d   :  { %v1966_v28 = vmul.f32 %v5790_v25, %v5786_v14  ;;  %5597 = vmatprep.subr.bf16.mxu0 %v5821_v15 }
 0x71f   :  { %v1968_v30 = vpack.c.bf16 %v1966_v28, %v1966_v28 }
 0x721   :  { %5582 = vmatmul.mubr.msk.bf16.vlgmr.msra.gmra.mxu1 %vm1025_vm7, %v1968_v30 }
 0x722   :  { %5592 = vmatpush3.bf16.msra.mxu1 %v2344_v31  ;;  %5593 = vmatprep.mubr.msk.bf16.mxu1 %vm5822_vm1, %v5821_v15 }
 0x723   :  { %5605 = vmatprep.subr.bf16.mxu1 %v5821_v15 }
 0x729   :  { %5594 = vmatmul.mubr.msk.bf16.vlgmr.msra.gmra.mxu1 %vm823_vm4, %v1268_v24 }
 0x72a   :  { %5606 = vmatpush3.bf16.msra.mxu1 %v5749_v33  ;;  %5609 = vmatprep.mubr.msk.bf16.mxu1 %vm5822_vm1, %v5821_v15  ;;  %v5752_v33 = vld [vmem:[%s6783_s3 + $0x20] sm:$0xff]  }
 0x72b   :  { %5607 = vmatprep.subr.bf16.mxu1 %v5821_v15 }
 0x72e   :  { %5608 = vmatpush3.bf16.msra.mxu1 %v5750_v34 }
 0x72f   :  { %5621 = vmatprep.subr.bf16.mxu1 %v5821_v15 }
 0x731   :  { %5610 = vmatmul.mubr.msk.bf16.vlgmr.msra.gmra.mxu1 %vm263_vm2, %v5948_v8 }
 0x732   :  { %5623 = vmatprep.mubr.msk.bf16.mxu1 %vm5822_vm1, %v5821_v15 }
 0x7db   :  { %v2091_v35 = vpop.f32.mrf.mxu0 }
 0x7dc   :  { %v2152_v37 = vrot.slane %v2091_v35, %v5925_v32  ;;  %v2145_v29 = vcombine.high %v2091_v35, %v2091_v35 }
 0x7dd   :  { %v5577_v21 = vpop.f32.mrf.mxu0 }
 0x7de   :  { %v2160_v24 = vcombine.high %v2152_v37, %v2152_v37  ;;  %v2159_v40 = vrot.slane %v2145_v29, %v5925_v32  ;;  %v2167_v41 = vrot.slane %v2152_v37, %v5925_v32 }
 0x7df   :  { %v2094_v38 = vpop.f32.mrf.mxu0 }
 0x7e0   :  { %v2181_v39 = vrot.slane %v2160_v24, %v5925_v32  ;;  %v2174_v54 = vrot.slane %v2159_v40, %v5925_v32  ;;  %v5753_v40 = vld [vmem:[%s6783_s3 + $0xa8] sm:$0xff]  }
 0x7e1   :  { %v2137_v42 = vpop.f32.mrf.mxu1  ;;  %v5578_v36 = vpop.f32.mrf.mxu0 }
 0x7e2   :  { %v2184_v43 = vcombine.high %v2137_v42, %v2137_v42  ;;  %v2191_v44 = vrot.slane %v2137_v42, %v5925_v32  ;;  %v2223_v45 = vcombine.low %v2167_v41, %v2181_v39  ;;  %v5304_v46 = vcombine.high %v2167_v41, %v2181_v39 }
 0x7e3   :  { %v5583_v47 = vpop.f32.mrf.mxu1 }
 0x7e4   :  { %v2198_v48 = vrot.slane %v2184_v43, %v5925_v32  ;;  %v2199_v49 = vcombine.high %v2191_v44, %v2191_v44  ;;  %v2206_v50 = vrot.slane %v2191_v44, %v5925_v32  ;;  %v2233_v53 = vrot.slane %v2223_v45, %v5925_v32 }
 0x7e5   :  { %v2140_v51 = vpop.f32.mrf.mxu1  ;;  %v2240_v58 = vrot.slane %v5304_v46, %v5925_v32 }
 0x7e6   :  { %v2220_v52 = vrot.slane %v2199_v49, %v5925_v32  ;;  %v2221_v59 = vcombine.high %v2206_v50, %v2206_v50  ;;  %v2225_v60 = vcombine.low %v2174_v54, %v2206_v50  ;;  %v2213_v62 = vrot.slane %v2198_v48, %v5925_v32  ;;  %v5754_v49 = vld [vmem:[%s6783_s3 + $0xa0] sm:$0xff]  }
 0x7e7   :  { %v5584_v61 = vpop.f32.mrf.mxu1  ;;  %v2255_v5 = vcombine.low %v2233_v53, %v2240_v58 }
 0x7e8   :  { %v2222_v63 = vcombine.high %v2220_v52, %v2220_v52  ;;  %v2226_v2 = vcombine.low %v2220_v52, %v2221_v59  ;;  %v2247_v56 = vrot.slane %v2225_v60, %v5925_v32 }
 0x7e9   :  { %v6302_v3 = vpop.f32.mrf.mxu1  ;;  %v2263_v7 = vrot.slane %v2255_v5, %v5925_v32 }
 0x7ea   :  { %v2272_v4 = vcombine.low %v2222_v63, %v2213_v62  ;;  %v2254_v0 = vrot.slane %v2226_v2, %v5925_v32 }
 0x7eb   :  { %v5595_v1 = vpop.f32.mrf.mxu1 }
 0x7ec   :  { %v2256_v26 = vcombine.low %v2247_v56, %v2254_v0  ;;  %v2279_v55 = vrot.slane %v2272_v4, %v5925_v32 }
 0x7ed   :  { %v6307_v6 = vpop.f32.mrf.mxu1 }
 0x7ee   :  { %v2270_v9 = vrot.slane %v2256_v26, %v5925_v32  ;;  %v2286_v14 = vrot.slane %v2279_v55, %v5925_v32 }
 0x7ef   :  { %v5596_v10 = vpop.f32.mrf.mxu1 }
 0x7f0   :  { %v2271_v13 = vcombine.low %v2263_v7, %v2270_v9  ;;  %v5313_v7 = vld [vmem:[%s6786_s4 + $0x2] ss:$0 sm:$0xff] }
 0x7f1   :  { %v2512_v16 = vpop.f32.mrf.mxu1 }
 0x7f2   :  { %v2513_v18 = vadd.f32 %v5322_v11, %v2512_v16  ;;  %v2289_v22 = vpack.c.bf16 %v2286_v14, %v2271_v13 }
 0x7f3   :  { %v5611_v20 = vpop.f32.mrf.mxu1 }
 0x7f4   :  { %v2660_v23 = vcombine.high %v2513_v18, %v2513_v18  ;;  %v2667_v25 = vrot.slane %v2513_v18, %v5925_v32  ;;  %5588 = vmatmul.mubr.msk.bf16.vlgmr.msra.gmra.mxu0 %vm823_vm4, %v2289_v22 }
 0x7f5   :  { %v2515_v27 = vpop.f32.mrf.mxu1  ;;  %5598 = vmatpush3.bf16.msra.mxu0 %v5751_v19  ;;  %5601 = vmatprep.mubr.msk.bf16.mxu0 %vm5822_vm1, %v5821_v15 }
 0x7f6   :  { %v2674_v28 = vrot.slane %v2660_v23, %v5925_v32  ;;  %v2675_v30 = vcombine.high %v2667_v25, %v2667_v25  ;;  %v2516_v31 = vadd.f32 %v5322_v11, %v2515_v27  ;;  %v2683_v34 = vrot.slane %v2667_v25, %v5925_v32  ;;  %5599 = vmatprep.subr.bf16.mxu0 %v5821_v15 }
 0x7f7   :  { %v5612_v57 = vpop.f32.mrf.mxu1 }
 0x7f8   :  { %v2676_v17 = vcombine.high %v2674_v28, %v2674_v28  ;;  %v2690_v35 = vrot.slane %v2674_v28, %v5925_v32  ;;  %v2697_v37 = vrot.slane %v2675_v30, %v5925_v32  ;;  %v2715_v29 = vrot.slane %v2516_v31, %v5925_v32  ;;  %v5331_v31 = vld [vmem:[%s6786_s4 + $0xa] ss:$0 sm:$0xff] }
 0x7f9   :  { %5600 = vmatpush3.bf16.msra.mxu0 %v5752_v33 }
 0x7fa   :  { %v2704_v21 = vrot.slane %v2676_v17, %v5925_v32  ;;  %v2706_v24 = vcombine.high %v2690_v35, %v2690_v35  ;;  %v2886_v38 = vcombine.low %v2683_v34, %v2697_v37  ;;  %v5336_v39 = vcombine.high %v2683_v34, %v2697_v37  ;;  %5613 = vmatprep.subr.bf16.mxu0 %v5821_v15 }
 0x7fb   :  { %v2908_v41 = vrot.slane %v2690_v35, %v5925_v32  ;;  %v2716_v42 = vcombine.high %v2715_v29, %v2715_v29  ;;  %v2723_v36 = vrot.slane %v2715_v29, %v5925_v32 }
 0x7fc   :  { %v2894_v43 = vrot.slane %v2886_v38, %v5925_v32  ;;  %v2901_v44 = vrot.slane %v5336_v39, %v5925_v32  ;;  %v2925_v45 = vcombine.low %v2704_v21, %v2706_v24  ;;  %v2708_v46 = vcombine.high %v2704_v21, %v2704_v21  ;;  %5602 = vmatmul.mubr.msk.bf16.vlgmr.msra.gmra.mxu0 %vm263_vm2, %v5948_v8 }
 0x7fd   :  { %v2730_v47 = vrot.slane %v2716_v42, %v5925_v32  ;;  %5614 = vmatpush3.bf16.msra.mxu0 %v5753_v40  ;;  %5617 = vmatprep.mubr.msk.bf16.mxu0 %vm5822_vm1, %v5821_v15  ;;  %v2923_v50 = vrot.slane %v2908_v41, %v5925_v32 }
 0x7fe   :  { %v2926_v48 = vcombine.low %v2708_v46, %v2723_v36  ;;  %v2909_v54 = vcombine.low %v2894_v43, %v2901_v44  ;;  %5615 = vmatprep.subr.bf16.mxu0 %v5821_v15  ;;  %v2933_v58 = vrot.slane %v2925_v45, %v5925_v32 }
 0x7ff   :  { %v2947_v52 = vrot.slane %v2730_v47, %v5925_v32 }
 0x800   :  { %v2940_v51 = vrot.slane %v2926_v48, %v5925_v32  ;;  %v2916_v53 = vrot.slane %v2909_v54, %v5925_v32 }
 0x801   :  { %5616 = vmatpush3.bf16.msra.mxu0 %v5754_v49  ;;  %v2962_v63 = vrot.slane %v2947_v52, %v5925_v32 }
 0x802   :  { %v2924_v59 = vcombine.low %v2916_v53, %v2923_v50  ;;  %v2948_v60 = vcombine.low %v2933_v58, %v2940_v51  ;;  %5627 = vmatprep.subr.bf16.mxu0 %v5821_v15 }
 0x804   :  { %v2966_v61 = vpack.c.bf16 %v2924_v59, %v2924_v59  ;;  %v2955_v62 = vrot.slane %v2948_v60, %v5925_v32  ;;  %5618 = vmatmul.mubr.msk.bf16.vlgmr.msra.gmra.mxu0 %vm263_vm2, %v5948_v8 }
 0x805   :  { %5629 = vmatprep.mubr.msk.bf16.mxu0 %vm5822_vm1, %v5821_v15 }
 0x806   :  { %v2972_v2 = vsel %vm823_vm4, %v2966_v61, 0  ;;  %v2963_v4 = vcombine.low %v2955_v62, %v2962_v63 }
 0x807   :  { %5622 = vmatpush3.bf16.xpose.msra.mxu1 %v2972_v2 }
 0x808   :  { %v2967_v5 = vpack.c.bf16 %v2963_v4, %v2963_v4  ;;  %5633 = vmatprep.subr.bf16.mxu1 %v5821_v15 }
 0x80a   :  { %v3018_v56 = vsel %vm823_vm4, %v2967_v5, 0 }
 0x80b   :  { %5628 = vmatpush3.bf16.xpose.msra.mxu0 %v3018_v56 }
 0x80c   :  { %5639 = vmatprep.subr.bf16.mxu0 %v5821_v15 }
 0x8b4   :  { %v6365_v0 = vpop.f32.mrf.mxu0 }
 0x8b6   :  { %v5589_v1 = vpop.f32.mrf.mxu0 }
 0x8b8   :  { %v6367_v26 = vpop.f32.mrf.mxu0 }
 0x8ba   :  { %v5590_v55 = vpop.f32.mrf.mxu0 }
 0x8bc   :  { %v2446_v9 = vpop.f32.mrf.mxu0 }
 0x8bd   :  { %v2447_v10 = vadd.f32 %v5313_v7, %v2446_v9 }
 0x8be   :  { %v5603_v11 = vpop.f32.mrf.mxu0 }
 0x8bf   :  { %v2587_v13 = vcombine.high %v2447_v10, %v2447_v10  ;;  %v2594_v14 = vrot.slane %v2447_v10, %v5925_v32 }
 0x8c0   :  { %v2449_v16 = vpop.f32.mrf.mxu0 }
 0x8c1   :  { %v2601_v18 = vrot.slane %v2587_v13, %v5925_v32  ;;  %v2602_v19 = vcombine.high %v2594_v14, %v2594_v14  ;;  %v2450_v20 = vadd.f32 %v5313_v7, %v2449_v16  ;;  %v2610_v22 = vrot.slane %v2594_v14, %v5925_v32 }
 0x8c2   :  { %v5604_v23 = vpop.f32.mrf.mxu0 }
 0x8c3   :  { %v2603_v25 = vcombine.high %v2601_v18, %v2601_v18  ;;  %v2617_v27 = vrot.slane %v2601_v18, %v5925_v32  ;;  %v2624_v28 = vrot.slane %v2602_v19, %v5925_v32  ;;  %v2642_v30 = vrot.slane %v2450_v20, %v5925_v32 }
 0x8c4   :  { %v2578_v33 = vpop.f32.mrf.mxu0 }
 0x8c5   :  { %v2631_v34 = vrot.slane %v2603_v25, %v5925_v32  ;;  %v2633_v57 = vcombine.high %v2617_v27, %v2617_v27  ;;  %v2804_v17 = vcombine.low %v2610_v22, %v2624_v28  ;;  %v5335_v35 = vcombine.high %v2610_v22, %v2624_v28 }
 0x8c6   :  { %v2826_v37 = vrot.slane %v2617_v27, %v5925_v32  ;;  %v2643_v29 = vcombine.high %v2642_v30, %v2642_v30  ;;  %v2650_v21 = vrot.slane %v2642_v30, %v5925_v32  ;;  %v2579_v24 = vadd.f32 %v5331_v31, %v2578_v33  ;;  %v5619_v38 = vpop.f32.mrf.mxu0 }
 0x8c7   :  { %v2812_v39 = vrot.slane %v2804_v17, %v5925_v32  ;;  %v2819_v40 = vrot.slane %v5335_v35, %v5925_v32  ;;  %v2843_v41 = vcombine.low %v2631_v34, %v2633_v57  ;;  %v2635_v42 = vcombine.high %v2631_v34, %v2631_v34 }
 0x8c8   :  { %v2657_v36 = vrot.slane %v2643_v29, %v5925_v32  ;;  %v2733_v43 = vcombine.high %v2579_v24, %v2579_v24  ;;  %v2740_v44 = vrot.slane %v2579_v24, %v5925_v32  ;;  %v2581_v45 = vpop.f32.mrf.mxu0  ;;  %v2841_v47 = vrot.slane %v2826_v37, %v5925_v32 }
 0x8c9   :  { %v2827_v46 = vcombine.low %v2812_v39, %v2819_v40  ;;  %v2844_v48 = vcombine.low %v2635_v42, %v2650_v21  ;;  %v2582_v49 = vadd.f32 %v5331_v31, %v2581_v45  ;;  %v2851_v54 = vrot.slane %v2843_v41, %v5925_v32 }
 0x8ca   :  { %v2865_v50 = vrot.slane %v2657_v36, %v5925_v32  ;;  %v2747_v51 = vrot.slane %v2733_v43, %v5925_v32  ;;  %v2748_v52 = vcombine.high %v2740_v44, %v2740_v44  ;;  %v5620_v53 = vpop.f32.mrf.mxu0  ;;  %v2756_v60 = vrot.slane %v2740_v44, %v5925_v32 }
 0x8cb   :  { %v2834_v58 = vrot.slane %v2827_v46, %v5925_v32  ;;  %v2858_v59 = vrot.slane %v2844_v48, %v5925_v32  ;;  %v2788_v61 = vrot.slane %v2582_v49, %v5925_v32 }
 0x8cc   :  { %v2880_v62 = vrot.slane %v2865_v50, %v5925_v32  ;;  %v2749_v63 = vcombine.high %v2747_v51, %v2747_v51  ;;  %v2763_v2 = vrot.slane %v2747_v51, %v5925_v32  ;;  %v2770_v4 = vrot.slane %v2748_v52, %v5925_v32 }
 0x8cd   :  { %v2866_v5 = vcombine.low %v2851_v54, %v2858_v59  ;;  %v2789_v56 = vcombine.high %v2788_v61, %v2788_v61  ;;  %v2796_v1 = vrot.slane %v2788_v61, %v5925_v32  ;;  %v2842_v55 = vcombine.low %v2834_v58, %v2841_v47 }
 0x8ce   :  { %v2777_v7 = vrot.slane %v2749_v63, %v5925_v32  ;;  %v2779_v9 = vcombine.high %v2763_v2, %v2763_v2  ;;  %v3086_v10 = vcombine.low %v2756_v60, %v2770_v4  ;;  %v5339_v11 = vcombine.high %v2756_v60, %v2770_v4 }
 0x8cf   :  { %v2873_v13 = vrot.slane %v2866_v5, %v5925_v32  ;;  %v3108_v14 = vrot.slane %v2763_v2, %v5925_v32  ;;  %v2803_v16 = vrot.slane %v2789_v56, %v5925_v32  ;;  %v2884_v18 = vpack.c.bf16 %v2842_v55, %v2842_v55 }
 0x8d0   :  { %v3094_v19 = vrot.slane %v3086_v10, %v5925_v32  ;;  %v3101_v20 = vrot.slane %v5339_v11, %v5925_v32  ;;  %v3125_v22 = vcombine.low %v2777_v7, %v2779_v9  ;;  %v2781_v23 = vcombine.high %v2777_v7, %v2777_v7  ;;  %v5755_v11 = vld [vmem:[%s6783_s3 + $0x38] sm:$0xff]  }
 0x8d1   :  { %5624 = vmatmul.mubr.msk.bf16.vlgmr.msra.gmra.mxu1 %vm823_vm4, %v2884_v18  ;;  %v2881_v25 = vcombine.low %v2873_v13, %v2880_v62  ;;  %v3123_v30 = vrot.slane %v3108_v14, %v5925_v32  ;;  %v3147_v57 = vrot.slane %v2803_v16, %v5925_v32  ;;  %v5756_v14 = vld [vmem:[%s6783_s3 + $0x30] sm:$0xff]   ;;  %v5757_v16 = vld [vmem:[%s6783_s3 + $0xb8] sm:$0xff]  }
 0x8d2   :  { %v3109_v27 = vcombine.low %v3094_v19, %v3101_v20  ;;  %v3126_v28 = vcombine.low %v2781_v23, %v2796_v1  ;;  %5635 = vmatprep.mubr.msk.bf16.mxu1 %vm5822_vm1, %v5821_v15  ;;  %v3133_v33 = vrot.slane %v3125_v22, %v5925_v32  ;;  %v5758_v18 = vld [vmem:[%s6783_s3 + $0xb0] sm:$0xff]   ;;  %v5343_v19 = vld [vmem:[%s6787_s5 + $0x8] sm:$0xf] }
 0x8d3   :  { %v2885_v31 = vpack.c.bf16 %v2881_v25, %v2881_v25  ;;  %v3162_v29 = vrot.slane %v3147_v57, %v5925_v32  ;;  %v3413_v20 = vsel %vm2295_vm8, %v5343_v19, 0 }
 0x8d4   :  { %v3140_v34 = vrot.slane %v3126_v28, %v5925_v32  ;;  %v3116_v17 = vrot.slane %v3109_v27, %v5925_v32 }
 0x8d5   :  { %5630 = vmatmul.mubr.msk.bf16.vlgmr.msra.gmra.mxu0 %vm823_vm4, %v2885_v31 }
 0x8d6   :  { %v3148_v35 = vcombine.low %v3133_v33, %v3140_v34  ;;  %v3124_v37 = vcombine.low %v3116_v17, %v3123_v30  ;;  %5641 = vmatprep.mubr.msk.bf16.mxu0 %vm5822_vm1, %v5821_v15 }
 0x8d8   :  { %v3166_v21 = vpack.c.bf16 %v3124_v37, %v3124_v37  ;;  %v3155_v24 = vrot.slane %v3148_v35, %v5925_v32 }
 0x8da   :  { %v3172_v38 = vand.u32 %v3166_v21, %v6068_v12  ;;  %v3163_v39 = vcombine.low %v3155_v24, %v3162_v29 }
 0x8dc   :  { %5634 = vmatpush3.bf16.msra.mxu1 %v3172_v38  ;;  %v3167_v40 = vpack.c.bf16 %v3163_v39, %v3163_v39 }
 0x8dd   :  { %5645 = vmatprep.subr.bf16.mxu1 %v5821_v15 }
 0x8de   :  { %v3218_v41 = vand.u32 %v3167_v40, %v6068_v12 }
 0x8e0   :  { %5640 = vmatpush3.bf16.msra.mxu0 %v3218_v41 }
 0x8e1   :  { %5651 = vmatprep.subr.bf16.mxu0 %v5821_v15 }
 0x991   :  { %v3008_v42 = vpop.f32.mrf.mxu1 }
 0x992   :  { %v3060_v36 = vmul.f32 0.35355338, %v3008_v42 }
 0x993   :  { %v5625_v43 = vpop.f32.mrf.mxu1 }
 0x994   :  { %v3062_v44 = vsel %vm918_vm6, %v3060_v36, -inf }
 0x995   :  { %3063 = vmax.xlane.f32.xlu0 %v3062_v44  ;;  %v3011_v45 = vpop.f32.mrf.mxu1  ;;  %v3054_v46 = vpop.f32.mrf.mxu0 }
 0x996   :  { %v3061_v47 = vmul.f32 0.35355338, %v3054_v46  ;;  %v5350_v46 = vld [vmem:[%s6786_s4 + $0x3] ss:$0 sm:$0xff] }
 0x997   :  { %v5626_v48 = vpop.f32.mrf.mxu1  ;;  %v5631_v49 = vpop.f32.mrf.mxu0 }
 0x998   :  { %v3065_v54 = vsel %vm918_vm6, %v3061_v47, -inf }
 0x999   :  { %3066 = vmax.xlane.f32.xlu1 %v3065_v54  ;;  %v3057_v50 = vpop.f32.mrf.mxu0 }
 0x99b   :  { %v5632_v51 = vpop.f32.mrf.mxu0 }
 0xa1e   :  { %v3064_v52 = vpop.xlane.xlu0 %3063 }
 0xa1f   :  { %v3068_v53 = vsub.f32 %v3060_v36, %v3064_v52 }
 0xa21   :  { %v3070_v58 = vmul.f32 1.442695, %v3068_v53 }
 0xa22   :  { %v3067_v59 = vpop.xlane.xlu1 %3066 }
 0xa23   :  { %5791 = vpow2.f32 %v3070_v58  ;;  %v3069_v60 = vsub.f32 %v3061_v47, %v3067_v59 }
 0xa25   :  { %v3072_v61 = vmul.f32 1.442695, %v3069_v60 }
 0xa27   :  { %5793 = vpow2.f32 %v3072_v61 }
 0xa30   :  { %v5792_v62 = vpop.eup %5791 }
 0xa31   :  { %v3074_v63 = vsel %vm918_vm6, %v5792_v62, 0.0 }
 0xa32   :  { %3075 = vadd.xlane.f32.xlu0 %v3074_v63 }
 0xa34   :  { %v5794_v2 = vpop.eup %5793 }
 0xa35   :  { %v3077_v4 = vsel %vm918_vm6, %v5794_v2, 0.0 }
 0xa36   :  { %3078 = vadd.xlane.f32.xlu1 %v3077_v4 }
 0xabb   :  { %v3076_v5 = vpop.xlane.xlu0 %3075 }
 0xabc   :  { %5795 = vrcp.f32 %v3076_v5 }
 0xabf   :  { %v3079_v56 = vpop.xlane.xlu1 %3078 }
 0xac0   :  { %5797 = vrcp.f32 %v3079_v56 }
 0xac9   :  { %v5796_v1 = vpop.eup %5795 }
 0xaca   :  { %v3082_v55 = vmul.f32 %v5796_v1, %v5792_v62 }
 0xacc   :  { %v3084_v7 = vpack.c.bf16 %v3082_v55, %v3082_v55 }
 0xacd   :  { %v5798_v9 = vpop.eup %5797 }
 0xace   :  { %5636 = vmatmul.mubr.msk.bf16.vlgmr.msra.gmra.mxu1 %vm1025_vm7, %v3084_v7  ;;  %v3083_v10 = vmul.f32 %v5798_v9, %v5794_v2 }
 0xacf   :  { %5647 = vmatprep.mubr.msk.bf16.mxu1 %vm5822_vm1, %v5821_v15  ;;  %5646 = vmatpush3.bf16.msra.mxu1 %v3413_v20 }
 0xad0   :  { %v3085_v13 = vpack.c.bf16 %v3083_v10, %v3083_v10  ;;  %5659 = vmatprep.subr.bf16.mxu1 %v5821_v15 }
 0xad2   :  { %5642 = vmatmul.mubr.msk.bf16.vlgmr.msra.gmra.mxu0 %vm1025_vm7, %v3085_v13 }
 0xad3   :  { %5652 = vmatpush3.bf16.msra.mxu0 %v5755_v11  ;;  %5655 = vmatprep.mubr.msk.bf16.mxu0 %vm5822_vm1, %v5821_v15  ;;  %v5368_v11 = vld [vmem:[%s6786_s4 + $0xb] ss:$0 sm:$0xff] }
 0xad4   :  { %5653 = vmatprep.subr.bf16.mxu0 %v5821_v15 }
 0xad7   :  { %5654 = vmatpush3.bf16.msra.mxu0 %v5756_v14 }
 0xad8   :  { %5667 = vmatprep.subr.bf16.mxu0 %v5821_v15 }
 0xada   :  { %5656 = vmatmul.mubr.msk.bf16.vlgmr.msra.gmra.mxu0 %vm263_vm2, %v5948_v8 }
 0xadb   :  { %5668 = vmatpush3.bf16.msra.mxu0 %v5757_v16  ;;  %5671 = vmatprep.mubr.msk.bf16.mxu0 %vm5822_vm1, %v5821_v15 }
 0xadc   :  { %5669 = vmatprep.subr.bf16.mxu0 %v5821_v15 }
 0xadf   :  { %5670 = vmatpush3.bf16.msra.mxu0 %v5758_v18 }
 0xae0   :  { %5681 = vmatprep.subr.bf16.mxu0 %v5821_v15 }
 0xae2   :  { %5672 = vmatmul.mubr.msk.bf16.vlgmr.msra.gmra.mxu0 %vm263_vm2, %v5948_v8 }
 0xae3   :  { %5683 = vmatprep.mubr.msk.bf16.mxu0 %vm5822_vm1, %v5821_v15 }
 0xb8e   :  { %v3208_v22 = vpop.f32.mrf.mxu1 }
 0xb8f   :  { %v3262_v23 = vcombine.high %v3208_v22, %v3208_v22  ;;  %v3269_v25 = vrot.slane %v3208_v22, %v5925_v32 }
 0xb90   :  { %v5637_v27 = vpop.f32.mrf.mxu1 }
 0xb91   :  { %v3277_v28 = vcombine.high %v3269_v25, %v3269_v25  ;;  %v3276_v30 = vrot.slane %v3262_v23, %v5925_v32  ;;  %v3284_v34 = vrot.slane %v3269_v25, %v5925_v32 }
 0xb92   :  { %v3211_v31 = vpop.f32.mrf.mxu1  ;;  %v3254_v33 = vpop.f32.mrf.mxu0 }
 0xb93   :  { %v3298_v57 = vrot.slane %v3277_v28, %v5925_v32  ;;  %v3301_v17 = vcombine.high %v3254_v33, %v3254_v33  ;;  %v3308_v35 = vrot.slane %v3254_v33, %v5925_v32  ;;  %v3291_v39 = vrot.slane %v3276_v30, %v5925_v32 }
 0xb94   :  { %v5638_v37 = vpop.f32.mrf.mxu1  ;;  %v5643_v29 = vpop.f32.mrf.mxu0 }
 0xb95   :  { %v3340_v21 = vcombine.low %v3284_v34, %v3298_v57  ;;  %v5342_v24 = vcombine.high %v3284_v34, %v3298_v57  ;;  %v3316_v38 = vcombine.high %v3308_v35, %v3308_v35  ;;  %v3323_v40 = vrot.slane %v3308_v35, %v5925_v32  ;;  %v5759_v34 = vld [vmem:[%s6783_s3 + $0x78] sm:$0xff]  }
 0xb96   :  { %v3257_v41 = vpop.f32.mrf.mxu0  ;;  %v3315_v42 = vrot.slane %v3301_v17, %v5925_v32 }
 0xb97   :  { %v3337_v36 = vrot.slane %v3316_v38, %v5925_v32  ;;  %v3338_v43 = vcombine.high %v3323_v40, %v3323_v40  ;;  %v3342_v44 = vcombine.low %v3291_v39, %v3323_v40  ;;  %v3350_v47 = vrot.slane %v3340_v21, %v5925_v32 }
 0xb98   :  { %v5644_v45 = vpop.f32.mrf.mxu0  ;;  %v3357_v48 = vrot.slane %v5342_v24, %v5925_v32  ;;  %v3330_v51 = vrot.slane %v3315_v42, %v5925_v32  ;;  %v5760_v42 = vld [vmem:[%s6783_s3 + $0x70] sm:$0xff]  }
 0xb99   :  { %v3339_v49 = vcombine.high %v3337_v36, %v3337_v36  ;;  %v3343_v54 = vcombine.low %v3337_v36, %v3338_v43  ;;  %v3364_v53 = vrot.slane %v3342_v44, %v5925_v32 }
 0xb9a   :  { %v3517_v50 = vpop.f32.mrf.mxu0  ;;  %v3372_v60 = vcombine.low %v3350_v47, %v3357_v48 }
 0xb9b   :  { %v6477_v52 = vadd.f32 %v5350_v46, %v3517_v50  ;;  %v3371_v58 = vrot.slane %v3343_v54, %v5925_v32  ;;  %v3389_v61 = vcombine.low %v3339_v49, %v3330_v51 }
 0xb9c   :  { %v5657_v59 = vpop.f32.mrf.mxu0  ;;  %v3380_v55 = vrot.slane %v3372_v60, %v5925_v32 }
 0xb9d   :  { %v3658_v62 = vcombine.high %v6477_v52, %v6477_v52  ;;  %v3373_v63 = vcombine.low %v3364_v53, %v3371_v58  ;;  %v3396_v7 = vrot.slane %v3389_v61, %v5925_v32 }
 0xb9e   :  { %v3520_v2 = vpop.f32.mrf.mxu0 }
 0xb9f   :  { %v3672_v4 = vrot.slane %v3658_v62, %v5925_v32  ;;  %v3387_v5 = vrot.slane %v3373_v63, %v5925_v32  ;;  %v3521_v56 = vadd.f32 %v5350_v46, %v3520_v2  ;;  %v3403_v25 = vrot.slane %v3396_v7, %v5925_v32 }
 0xba0   :  { %v5658_v1 = vpop.f32.mrf.mxu0 }
 0xba1   :  { %v3674_v9 = vcombine.high %v3672_v4, %v3672_v4  ;;  %v6488_v10 = vrot.slane %v3672_v4, %v5925_v32  ;;  %v3713_v13 = vrot.slane %v3521_v56, %v5925_v32  ;;  %v3388_v16 = vcombine.low %v3380_v55, %v3387_v5 }
 0xba2   :  { %v3649_v14 = vpop.f32.mrf.mxu0  ;;  %v2381_v5 = vadd.f32 %v6302_v3, %v6365_v0  ;;  %v5359_v3 = vld [vmem:[%s6786_s4 + $0x7] ss:$0 sm:$0xff] }
 0xba3   :  { %v3702_v18 = vrot.slane %v3674_v9, %v5925_v32  ;;  %v3704_v19 = vcombine.high %v6488_v10, %v6488_v10  ;;  %v3714_v20 = vcombine.high %v3713_v13, %v3713_v13  ;;  %v3650_v22 = vadd.f32 %v5368_v11, %v3649_v14 }
 0xba4   :  { %v5673_v23 = vpop.f32.mrf.mxu0  ;;  %v3721_v30 = vrot.slane %v3713_v13, %v5925_v32  ;;  %v3406_v35 = vpack.c.bf16 %v3403_v25, %v3388_v16  ;;  %v2384_v9 = vadd.f32 %v6307_v6, %v6367_v26 }
 0xba5   :  { %v3914_v27 = vcombine.low %v3702_v18, %v3704_v19  ;;  %v3706_v28 = vcombine.high %v3702_v18, %v3702_v18  ;;  %v3728_v31 = vrot.slane %v3714_v20, %v5925_v32  ;;  %v3804_v33 = vcombine.high %v3650_v22, %v3650_v22 }
 0xba6   :  { %v3652_v57 = vpop.f32.mrf.mxu0  ;;  %5648 = vmatmul.mubr.msk.bf16.vlgmr.msra.gmra.mxu1 %vm823_vm4, %v3406_v35  ;;  %v3811_v56 = vrot.slane %v3650_v22, %v5925_v32 }
 0xba7   :  { %v3915_v17 = vcombine.low %v3706_v28, %v3721_v30  ;;  %v3818_v37 = vrot.slane %v3804_v33, %v5925_v32  ;;  %v3922_v21 = vrot.slane %v3914_v27, %v5925_v32  ;;  %v3936_v38 = vrot.slane %v3728_v31, %v5925_v32  ;;  %5660 = vmatpush3.bf16.msra.mxu1 %v5759_v34 }
 0xba8   :  { %v5674_v29 = vpop.f32.mrf.mxu0  ;;  %v3653_v39 = vadd.f32 %v5368_v11, %v3652_v57  ;;  %5661 = vmatprep.subr.bf16.mxu1 %v5821_v15  ;;  %5663 = vmatprep.mubr.msk.bf16.mxu1 %vm5822_vm1, %v5821_v15  ;;  %v3819_v13 = vcombine.high %v3811_v56, %v3811_v56  ;;  %v3827_v6 = vrot.slane %v3811_v56, %v5925_v32 }
 0xba9   :  { %v3929_v24 = vrot.slane %v3915_v17, %v5925_v32  ;;  %v3820_v40 = vcombine.high %v3818_v37, %v3818_v37  ;;  %v6509_v41 = vrot.slane %v3818_v37, %v5925_v32  ;;  %v3951_v47 = vrot.slane %v3936_v38, %v5925_v32 }
 0xbaa   :  { %v3859_v43 = vrot.slane %v3653_v39, %v5925_v32 }
 0xbab   :  { %v3937_v36 = vcombine.low %v3922_v21, %v3929_v24  ;;  %v3848_v44 = vrot.slane %v3820_v40, %v5925_v32  ;;  %v3850_v45 = vcombine.high %v6509_v41, %v6509_v41  ;;  %5662 = vmatpush3.bf16.msra.mxu1 %v5760_v42 }
 0xbac   :  { %v3860_v48 = vcombine.high %v3859_v43, %v3859_v43  ;;  %v3867_v50 = vrot.slane %v3859_v43, %v5925_v32  ;;  %5675 = vmatprep.subr.bf16.mxu1 %v5821_v15 }
 0xbad   :  { %v3944_v46 = vrot.slane %v3937_v36, %v5925_v32  ;;  %v4196_v49 = vcombine.low %v3848_v44, %v3850_v45  ;;  %v3852_v54 = vcombine.high %v3848_v44, %v3848_v44 }
 0xbae   :  { %v3874_v51 = vrot.slane %v3860_v48, %v5925_v32  ;;  %5664 = vmatmul.mubr.msk.bf16.vlgmr.msra.gmra.mxu1 %vm263_vm2, %v5948_v8  ;;  %v3665_v8 = vrot.slane %v6477_v52, %v5925_v32  ;;  %v3841_v52 = vrot.slane %v3819_v13, %v5925_v32 }
 0xbaf   :  { %v6526_v53 = vcombine.low %v3944_v46, %v3951_v47  ;;  %v4197_v58 = vcombine.low %v3852_v54, %v3867_v50  ;;  %v4204_v59 = vrot.slane %v4196_v49, %v5925_v32  ;;  %5677 = vmatprep.mubr.msk.bf16.mxu1 %vm5822_vm1, %v5821_v15 }
 0xbb0   :  { %v4218_v61 = vrot.slane %v3874_v51, %v5925_v32  ;;  %v3673_v11 = vcombine.high %v3665_v8, %v3665_v8  ;;  %v3681_v22 = vrot.slane %v3665_v8, %v5925_v32  ;;  %v4157_v28 = vcombine.low %v3827_v6, %v3841_v52 }
 0xbb1   :  { %v4211_v60 = vrot.slane %v4197_v58, %v5925_v32  ;;  %v5376_v30 = vcombine.high %v3827_v6, %v3841_v52 }
 0xbb2   :  { %v4233_v63 = vrot.slane %v4218_v61, %v5925_v32  ;;  %v3695_v0 = vrot.slane %v3673_v11, %v5925_v32  ;;  %v4165_v40 = vrot.slane %v4157_v28, %v5925_v32  ;;  %v3897_v11 = vrot.slane %v6488_v10, %v5925_v32 }
 0xbb3   :  { %v4219_v62 = vcombine.low %v4204_v59, %v4211_v60  ;;  %v4172_v42 = vrot.slane %v5376_v30, %v5925_v32 }
 0xbb4   :  { %v3875_v27 = vcombine.low %v3681_v22, %v3695_v0  ;;  %v5372_v17 = vcombine.high %v3681_v22, %v3695_v0 }
 0xbb5   :  { %v4226_v2 = vrot.slane %v4219_v62, %v5925_v32  ;;  %v4180_v59 = vcombine.low %v4165_v40, %v4172_v42 }
 0xbb6   :  { %v3883_v39 = vrot.slane %v3875_v27, %v5925_v32  ;;  %v3890_v46 = vrot.slane %v5372_v17, %v5925_v32 }
 0xbb7   :  { %v6537_v4 = vcombine.low %v4226_v2, %v4233_v63  ;;  %v4179_v2 = vrot.slane %v6509_v41, %v5925_v32 }
 0xbb8   :  { %v3898_v63 = vcombine.low %v3883_v39, %v3890_v46 }
 0xbb9   :  { %v4238_v30 = vpack.c.bf16 %v6537_v4, %v6537_v4 }
 0xbba   :  { %v3905_v41 = vrot.slane %v3898_v63, %v5925_v32 }
 0xc66   :  { %v3449_v1 = vpop.f32.mrf.mxu1 }
 0xc67   :  { %v6544_v55 = vadd.f32 %v3449_v1, %v2381_v5 }
 0xc68   :  { %v5649_v7 = vpop.f32.mrf.mxu1 }
 0xc6a   :  { %v3452_v14 = vpop.f32.mrf.mxu1 }
 0xc6b   :  { %v6548_v16 = vadd.f32 %v3452_v14, %v2384_v9  ;;  %v4187_v9 = vrot.slane %v4180_v59, %v5925_v32 }
 0xc6c   :  { %v5650_v18 = vpop.f32.mrf.mxu1 }
 0xc6d   :  { %v4194_v18 = vrot.slane %v4179_v2, %v5925_v32 }
 0xc6e   :  { %v3583_v19 = vpop.f32.mrf.mxu1 }
 0xc6f   :  { %v3584_v20 = vadd.f32 %v5359_v3, %v3583_v19  ;;  %v4195_v19 = vcombine.low %v4187_v9, %v4194_v18 }
 0xc70   :  { %v5665_v26 = vpop.f32.mrf.mxu1 }
 0xc71   :  { %v3731_v23 = vcombine.high %v3584_v20, %v3584_v20  ;;  %v3738_v25 = vrot.slane %v3584_v20, %v5925_v32  ;;  %v3912_v20 = vrot.slane %v3897_v11, %v5925_v32 }
 0xc72   :  { %v3586_v31 = vpop.f32.mrf.mxu1 }
 0xc73   :  { %v3745_v33 = vrot.slane %v3731_v23, %v5925_v32  ;;  %v3746_v34 = vcombine.high %v3738_v25, %v3738_v25  ;;  %v3587_v57 = vadd.f32 %v5359_v3, %v3586_v31  ;;  %v3754_v35 = vrot.slane %v3738_v25, %v5925_v32 }
 0xc74   :  { %v5666_v37 = vpop.f32.mrf.mxu1  ;;  %v3913_v10 = vcombine.low %v3905_v41, %v3912_v20  ;;  %v4237_v23 = vpack.c.bf16 %v4195_v19, %v4195_v19  ;;  %v3956_v31 = vpack.c.bf16 %v6526_v53, %v6526_v53 }
 0xc75   :  { %v3747_v29 = vcombine.high %v3745_v33, %v3745_v33  ;;  %v3761_v21 = vrot.slane %v3745_v33, %v5925_v32  ;;  %v3768_v24 = vrot.slane %v3746_v34, %v5925_v32  ;;  %v3786_v38 = vrot.slane %v3587_v57, %v5925_v32 }
 0xc76   :  { %v3955_v27 = vpack.c.bf16 %v3913_v10, %v3913_v10  ;;  %v4243_v28 = vand.u32 %v4237_v23, %v6068_v12  ;;  %v4289_v33 = vand.u32 %v4238_v30, %v6068_v12 }
 0xc77   :  { %v3775_v36 = vrot.slane %v3747_v29, %v5925_v32  ;;  %v3777_v43 = vcombine.high %v3761_v21, %v3761_v21  ;;  %v3957_v44 = vcombine.low %v3754_v35, %v3768_v24  ;;  %v5373_v45 = vcombine.high %v3754_v35, %v3768_v24 }
 0xc78   :  { %v3979_v47 = vrot.slane %v3761_v21, %v5925_v32  ;;  %v3787_v48 = vcombine.high %v3786_v38, %v3786_v38  ;;  %v3794_v49 = vrot.slane %v3786_v38, %v5925_v32 }
 0xc79   :  { %v3965_v54 = vrot.slane %v3957_v44, %v5925_v32  ;;  %v3972_v50 = vrot.slane %v5373_v45, %v5925_v32  ;;  %v3996_v51 = vcombine.low %v3775_v36, %v3777_v43  ;;  %v3779_v58 = vcombine.high %v3775_v36, %v3775_v36 }
 0xc7a   :  { %v3801_v60 = vrot.slane %v3787_v48, %v5925_v32  ;;  %v3994_v5 = vrot.slane %v3979_v47, %v5925_v32 }
 0xc7b   :  { %v3997_v61 = vcombine.low %v3779_v58, %v3794_v49  ;;  %v3980_v62 = vcombine.low %v3965_v54, %v3972_v50  ;;  %v4004_v7 = vrot.slane %v3996_v51, %v5925_v32 }
 0xc7c   :  { %v4018_v56 = vrot.slane %v3801_v60, %v5925_v32 }
 0xc7d   :  { %v4011_v8 = vrot.slane %v3997_v61, %v5925_v32  ;;  %v3987_v1 = vrot.slane %v3980_v62, %v5925_v32  ;;  %v5380_v62 = vld [vmem:[%s6787_s5 + $0xc] sm:$0xf] }
 0xc7e   :  { %v4033_v52 = vrot.slane %v4018_v56, %v5925_v32  ;;  %v4484_v63 = vsel %vm2295_vm8, %v5380_v62, 0 }
 0xc7f   :  { %v3995_v13 = vcombine.low %v3987_v1, %v3994_v5  ;;  %v4019_v14 = vcombine.low %v4004_v7, %v4011_v8 }
 0xc81   :  { %v4037_v3 = vpack.c.bf16 %v3995_v13, %v3995_v13  ;;  %v4026_v0 = vrot.slane %v4019_v14, %v5925_v32 }
 0xc83   :  { %v4043_v22 = vsel %vm823_vm4, %v4037_v3, 0  ;;  %v4034_v6 = vcombine.low %v4026_v0, %v4033_v52 }
 0xc84   :  { %5676 = vmatpush3.bf16.xpose.msra.mxu1 %v4043_v22 }
 0xc85   :  { %v4038_v26 = vpack.c.bf16 %v4034_v6, %v4034_v6  ;;  %5687 = vmatprep.subr.bf16.mxu1 %v5821_v15 }
 0xc87   :  { %v4089_v25 = vsel %vm823_vm4, %v4038_v26, 0 }
 0xc88   :  { %5682 = vmatpush3.bf16.xpose.msra.mxu0 %v4089_v25 }
 0xc89   :  { %5693 = vmatprep.subr.bf16.mxu0 %v5821_v15 }
 0xc8b   :  { %5678 = vmatmul.mubr.msk.bf16.vlgmr.msra.gmra.mxu1 %vm823_vm4, %v3955_v27 }
 0xc8c   :  { %5688 = vmatpush3.bf16.msra.mxu1 %v4243_v28  ;;  %5689 = vmatprep.mubr.msk.bf16.mxu1 %vm5822_vm1, %v5821_v15 }
 0xc8d   :  { %5699 = vmatprep.subr.bf16.mxu1 %v5821_v15 }
 0xc8f   :  { %5684 = vmatmul.mubr.msk.bf16.vlgmr.msra.gmra.mxu0 %vm823_vm4, %v3956_v31 }
 0xc90   :  { %5694 = vmatpush3.bf16.msra.mxu0 %v4289_v33  ;;  %5695 = vmatprep.mubr.msk.bf16.mxu0 %vm5822_vm1, %v5821_v15 }
 0xc91   :  { %5705 = vmatprep.subr.bf16.mxu0 %v5821_v15 }
 0xd4b   :  { %v4079_v4 = vpop.f32.mrf.mxu1 }
 0xd4c   :  { %v4131_v34 = vmul.f32 0.35355338, %v4079_v4 }
 0xd4d   :  { %v5679_v57 = vpop.f32.mrf.mxu1 }
 0xd4e   :  { %v4133_v17 = vsel %vm918_vm6, %v4131_v34, -inf }
 0xd4f   :  { %4134 = vmax.xlane.f32.xlu0 %v4133_v17  ;;  %v4082_v35 = vpop.f32.mrf.mxu1  ;;  %v4125_v53 = vpop.f32.mrf.mxu0 }
 0xd50   :  { %v4132_v37 = vmul.f32 0.35355338, %v4125_v53 }
 0xd51   :  { %v5680_v29 = vpop.f32.mrf.mxu1  ;;  %v5685_v21 = vpop.f32.mrf.mxu0 }
 0xd52   :  { %v4136_v12 = vsel %vm918_vm6, %v4132_v37, -inf }
 0xd53   :  { %4137 = vmax.xlane.f32.xlu1 %v4136_v12  ;;  %v4128_v24 = vpop.f32.mrf.mxu0 }
 0xd55   :  { %v5686_v38 = vpop.f32.mrf.mxu0 }
 0xdd8   :  { %v4135_v39 = vpop.xlane.xlu0 %4134 }
 0xdd9   :  { %v4139_v40 = vsub.f32 %v4131_v34, %v4135_v39 }
 0xddb   :  { %v4141_v42 = vmul.f32 1.442695, %v4139_v40 }
 0xddc   :  { %v4138_v36 = vpop.xlane.xlu1 %4137 }
 0xddd   :  { %5799 = vpow2.f32 %v4141_v42  ;;  %v4140_v43 = vsub.f32 %v4132_v37, %v4138_v36  ;;  %v5382_v42 = vld [vmem:[%s6788_s6] ss:$0 sm:$0xff] }
 0xddf   :  { %v4143_v44 = vmul.f32 1.442695, %v4140_v43 }
 0xde1   :  { %5801 = vpow2.f32 %v4143_v44 }
 0xdea   :  { %v5800_v45 = vpop.eup %5799 }
 0xdeb   :  { %v4145_v46 = vsel %vm918_vm6, %v5800_v45, 0.0 }
 0xdec   :  { %4146 = vadd.xlane.f32.xlu0 %v4145_v46 }
 0xdee   :  { %v5802_v47 = vpop.eup %5801 }
 0xdef   :  { %v4148_v48 = vsel %vm918_vm6, %v5802_v47, 0.0 }
 0xdf0   :  { %4149 = vadd.xlane.f32.xlu1 %v4148_v48 }
 0xe75   :  { %v4147_v49 = vpop.xlane.xlu0 %4146 }
 0xe76   :  { %5803 = vrcp.f32 %v4147_v49 }
 0xe79   :  { %v4150_v54 = vpop.xlane.xlu1 %4149 }
 0xe7a   :  { %5805 = vrcp.f32 %v4150_v54 }
 0xe83   :  { %v5804_v50 = vpop.eup %5803 }
 0xe84   :  { %v4153_v51 = vmul.f32 %v5804_v50, %v5800_v45 }
 0xe86   :  { %v4155_v58 = vpack.c.bf16 %v4153_v51, %v4153_v51 }
 0xe87   :  { %v5806_v59 = vpop.eup %5805 }
 0xe88   :  { %5690 = vmatmul.mubr.msk.bf16.vlgmr.msra.gmra.mxu1 %vm1025_vm7, %v4155_v58  ;;  %v4154_v60 = vmul.f32 %v5806_v59, %v5802_v47 }
 0xe89   :  { %5701 = vmatprep.mubr.msk.bf16.mxu1 %vm5822_vm1, %v5821_v15  ;;  %5700 = vmatpush3.bf16.msra.mxu1 %v4484_v63 }
 0xe8a   :  { %v4156_v61 = vpack.c.bf16 %v4154_v60, %v4154_v60  ;;  %5713 = vmatprep.subr.bf16.mxu1 %v5821_v15 }
 0xe8c   :  { %5696 = vmatmul.mubr.msk.bf16.vlgmr.msra.gmra.mxu0 %vm1025_vm7, %v4156_v61 }
 0xe8d   :  { %5709 = vmatprep.mubr.msk.bf16.mxu0 %vm5822_vm1, %v5821_v15 }
 0xf48   :  { %v4279_v2 = vpop.f32.mrf.mxu1 }
 0xf49   :  { %v4333_v5 = vcombine.high %v4279_v2, %v4279_v2  ;;  %v4340_v8 = vrot.slane %v4279_v2, %v5925_v32 }
 0xf4a   :  { %v5691_v56 = vpop.f32.mrf.mxu1 }
 0xf4b   :  { %v4348_v1 = vcombine.high %v4340_v8, %v4340_v8  ;;  %v4347_v7 = vrot.slane %v4333_v5, %v5925_v32  ;;  %v4355_v13 = vrot.slane %v4340_v8, %v5925_v32 }
 0xf4c   :  { %v4282_v9 = vpop.f32.mrf.mxu1  ;;  %v4325_v11 = vpop.f32.mrf.mxu0 }
 0xf4d   :  { %v4369_v14 = vrot.slane %v4348_v1, %v5925_v32  ;;  %v4372_v18 = vcombine.high %v4325_v11, %v4325_v11  ;;  %v4379_v41 = vrot.slane %v4325_v11, %v5925_v32  ;;  %v4362_v6 = vrot.slane %v4347_v7, %v5925_v32 }
 0xf4e   :  { %v5692_v3 = vpop.f32.mrf.mxu1  ;;  %v5697_v0 = vpop.f32.mrf.mxu0 }
 0xf4f   :  { %v4411_v52 = vcombine.low %v4355_v13, %v4369_v14  ;;  %v5379_v19 = vcombine.high %v4355_v13, %v4369_v14  ;;  %v4386_v20 = vrot.slane %v4372_v18, %v5925_v32  ;;  %v4387_v22 = vcombine.high %v4379_v41, %v4379_v41 }
 0xf50   :  { %v4394_v26 = vrot.slane %v4379_v41, %v5925_v32  ;;  %v4328_v10 = vpop.f32.mrf.mxu0 }
 0xf51   :  { %v4408_v23 = vrot.slane %v4387_v22, %v5925_v32  ;;  %v4421_v25 = vrot.slane %v4411_v52, %v5925_v32  ;;  %v4428_v27 = vrot.slane %v5379_v19, %v5925_v32  ;;  %v4401_v33 = vrot.slane %v4386_v20, %v5925_v32 }
 0xf52   :  { %v4409_v28 = vcombine.high %v4394_v26, %v4394_v26  ;;  %v4413_v30 = vcombine.low %v4362_v6, %v4394_v26  ;;  %v5698_v31 = vpop.f32.mrf.mxu0  ;;  %v5819_v6 = vld [vmem:[%s6782_s0] sm:$0x1f] }
 0xf53   :  { %v4410_v4 = vcombine.high %v4408_v23, %v4408_v23  ;;  %v4443_v17 = vcombine.low %v4421_v25, %v4428_v27 }
 0xf54   :  { %v4414_v34 = vcombine.low %v4408_v23, %v4409_v28  ;;  %v4435_v35 = vrot.slane %v4413_v30, %v5925_v32  ;;  %v5820_v28 = vld [vmem:[%s6782_s0 + $0x8] sm:$0x1f] }
 0xf55   :  { %v4460_v57 = vcombine.low %v4410_v4, %v4401_v33  ;;  %v4451_v21 = vrot.slane %v4443_v17, %v5925_v32 }
 0xf56   :  { %v4442_v53 = vrot.slane %v4414_v34, %v5925_v32 }
 0xf57   :  { %v4467_v29 = vrot.slane %v4460_v57, %v5925_v32 }
 0xf58   :  { %v4444_v37 = vcombine.low %v4435_v35, %v4442_v53 }
 0xf59   :  { %v4474_v38 = vrot.slane %v4467_v29, %v5925_v32 }
 0xf5a   :  { %v4458_v12 = vrot.slane %v4444_v37, %v5925_v32 }
 0xf5c   :  { %v4459_v24 = vcombine.low %v4451_v21, %v4458_v12  ;;  %v5761_v12 = vld [vmem:[%s6789_s9 + $0x8] sm:$0xff]  }
 0xf5d   :  { %5706 = vmatpush3.bf16.msra.mxu0 %v5761_v12 }
 0xf5e   :  { %v4477_v39 = vpack.c.bf16 %v4474_v38, %v4459_v24  ;;  %v5762_v24 = vld [vmem:[%s6789_s9] sm:$0xff]   ;;  %5707 = vmatprep.subr.bf16.mxu0 %v5821_v15 }
 0xf60   :  { %5702 = vmatmul.mubr.msk.bf16.vlgmr.msra.gmra.mxu1 %vm823_vm4, %v4477_v39 }
 0xf61   :  { %5729 = vmatprep.mubr.msk.bf16.mxu1 %vm5822_vm1, %v5821_v15  ;;  %5708 = vmatpush3.bf16.msra.mxu0 %v5762_v24 }
0x1020   :  { %v4520_v40 = vpop.f32.mrf.mxu1 }
0x1021   :  { %v4527_v36 = vadd.f32 %v4520_v40, %v6544_v55 }
0x1022   :  { %v5703_v43 = vpop.f32.mrf.mxu1 }
0x1023   :  { %v4536_v44 = vadd.f32 %v5382_v42, %v4527_v36 }
0x1024   :  { %v4523_v45 = vpop.f32.mrf.mxu1 }
0x1025   :  { %v4540_v46 = vcombine.high %v4536_v44, %v4536_v44  ;;  %v4547_v47 = vrot.slane %v4536_v44, %v5925_v32  ;;  %v4528_v48 = vadd.f32 %v4523_v45, %v6548_v16  ;;  %v5384_v45 = vld [vmem:[%s6790_s7] ss:$0 sm:$0xff] }
0x1026   :  { %v5704_v49 = vpop.f32.mrf.mxu1 }
0x1027   :  { %v4554_v54 = vrot.slane %v4540_v46, %v5925_v32  ;;  %v4555_v50 = vcombine.high %v4547_v47, %v4547_v47  ;;  %v4537_v51 = vadd.f32 %v5382_v42, %v4528_v48  ;;  %v4563_v58 = vrot.slane %v4547_v47, %v5925_v32  ;;  %v5385_v47 = vld [vmem:[%s6791_s8] ss:$0 sm:$0xff] }
0x1029   :  { %v4556_v59 = vcombine.high %v4554_v54, %v4554_v54  ;;  %v4570_v60 = vrot.slane %v4554_v54, %v5925_v32  ;;  %v4577_v55 = vrot.slane %v4555_v50, %v5925_v32  ;;  %v4595_v61 = vrot.slane %v4537_v51, %v5925_v32 }
0x102b   :  { %v4584_v62 = vrot.slane %v4556_v59, %v5925_v32  ;;  %v4586_v63 = vcombine.high %v4570_v60, %v4570_v60  ;;  %v4611_v2 = vcombine.low %v4563_v58, %v4577_v55  ;;  %v5383_v5 = vcombine.high %v4563_v58, %v4577_v55 }
0x102c   :  { %v4633_v16 = vrot.slane %v4570_v60, %v5925_v32  ;;  %v4596_v8 = vcombine.high %v4595_v61, %v4595_v61  ;;  %v4603_v56 = vrot.slane %v4595_v61, %v5925_v32 }
0x102d   :  { %v4619_v1 = vrot.slane %v4611_v2, %v5925_v32  ;;  %v4626_v7 = vrot.slane %v5383_v5, %v5925_v32  ;;  %v4650_v9 = vcombine.low %v4584_v62, %v4586_v63  ;;  %v4588_v11 = vcombine.high %v4584_v62, %v4584_v62 }
0x102e   :  { %v4610_v13 = vrot.slane %v4596_v8, %v5925_v32  ;;  %v4648_v41 = vrot.slane %v4633_v16, %v5925_v32 }
0x102f   :  { %v4651_v14 = vcombine.low %v4588_v11, %v4603_v56  ;;  %v4634_v18 = vcombine.low %v4619_v1, %v4626_v7  ;;  %v4658_v19 = vrot.slane %v4650_v9, %v5925_v32 }
0x1030   :  { %v4672_v0 = vrot.slane %v4610_v13, %v5925_v32 }
0x1031   :  { %v4665_v3 = vrot.slane %v4651_v14, %v5925_v32  ;;  %v4641_v52 = vrot.slane %v4634_v18, %v5925_v32 }
0x1032   :  { %v4687_v23 = vrot.slane %v4672_v0, %v5925_v32 }
0x1033   :  { %v4649_v20 = vcombine.low %v4641_v52, %v4648_v41  ;;  %v4673_v22 = vcombine.low %v4658_v19, %v4665_v3 }
0x1035   :  { %v6667_v26 = vadd.f32 %v5819_v6, %v4649_v20  ;;  %v4680_v10 = vrot.slane %v4673_v22, %v5925_v32 }
0x1037   :  { %v4695_v25 = vsel %vm49_vm0, %v6667_v26, 0.0  ;;  %v4688_v27 = vcombine.low %v4680_v10, %v4687_v23 }
0x1038   :  { %4696 = vadd.xlane.f32.xlu0 %v4695_v25 }
0x1039   :  { %v6676_v30 = vadd.f32 %v5820_v28, %v4688_v27 }
0x103b   :  { %v4698_v31 = vsel %vm49_vm0, %v6676_v30, 0.0 }
0x103c   :  { %4699 = vadd.xlane.f32.xlu1 %v4698_v31 }
0x10c1   :  { %v4697_v33 = vpop.xlane.xlu0 %4696 }
0x10c2   :  { %v4701_v4 = vmul.f32 0.03125, %v4697_v33 }
0x10c4   :  { %v4703_v34 = vsub.f32 %v6667_v26, %v4701_v4  ;;  %v5763_v4 = vld [vmem:[%s6792_s11 + $0x38] sm:$0xff]  }
0x10c5   :  { %v4700_v57 = vpop.xlane.xlu1 %4699  ;;  %5714 = vmatpush3.bf16.msra.mxu1 %v5763_v4 }
0x10c6   :  { %v4702_v17 = vmul.f32 0.03125, %v4700_v57  ;;  %v4705_v35 = vmul.f32 %v4703_v34, %v4703_v34  ;;  %5715 = vmatprep.subr.bf16.mxu1 %v5821_v15  ;;  %v5765_v57 = vld [vmem:[%s6792_s11 + $0x28] sm:$0xff]  }
0x10c8   :  { %v4704_v53 = vsub.f32 %v6676_v30, %v4702_v17  ;;  %v4707_v37 = vsel %vm49_vm0, %v4705_v35, 0.0  ;;  %v5766_v17 = vld [vmem:[%s6792_s11 + $0x20] sm:$0xff]   ;;  %v5767_v35 = vld [vmem:[%s6792_s11 + $0x18] sm:$0xff]  }
0x10c9   :  { %4708 = vadd.xlane.f32.xlu0 %v4707_v37  ;;  %v5769_v37 = vld [vmem:[%s6792_s11 + $0x8] sm:$0xff]  }
0x10ca   :  { %v4706_v29 = vmul.f32 %v4704_v53, %v4704_v53 }
0x10cc   :  { %v4710_v21 = vsel %vm49_vm0, %v4706_v29, 0.0  ;;  %v5770_v29 = vld [vmem:[%s6792_s11] sm:$0xff]  }
0x10cd   :  { %4711 = vadd.xlane.f32.xlu1 %v4710_v21  ;;  %v5387_v21 = vld [vmem:[%s6793_s10] ss:$0 sm:$0xff] }
0x1152   :  { %v4709_v38 = vpop.xlane.xlu0 %4708 }
0x1153   :  { %v4713_v39 = vmul.f32 0.03125, %v4709_v38 }
0x1155   :  { %v4715_v40 = vadd.f32 1e-05, %v4713_v39 }
0x1156   :  { %v4712_v42 = vpop.xlane.xlu1 %4711 }
0x1157   :  { %5807 = vrsqrt.f32 %v4715_v40  ;;  %v4714_v36 = vmul.f32 0.03125, %v4712_v42 }
0x1159   :  { %v4716_v43 = vadd.f32 1e-05, %v4714_v36 }
0x115b   :  { %5809 = vrsqrt.f32 %v4716_v43 }
0x1164   :  { %v5808_v44 = vpop.eup %5807 }
0x1165   :  { %v4719_v46 = vmul.f32 %v5808_v44, %v4703_v34  ;;  %v5764_v34 = vld [vmem:[%s6792_s11 + $0x30] sm:$0xff]  }
0x1166   :  { %5716 = vmatpush3.bf16.msra.mxu1 %v5764_v34 }
0x1167   :  { %v4727_v48 = vmul.f32 %v5384_v45, %v4719_v46  ;;  %5717 = vmatprep.subr.bf16.mxu1 %v5821_v15 }
0x1168   :  { %v5810_v49 = vpop.eup %5809 }
0x1169   :  { %v4735_v54 = vadd.f32 %v5385_v47, %v4727_v48  ;;  %v4720_v50 = vmul.f32 %v5810_v49, %v4704_v53  ;;  %v5768_v53 = vld [vmem:[%s6792_s11 + $0x10] sm:$0xff]  }
0x116a   :  { %5718 = vmatpush3.bf16.msra.mxu1 %v5765_v57 }
0x116b   :  { %v4739_v51 = vcombine.high %v4735_v54, %v4735_v54  ;;  %v4746_v58 = vrot.slane %v4735_v54, %v5925_v32  ;;  %v4728_v59 = vmul.f32 %v5384_v45, %v4720_v50  ;;  %5719 = vmatprep.subr.bf16.mxu1 %v5821_v15 }
0x116d   :  { %v4753_v60 = vrot.slane %v4739_v51, %v5925_v32  ;;  %v4754_v55 = vcombine.high %v4746_v58, %v4746_v58  ;;  %v4736_v61 = vadd.f32 %v5385_v47, %v4728_v59  ;;  %v4761_v62 = vrot.slane %v4746_v58, %v5925_v32  ;;  %v5391_v59 = vld [vmem:[%s6794_s12] ss:$0 sm:$0xff] }
0x116e   :  { %5720 = vmatpush3.bf16.msra.mxu1 %v5766_v17 }
0x116f   :  { %v4778_v63 = vcombine.high %v4736_v61, %v4736_v61  ;;  %v4785_v2 = vrot.slane %v4736_v61, %v5925_v32  ;;  %v4775_v5 = vrot.slane %v4754_v55, %v5925_v32  ;;  %v4768_v16 = vrot.slane %v4753_v60, %v5925_v32  ;;  %5721 = vmatprep.subr.bf16.mxu1 %v5821_v15 }
0x1171   :  { %v4793_v8 = vcombine.high %v4785_v2, %v4785_v2  ;;  %v4800_v56 = vrot.slane %v4785_v2, %v5925_v32  ;;  %v4792_v1 = vrot.slane %v4778_v63, %v5925_v32  ;;  %v4817_v7 = vcombine.low %v4761_v62, %v4775_v5 }
0x1172   :  { %v5386_v9 = vcombine.high %v4761_v62, %v4775_v5  ;;  %5722 = vmatpush3.bf16.msra.mxu1 %v5767_v35 }
0x1173   :  { %v4814_v11 = vrot.slane %v4793_v8, %v5925_v32  ;;  %v4815_v13 = vcombine.high %v4800_v56, %v4800_v56  ;;  %v4819_v14 = vcombine.low %v4768_v16, %v4800_v56  ;;  %v4827_v18 = vrot.slane %v4817_v7, %v5925_v32  ;;  %5723 = vmatprep.subr.bf16.mxu1 %v5821_v15 }
0x1174   :  { %v4834_v41 = vrot.slane %v5386_v9, %v5925_v32  ;;  %v4807_v3 = vrot.slane %v4792_v1, %v5925_v32 }
0x1175   :  { %v4816_v0 = vcombine.high %v4814_v11, %v4814_v11  ;;  %v4820_v52 = vcombine.low %v4814_v11, %v4815_v13  ;;  %v4841_v19 = vrot.slane %v4819_v14, %v5925_v32 }
0x1176   :  { %v4849_v22 = vcombine.low %v4827_v18, %v4834_v41  ;;  %5724 = vmatpush3.bf16.msra.mxu1 %v5768_v53 }
0x1177   :  { %v4848_v20 = vrot.slane %v4820_v52, %v5925_v32  ;;  %v4866_v6 = vcombine.low %v4816_v0, %v4807_v3  ;;  %5725 = vmatprep.subr.bf16.mxu1 %v5821_v15 }
0x1178   :  { %v4857_v25 = vrot.slane %v4849_v22, %v5925_v32 }
0x1179   :  { %v4850_v10 = vcombine.low %v4841_v19, %v4848_v20  ;;  %v4873_v23 = vrot.slane %v4866_v6, %v5925_v32 }
0x117a   :  { %5726 = vmatpush3.bf16.msra.mxu1 %v5769_v37 }
0x117b   :  { %v4864_v27 = vrot.slane %v4850_v10, %v5925_v32  ;;  %v4880_v31 = vrot.slane %v4873_v23, %v5925_v32  ;;  %5727 = vmatprep.subr.bf16.mxu1 %v5821_v15 }
0x117d   :  { %v4865_v28 = vcombine.low %v4857_v25, %v4864_v27 }
0x117e   :  { %5728 = vmatpush3.bf16.msra.mxu1 %v5770_v29 }
0x117f   :  { %v4883_v33 = vpack.c.bf16 %v4880_v31, %v4865_v28 }
0x1181   :  { %5710 = vmatmul.mubr.msk.bf16.vlgmr.msra.gmra.mxu0 %vm263_vm2, %v4883_v33 }
0x1241   :  { %v4944_v12 = vpop.f32.mrf.mxu0 }
0x1242   :  { %v4945_v24 = vadd.f32 %v5387_v21, %v4944_v12 }
0x1243   :  { %v5711_v38 = vpop.f32.mrf.mxu0 }
0x1244   :  { %v4951_v39 = vmul.f32 -1.702, %v4945_v24 }
0x1245   :  { %v4947_v40 = vpop.f32.mrf.mxu0 }
0x1246   :  { %v4953_v42 = vmul.f32 1.442695, %v4951_v39  ;;  %v4948_v36 = vadd.f32 %v5387_v21, %v4947_v40 }
0x1247   :  { %v5712_v43 = vpop.f32.mrf.mxu0 }
0x1248   :  { %5811 = vpow2.f32 %v4953_v42  ;;  %v4952_v44 = vmul.f32 -1.702, %v4948_v36 }
0x124a   :  { %v4955_v45 = vmul.f32 1.442695, %v4952_v44 }
0x124c   :  { %5813 = vpow2.f32 %v4955_v45 }
0x1255   :  { %v5812_v46 = vpop.eup %5811 }
0x1256   :  { %v4957_v47 = vadd.f32 1.0, %v5812_v46 }
0x1258   :  { %5815 = vrcp.f32 %v4957_v47 }
0x1259   :  { %v5814_v15 = vpop.eup %5813 }
0x125a   :  { %v4958_v48 = vadd.f32 1.0, %v5814_v15 }
0x125c   :  { %5817 = vrcp.f32 %v4958_v48 }
0x1265   :  { %v5816_v49 = vpop.eup %5815 }
0x1266   :  { %v4961_v50 = vmul.f32 %v5816_v49, %v4945_v24 }
0x1269   :  { %v5818_v54 = vpop.eup %5817 }
0x126a   :  { %v4962_v51 = vmul.f32 %v5818_v54, %v4948_v36 }
0x126c   :  { %v4963_v58 = vpack.c.bf16 %v4962_v51, %v4961_v50 }
0x126e   :  { %5730 = vmatmul.mubr.bf16.vlgmr.msra.gmra.mxu1 %v4963_v58 }
0x132e   :  { %v5069_v60 = vpop.f32.mrf.mxu1 }
0x132f   :  { %v5070_v55 = vadd.f32 %v5391_v59, %v5069_v60 }
0x1330   :  { %v5731_v61 = vpop.f32.mrf.mxu1 }
0x1331   :  { %v5078_v62 = vcombine.high %v5070_v55, %v5070_v55  ;;  %v5085_v63 = vrot.slane %v5070_v55, %v5925_v32 }
0x1332   :  { %v5072_v2 = vpop.f32.mrf.mxu1 }
0x1333   :  { %v5092_v5 = vrot.slane %v5078_v62, %v5925_v32  ;;  %v5093_v16 = vcombine.high %v5085_v63, %v5085_v63  ;;  %v5073_v8 = vadd.f32 %v5391_v59, %v5072_v2  ;;  %v5101_v56 = vrot.slane %v5085_v63, %v5925_v32 }
0x1334   :  { %v5732_v1 = vpop.f32.mrf.mxu1 }
0x1335   :  { %v5094_v7 = vcombine.high %v5092_v5, %v5092_v5  ;;  %v5108_v9 = vrot.slane %v5092_v5, %v5925_v32  ;;  %v5115_v11 = vrot.slane %v5093_v16, %v5925_v32  ;;  %v5133_v13 = vrot.slane %v5073_v8, %v5925_v32 }
0x1337   :  { %v5122_v14 = vrot.slane %v5094_v7, %v5925_v32  ;;  %v5124_v18 = vcombine.high %v5108_v9, %v5108_v9  ;;  %v5149_v41 = vcombine.low %v5101_v56, %v5115_v11  ;;  %v5400_v3 = vcombine.high %v5101_v56, %v5115_v11 }
0x1338   :  { %v5171_v0 = vrot.slane %v5108_v9, %v5925_v32  ;;  %v5134_v52 = vcombine.high %v5133_v13, %v5133_v13  ;;  %v5141_v19 = vrot.slane %v5133_v13, %v5925_v32 }
0x1339   :  { %v5157_v20 = vrot.slane %v5149_v41, %v5925_v32  ;;  %v5164_v22 = vrot.slane %v5400_v3, %v5925_v32  ;;  %v5188_v6 = vcombine.low %v5122_v14, %v5124_v18  ;;  %v5126_v10 = vcombine.high %v5122_v14, %v5122_v14 }
0x133a   :  { %v5148_v23 = vrot.slane %v5134_v52, %v5925_v32  ;;  %v5186_v28 = vrot.slane %v5171_v0, %v5925_v32 }
0x133b   :  { %v5172_v25 = vcombine.low %v5157_v20, %v5164_v22  ;;  %v5189_v27 = vcombine.low %v5126_v10, %v5141_v19  ;;  %v5196_v33 = vrot.slane %v5188_v6, %v5925_v32 }
0x133c   :  { %v5210_v34 = vrot.slane %v5148_v23, %v5925_v32 }
0x133d   :  { %v5179_v31 = vrot.slane %v5172_v25, %v5925_v32  ;;  %v5203_v4 = vrot.slane %v5189_v27, %v5925_v32 }
0x133e   :  { %v5225_v37 = vrot.slane %v5210_v34, %v5925_v32 }
0x133f   :  { %v5187_v57 = vcombine.low %v5179_v31, %v5186_v28  ;;  %v5211_v17 = vcombine.low %v5196_v33, %v5203_v4 }
0x1341   :  { %v5229_v35 = vadd.f32 %v5187_v57, %v6667_v26  ;;  %v5218_v53 = vrot.slane %v5211_v17, %v5925_v32 }
0x1343   :  { %5231 = vst.msk [vmem:[%s6795_s13] sm:$0x1f] %vm49_vm0, %v5229_v35  ;;  %v5226_v29 = vcombine.low %v5218_v53, %v5225_v37 }
0x1345   :  { %v5230_v21 = vadd.f32 %v5226_v29, %v6676_v30 }
0x1347   :  { %5232 = vst.msk [vmem:[%s6795_s13 + $0x8] sm:$0x1f] %vm49_vm0, %v5230_v21 }

// kernel: custom_clip_forward.10
= control target key start
LH: loop header
LB: loop body
LE: loop exit
PB: predicated region body
PF: predicated region fallthrough
CT: control target
= control target key end

     0   :  { %vm53_vm0 = vcmask 261120   ;;  %v5648_v43 = vmov 0.0   ;;  %vm5649_vm1 = vmmov 0   ;;  %vm431_vm2 = vcmask 64512   ;;  %s6819_s0 = inlined_call_operand.vmem [shape: f32[6,8,32], index: 0, kind: input, shape index: {}]   ;;  %s6820_s3 = inlined_call_operand.vmem [shape: bf16[3,4,32,8], index: 3, kind: input, shape index: {}]   ;;  %s6821_s1 = inlined_call_operand.vmem [shape: f32[1,32], index: 1, kind: input, shape index: {}]   ;;  %s6822_s2 = inlined_call_operand.vmem [shape: f32[1,32], index: 2, kind: input, shape index: {}]   ;;  %s6823_s4 = inlined_call_operand.vmem [shape: f32[3,4,1,8], index: 4, kind: input, shape index: {}]   ;;  %s6824_s5 = inlined_call_operand.vmem [shape: bf16[4,8,32], index: 5, kind: input, shape index: {}]   ;;  %s6825_s6 = inlined_call_operand.vmem [shape: f32[1,32], index: 6, kind: input, shape index: {}]   ;;  %s6826_s9 = inlined_call_operand.vmem [shape: bf16[32,128], index: 9, kind: input, shape index: {}]   ;;  %s6827_s7 = inlined_call_operand.vmem [shape: f32[1,32], index: 7, kind: input, shape index: {}]   ;;  %s6828_s8 = inlined_call_operand.vmem [shape: f32[1,32], index: 8, kind: input, shape index: {}]   ;;  %s6829_s11 = inlined_call_operand.vmem [shape: bf16[128,32], index: 11, kind: input, shape index: {}]   ;;  %s6830_s10 = inlined_call_operand.vmem [shape: f32[1,128], index: 10, kind: input, shape index: {}]   ;;  %s6831_s12 = inlined_call_operand.vmem [shape: f32[1,32], index: 12, kind: input, shape index: {}]   ;;  %s6832_s13 = inlined_call_operand.vmem [shape: f32[6,8,32], index: 13, kind: output, shape index: {}]  }
   0x1   :  { %v45_v0 = vld [vmem:[%s6819_s0] sm:$0xff]  ;;  %v47_v1 = vld [vmem:[%s6819_s0 + $0x10] sm:$0xff]  ;;  %v46_v2 = vld [vmem:[%s6819_s0 + $0x8] sm:$0xff]  ;;  %4878 = vmatprep.subr.bf16.mxu0 %v5648_v43  ;;  %5458 = vmatprep.subr.bf16.mxu1 %v5648_v43  ;;  %vm801_vm3 = vcmask 1043456  }
   0x2   :  { %v54_v3 = vsel %vm53_vm0, %v45_v0, 0.0  ;;  %v60_v4 = vsel %vm53_vm0, %v47_v1, 0.0  ;;  %v48_v5 = vld [vmem:[%s6819_s0 + $0x18] sm:$0xff]  ;;  %v57_v6 = vsel %vm53_vm0, %v46_v2, 0.0  ;;  %v49_v8 = vld [vmem:[%s6819_s0 + $0x20] sm:$0xff]  ;;  %v50_v9 = vld [vmem:[%s6819_s0 + $0x28] sm:$0xff]  ;;  %4882 = vmatprep.mubr.msk.bf16.mxu0 %vm5649_vm1, %v5648_v43  ;;  %4906 = vmatprep.mubr.msk.bf16.mxu1 %vm5649_vm1, %v5648_v43 }
   0x3   :  { %55 = vadd.xlane.f32.xlu0 %v54_v3  ;;  %61 = vadd.xlane.f32.xlu1 %v60_v4  ;;  %v63_v7 = vsel %vm53_vm0, %v48_v5, 0.0  ;;  %v66_v10 = vsel %vm53_vm0, %v49_v8, 0.0  ;;  %v69_v11 = vsel %vm53_vm0, %v50_v9, 0.0  ;;  %v5464_v42 = vld [vmem:[%s6820_s3 + $0x8] sm:$0xff]   ;;  %v5465_v44 = vld [vmem:[%s6820_s3] sm:$0xff]  }
   0x4   :  { %4879 = vmatpush3.bf16.msra.mxu0 %v5464_v42  ;;  %v5466_v45 = vld [vmem:[%s6820_s3 + $0x48] sm:$0xff]   ;;  %v5467_v46 = vld [vmem:[%s6820_s3 + $0x40] sm:$0xff]  }
   0x5   :  { %4880 = vmatprep.subr.bf16.mxu0 %v5648_v43  ;;  %5460 = vmatpush3.bf16.msra.mxu1 %v5466_v45  ;;  %v4480_v3 = vld [vmem:[%s6821_s1] ss:$0 sm:$0xff] }
   0x6   :  { %5459 = vmatprep.subr.bf16.mxu1 %v5648_v43 }
   0x7   :  { %58 = vadd.xlane.f32.xlu0 %v57_v6  ;;  %64 = vadd.xlane.f32.xlu1 %v63_v7 }
   0x8   :  { %4881 = vmatpush3.bf16.msra.mxu0 %v5465_v44 }
   0x9   :  { %4894 = vmatprep.subr.bf16.mxu0 %v5648_v43  ;;  %5461 = vmatpush3.bf16.msra.mxu1 %v5467_v46 }
   0xa   :  { %4926 = vmatprep.subr.bf16.mxu1 %v5648_v43 }
   0xb   :  { %67 = vadd.xlane.f32.xlu0 %v66_v10  ;;  %70 = vadd.xlane.f32.xlu1 %v69_v11 }
  0x8c   :  { %v56_v12 = vpop.xlane.xlu0 %55  ;;  %v62_v13 = vpop.xlane.xlu1 %61 }
  0x8d   :  { %v73_v14 = vmul.f32 0.03125, %v56_v12  ;;  %v75_v15 = vmul.f32 0.03125, %v62_v13 }
  0x8f   :  { %v5744_v16 = vsub.f32 %v45_v0, %v73_v14  ;;  %v5746_v17 = vsub.f32 %v47_v1, %v75_v15 }
  0x90   :  { %v59_v18 = vpop.xlane.xlu0 %58  ;;  %v65_v19 = vpop.xlane.xlu1 %64 }
  0x91   :  { %v74_v20 = vmul.f32 0.03125, %v59_v18  ;;  %v76_v21 = vmul.f32 0.03125, %v65_v19  ;;  %v85_v22 = vmul.f32 %v5744_v16, %v5744_v16  ;;  %v87_v23 = vmul.f32 %v5746_v17, %v5746_v17 }
  0x93   :  { %v5752_v24 = vsub.f32 %v46_v2, %v74_v20  ;;  %v5754_v25 = vsub.f32 %v48_v5, %v76_v21  ;;  %v91_v26 = vsel %vm53_vm0, %v85_v22, 0.0  ;;  %v97_v29 = vsel %vm53_vm0, %v87_v23, 0.0 }
  0x94   :  { %92 = vadd.xlane.f32.xlu0 %v91_v26  ;;  %v68_v27 = vpop.xlane.xlu0 %67  ;;  %v71_v28 = vpop.xlane.xlu1 %70 }
  0x95   :  { %v77_v30 = vmul.f32 0.03125, %v68_v27  ;;  %v78_v31 = vmul.f32 0.03125, %v71_v28  ;;  %v86_v32 = vmul.f32 %v5752_v24, %v5752_v24  ;;  %v88_v33 = vmul.f32 %v5754_v25, %v5754_v25 }
  0x97   :  { %v5762_v34 = vsub.f32 %v49_v8, %v77_v30  ;;  %v5764_v35 = vsub.f32 %v50_v9, %v78_v31  ;;  %v94_v36 = vsel %vm53_vm0, %v86_v32, 0.0  ;;  %v100_v37 = vsel %vm53_vm0, %v88_v33, 0.0  ;;  %v4481_v8 = vld [vmem:[%s6822_s2] ss:$0 sm:$0xff]  ;;  %v5468_v30 = vld [vmem:[%s6820_s3 + $0x88] sm:$0xff]  }
  0x98   :  { %98 = vadd.xlane.f32.xlu0 %v97_v29  ;;  %95 = vadd.xlane.f32.xlu1 %v94_v36  ;;  %v5469_v31 = vld [vmem:[%s6820_s3 + $0x80] sm:$0xff]  }
  0x99   :  { %v89_v38 = vmul.f32 %v5762_v34, %v5762_v34  ;;  %v90_v39 = vmul.f32 %v5764_v35, %v5764_v35 }
  0x9b   :  { %v103_v40 = vsel %vm53_vm0, %v89_v38, 0.0  ;;  %v106_v41 = vsel %vm53_vm0, %v90_v39, 0.0 }
  0x9c   :  { %101 = vadd.xlane.f32.xlu1 %v100_v37  ;;  %104 = vadd.xlane.f32.xlu0 %v103_v40 }
  0xa0   :  { %107 = vadd.xlane.f32.xlu1 %v106_v41 }
 0x11d   :  { %v93_v47 = vpop.xlane.xlu0 %92 }
 0x11e   :  { %v109_v48 = vmul.f32 0.03125, %v93_v47 }
 0x120   :  { %v115_v49 = vadd.f32 1e-05, %v109_v48 }
 0x121   :  { %v96_v50 = vpop.xlane.xlu1 %95  ;;  %v99_v51 = vpop.xlane.xlu0 %98 }
 0x122   :  { %5498 = vrsqrt.f32 %v115_v49  ;;  %v110_v52 = vmul.f32 0.03125, %v96_v50  ;;  %v111_v53 = vmul.f32 0.03125, %v99_v51  ;;  %v4493_v49 = vld [vmem:[%s6823_s4 + $0x4] ss:$0 sm:$0xff] }
 0x124   :  { %v116_v54 = vadd.f32 1e-05, %v110_v52  ;;  %v117_v55 = vadd.f32 1e-05, %v111_v53 }
 0x125   :  { %v102_v56 = vpop.xlane.xlu1 %101  ;;  %v105_v57 = vpop.xlane.xlu0 %104 }
 0x126   :  { %5500 = vrsqrt.f32 %v116_v54  ;;  %v112_v58 = vmul.f32 0.03125, %v102_v56  ;;  %v113_v59 = vmul.f32 0.03125, %v105_v57  ;;  %v5870_v54 = vld [vmem:[%s6823_s4] ss:$0 sm:$0xff] }
 0x127   :  { %5502 = vrsqrt.f32 %v117_v55 }
 0x128   :  { %v118_v60 = vadd.f32 1e-05, %v112_v58  ;;  %v119_v61 = vadd.f32 1e-05, %v113_v59 }
 0x129   :  { %v108_v62 = vpop.xlane.xlu1 %107 }
 0x12a   :  { %5504 = vrsqrt.f32 %v118_v60  ;;  %v114_v63 = vmul.f32 0.03125, %v108_v62 }
 0x12b   :  { %5506 = vrsqrt.f32 %v119_v61 }
 0x12c   :  { %v120_v0 = vadd.f32 1e-05, %v114_v63 }
 0x12e   :  { %5508 = vrsqrt.f32 %v120_v0 }
 0x12f   :  { %v5499_v1 = vpop.eup %5498 }
 0x130   :  { %v127_v2 = vmul.f32 %v5499_v1, %v5744_v16 }
 0x132   :  { %v139_v5 = vmul.f32 %v4480_v3, %v127_v2 }
 0x133   :  { %v5501_v4 = vpop.eup %5500 }
 0x134   :  { %v128_v6 = vmul.f32 %v5501_v4, %v5752_v24  ;;  %v5503_v7 = vpop.eup %5502  ;;  %v151_v12 = vadd.f32 %v4481_v8, %v139_v5 }
 0x135   :  { %v129_v14 = vmul.f32 %v5503_v7, %v5746_v17 }
 0x136   :  { %v140_v9 = vmul.f32 %v4480_v3, %v128_v6 }
 0x137   :  { %v5505_v10 = vpop.eup %5504  ;;  %v141_v21 = vmul.f32 %v4480_v3, %v129_v14 }
 0x138   :  { %v5507_v11 = vpop.eup %5506  ;;  %v152_v13 = vadd.f32 %v4481_v8, %v140_v9  ;;  %v130_v15 = vmul.f32 %v5505_v10, %v5754_v25 }
 0x139   :  { %v131_v16 = vmul.f32 %v5507_v11, %v5762_v34  ;;  %v153_v25 = vadd.f32 %v4481_v8, %v141_v21 }
 0x13a   :  { %v5807_v18 = vpack.c.bf16 %v152_v13, %v151_v12  ;;  %v142_v19 = vmul.f32 %v4480_v3, %v130_v15 }
 0x13b   :  { %v5509_v20 = vpop.eup %5508  ;;  %v143_v22 = vmul.f32 %v4480_v3, %v131_v16 }
 0x13c   :  { %v132_v23 = vmul.f32 %v5509_v20, %v5764_v35  ;;  %4883 = vmatmul.mubr.msk.bf16.vlgmr.msra.gmra.mxu0 %vm53_vm0, %v5807_v18  ;;  %v154_v17 = vadd.f32 %v4481_v8, %v142_v19 }
 0x13d   :  { %4886 = vmatprep.mubr.msk.bf16.mxu0 %vm5649_vm1, %v5648_v43  ;;  %4895 = vmatpush3.bf16.msra.mxu0 %v5466_v45  ;;  %v155_v26 = vadd.f32 %v4481_v8, %v143_v22 }
 0x13e   :  { %v144_v24 = vmul.f32 %v4480_v3, %v132_v23  ;;  %4896 = vmatprep.subr.bf16.mxu0 %v5648_v43  ;;  %v5815_v28 = vpack.c.bf16 %v154_v17, %v153_v25  ;;  %v4504_v23 = vld [vmem:[%s6823_s4 + $0x8] ss:$0 sm:$0xff] }
 0x140   :  { %v156_v27 = vadd.f32 %v4481_v8, %v144_v24 }
 0x141   :  { %4897 = vmatpush3.bf16.msra.mxu0 %v5467_v46 }
 0x142   :  { %v5817_v29 = vpack.c.bf16 %v156_v27, %v155_v26  ;;  %4910 = vmatprep.subr.bf16.mxu0 %v5648_v43 }
 0x144   :  { %4887 = vmatmul.mubr.msk.bf16.gmra.mxu0 %vm53_vm0, %v5815_v28  ;;  %4907 = vmatmul.mubr.msk.bf16.vlgmr.msra.gmra.mxu1 %vm53_vm0, %v5817_v29 }
 0x145   :  { %4890 = vmatprep.mubr.msk.bf16.mxu0 %vm5649_vm1, %v5648_v43  ;;  %4928 = vmatprep.mubr.msk.bf16.mxu1 %vm5649_vm1, %v5648_v43 }
 0x14c   :  { %4891 = vmatmul.mubr.msk.bf16.gmra.mxu0 %vm53_vm0, %v5817_v29 }
 0x14d   :  { %4898 = vmatprep.mubr.msk.bf16.mxu0 %vm5649_vm1, %v5648_v43 }
 0x154   :  { %4899 = vmatmul.mubr.msk.bf16.vlgmr.msra.gmra.mxu0 %vm53_vm0, %v5807_v18 }
 0x155   :  { %4902 = vmatprep.mubr.msk.bf16.mxu0 %vm5649_vm1, %v5648_v43  ;;  %4911 = vmatpush3.bf16.msra.mxu0 %v5468_v30 }
 0x156   :  { %4912 = vmatprep.subr.bf16.mxu0 %v5648_v43 }
 0x159   :  { %4913 = vmatpush3.bf16.msra.mxu0 %v5469_v31 }
 0x15a   :  { %4944 = vmatprep.subr.bf16.mxu0 %v5648_v43 }
 0x15c   :  { %4903 = vmatmul.mubr.msk.bf16.gmra.mxu0 %vm53_vm0, %v5815_v28 }
 0x15d   :  { %4914 = vmatprep.mubr.msk.bf16.mxu0 %vm5649_vm1, %v5648_v43 }
 0x164   :  { %4915 = vmatmul.mubr.msk.bf16.vlgmr.msra.gmra.mxu0 %vm53_vm0, %v5807_v18 }
 0x165   :  { %4918 = vmatprep.mubr.msk.bf16.mxu0 %vm5649_vm1, %v5648_v43 }
 0x16c   :  { %4919 = vmatmul.mubr.msk.bf16.gmra.mxu0 %vm53_vm0, %v5815_v28 }
 0x16d   :  { %4922 = vmatprep.mubr.msk.bf16.mxu0 %vm5649_vm1, %v5648_v43 }
 0x174   :  { %4923 = vmatmul.mubr.msk.bf16.gmra.mxu0 %vm53_vm0, %v5817_v29 }
 0x175   :  { %4946 = vmatprep.mubr.msk.bf16.mxu0 %vm5649_vm1, %v5648_v43 }
 0x1fc   :  { %v232_v32 = vpop.f32.mrf.mxu0 }
 0x1fd   :  { %v233_v59 = vadd.f32 %v5870_v54, %v232_v32 }
 0x1fe   :  { %v4884_v33 = vpop.f32.mrf.mxu0 }
 0x1ff   :  { %v419_v63 = vpack.c.bf16 %v233_v59, %v233_v59 }
 0x200   :  { %v235_v34 = vpop.f32.mrf.mxu0 }
 0x201   :  { %v236_v5 = vadd.f32 %v5870_v54, %v235_v34 }
 0x202   :  { %v4885_v35 = vpop.f32.mrf.mxu0 }
 0x203   :  { %v420_v12 = vpack.c.bf16 %v236_v5, %v236_v5 }
 0x204   :  { %v240_v36 = vpop.f32.mrf.mxu0  ;;  %v330_v37 = vpop.f32.mrf.mxu1 }
 0x205   :  { %v331_v15 = vadd.f32 %v4493_v49, %v330_v37  ;;  %v241_v21 = vadd.f32 %v5870_v54, %v240_v36 }
 0x206   :  { %v4888_v38 = vpop.f32.mrf.mxu0  ;;  %v4908_v39 = vpop.f32.mrf.mxu1 }
 0x207   :  { %v429_v24 = vpack.c.bf16 %v331_v15, %v331_v15  ;;  %v421_v31 = vpack.c.bf16 %v241_v21, %v241_v21 }
 0x208   :  { %v243_v40 = vpop.f32.mrf.mxu0  ;;  %v333_v41 = vpop.f32.mrf.mxu1 }
 0x209   :  { %v334_v8 = vadd.f32 %v4493_v49, %v333_v41  ;;  %v244_v13 = vadd.f32 %v5870_v54, %v243_v40  ;;  %v620_v34 = vsel %vm431_vm2, %v429_v24, 0 }
 0x20a   :  { %v4889_v42 = vpop.f32.mrf.mxu0  ;;  %v4909_v44 = vpop.f32.mrf.mxu1 }
 0x20b   :  { %v430_v16 = vpack.c.bf16 %v334_v8, %v334_v8  ;;  %v422_v22 = vpack.c.bf16 %v244_v13, %v244_v13 }
 0x20c   :  { %v5860_v45 = vpop.f32.mrf.mxu0 }
 0x20d   :  { %v666_v25 = vsel %vm431_vm2, %v430_v16, 0  ;;  %v249_v39 = vadd.f32 %v5870_v54, %v5860_v45 }
 0x20e   :  { %v4892_v46 = vpop.f32.mrf.mxu0 }
 0x210   :  { %v5862_v47 = vpop.f32.mrf.mxu0 }
 0x211   :  { %v252_v32 = vadd.f32 %v5870_v54, %v5862_v47 }
 0x212   :  { %v4893_v48 = vpop.f32.mrf.mxu0 }
 0x213   :  { %v424_v40 = vpack.c.bf16 %v252_v32, %v252_v32  ;;  %v423_v48 = vpack.c.bf16 %v249_v39, %v249_v39 }
 0x214   :  { %v314_v50 = vpop.f32.mrf.mxu0 }
 0x215   :  { %v315_v51 = vadd.f32 %v4493_v49, %v314_v50 }
 0x216   :  { %v4900_v52 = vpop.f32.mrf.mxu0 }
 0x217   :  { %v425_v53 = vpack.c.bf16 %v315_v51, %v315_v51  ;;  %v160_v52 = vlaneseq }
 0x218   :  { %v317_v55 = vpop.f32.mrf.mxu0 }
 0x219   :  { %v436_v56 = vsel %vm431_vm2, %v425_v53, 0  ;;  %v318_v57 = vadd.f32 %v4493_v49, %v317_v55  ;;  %v161_v53 = vshrl.u32 %v160_v52, 7  ;;  %v163_v54 = vand.u32 127, %v160_v52 }
 0x21a   :  { %v4901_v58 = vpop.f32.mrf.mxu0  ;;  %4927 = vmatpush3.bf16.xpose.msra.mxu1 %v436_v56 }
 0x21b   :  { %4932 = vmatprep.subr.bf16.mxu1 %v5648_v43  ;;  %v426_v61 = vpack.c.bf16 %v318_v57, %v318_v57  ;;  %vm164_vm4 = vcmp.gt.s32.totalorder %v163_v54, %v161_v53 }
 0x21c   :  { %v322_v60 = vpop.f32.mrf.mxu0  ;;  %v5926_v56 = vsel %vm164_vm4, -1e+09, %v5648_v43 }
 0x21d   :  { %v482_v1 = vsel %vm431_vm2, %v426_v61, 0  ;;  %v323_v2 = vadd.f32 %v4493_v49, %v322_v60 }
 0x21e   :  { %v4904_v62 = vpop.f32.mrf.mxu0 }
 0x21f   :  { %v427_v9 = vpack.c.bf16 %v323_v2, %v323_v2 }
 0x220   :  { %v325_v0 = vpop.f32.mrf.mxu0 }
 0x221   :  { %v326_v3 = vadd.f32 %v4493_v49, %v325_v0  ;;  %4929 = vmatmul.mubr.msk.bf16.vlgmr.msra.gmra.mxu1 %vm431_vm2, %v419_v63  ;;  %v528_v19 = vsel %vm431_vm2, %v427_v9, 0 }
 0x222   :  { %v4905_v4 = vpop.f32.mrf.mxu0  ;;  %4933 = vmatpush3.bf16.xpose.msra.mxu1 %v482_v1  ;;  %4934 = vmatprep.mubr.msk.bf16.mxu1 %vm5649_vm1, %v5648_v43 }
 0x223   :  { %v428_v6 = vpack.c.bf16 %v326_v3, %v326_v3  ;;  %4938 = vmatprep.subr.bf16.mxu1 %v5648_v43 }
 0x224   :  { %v396_v7 = vpop.f32.mrf.mxu0 }
 0x225   :  { %v574_v10 = vsel %vm431_vm2, %v428_v6, 0  ;;  %v397_v35 = vadd.f32 %v4504_v23, %v396_v7 }
 0x226   :  { %v4916_v11 = vpop.f32.mrf.mxu0  ;;  %4945 = vmatpush3.bf16.xpose.msra.mxu0 %v574_v10 }
 0x227   :  { %4956 = vmatprep.subr.bf16.mxu0 %v5648_v43  ;;  %v792_v42 = vpack.c.bf16 %v397_v35, %v397_v35 }
 0x228   :  { %v399_v14 = vpop.f32.mrf.mxu0 }
 0x229   :  { %4935 = vmatmul.mubr.msk.bf16.vlgmr.msra.gmra.mxu1 %vm431_vm2, %v420_v12  ;;  %v400_v26 = vadd.f32 %v4504_v23, %v399_v14  ;;  %v803_v49 = vsel %vm801_vm3, %v792_v42, 0 }
 0x22a   :  { %v4917_v20 = vpop.f32.mrf.mxu0  ;;  %4939 = vmatpush3.bf16.xpose.msra.mxu1 %v528_v19  ;;  %4940 = vmatprep.mubr.msk.bf16.mxu1 %vm5649_vm1, %v5648_v43 }
 0x22b   :  { %4950 = vmatprep.subr.bf16.mxu1 %v5648_v43  ;;  %v793_v36 = vpack.c.bf16 %v400_v26, %v400_v26 }
 0x22c   :  { %v404_v17 = vpop.f32.mrf.mxu0 }
 0x22d   :  { %v5894_v27 = vadd.f32 %v4504_v23, %v404_v17  ;;  %4947 = vmatmul.mubr.msk.bf16.vlgmr.msra.gmra.mxu0 %vm431_vm2, %v422_v22  ;;  %v849_v44 = vsel %vm801_vm3, %v793_v36, 0 }
 0x22e   :  { %v4920_v30 = vpop.f32.mrf.mxu0  ;;  %4957 = vmatpush3.bf16.xpose.msra.mxu0 %v666_v25  ;;  %4958 = vmatprep.mubr.msk.bf16.mxu0 %vm5649_vm1, %v5648_v43 }
 0x22f   :  { %4968 = vmatprep.subr.bf16.mxu0 %v5648_v43 }
 0x230   :  { %v407_v33 = vpop.f32.mrf.mxu0 }
 0x231   :  { %v5903_v37 = vadd.f32 %v4504_v23, %v407_v33  ;;  %4941 = vmatmul.mubr.msk.bf16.vlgmr.msra.gmra.mxu1 %vm431_vm2, %v421_v31 }
 0x232   :  { %v4921_v38 = vpop.f32.mrf.mxu0  ;;  %4951 = vmatpush3.bf16.xpose.msra.mxu1 %v620_v34  ;;  %4952 = vmatprep.mubr.msk.bf16.mxu1 %vm5649_vm1, %v5648_v43 }
 0x233   :  { %4962 = vmatprep.subr.bf16.mxu1 %v5648_v43 }
 0x234   :  { %v412_v41 = vpop.f32.mrf.mxu0 }
 0x235   :  { %v5912_v46 = vadd.f32 %v4504_v23, %v412_v41  ;;  %4959 = vmatmul.mubr.msk.bf16.vlgmr.msra.gmra.mxu0 %vm431_vm2, %v424_v40 }
 0x236   :  { %v4924_v47 = vpop.f32.mrf.mxu0  ;;  %4969 = vmatpush3.bf16.msra.mxu0 %v849_v44  ;;  %4970 = vmatprep.mubr.msk.bf16.mxu0 %vm5649_vm1, %v5648_v43 }
 0x237   :  { %4980 = vmatprep.subr.bf16.mxu0 %v5648_v43 }
 0x238   :  { %v415_v45 = vpop.f32.mrf.mxu0 }
 0x239   :  { %v5919_v50 = vadd.f32 %v4504_v23, %v415_v45  ;;  %4953 = vmatmul.mubr.msk.bf16.vlgmr.msra.gmra.mxu1 %vm431_vm2, %v423_v48 }
 0x23a   :  { %v4925_v51 = vpop.f32.mrf.mxu0  ;;  %4963 = vmatpush3.bf16.msra.mxu1 %v803_v49  ;;  %4964 = vmatprep.mubr.msk.bf16.mxu1 %vm5649_vm1, %v5648_v43 }
 0x23b   :  { %4974 = vmatprep.subr.bf16.mxu1 %v5648_v43 }
 0x2e1   :  { %v472_v55 = vpop.f32.mrf.mxu1 }
 0x2e2   :  { %v708_v57 = vmul.f32 0.35355338, %v472_v55 }
 0x2e3   :  { %v4930_v58 = vpop.f32.mrf.mxu1 }
 0x2e4   :  { %v714_v59 = vadd.f32 %v708_v57, %v5926_v56 }
 0x2e5   :  { %v475_v60 = vpop.f32.mrf.mxu1 }
 0x2e6   :  { %v720_v61 = vsel %vm431_vm2, %v714_v59, -inf }
 0x2e7   :  { %721 = vmax.xlane.f32.xlu1 %v720_v61  ;;  %v4931_v62 = vpop.f32.mrf.mxu1 }
 0x2e9   :  { %v518_v63 = vpop.f32.mrf.mxu1 }
 0x2ea   :  { %v709_v0 = vmul.f32 0.35355338, %v518_v63 }
 0x2eb   :  { %v4936_v1 = vpop.f32.mrf.mxu1 }
 0x2ec   :  { %v715_v2 = vadd.f32 %v709_v0, %v5926_v56 }
 0x2ed   :  { %v521_v3 = vpop.f32.mrf.mxu1  ;;  %v610_v4 = vpop.f32.mrf.mxu0 }
 0x2ee   :  { %v711_v5 = vmul.f32 0.35355338, %v610_v4  ;;  %v723_v6 = vsel %vm431_vm2, %v715_v2, -inf }
 0x2ef   :  { %724 = vmax.xlane.f32.xlu0 %v723_v6  ;;  %v4937_v7 = vpop.f32.mrf.mxu1  ;;  %v4948_v8 = vpop.f32.mrf.mxu0 }
 0x2f0   :  { %v717_v9 = vadd.f32 %v711_v5, %v5926_v56 }
 0x2f1   :  { %v564_v10 = vpop.f32.mrf.mxu1  ;;  %v613_v11 = vpop.f32.mrf.mxu0 }
 0x2f2   :  { %v710_v12 = vmul.f32 0.35355338, %v564_v10  ;;  %v729_v13 = vsel %vm431_vm2, %v717_v9, -inf }
 0x2f3   :  { %v4942_v14 = vpop.f32.mrf.mxu1  ;;  %730 = vmax.xlane.f32.xlu0 %v729_v13  ;;  %v4949_v15 = vpop.f32.mrf.mxu0  ;;  %v794_v13 = vpack.c.bf16 %v5894_v27, %v5894_v27  ;;  %v795_v27 = vpack.c.bf16 %v5903_v37, %v5903_v37  ;;  %v796_v37 = vpack.c.bf16 %v5912_v46, %v5912_v46 }
 0x2f4   :  { %v716_v16 = vadd.f32 %v710_v12, %v5926_v56 }
 0x2f5   :  { %v567_v19 = vpop.f32.mrf.mxu1  ;;  %v702_v20 = vpop.f32.mrf.mxu0 }
 0x2f6   :  { %v713_v21 = vmul.f32 0.35355338, %v702_v20  ;;  %v726_v22 = vsel %vm431_vm2, %v716_v16, -inf  ;;  %v895_v19 = vsel %vm801_vm3, %v794_v13, 0 }
 0x2f7   :  { %727 = vmax.xlane.f32.xlu1 %v726_v22  ;;  %v4943_v23 = vpop.f32.mrf.mxu1  ;;  %v4960_v17 = vpop.f32.mrf.mxu0 }
 0x2f8   :  { %v719_v24 = vadd.f32 %v713_v21, %v5926_v56 }
 0x2f9   :  { %v656_v25 = vpop.f32.mrf.mxu1  ;;  %v705_v26 = vpop.f32.mrf.mxu0 }
 0x2fa   :  { %v712_v30 = vmul.f32 0.35355338, %v656_v25  ;;  %v735_v31 = vsel %vm431_vm2, %v719_v24, -inf  ;;  %v941_v25 = vsel %vm801_vm3, %v795_v27, 0 }
 0x2fb   :  { %v4954_v32 = vpop.f32.mrf.mxu1  ;;  %736 = vmax.xlane.f32.xlu0 %v735_v31  ;;  %v4961_v33 = vpop.f32.mrf.mxu0  ;;  %v797_v31 = vpack.c.bf16 %v5919_v50, %v5919_v50 }
 0x2fc   :  { %v718_v34 = vadd.f32 %v712_v30, %v5926_v56 }
 0x2fd   :  { %v659_v35 = vpop.f32.mrf.mxu1 }
 0x2fe   :  { %v732_v36 = vsel %vm431_vm2, %v718_v34, -inf }
 0x2ff   :  { %733 = vmax.xlane.f32.xlu1 %v732_v36  ;;  %v4955_v38 = vpop.f32.mrf.mxu1  ;;  %v987_v36 = vsel %vm801_vm3, %v796_v37, 0 }
 0x300   :  { %v1033_v38 = vsel %vm801_vm3, %v797_v31, 0 }
 0x370   :  { %v722_v39 = vpop.xlane.xlu1 %721 }
 0x371   :  { %v738_v40 = vsub.f32 %v714_v59, %v722_v39 }
 0x373   :  { %v744_v41 = vmul.f32 1.442695, %v738_v40  ;;  %v5470_v40 = vld [vmem:[%s6820_s3 + $0x18] sm:$0xff]  }
 0x375   :  { %5510 = vpow2.f32 %v744_v41  ;;  %v5471_v41 = vld [vmem:[%s6820_s3 + $0x58] sm:$0xff]  }
 0x378   :  { %v725_v42 = vpop.xlane.xlu0 %724 }
 0x379   :  { %v739_v44 = vsub.f32 %v715_v2, %v725_v42 }
 0x37b   :  { %v746_v47 = vmul.f32 1.442695, %v739_v44 }
 0x37c   :  { %v731_v48 = vpop.xlane.xlu0 %730 }
 0x37d   :  { %5512 = vpow2.f32 %v746_v47  ;;  %v741_v45 = vsub.f32 %v717_v9, %v731_v48  ;;  %v5472_v47 = vld [vmem:[%s6820_s3 + $0x10] sm:$0xff]  }
 0x37e   :  { %v5473_v48 = vld [vmem:[%s6820_s3 + $0x50] sm:$0xff]  }
 0x37f   :  { %v750_v49 = vmul.f32 1.442695, %v741_v45  ;;  %v5474_v45 = vld [vmem:[%s6820_s3 + $0x98] sm:$0xff]  }
 0x380   :  { %v728_v51 = vpop.xlane.xlu1 %727 }
 0x381   :  { %5514 = vpow2.f32 %v750_v49  ;;  %v740_v52 = vsub.f32 %v716_v16, %v728_v51  ;;  %v5475_v49 = vld [vmem:[%s6820_s3 + $0x90] sm:$0xff]  }
 0x382   :  { %v5511_v53 = vpop.eup %5510 }
 0x383   :  { %v748_v54 = vmul.f32 1.442695, %v740_v52  ;;  %v756_v55 = vsel %vm431_vm2, %v5511_v53, 0.0 }
 0x384   :  { %757 = vadd.xlane.f32.xlu1 %v756_v55  ;;  %v737_v57 = vpop.xlane.xlu0 %736 }
 0x385   :  { %5516 = vpow2.f32 %v748_v54  ;;  %v743_v58 = vsub.f32 %v719_v24, %v737_v57 }
 0x387   :  { %v754_v59 = vmul.f32 1.442695, %v743_v58 }
 0x388   :  { %v734_v60 = vpop.xlane.xlu1 %733 }
 0x389   :  { %5518 = vpow2.f32 %v754_v59  ;;  %v742_v61 = vsub.f32 %v718_v34, %v734_v60 }
 0x38a   :  { %v5513_v62 = vpop.eup %5512 }
 0x38b   :  { %v752_v63 = vmul.f32 1.442695, %v742_v61  ;;  %v759_v0 = vsel %vm431_vm2, %v5513_v62, 0.0 }
 0x38c   :  { %760 = vadd.xlane.f32.xlu0 %v759_v0 }
 0x38d   :  { %5520 = vpow2.f32 %v752_v63 }
 0x38e   :  { %v5515_v1 = vpop.eup %5514 }
 0x38f   :  { %v765_v2 = vsel %vm431_vm2, %v5515_v1, 0.0 }
 0x390   :  { %766 = vadd.xlane.f32.xlu0 %v765_v2 }
 0x392   :  { %v5517_v3 = vpop.eup %5516 }
 0x393   :  { %v762_v4 = vsel %vm431_vm2, %v5517_v3, 0.0 }
 0x394   :  { %763 = vadd.xlane.f32.xlu1 %v762_v4 }
 0x396   :  { %v5519_v5 = vpop.eup %5518 }
 0x397   :  { %v771_v6 = vsel %vm431_vm2, %v5519_v5, 0.0 }
 0x398   :  { %772 = vadd.xlane.f32.xlu0 %v771_v6 }
 0x39a   :  { %v5521_v7 = vpop.eup %5520 }
 0x39b   :  { %v768_v8 = vsel %vm431_vm2, %v5521_v7, 0.0 }
 0x39c   :  { %769 = vadd.xlane.f32.xlu1 %v768_v8 }
 0x40d   :  { %v758_v9 = vpop.xlane.xlu1 %757 }
 0x40e   :  { %5522 = vrcp.f32 %v758_v9 }
 0x415   :  { %v761_v10 = vpop.xlane.xlu0 %760 }
 0x416   :  { %5524 = vrcp.f32 %v761_v10 }
 0x419   :  { %v767_v11 = vpop.xlane.xlu0 %766 }
 0x41a   :  { %5526 = vrcp.f32 %v767_v11 }
 0x41b   :  { %v5523_v12 = vpop.eup %5522 }
 0x41c   :  { %v780_v14 = vmul.f32 %v5523_v12, %v5511_v53 }
 0x41d   :  { %v764_v15 = vpop.xlane.xlu1 %763 }
 0x41e   :  { %5528 = vrcp.f32 %v764_v15  ;;  %v786_v16 = vpack.c.bf16 %v780_v14, %v780_v14  ;;  %v4538_v15 = vld [vmem:[%s6823_s4 + $0x5] ss:$0 sm:$0xff] }
 0x420   :  { %4965 = vmatmul.mubr.msk.bf16.vlgmr.msra.gmra.mxu1 %vm431_vm2, %v786_v16 }
 0x421   :  { %4975 = vmatpush3.bf16.msra.mxu1 %v895_v19  ;;  %v773_v20 = vpop.xlane.xlu0 %772  ;;  %4976 = vmatprep.mubr.msk.bf16.mxu1 %vm5649_vm1, %v5648_v43 }
 0x422   :  { %5530 = vrcp.f32 %v773_v20  ;;  %4986 = vmatprep.subr.bf16.mxu1 %v5648_v43 }
 0x423   :  { %v5525_v21 = vpop.eup %5524 }
 0x424   :  { %v781_v22 = vmul.f32 %v5525_v21, %v5513_v62 }
 0x425   :  { %v770_v23 = vpop.xlane.xlu1 %769 }
 0x426   :  { %5532 = vrcp.f32 %v770_v23  ;;  %v787_v17 = vpack.c.bf16 %v781_v22, %v781_v22  ;;  %v6064_v23 = vld [vmem:[%s6823_s4 + $0x1] ss:$0 sm:$0xff] }
 0x427   :  { %v5527_v24 = vpop.eup %5526 }
 0x428   :  { %4971 = vmatmul.mubr.msk.bf16.vlgmr.msra.gmra.mxu0 %vm431_vm2, %v787_v17  ;;  %v783_v26 = vmul.f32 %v5527_v24, %v5515_v1 }
 0x429   :  { %4981 = vmatpush3.bf16.msra.mxu0 %v941_v25  ;;  %4982 = vmatprep.mubr.msk.bf16.mxu0 %vm5649_vm1, %v5648_v43 }
 0x42a   :  { %4992 = vmatprep.subr.bf16.mxu0 %v5648_v43  ;;  %v789_v34 = vpack.c.bf16 %v783_v26, %v783_v26 }
 0x42b   :  { %v5529_v30 = vpop.eup %5528 }
 0x42c   :  { %v782_v32 = vmul.f32 %v5529_v30, %v5517_v3 }
 0x42e   :  { %v788_v33 = vpack.c.bf16 %v782_v32, %v782_v32 }
 0x42f   :  { %v5531_v35 = vpop.eup %5530 }
 0x430   :  { %4977 = vmatmul.mubr.msk.bf16.vlgmr.msra.gmra.mxu1 %vm431_vm2, %v788_v33  ;;  %4983 = vmatmul.mubr.msk.bf16.vlgmr.msra.gmra.mxu0 %vm431_vm2, %v789_v34  ;;  %v785_v46 = vmul.f32 %v5531_v35, %v5519_v5 }
 0x431   :  { %4987 = vmatpush3.bf16.msra.mxu1 %v987_v36  ;;  %4993 = vmatpush3.bf16.msra.mxu0 %v1033_v38 }
 0x432   :  { %4988 = vmatprep.mubr.msk.bf16.mxu1 %vm5649_vm1, %v5648_v43  ;;  %4994 = vmatprep.mubr.msk.bf16.mxu0 %vm5649_vm1, %v5648_v43  ;;  %v791_v44 = vpack.c.bf16 %v785_v46, %v785_v46 }
 0x433   :  { %v5533_v50 = vpop.eup %5532  ;;  %4998 = vmatprep.subr.bf16.mxu1 %v5648_v43  ;;  %5014 = vmatprep.subr.bf16.mxu0 %v5648_v43 }
 0x434   :  { %v784_v39 = vmul.f32 %v5533_v50, %v5521_v7 }
 0x436   :  { %v790_v42 = vpack.c.bf16 %v784_v39, %v784_v39 }
 0x438   :  { %4989 = vmatmul.mubr.msk.bf16.vlgmr.msra.gmra.mxu1 %vm431_vm2, %v790_v42  ;;  %4995 = vmatmul.mubr.msk.bf16.vlgmr.msra.gmra.mxu0 %vm431_vm2, %v791_v44 }
 0x439   :  { %4999 = vmatpush3.bf16.msra.mxu1 %v5470_v40  ;;  %5015 = vmatpush3.bf16.msra.mxu0 %v5471_v41 }
 0x43a   :  { %5000 = vmatprep.subr.bf16.mxu1 %v5648_v43  ;;  %5016 = vmatprep.subr.bf16.mxu0 %v5648_v43 }
 0x43b   :  { %5002 = vmatprep.mubr.msk.bf16.mxu1 %vm5649_vm1, %v5648_v43  ;;  %5018 = vmatprep.mubr.msk.bf16.mxu0 %vm5649_vm1, %v5648_v43 }
 0x43d   :  { %5001 = vmatpush3.bf16.msra.mxu1 %v5472_v47  ;;  %5017 = vmatpush3.bf16.msra.mxu0 %v5473_v48 }
 0x43e   :  { %5030 = vmatprep.subr.bf16.mxu1 %v5648_v43  ;;  %5046 = vmatprep.subr.bf16.mxu0 %v5648_v43 }
 0x440   :  { %5003 = vmatmul.mubr.msk.bf16.vlgmr.msra.gmra.mxu1 %vm53_vm0, %v5807_v18  ;;  %5019 = vmatmul.mubr.msk.bf16.vlgmr.msra.gmra.mxu0 %vm53_vm0, %v5807_v18 }
 0x441   :  { %5006 = vmatprep.mubr.msk.bf16.mxu1 %vm5649_vm1, %v5648_v43  ;;  %5022 = vmatprep.mubr.msk.bf16.mxu0 %vm5649_vm1, %v5648_v43 }
 0x442   :  { %5031 = vmatpush3.bf16.msra.mxu1 %v5474_v45 }
 0x443   :  { %5032 = vmatprep.subr.bf16.mxu1 %v5648_v43 }
 0x446   :  { %5033 = vmatpush3.bf16.msra.mxu1 %v5475_v49 }
 0x447   :  { %5064 = vmatprep.subr.bf16.mxu1 %v5648_v43 }
 0x448   :  { %5007 = vmatmul.mubr.msk.bf16.gmra.mxu1 %vm53_vm0, %v5815_v28  ;;  %5023 = vmatmul.mubr.msk.bf16.gmra.mxu0 %vm53_vm0, %v5815_v28 }
 0x449   :  { %5010 = vmatprep.mubr.msk.bf16.mxu1 %vm5649_vm1, %v5648_v43  ;;  %5026 = vmatprep.mubr.msk.bf16.mxu0 %vm5649_vm1, %v5648_v43 }
 0x450   :  { %5011 = vmatmul.mubr.msk.bf16.gmra.mxu1 %vm53_vm0, %v5817_v29  ;;  %5027 = vmatmul.mubr.msk.bf16.gmra.mxu0 %vm53_vm0, %v5817_v29 }
 0x451   :  { %5034 = vmatprep.mubr.msk.bf16.mxu1 %vm5649_vm1, %v5648_v43  ;;  %5048 = vmatprep.mubr.msk.bf16.mxu0 %vm5649_vm1, %v5648_v43 }
 0x458   :  { %5035 = vmatmul.mubr.msk.bf16.vlgmr.msra.gmra.mxu1 %vm53_vm0, %v5807_v18 }
 0x459   :  { %5038 = vmatprep.mubr.msk.bf16.mxu1 %vm5649_vm1, %v5648_v43 }
 0x460   :  { %5039 = vmatmul.mubr.msk.bf16.gmra.mxu1 %vm53_vm0, %v5815_v28 }
 0x461   :  { %5042 = vmatprep.mubr.msk.bf16.mxu1 %vm5649_vm1, %v5648_v43 }
 0x468   :  { %5043 = vmatmul.mubr.msk.bf16.gmra.mxu1 %vm53_vm0, %v5817_v29 }
 0x469   :  { %5066 = vmatprep.mubr.msk.bf16.mxu1 %vm5649_vm1, %v5648_v43 }
 0x4e0   :  { %v6040_v51 = vpop.f32.mrf.mxu1 }
 0x4e2   :  { %v4966_v52 = vpop.f32.mrf.mxu1 }
 0x4e4   :  { %v842_v53 = vpop.f32.mrf.mxu1 }
 0x4e6   :  { %v4967_v54 = vpop.f32.mrf.mxu1 }
 0x4e8   :  { %v6042_v55 = vpop.f32.mrf.mxu0 }
 0x4e9   :  { %v1075_v57 = vpack.c.bf16 %v6042_v55, %v6040_v51  ;;  %v4567_v51 = vld [vmem:[%s6824_s5 + $0x4] sm:$0xf] }
 0x4ea   :  { %v4972_v58 = vpop.f32.mrf.mxu0  ;;  %v1994_v55 = vsel %vm801_vm3, %v4567_v51, 0 }
 0x4ec   :  { %v888_v59 = vpop.f32.mrf.mxu0 }
 0x4ee   :  { %v4973_v60 = vpop.f32.mrf.mxu0 }
 0x4f0   :  { %v6046_v61 = vpop.f32.mrf.mxu1  ;;  %v6048_v62 = vpop.f32.mrf.mxu0 }
 0x4f1   :  { %v1076_v63 = vpack.c.bf16 %v6048_v62, %v6046_v61 }
 0x4f2   :  { %v4978_v0 = vpop.f32.mrf.mxu1  ;;  %v4984_v1 = vpop.f32.mrf.mxu0 }
 0x4f4   :  { %v934_v2 = vpop.f32.mrf.mxu1  ;;  %v980_v3 = vpop.f32.mrf.mxu0 }
 0x4f6   :  { %v4979_v4 = vpop.f32.mrf.mxu1  ;;  %v4985_v5 = vpop.f32.mrf.mxu0 }
 0x4f8   :  { %v6052_v6 = vpop.f32.mrf.mxu1  ;;  %v6054_v7 = vpop.f32.mrf.mxu0 }
 0x4f9   :  { %v1077_v8 = vpack.c.bf16 %v6054_v7, %v6052_v6  ;;  %v5478_v7 = vld [vmem:[%s6820_s3 + $0x28] sm:$0xff]  }
 0x4fa   :  { %v4990_v9 = vpop.f32.mrf.mxu1  ;;  %v4996_v10 = vpop.f32.mrf.mxu0 }
 0x4fc   :  { %v1026_v11 = vpop.f32.mrf.mxu1  ;;  %v1072_v12 = vpop.f32.mrf.mxu0 }
 0x4fe   :  { %v4991_v13 = vpop.f32.mrf.mxu1  ;;  %v4997_v14 = vpop.f32.mrf.mxu0 }
 0x500   :  { %v1138_v16 = vpop.f32.mrf.mxu1  ;;  %v1220_v19 = vpop.f32.mrf.mxu0 }
 0x501   :  { %v1221_v20 = vadd.f32 %v4538_v15, %v1220_v19  ;;  %v1139_v31 = vadd.f32 %v6064_v23, %v1138_v16 }
 0x502   :  { %v5004_v21 = vpop.f32.mrf.mxu1  ;;  %v5020_v27 = vpop.f32.mrf.mxu0 }
 0x503   :  { %v1331_v22 = vpack.c.bf16 %v1221_v20, %v1221_v20  ;;  %v1325_v38 = vpack.c.bf16 %v1139_v31, %v1139_v31 }
 0x504   :  { %v1141_v17 = vpop.f32.mrf.mxu1  ;;  %v1223_v24 = vpop.f32.mrf.mxu0 }
 0x505   :  { %v1341_v25 = vsel %vm431_vm2, %v1331_v22, 0  ;;  %v1224_v26 = vadd.f32 %v4538_v15, %v1223_v24  ;;  %v1142_v47 = vadd.f32 %v6064_v23, %v1141_v17 }
 0x506   :  { %v5005_v30 = vpop.f32.mrf.mxu1  ;;  %v5021_v37 = vpop.f32.mrf.mxu0  ;;  %5047 = vmatpush3.bf16.xpose.msra.mxu0 %v1341_v25 }
 0x507   :  { %5052 = vmatprep.subr.bf16.mxu0 %v5648_v43  ;;  %v1332_v34 = vpack.c.bf16 %v1224_v26, %v1224_v26  ;;  %v1326_v59 = vpack.c.bf16 %v1142_v47, %v1142_v47 }
 0x508   :  { %v1146_v32 = vpop.f32.mrf.mxu1  ;;  %v1228_v33 = vpop.f32.mrf.mxu0 }
 0x509   :  { %v1387_v39 = vsel %vm431_vm2, %v1332_v34, 0  ;;  %v1229_v40 = vadd.f32 %v4538_v15, %v1228_v33  ;;  %v1147_v10 = vadd.f32 %v6064_v23, %v1146_v32 }
 0x50a   :  { %v5008_v35 = vpop.f32.mrf.mxu1  ;;  %v5024_v36 = vpop.f32.mrf.mxu0 }
 0x50b   :  { %v1333_v52 = vpack.c.bf16 %v1229_v40, %v1229_v40  ;;  %v1327_v20 = vpack.c.bf16 %v1147_v10, %v1147_v10 }
 0x50c   :  { %v1149_v46 = vpop.f32.mrf.mxu1  ;;  %v1231_v50 = vpop.f32.mrf.mxu0 }
 0x50d   :  { %v1232_v41 = vadd.f32 %v4538_v15, %v1231_v50  ;;  %5049 = vmatmul.mubr.msk.bf16.vlgmr.msra.gmra.mxu0 %vm431_vm2, %v1325_v38  ;;  %v1150_v60 = vadd.f32 %v6064_v23, %v1149_v46  ;;  %v1433_v2 = vsel %vm431_vm2, %v1333_v52, 0 }
 0x50e   :  { %v5009_v42 = vpop.f32.mrf.mxu1  ;;  %v5025_v44 = vpop.f32.mrf.mxu0  ;;  %5053 = vmatpush3.bf16.xpose.msra.mxu0 %v1387_v39  ;;  %5054 = vmatprep.mubr.msk.bf16.mxu0 %vm5649_vm1, %v5648_v43 }
 0x50f   :  { %v1334_v48 = vpack.c.bf16 %v1232_v41, %v1232_v41  ;;  %5058 = vmatprep.subr.bf16.mxu0 %v5648_v43  ;;  %v1328_v11 = vpack.c.bf16 %v1150_v60, %v1150_v60 }
 0x510   :  { %v1154_v45 = vpop.f32.mrf.mxu1  ;;  %v1236_v49 = vpop.f32.mrf.mxu0 }
 0x511   :  { %v1479_v53 = vsel %vm431_vm2, %v1334_v48, 0  ;;  %v1237_v3 = vadd.f32 %v4538_v15, %v1236_v49  ;;  %v1155_v26 = vadd.f32 %v6064_v23, %v1154_v45 }
 0x512   :  { %v5012_v54 = vpop.f32.mrf.mxu1  ;;  %v5028_v58 = vpop.f32.mrf.mxu0  ;;  %5065 = vmatpush3.bf16.xpose.msra.mxu1 %v1479_v53 }
 0x513   :  { %5076 = vmatprep.subr.bf16.mxu1 %v5648_v43  ;;  %v1335_v14 = vpack.c.bf16 %v1237_v3, %v1237_v3  ;;  %v1329_v36 = vpack.c.bf16 %v1155_v26, %v1155_v26 }
 0x514   :  { %v1157_v0 = vpop.f32.mrf.mxu1  ;;  %v1239_v1 = vpop.f32.mrf.mxu0 }
 0x515   :  { %v1240_v4 = vadd.f32 %v4538_v15, %v1239_v1  ;;  %5055 = vmatmul.mubr.msk.bf16.vlgmr.msra.gmra.mxu0 %vm431_vm2, %v1326_v59  ;;  %v4549_v15 = vld [vmem:[%s6823_s4 + $0x9] ss:$0 sm:$0xff]  ;;  %v1158_v21 = vadd.f32 %v6064_v23, %v1157_v0  ;;  %v1525_v22 = vsel %vm431_vm2, %v1335_v14, 0 }
 0x516   :  { %v5013_v5 = vpop.f32.mrf.mxu1  ;;  %v5029_v9 = vpop.f32.mrf.mxu0  ;;  %5059 = vmatpush3.bf16.xpose.msra.mxu0 %v1433_v2  ;;  %5060 = vmatprep.mubr.msk.bf16.mxu0 %vm5649_vm1, %v5648_v43 }
 0x517   :  { %v1336_v12 = vpack.c.bf16 %v1240_v4, %v1240_v4  ;;  %5070 = vmatprep.subr.bf16.mxu0 %v5648_v43  ;;  %v1330_v30 = vpack.c.bf16 %v1158_v21, %v1158_v21 }
 0x518   :  { %v1302_v13 = vpop.f32.mrf.mxu1 }
 0x519   :  { %v1571_v16 = vsel %vm431_vm2, %v1336_v12, 0  ;;  %5067 = vmatmul.mubr.msk.bf16.vlgmr.msra.gmra.mxu1 %vm431_vm2, %v1328_v11  ;;  %v1303_v17 = vadd.f32 %v4549_v15, %v1302_v13 }
 0x51a   :  { %v5036_v19 = vpop.f32.mrf.mxu1  ;;  %5077 = vmatpush3.bf16.xpose.msra.mxu1 %v1571_v16  ;;  %5078 = vmatprep.mubr.msk.bf16.mxu1 %vm5649_vm1, %v5648_v43 }
 0x51b   :  { %5088 = vmatprep.subr.bf16.mxu1 %v5648_v43  ;;  %v1697_v32 = vpack.c.bf16 %v1303_v17, %v1303_v17 }
 0x51c   :  { %v1305_v27 = vpop.f32.mrf.mxu1 }
 0x51d   :  { %v1306_v24 = vadd.f32 %v4549_v15, %v1305_v27  ;;  %5061 = vmatmul.mubr.msk.bf16.vlgmr.msra.gmra.mxu0 %vm431_vm2, %v1327_v20  ;;  %v1707_v38 = vsel %vm801_vm3, %v1697_v32, 0 }
 0x51e   :  { %v5037_v25 = vpop.f32.mrf.mxu1  ;;  %5071 = vmatpush3.bf16.xpose.msra.mxu0 %v1525_v22  ;;  %5072 = vmatprep.mubr.msk.bf16.mxu0 %vm5649_vm1, %v5648_v43 }
 0x51f   :  { %v1698_v37 = vpack.c.bf16 %v1306_v24, %v1306_v24  ;;  %5082 = vmatprep.subr.bf16.mxu0 %v5648_v43 }
 0x520   :  { %v1310_v31 = vpop.f32.mrf.mxu1 }
 0x521   :  { %v1753_v33 = vsel %vm801_vm3, %v1698_v37, 0  ;;  %v6100_v34 = vadd.f32 %v4549_v15, %v1310_v31  ;;  %5079 = vmatmul.mubr.msk.bf16.vlgmr.msra.gmra.mxu1 %vm431_vm2, %v1330_v30 }
 0x522   :  { %v5040_v35 = vpop.f32.mrf.mxu1  ;;  %5089 = vmatpush3.bf16.msra.mxu1 %v1753_v33  ;;  %5090 = vmatprep.mubr.msk.bf16.mxu1 %vm5649_vm1, %v5648_v43 }
 0x523   :  { %5100 = vmatprep.subr.bf16.mxu1 %v5648_v43 }
 0x524   :  { %v1313_v23 = vpop.f32.mrf.mxu1 }
 0x525   :  { %v6107_v46 = vadd.f32 %v4549_v15, %v1313_v23  ;;  %5073 = vmatmul.mubr.msk.bf16.vlgmr.msra.gmra.mxu0 %vm431_vm2, %v1329_v36 }
 0x526   :  { %v5041_v50 = vpop.f32.mrf.mxu1  ;;  %5083 = vmatpush3.bf16.msra.mxu0 %v1707_v38  ;;  %5084 = vmatprep.mubr.msk.bf16.mxu0 %vm5649_vm1, %v5648_v43 }
 0x527   :  { %5094 = vmatprep.subr.bf16.mxu0 %v5648_v43 }
 0x528   :  { %v1318_v39 = vpop.f32.mrf.mxu1 }
 0x529   :  { %v6113_v40 = vadd.f32 %v4549_v15, %v1318_v39 }
 0x52a   :  { %v5044_v41 = vpop.f32.mrf.mxu1 }
 0x52c   :  { %v1321_v42 = vpop.f32.mrf.mxu1 }
 0x52d   :  { %v6115_v44 = vadd.f32 %v4549_v15, %v1321_v42 }
 0x52e   :  { %v5045_v47 = vpop.f32.mrf.mxu1 }
 0x5cd   :  { %v1377_v48 = vpop.f32.mrf.mxu0 }
 0x5ce   :  { %v1613_v45 = vmul.f32 0.35355338, %v1377_v48 }
 0x5cf   :  { %v5050_v49 = vpop.f32.mrf.mxu0 }
 0x5d0   :  { %v1619_v52 = vadd.f32 %v1613_v45, %v5926_v56 }
 0x5d1   :  { %v1380_v53 = vpop.f32.mrf.mxu0 }
 0x5d2   :  { %v1625_v54 = vsel %vm431_vm2, %v1619_v52, -inf }
 0x5d3   :  { %1626 = vmax.xlane.f32.xlu0 %v1625_v54  ;;  %v5051_v58 = vpop.f32.mrf.mxu0 }
 0x5d5   :  { %v1423_v59 = vpop.f32.mrf.mxu0 }
 0x5d6   :  { %v1614_v60 = vmul.f32 0.35355338, %v1423_v59 }
 0x5d7   :  { %v5056_v0 = vpop.f32.mrf.mxu0 }
 0x5d8   :  { %v1620_v1 = vadd.f32 %v1614_v60, %v5926_v56 }
 0x5d9   :  { %v1426_v2 = vpop.f32.mrf.mxu0  ;;  %v1515_v3 = vpop.f32.mrf.mxu1 }
 0x5da   :  { %v1616_v4 = vmul.f32 0.35355338, %v1515_v3  ;;  %v1628_v5 = vsel %vm431_vm2, %v1620_v1, -inf }
 0x5db   :  { %v5068_v9 = vpop.f32.mrf.mxu1  ;;  %1629 = vmax.xlane.f32.xlu1 %v1628_v5  ;;  %v5057_v10 = vpop.f32.mrf.mxu0 }
 0x5dc   :  { %v1622_v11 = vadd.f32 %v1616_v4, %v5926_v56 }
 0x5dd   :  { %v1469_v12 = vpop.f32.mrf.mxu0  ;;  %v1518_v13 = vpop.f32.mrf.mxu1 }
 0x5de   :  { %v1615_v14 = vmul.f32 0.35355338, %v1469_v12  ;;  %v1634_v16 = vsel %vm431_vm2, %v1622_v11, -inf }
 0x5df   :  { %v5069_v15 = vpop.f32.mrf.mxu1  ;;  %1635 = vmax.xlane.f32.xlu1 %v1634_v16  ;;  %v5062_v19 = vpop.f32.mrf.mxu0 }
 0x5e0   :  { %v1621_v20 = vadd.f32 %v1615_v14, %v5926_v56 }
 0x5e1   :  { %v1472_v21 = vpop.f32.mrf.mxu0  ;;  %v1607_v27 = vpop.f32.mrf.mxu1 }
 0x5e2   :  { %v1618_v22 = vmul.f32 0.35355338, %v1607_v27  ;;  %v1631_v17 = vsel %vm431_vm2, %v1621_v20, -inf }
 0x5e3   :  { %v5080_v24 = vpop.f32.mrf.mxu1  ;;  %1632 = vmax.xlane.f32.xlu0 %v1631_v17  ;;  %v5063_v25 = vpop.f32.mrf.mxu0 }
 0x5e4   :  { %v1624_v26 = vadd.f32 %v1618_v22, %v5926_v56  ;;  %v1699_v25 = vpack.c.bf16 %v6100_v34, %v6100_v34  ;;  %v1700_v34 = vpack.c.bf16 %v6107_v46, %v6107_v46  ;;  %v1701_v46 = vpack.c.bf16 %v6113_v40, %v6113_v40 }
 0x5e5   :  { %v1561_v30 = vpop.f32.mrf.mxu0  ;;  %v1610_v37 = vpop.f32.mrf.mxu1 }
 0x5e6   :  { %v1617_v31 = vmul.f32 0.35355338, %v1561_v30  ;;  %v1640_v32 = vsel %vm431_vm2, %v1624_v26, -inf }
 0x5e7   :  { %v5081_v33 = vpop.f32.mrf.mxu1  ;;  %1641 = vmax.xlane.f32.xlu1 %v1640_v32  ;;  %v5074_v35 = vpop.f32.mrf.mxu0 }
 0x5e8   :  { %v1623_v36 = vadd.f32 %v1617_v31, %v5926_v56  ;;  %v1799_v31 = vsel %vm801_vm3, %v1699_v25, 0 }
 0x5e9   :  { %v1564_v23 = vpop.f32.mrf.mxu0 }
 0x5ea   :  { %v1637_v38 = vsel %vm431_vm2, %v1623_v36, -inf }
 0x5eb   :  { %1638 = vmax.xlane.f32.xlu0 %v1637_v38  ;;  %v5075_v50 = vpop.f32.mrf.mxu0 }
 0x5ec   :  { %v1845_v50 = vsel %vm801_vm3, %v1700_v34, 0 }
 0x65c   :  { %v1627_v39 = vpop.xlane.xlu0 %1626 }
 0x65d   :  { %v1643_v41 = vsub.f32 %v1619_v52, %v1627_v39 }
 0x65f   :  { %v1649_v42 = vmul.f32 1.442695, %v1643_v41 }
 0x661   :  { %5534 = vpow2.f32 %v1649_v42  ;;  %v1702_v42 = vpack.c.bf16 %v6115_v44, %v6115_v44 }
 0x664   :  { %v1630_v47 = vpop.xlane.xlu1 %1629 }
 0x665   :  { %v1644_v48 = vsub.f32 %v1620_v1, %v1630_v47 }
 0x667   :  { %v1651_v45 = vmul.f32 1.442695, %v1644_v48 }
 0x668   :  { %v1636_v49 = vpop.xlane.xlu1 %1635 }
 0x669   :  { %5536 = vpow2.f32 %v1651_v45  ;;  %v1646_v53 = vsub.f32 %v1622_v11, %v1636_v49 }
 0x66b   :  { %v1655_v54 = vmul.f32 1.442695, %v1646_v53  ;;  %v1891_v53 = vsel %vm801_vm3, %v1701_v46, 0 }
 0x66c   :  { %v1633_v58 = vpop.xlane.xlu0 %1632 }
 0x66d   :  { %5538 = vpow2.f32 %v1655_v54  ;;  %v1645_v59 = vsub.f32 %v1621_v20, %v1633_v58  ;;  %v1937_v54 = vsel %vm801_vm3, %v1702_v42, 0  ;;  %v1078_v58 = vld [vmem:[%s6824_s5] sm:$0xf] }
 0x66e   :  { %v5535_v60 = vpop.eup %5534 }
 0x66f   :  { %v1653_v0 = vmul.f32 1.442695, %v1645_v59  ;;  %v1661_v2 = vsel %vm431_vm2, %v5535_v60, 0.0 }
 0x670   :  { %v1642_v3 = vpop.xlane.xlu1 %1641  ;;  %1662 = vadd.xlane.f32.xlu0 %v1661_v2  ;;  %v2063_v2 = vsel %vm801_vm3, %v1078_v58, 0 }
 0x671   :  { %5540 = vpow2.f32 %v1653_v0  ;;  %v1648_v52 = vsub.f32 %v1624_v26, %v1642_v3  ;;  %v5476_v3 = vld [vmem:[%s6820_s3 + $0x68] sm:$0xff]  }
 0x673   :  { %v1659_v4 = vmul.f32 1.442695, %v1648_v52  ;;  %v5477_v52 = vld [vmem:[%s6820_s3 + $0x60] sm:$0xff]  }
 0x674   :  { %v1639_v5 = vpop.xlane.xlu0 %1638 }
 0x675   :  { %5542 = vpow2.f32 %v1659_v4  ;;  %v1647_v1 = vsub.f32 %v1623_v36, %v1639_v5 }
 0x676   :  { %v5537_v9 = vpop.eup %5536 }
 0x677   :  { %v1657_v10 = vmul.f32 1.442695, %v1647_v1  ;;  %v1664_v11 = vsel %vm431_vm2, %v5537_v9, 0.0  ;;  %v5479_v1 = vld [vmem:[%s6820_s3 + $0x20] sm:$0xff]  }
 0x678   :  { %1665 = vadd.xlane.f32.xlu1 %v1664_v11 }
 0x679   :  { %5544 = vpow2.f32 %v1657_v10 }
 0x67a   :  { %v5539_v12 = vpop.eup %5538 }
 0x67b   :  { %v1670_v13 = vsel %vm431_vm2, %v5539_v12, 0.0 }
 0x67c   :  { %1671 = vadd.xlane.f32.xlu1 %v1670_v13 }
 0x67e   :  { %v5541_v14 = vpop.eup %5540 }
 0x67f   :  { %v1667_v16 = vsel %vm431_vm2, %v5541_v14, 0.0 }
 0x680   :  { %1668 = vadd.xlane.f32.xlu0 %v1667_v16 }
 0x682   :  { %v5543_v15 = vpop.eup %5542 }
 0x683   :  { %v1676_v19 = vsel %vm431_vm2, %v5543_v15, 0.0 }
 0x684   :  { %1677 = vadd.xlane.f32.xlu1 %v1676_v19 }
 0x686   :  { %v5545_v20 = vpop.eup %5544 }
 0x687   :  { %v1673_v21 = vsel %vm431_vm2, %v5545_v20, 0.0 }
 0x688   :  { %1674 = vadd.xlane.f32.xlu0 %v1673_v21 }
 0x6f9   :  { %v1663_v27 = vpop.xlane.xlu0 %1662 }
 0x6fa   :  { %5546 = vrcp.f32 %v1663_v27 }
 0x701   :  { %v1666_v22 = vpop.xlane.xlu1 %1665 }
 0x702   :  { %5548 = vrcp.f32 %v1666_v22 }
 0x705   :  { %v1672_v17 = vpop.xlane.xlu1 %1671 }
 0x706   :  { %5550 = vrcp.f32 %v1672_v17 }
 0x707   :  { %v5547_v24 = vpop.eup %5546 }
 0x708   :  { %v1685_v26 = vmul.f32 %v5547_v24, %v5535_v60 }
 0x709   :  { %v1669_v30 = vpop.xlane.xlu0 %1668 }
 0x70a   :  { %5552 = vrcp.f32 %v1669_v30  ;;  %v1691_v37 = vpack.c.bf16 %v1685_v26, %v1685_v26 }
 0x70c   :  { %5085 = vmatmul.mubr.msk.bf16.vlgmr.msra.gmra.mxu0 %vm431_vm2, %v1691_v37 }
 0x70d   :  { %5095 = vmatpush3.bf16.msra.mxu0 %v1799_v31  ;;  %v1678_v32 = vpop.xlane.xlu1 %1677  ;;  %5096 = vmatprep.mubr.msk.bf16.mxu0 %vm5649_vm1, %v5648_v43 }
 0x70e   :  { %5554 = vrcp.f32 %v1678_v32  ;;  %5106 = vmatprep.subr.bf16.mxu0 %v5648_v43  ;;  %v5480_v32 = vld [vmem:[%s6820_s3 + $0xa8] sm:$0xff]  }
 0x70f   :  { %v5549_v33 = vpop.eup %5548 }
 0x710   :  { %v1686_v35 = vmul.f32 %v5549_v33, %v5537_v9 }
 0x711   :  { %v1675_v36 = vpop.xlane.xlu0 %1674 }
 0x712   :  { %5556 = vrcp.f32 %v1675_v36  ;;  %v1692_v23 = vpack.c.bf16 %v1686_v35, %v1686_v35  ;;  %v5481_v35 = vld [vmem:[%s6820_s3 + $0xa0] sm:$0xff]  }
 0x713   :  { %v5551_v38 = vpop.eup %5550 }
 0x714   :  { %5091 = vmatmul.mubr.msk.bf16.vlgmr.msra.gmra.mxu1 %vm431_vm2, %v1692_v23  ;;  %v1688_v39 = vmul.f32 %v5551_v38, %v5539_v12 }
 0x715   :  { %5101 = vmatpush3.bf16.msra.mxu1 %v1845_v50  ;;  %5102 = vmatprep.mubr.msk.bf16.mxu1 %vm5649_vm1, %v5648_v43 }
 0x716   :  { %5112 = vmatprep.subr.bf16.mxu1 %v5648_v43  ;;  %v1694_v45 = vpack.c.bf16 %v1688_v39, %v1688_v39 }
 0x717   :  { %v5553_v41 = vpop.eup %5552 }
 0x718   :  { %v1687_v47 = vmul.f32 %v5553_v41, %v5541_v14 }
 0x71a   :  { %v1693_v48 = vpack.c.bf16 %v1687_v47, %v1687_v47 }
 0x71b   :  { %v5555_v49 = vpop.eup %5554 }
 0x71c   :  { %5097 = vmatmul.mubr.msk.bf16.vlgmr.msra.gmra.mxu0 %vm431_vm2, %v1693_v48  ;;  %5103 = vmatmul.mubr.msk.bf16.vlgmr.msra.gmra.mxu1 %vm431_vm2, %v1694_v45  ;;  %v1690_v40 = vmul.f32 %v5555_v49, %v5543_v15  ;;  %v4590_v48 = vld [vmem:[%s6823_s4 + $0x6] ss:$0 sm:$0xff] }
 0x71d   :  { %5107 = vmatpush3.bf16.msra.mxu0 %v1891_v53  ;;  %5113 = vmatpush3.bf16.msra.mxu1 %v1937_v54 }
 0x71e   :  { %5108 = vmatprep.mubr.msk.bf16.mxu0 %vm5649_vm1, %v5648_v43  ;;  %5114 = vmatprep.mubr.msk.bf16.mxu1 %vm5649_vm1, %v5648_v43  ;;  %v1696_v0 = vpack.c.bf16 %v1690_v40, %v1690_v40 }
 0x71f   :  { %v5557_v44 = vpop.eup %5556  ;;  %5132 = vmatprep.subr.bf16.mxu1 %v5648_v43  ;;  %5118 = vmatprep.subr.bf16.mxu0 %v5648_v43 }
 0x720   :  { %v1689_v59 = vmul.f32 %v5557_v44, %v5545_v20 }
 0x722   :  { %v1695_v60 = vpack.c.bf16 %v1689_v59, %v1689_v59 }
 0x724   :  { %5109 = vmatmul.mubr.msk.bf16.vlgmr.msra.gmra.mxu0 %vm431_vm2, %v1695_v60  ;;  %5115 = vmatmul.mubr.msk.bf16.vlgmr.msra.gmra.mxu1 %vm431_vm2, %v1696_v0 }
 0x725   :  { %5133 = vmatpush3.bf16.msra.mxu1 %v2063_v2  ;;  %5134 = vmatprep.mubr.msk.bf16.mxu1 %vm5649_vm1, %v5648_v43 }
 0x726   :  { %5162 = vmatprep.subr.bf16.mxu1 %v5648_v43  ;;  %5120 = vmatprep.mubr.msk.bf16.mxu0 %vm5649_vm1, %v5648_v43 }
 0x727   :  { %5119 = vmatpush3.bf16.msra.mxu0 %v1994_v55 }
 0x728   :  { %5146 = vmatprep.subr.bf16.mxu0 %v5648_v43 }
 0x72c   :  { %5135 = vmatmul.mubr.msk.bf16.vlgmr.msra.gmra.mxu1 %vm431_vm2, %v1075_v57 }
 0x72d   :  { %5138 = vmatprep.mubr.msk.bf16.mxu1 %vm5649_vm1, %v5648_v43  ;;  %5163 = vmatpush3.bf16.msra.mxu1 %v5476_v3 }
 0x72e   :  { %5164 = vmatprep.subr.bf16.mxu1 %v5648_v43 }
 0x731   :  { %5165 = vmatpush3.bf16.msra.mxu1 %v5477_v52 }
 0x732   :  { %5194 = vmatprep.subr.bf16.mxu1 %v5648_v43 }
 0x734   :  { %5139 = vmatmul.mubr.msk.bf16.gmra.mxu1 %vm431_vm2, %v1076_v63 }
 0x735   :  { %5142 = vmatprep.mubr.msk.bf16.mxu1 %vm5649_vm1, %v5648_v43 }
 0x73c   :  { %5143 = vmatmul.mubr.msk.bf16.gmra.mxu1 %vm431_vm2, %v1077_v8 }
 0x73d   :  { %5166 = vmatprep.mubr.msk.bf16.mxu1 %vm5649_vm1, %v5648_v43 }
 0x744   :  { %5167 = vmatmul.mubr.msk.bf16.vlgmr.msra.gmra.mxu1 %vm53_vm0, %v5807_v18 }
 0x745   :  { %5170 = vmatprep.mubr.msk.bf16.mxu1 %vm5649_vm1, %v5648_v43 }
 0x74c   :  { %5171 = vmatmul.mubr.msk.bf16.gmra.mxu1 %vm53_vm0, %v5815_v28 }
 0x74d   :  { %5174 = vmatprep.mubr.msk.bf16.mxu1 %vm5649_vm1, %v5648_v43 }
 0x754   :  { %5175 = vmatmul.mubr.msk.bf16.gmra.mxu1 %vm53_vm0, %v5817_v29 }
 0x755   :  { %5196 = vmatprep.mubr.msk.bf16.mxu1 %vm5649_vm1, %v5648_v43 }
 0x7cc   :  { %v1743_v57 = vpop.f32.mrf.mxu0 }
 0x7ce   :  { %v5086_v61 = vpop.f32.mrf.mxu0 }
 0x7d0   :  { %v1746_v62 = vpop.f32.mrf.mxu0 }
 0x7d2   :  { %v5087_v63 = vpop.f32.mrf.mxu0 }
 0x7d4   :  { %v1789_v6 = vpop.f32.mrf.mxu1 }
 0x7d5   :  { %v1979_v8 = vpack.c.bf16 %v1789_v6, %v1743_v57 }
 0x7d6   :  { %v5092_v4 = vpop.f32.mrf.mxu1 }
 0x7d7   :  { %5121 = vmatmul.mubr.msk.bf16.vlgmr.msra.gmra.mxu0 %vm431_vm2, %v1979_v8 }
 0x7d8   :  { %v1792_v5 = vpop.f32.mrf.mxu1  ;;  %5124 = vmatprep.mubr.msk.bf16.mxu0 %vm5649_vm1, %v5648_v43  ;;  %5147 = vmatpush3.bf16.msra.mxu0 %v5478_v7 }
 0x7d9   :  { %5148 = vmatprep.subr.bf16.mxu0 %v5648_v43 }
 0x7da   :  { %v5093_v9 = vpop.f32.mrf.mxu1 }
 0x7dc   :  { %v1835_v10 = vpop.f32.mrf.mxu0  ;;  %v1881_v11 = vpop.f32.mrf.mxu1  ;;  %5149 = vmatpush3.bf16.msra.mxu0 %v5479_v1 }
 0x7dd   :  { %v1980_v12 = vpack.c.bf16 %v1881_v11, %v1835_v10  ;;  %5178 = vmatprep.subr.bf16.mxu0 %v5648_v43 }
 0x7de   :  { %v5098_v13 = vpop.f32.mrf.mxu0  ;;  %v5104_v14 = vpop.f32.mrf.mxu1 }
 0x7df   :  { %5125 = vmatmul.mubr.msk.bf16.gmra.mxu0 %vm431_vm2, %v1980_v12 }
 0x7e0   :  { %v1838_v16 = vpop.f32.mrf.mxu0  ;;  %v1884_v15 = vpop.f32.mrf.mxu1  ;;  %5128 = vmatprep.mubr.msk.bf16.mxu0 %vm5649_vm1, %v5648_v43 }
 0x7e2   :  { %v5099_v19 = vpop.f32.mrf.mxu0  ;;  %v5105_v20 = vpop.f32.mrf.mxu1 }
 0x7e3   :  { %v4579_v20 = vld [vmem:[%s6823_s4 + $0x2] ss:$0 sm:$0xff] }
 0x7e4   :  { %v1927_v21 = vpop.f32.mrf.mxu0  ;;  %v1973_v27 = vpop.f32.mrf.mxu1 }
 0x7e5   :  { %v1981_v22 = vpack.c.bf16 %v1973_v27, %v1927_v21 }
 0x7e6   :  { %v5110_v17 = vpop.f32.mrf.mxu0  ;;  %v5116_v24 = vpop.f32.mrf.mxu1 }
 0x7e7   :  { %5129 = vmatmul.mubr.msk.bf16.gmra.mxu0 %vm431_vm2, %v1981_v22 }
 0x7e8   :  { %v1930_v25 = vpop.f32.mrf.mxu0  ;;  %v1976_v26 = vpop.f32.mrf.mxu1  ;;  %5150 = vmatprep.mubr.msk.bf16.mxu0 %vm5649_vm1, %v5648_v43 }
 0x7ea   :  { %v5111_v30 = vpop.f32.mrf.mxu0  ;;  %v5117_v37 = vpop.f32.mrf.mxu1 }
 0x7ec   :  { %v6234_v31 = vpop.f32.mrf.mxu1 }
 0x7ee   :  { %v5136_v33 = vpop.f32.mrf.mxu1 }
 0x7ef   :  { %5151 = vmatmul.mubr.msk.bf16.vlgmr.msra.gmra.mxu0 %vm53_vm0, %v5807_v18 }
 0x7f0   :  { %v6241_v34 = vpop.f32.mrf.mxu1  ;;  %5154 = vmatprep.mubr.msk.bf16.mxu0 %vm5649_vm1, %v5648_v43  ;;  %5179 = vmatpush3.bf16.msra.mxu0 %v5480_v32 }
 0x7f1   :  { %5180 = vmatprep.subr.bf16.mxu0 %v5648_v43 }
 0x7f2   :  { %v5137_v36 = vpop.f32.mrf.mxu1 }
 0x7f4   :  { %v6249_v23 = vpop.f32.mrf.mxu1  ;;  %5181 = vmatpush3.bf16.msra.mxu0 %v5481_v35 }
 0x7f5   :  { %5212 = vmatprep.subr.bf16.mxu0 %v5648_v43 }
 0x7f6   :  { %v5140_v38 = vpop.f32.mrf.mxu1 }
 0x7f7   :  { %5155 = vmatmul.mubr.msk.bf16.gmra.mxu0 %vm53_vm0, %v5815_v28 }
 0x7f8   :  { %v6254_v50 = vpop.f32.mrf.mxu1  ;;  %5158 = vmatprep.mubr.msk.bf16.mxu0 %vm5649_vm1, %v5648_v43 }
 0x7fa   :  { %v5141_v39 = vpop.f32.mrf.mxu1 }
 0x7fc   :  { %v6258_v41 = vpop.f32.mrf.mxu1 }
 0x7fe   :  { %v5144_v46 = vpop.f32.mrf.mxu1 }
 0x7ff   :  { %5159 = vmatmul.mubr.msk.bf16.gmra.mxu0 %vm53_vm0, %v5817_v29 }
 0x800   :  { %v6262_v42 = vpop.f32.mrf.mxu1  ;;  %5182 = vmatprep.mubr.msk.bf16.mxu0 %vm5649_vm1, %v5648_v43 }
 0x802   :  { %v5145_v47 = vpop.f32.mrf.mxu1 }
 0x804   :  { %v2263_v45 = vpop.f32.mrf.mxu1 }
 0x805   :  { %v2264_v49 = vadd.f32 %v4590_v48, %v2263_v45 }
 0x806   :  { %v5168_v53 = vpop.f32.mrf.mxu1 }
 0x807   :  { %v2374_v54 = vpack.c.bf16 %v2264_v49, %v2264_v49  ;;  %5183 = vmatmul.mubr.msk.bf16.vlgmr.msra.gmra.mxu0 %vm53_vm0, %v5807_v18 }
 0x808   :  { %v2266_v40 = vpop.f32.mrf.mxu1  ;;  %5186 = vmatprep.mubr.msk.bf16.mxu0 %vm5649_vm1, %v5648_v43 }
 0x809   :  { %v2384_v44 = vsel %vm431_vm2, %v2374_v54, 0  ;;  %v2267_v58 = vadd.f32 %v4590_v48, %v2266_v40 }
 0x80a   :  { %v5169_v59 = vpop.f32.mrf.mxu1  ;;  %5195 = vmatpush3.bf16.xpose.msra.mxu1 %v2384_v44 }
 0x80b   :  { %5200 = vmatprep.subr.bf16.mxu1 %v5648_v43  ;;  %v2375_v27 = vpack.c.bf16 %v2267_v58, %v2267_v58 }
 0x80c   :  { %v2271_v60 = vpop.f32.mrf.mxu1 }
 0x80d   :  { %v2272_v0 = vadd.f32 %v4590_v48, %v2271_v60  ;;  %v2430_v26 = vsel %vm431_vm2, %v2375_v27, 0 }
 0x80e   :  { %v5172_v2 = vpop.f32.mrf.mxu1 }
 0x80f   :  { %5187 = vmatmul.mubr.msk.bf16.gmra.mxu0 %vm53_vm0, %v5815_v28  ;;  %v2376_v33 = vpack.c.bf16 %v2272_v0, %v2272_v0 }
 0x810   :  { %v2274_v3 = vpop.f32.mrf.mxu1  ;;  %5190 = vmatprep.mubr.msk.bf16.mxu0 %vm5649_vm1, %v5648_v43 }
 0x811   :  { %v2275_v52 = vadd.f32 %v4590_v48, %v2274_v3  ;;  %v2476_v39 = vsel %vm431_vm2, %v2376_v33, 0  ;;  %v4601_v3 = vld [vmem:[%s6823_s4 + $0xa] ss:$0 sm:$0xff] }
 0x812   :  { %v5173_v51 = vpop.f32.mrf.mxu1 }
 0x813   :  { %v2377_v55 = vpack.c.bf16 %v2275_v52, %v2275_v52 }
 0x814   :  { %v2279_v57 = vpop.f32.mrf.mxu1 }
 0x815   :  { %v2522_v61 = vsel %vm431_vm2, %v2377_v55, 0  ;;  %v2280_v62 = vadd.f32 %v4590_v48, %v2279_v57 }
 0x816   :  { %v5176_v63 = vpop.f32.mrf.mxu1  ;;  %5213 = vmatpush3.bf16.xpose.msra.mxu0 %v2522_v61 }
 0x817   :  { %5191 = vmatmul.mubr.msk.bf16.gmra.mxu0 %vm53_vm0, %v5817_v29  ;;  %5224 = vmatprep.subr.bf16.mxu0 %v5648_v43  ;;  %v2378_v54 = vpack.c.bf16 %v2280_v62, %v2280_v62 }
 0x818   :  { %v2282_v6 = vpop.f32.mrf.mxu1  ;;  %5214 = vmatprep.mubr.msk.bf16.mxu0 %vm5649_vm1, %v5648_v43 }
 0x819   :  { %v2283_v7 = vadd.f32 %v4590_v48, %v2282_v6  ;;  %v2568_v60 = vsel %vm431_vm2, %v2378_v54, 0 }
 0x81a   :  { %v5177_v8 = vpop.f32.mrf.mxu1 }
 0x81b   :  { %v2379_v46 = vpack.c.bf16 %v2283_v7, %v2283_v7 }
 0x81d   :  { %v2614_v40 = vsel %vm431_vm2, %v2379_v46, 0 }
 0x897   :  { %v6285_v4 = vpop.f32.mrf.mxu0 }
 0x899   :  { %v5122_v5 = vpop.f32.mrf.mxu0 }
 0x89b   :  { %v6287_v1 = vpop.f32.mrf.mxu0 }
 0x89d   :  { %v5123_v9 = vpop.f32.mrf.mxu0 }
 0x89f   :  { %v6289_v10 = vpop.f32.mrf.mxu0 }
 0x8a1   :  { %v5126_v11 = vpop.f32.mrf.mxu0 }
 0x8a3   :  { %v6291_v12 = vpop.f32.mrf.mxu0 }
 0x8a5   :  { %v5127_v13 = vpop.f32.mrf.mxu0 }
 0x8a7   :  { %v6293_v14 = vpop.f32.mrf.mxu0 }
 0x8a9   :  { %v5130_v16 = vpop.f32.mrf.mxu0 }
 0x8ab   :  { %v6295_v15 = vpop.f32.mrf.mxu0 }
 0x8ad   :  { %v5131_v19 = vpop.f32.mrf.mxu0 }
 0x8af   :  { %v2181_v21 = vpop.f32.mrf.mxu0 }
 0x8b0   :  { %v2182_v22 = vadd.f32 %v4579_v20, %v2181_v21 }
 0x8b1   :  { %v5152_v17 = vpop.f32.mrf.mxu0 }
 0x8b2   :  { %v2368_v24 = vpack.c.bf16 %v2182_v22, %v2182_v22 }
 0x8b3   :  { %v2184_v25 = vpop.f32.mrf.mxu0 }
 0x8b4   :  { %5197 = vmatmul.mubr.msk.bf16.vlgmr.msra.gmra.mxu1 %vm431_vm2, %v2368_v24  ;;  %v2185_v37 = vadd.f32 %v4579_v20, %v2184_v25 }
 0x8b5   :  { %5201 = vmatpush3.bf16.xpose.msra.mxu1 %v2430_v26  ;;  %v5153_v30 = vpop.f32.mrf.mxu0  ;;  %5202 = vmatprep.mubr.msk.bf16.mxu1 %vm5649_vm1, %v5648_v43 }
 0x8b6   :  { %5206 = vmatprep.subr.bf16.mxu1 %v5648_v43  ;;  %v2369_v36 = vpack.c.bf16 %v2185_v37, %v2185_v37 }
 0x8b7   :  { %v2189_v32 = vpop.f32.mrf.mxu0 }
 0x8b8   :  { %v2190_v45 = vadd.f32 %v4579_v20, %v2189_v32 }
 0x8b9   :  { %v5156_v35 = vpop.f32.mrf.mxu0 }
 0x8ba   :  { %v2370_v58 = vpack.c.bf16 %v2190_v45, %v2190_v45 }
 0x8bb   :  { %v2192_v38 = vpop.f32.mrf.mxu0 }
 0x8bc   :  { %v2193_v47 = vadd.f32 %v4579_v20, %v2192_v38  ;;  %5203 = vmatmul.mubr.msk.bf16.vlgmr.msra.gmra.mxu1 %vm431_vm2, %v2369_v36 }
 0x8bd   :  { %5207 = vmatpush3.bf16.xpose.msra.mxu1 %v2476_v39  ;;  %v5157_v48 = vpop.f32.mrf.mxu0  ;;  %5208 = vmatprep.mubr.msk.bf16.mxu1 %vm5649_vm1, %v5648_v43 }
 0x8be   :  { %v2371_v49 = vpack.c.bf16 %v2193_v47, %v2193_v47  ;;  %5218 = vmatprep.subr.bf16.mxu1 %v5648_v43 }
 0x8bf   :  { %v2197_v53 = vpop.f32.mrf.mxu0 }
 0x8c0   :  { %5215 = vmatmul.mubr.msk.bf16.vlgmr.msra.gmra.mxu0 %vm431_vm2, %v2371_v49  ;;  %v2198_v52 = vadd.f32 %v4579_v20, %v2197_v53 }
 0x8c1   :  { %5225 = vmatpush3.bf16.xpose.msra.mxu0 %v2614_v40  ;;  %v5160_v44 = vpop.f32.mrf.mxu0  ;;  %5226 = vmatprep.mubr.msk.bf16.mxu0 %vm5649_vm1, %v5648_v43 }
 0x8c2   :  { %5236 = vmatprep.subr.bf16.mxu0 %v5648_v43  ;;  %v2372_v62 = vpack.c.bf16 %v2198_v52, %v2198_v52 }
 0x8c3   :  { %v2200_v59 = vpop.f32.mrf.mxu0 }
 0x8c4   :  { %v2201_v0 = vadd.f32 %v4579_v20, %v2200_v59  ;;  %5209 = vmatmul.mubr.msk.bf16.vlgmr.msra.gmra.mxu1 %vm431_vm2, %v2370_v58 }
 0x8c5   :  { %5219 = vmatpush3.bf16.xpose.msra.mxu1 %v2568_v60  ;;  %v5161_v2 = vpop.f32.mrf.mxu0  ;;  %5220 = vmatprep.mubr.msk.bf16.mxu1 %vm5649_vm1, %v5648_v43 }
 0x8c6   :  { %v2373_v51 = vpack.c.bf16 %v2201_v0, %v2201_v0  ;;  %5230 = vmatprep.subr.bf16.mxu1 %v5648_v43 }
 0x8c7   :  { %v2345_v55 = vpop.f32.mrf.mxu0 }
 0x8c8   :  { %v2346_v57 = vadd.f32 %v4601_v3, %v2345_v55  ;;  %5227 = vmatmul.mubr.msk.bf16.vlgmr.msra.gmra.mxu0 %vm431_vm2, %v2373_v51 }
 0x8c9   :  { %v5184_v61 = vpop.f32.mrf.mxu0  ;;  %5238 = vmatprep.mubr.msk.bf16.mxu0 %vm5649_vm1, %v5648_v43 }
 0x8ca   :  { %v2740_v63 = vpack.c.bf16 %v2346_v57, %v2346_v57 }
 0x8cb   :  { %v2348_v6 = vpop.f32.mrf.mxu0 }
 0x8cc   :  { %v2750_v7 = vsel %vm801_vm3, %v2740_v63, 0  ;;  %v2349_v8 = vadd.f32 %v4601_v3, %v2348_v6  ;;  %5221 = vmatmul.mubr.msk.bf16.vlgmr.msra.gmra.mxu1 %vm431_vm2, %v2372_v62 }
 0x8cd   :  { %v5185_v5 = vpop.f32.mrf.mxu0  ;;  %5231 = vmatpush3.bf16.msra.mxu1 %v2750_v7  ;;  %5232 = vmatprep.mubr.msk.bf16.mxu1 %vm5649_vm1, %v5648_v43 }
 0x8ce   :  { %v2741_v9 = vpack.c.bf16 %v2349_v8, %v2349_v8  ;;  %5242 = vmatprep.subr.bf16.mxu1 %v5648_v43 }
 0x8cf   :  { %v2353_v11 = vpop.f32.mrf.mxu0 }
 0x8d0   :  { %v2796_v13 = vsel %vm801_vm3, %v2741_v9, 0  ;;  %v6332_v16 = vadd.f32 %v4601_v3, %v2353_v11 }
 0x8d1   :  { %v5188_v19 = vpop.f32.mrf.mxu0  ;;  %5237 = vmatpush3.bf16.msra.mxu0 %v2796_v13 }
 0x8d2   :  { %5248 = vmatprep.subr.bf16.mxu0 %v5648_v43 }
 0x8d3   :  { %v2356_v20 = vpop.f32.mrf.mxu0 }
 0x8d4   :  { %v6335_v21 = vadd.f32 %v4601_v3, %v2356_v20 }
 0x8d5   :  { %v5189_v27 = vpop.f32.mrf.mxu0 }
 0x8d7   :  { %v2361_v22 = vpop.f32.mrf.mxu0 }
 0x8d8   :  { %v6337_v17 = vadd.f32 %v4601_v3, %v2361_v22 }
 0x8d9   :  { %v5192_v24 = vpop.f32.mrf.mxu0 }
 0x8db   :  { %v2364_v25 = vpop.f32.mrf.mxu0 }
 0x8dc   :  { %v6339_v26 = vadd.f32 %v4601_v3, %v2364_v25 }
 0x8dd   :  { %v5193_v30 = vpop.f32.mrf.mxu0 }
 0x974   :  { %v2420_v37 = vpop.f32.mrf.mxu1 }
 0x975   :  { %v2656_v32 = vmul.f32 0.35355338, %v2420_v37 }
 0x976   :  { %v5198_v33 = vpop.f32.mrf.mxu1 }
 0x977   :  { %v2662_v35 = vadd.f32 %v2656_v32, %v5926_v56 }
 0x978   :  { %v2423_v36 = vpop.f32.mrf.mxu1 }
 0x979   :  { %v2668_v38 = vsel %vm431_vm2, %v2662_v35, -inf }
 0x97a   :  { %2669 = vmax.xlane.f32.xlu0 %v2668_v38  ;;  %v5199_v39 = vpop.f32.mrf.mxu1 }
 0x97c   :  { %v2466_v46 = vpop.f32.mrf.mxu1 }
 0x97d   :  { %v2657_v47 = vmul.f32 0.35355338, %v2466_v46 }
 0x97e   :  { %v5204_v48 = vpop.f32.mrf.mxu1 }
 0x97f   :  { %v2663_v45 = vadd.f32 %v2657_v47, %v5926_v56 }
 0x980   :  { %v2469_v49 = vpop.f32.mrf.mxu1  ;;  %v2558_v53 = vpop.f32.mrf.mxu0 }
 0x981   :  { %v2659_v54 = vmul.f32 0.35355338, %v2558_v53  ;;  %v2671_v40 = vsel %vm431_vm2, %v2663_v45, -inf }
 0x982   :  { %2672 = vmax.xlane.f32.xlu1 %v2671_v40  ;;  %v5205_v44 = vpop.f32.mrf.mxu1  ;;  %v5216_v58 = vpop.f32.mrf.mxu0 }
 0x983   :  { %v2665_v59 = vadd.f32 %v2659_v54, %v5926_v56 }
 0x984   :  { %v2512_v60 = vpop.f32.mrf.mxu1  ;;  %v2561_v0 = vpop.f32.mrf.mxu0 }
 0x985   :  { %v2658_v2 = vmul.f32 0.35355338, %v2512_v60  ;;  %v2677_v3 = vsel %vm431_vm2, %v2665_v59, -inf }
 0x986   :  { %v5210_v52 = vpop.f32.mrf.mxu1  ;;  %2678 = vmax.xlane.f32.xlu1 %v2677_v3  ;;  %v5217_v51 = vpop.f32.mrf.mxu0 }
 0x987   :  { %v2664_v55 = vadd.f32 %v2658_v2, %v5926_v56 }
 0x988   :  { %v2515_v57 = vpop.f32.mrf.mxu1  ;;  %v2650_v61 = vpop.f32.mrf.mxu0 }
 0x989   :  { %v2661_v62 = vmul.f32 0.35355338, %v2650_v61  ;;  %v2674_v63 = vsel %vm431_vm2, %v2664_v55, -inf }
 0x98a   :  { %2675 = vmax.xlane.f32.xlu0 %v2674_v63  ;;  %v5211_v6 = vpop.f32.mrf.mxu1  ;;  %v5228_v7 = vpop.f32.mrf.mxu0 }
 0x98b   :  { %v2667_v8 = vadd.f32 %v2661_v62, %v5926_v56 }
 0x98c   :  { %v2604_v5 = vpop.f32.mrf.mxu1  ;;  %v2653_v9 = vpop.f32.mrf.mxu0 }
 0x98d   :  { %v2660_v11 = vmul.f32 0.35355338, %v2604_v5  ;;  %v2683_v13 = vsel %vm431_vm2, %v2667_v8, -inf  ;;  %v2742_v9 = vpack.c.bf16 %v6332_v16, %v6332_v16  ;;  %v2743_v16 = vpack.c.bf16 %v6335_v21, %v6335_v21 }
 0x98e   :  { %v5222_v19 = vpop.f32.mrf.mxu1  ;;  %2684 = vmax.xlane.f32.xlu1 %v2683_v13  ;;  %v5229_v20 = vpop.f32.mrf.mxu0  ;;  %v2744_v21 = vpack.c.bf16 %v6337_v17, %v6337_v17 }
 0x98f   :  { %v2666_v27 = vadd.f32 %v2660_v11, %v5926_v56  ;;  %v2842_v20 = vsel %vm801_vm3, %v2742_v9, 0 }
 0x990   :  { %v2607_v22 = vpop.f32.mrf.mxu1 }
 0x991   :  { %v2680_v24 = vsel %vm431_vm2, %v2666_v27, -inf }
 0x992   :  { %2681 = vmax.xlane.f32.xlu0 %v2680_v24  ;;  %v5223_v25 = vpop.f32.mrf.mxu1 }
 0xa03   :  { %v2670_v30 = vpop.xlane.xlu0 %2669 }
 0xa04   :  { %v2686_v37 = vsub.f32 %v2662_v35, %v2670_v30 }
 0xa06   :  { %v2692_v32 = vmul.f32 1.442695, %v2686_v37 }
 0xa08   :  { %5558 = vpow2.f32 %v2692_v32  ;;  %v2888_v32 = vsel %vm801_vm3, %v2743_v16, 0 }
 0xa0b   :  { %v2673_v33 = vpop.xlane.xlu1 %2672 }
 0xa0c   :  { %v2687_v36 = vsub.f32 %v2663_v45, %v2673_v33 }
 0xa0e   :  { %v2694_v38 = vmul.f32 1.442695, %v2687_v36 }
 0xa0f   :  { %v2679_v39 = vpop.xlane.xlu1 %2678 }
 0xa10   :  { %5560 = vpow2.f32 %v2694_v38  ;;  %v2689_v46 = vsub.f32 %v2665_v59, %v2679_v39  ;;  %v2745_v38 = vpack.c.bf16 %v6339_v26, %v6339_v26 }
 0xa12   :  { %v2698_v47 = vmul.f32 1.442695, %v2689_v46 }
 0xa13   :  { %v2676_v48 = vpop.xlane.xlu0 %2675 }
 0xa14   :  { %5562 = vpow2.f32 %v2698_v47  ;;  %v2688_v49 = vsub.f32 %v2664_v55, %v2676_v48 }
 0xa15   :  { %v5559_v53 = vpop.eup %5558 }
 0xa16   :  { %v2696_v54 = vmul.f32 1.442695, %v2688_v49  ;;  %v2704_v40 = vsel %vm431_vm2, %v5559_v53, 0.0  ;;  %v2934_v49 = vsel %vm801_vm3, %v2744_v21, 0 }
 0xa17   :  { %2705 = vadd.xlane.f32.xlu0 %v2704_v40  ;;  %v2685_v44 = vpop.xlane.xlu1 %2684  ;;  %v5482_v40 = vld [vmem:[%s6820_s3 + $0x38] sm:$0xff]  }
 0xa18   :  { %5564 = vpow2.f32 %v2696_v54  ;;  %v2691_v35 = vsub.f32 %v2667_v8, %v2685_v44 }
 0xa1a   :  { %v2702_v58 = vmul.f32 1.442695, %v2691_v35 }
 0xa1b   :  { %v2682_v60 = vpop.xlane.xlu0 %2681 }
 0xa1c   :  { %5566 = vpow2.f32 %v2702_v58  ;;  %v2690_v45 = vsub.f32 %v2666_v27, %v2682_v60  ;;  %v5483_v58 = vld [vmem:[%s6820_s3 + $0x30] sm:$0xff]   ;;  %v5484_v60 = vld [vmem:[%s6820_s3 + $0xb8] sm:$0xff]  }
 0xa1d   :  { %v5561_v0 = vpop.eup %5560 }
 0xa1e   :  { %v2700_v2 = vmul.f32 1.442695, %v2690_v45  ;;  %v2707_v59 = vsel %vm431_vm2, %v5561_v0, 0.0  ;;  %v5485_v45 = vld [vmem:[%s6820_s3 + $0xb0] sm:$0xff]  }
 0xa1f   :  { %2708 = vadd.xlane.f32.xlu1 %v2707_v59 }
 0xa20   :  { %5568 = vpow2.f32 %v2700_v2 }
 0xa21   :  { %v5563_v3 = vpop.eup %5562 }
 0xa22   :  { %v2713_v52 = vsel %vm431_vm2, %v5563_v3, 0.0 }
 0xa23   :  { %2714 = vadd.xlane.f32.xlu1 %v2713_v52 }
 0xa25   :  { %v5565_v51 = vpop.eup %5564 }
 0xa26   :  { %v2710_v55 = vsel %vm431_vm2, %v5565_v51, 0.0 }
 0xa27   :  { %2711 = vadd.xlane.f32.xlu0 %v2710_v55 }
 0xa29   :  { %v5567_v57 = vpop.eup %5566 }
 0xa2a   :  { %v2719_v61 = vsel %vm431_vm2, %v5567_v57, 0.0 }
 0xa2b   :  { %2720 = vadd.xlane.f32.xlu1 %v2719_v61 }
 0xa2d   :  { %v5569_v62 = vpop.eup %5568 }
 0xa2e   :  { %v2716_v63 = vsel %vm431_vm2, %v5569_v62, 0.0 }
 0xa2f   :  { %2717 = vadd.xlane.f32.xlu0 %v2716_v63 }
 0xaa0   :  { %v2706_v6 = vpop.xlane.xlu0 %2705 }
 0xaa1   :  { %5570 = vrcp.f32 %v2706_v6  ;;  %v5487_v6 = vld [vmem:[%s6820_s3 + $0x70] sm:$0xff]  }
 0xaa8   :  { %v2709_v7 = vpop.xlane.xlu1 %2708 }
 0xaa9   :  { %5572 = vrcp.f32 %v2709_v7 }
 0xaac   :  { %v2715_v8 = vpop.xlane.xlu1 %2714 }
 0xaad   :  { %5574 = vrcp.f32 %v2715_v8 }
 0xaae   :  { %v5571_v5 = vpop.eup %5570 }
 0xaaf   :  { %v2728_v11 = vmul.f32 %v5571_v5, %v5559_v53  ;;  %v2980_v53 = vsel %vm801_vm3, %v2745_v38, 0 }
 0xab0   :  { %v2712_v13 = vpop.xlane.xlu0 %2711 }
 0xab1   :  { %v2734_v19 = vpack.c.bf16 %v2728_v11, %v2728_v11  ;;  %5576 = vrcp.f32 %v2712_v13 }
 0xab3   :  { %5233 = vmatmul.mubr.msk.bf16.vlgmr.msra.gmra.mxu1 %vm431_vm2, %v2734_v19 }
 0xab4   :  { %5243 = vmatpush3.bf16.msra.mxu1 %v2842_v20  ;;  %v2721_v27 = vpop.xlane.xlu1 %2720  ;;  %5244 = vmatprep.mubr.msk.bf16.mxu1 %vm5649_vm1, %v5648_v43 }
 0xab5   :  { %5578 = vrcp.f32 %v2721_v27  ;;  %5254 = vmatprep.subr.bf16.mxu1 %v5648_v43 }
 0xab6   :  { %v5573_v22 = vpop.eup %5572 }
 0xab7   :  { %v2729_v24 = vmul.f32 %v5573_v22, %v5561_v0  ;;  %v4619_v0 = vld [vmem:[%s6824_s5 + $0x8] sm:$0xf] }
 0xab8   :  { %v2718_v25 = vpop.xlane.xlu0 %2717  ;;  %v3037_v2 = vsel %vm801_vm3, %v4619_v0, 0 }
 0xab9   :  { %v2735_v30 = vpack.c.bf16 %v2729_v24, %v2729_v24  ;;  %5580 = vrcp.f32 %v2718_v25 }
 0xaba   :  { %v5575_v37 = vpop.eup %5574 }
 0xabb   :  { %5239 = vmatmul.mubr.msk.bf16.vlgmr.msra.gmra.mxu0 %vm431_vm2, %v2735_v30  ;;  %v2731_v33 = vmul.f32 %v5575_v37, %v5563_v3 }
 0xabc   :  { %5249 = vmatpush3.bf16.msra.mxu0 %v2888_v32  ;;  %5250 = vmatprep.mubr.msk.bf16.mxu0 %vm5649_vm1, %v5648_v43 }
 0xabd   :  { %5260 = vmatprep.subr.bf16.mxu0 %v5648_v43  ;;  %v2737_v46 = vpack.c.bf16 %v2731_v33, %v2731_v33 }
 0xabe   :  { %v5577_v36 = vpop.eup %5576 }
 0xabf   :  { %v2730_v39 = vmul.f32 %v5577_v36, %v5565_v51 }
 0xac1   :  { %v2736_v47 = vpack.c.bf16 %v2730_v39, %v2730_v39 }
 0xac2   :  { %v5579_v48 = vpop.eup %5578 }
 0xac3   :  { %5245 = vmatmul.mubr.msk.bf16.vlgmr.msra.gmra.mxu1 %vm431_vm2, %v2736_v47  ;;  %5251 = vmatmul.mubr.msk.bf16.vlgmr.msra.gmra.mxu0 %vm431_vm2, %v2737_v46  ;;  %v2733_v54 = vmul.f32 %v5579_v48, %v5567_v57  ;;  %v5486_v57 = vld [vmem:[%s6820_s3 + $0x78] sm:$0xff]  }
 0xac4   :  { %5255 = vmatpush3.bf16.msra.mxu1 %v2934_v49  ;;  %5261 = vmatpush3.bf16.msra.mxu0 %v2980_v53 }
 0xac5   :  { %5256 = vmatprep.mubr.msk.bf16.mxu1 %vm5649_vm1, %v5648_v43  ;;  %5262 = vmatprep.mubr.msk.bf16.mxu0 %vm5649_vm1, %v5648_v43  ;;  %v2739_v44 = vpack.c.bf16 %v2733_v54, %v2733_v54 }
 0xac6   :  { %v5581_v17 = vpop.eup %5580  ;;  %5280 = vmatprep.subr.bf16.mxu0 %v5648_v43  ;;  %5266 = vmatprep.subr.bf16.mxu1 %v5648_v43 }
 0xac7   :  { %v2732_v26 = vmul.f32 %v5581_v17, %v5569_v62 }
 0xac9   :  { %v2738_v35 = vpack.c.bf16 %v2732_v26, %v2732_v26 }
 0xacb   :  { %5257 = vmatmul.mubr.msk.bf16.vlgmr.msra.gmra.mxu1 %vm431_vm2, %v2738_v35  ;;  %5263 = vmatmul.mubr.msk.bf16.vlgmr.msra.gmra.mxu0 %vm431_vm2, %v2739_v44 }
 0xacc   :  { %5281 = vmatpush3.bf16.msra.mxu0 %v5482_v40  ;;  %5284 = vmatprep.mubr.msk.bf16.mxu0 %vm5649_vm1, %v5648_v43 }
 0xacd   :  { %5282 = vmatprep.subr.bf16.mxu0 %v5648_v43  ;;  %5268 = vmatprep.mubr.msk.bf16.mxu1 %vm5649_vm1, %v5648_v43 }
 0xace   :  { %5267 = vmatpush3.bf16.msra.mxu1 %v3037_v2 }
 0xacf   :  { %5296 = vmatprep.subr.bf16.mxu1 %v5648_v43 }
 0xad0   :  { %5283 = vmatpush3.bf16.msra.mxu0 %v5483_v58 }
 0xad1   :  { %5312 = vmatprep.subr.bf16.mxu0 %v5648_v43 }
 0xad3   :  { %5285 = vmatmul.mubr.msk.bf16.vlgmr.msra.gmra.mxu0 %vm53_vm0, %v5807_v18 }
 0xad4   :  { %5288 = vmatprep.mubr.msk.bf16.mxu0 %vm5649_vm1, %v5648_v43  ;;  %5313 = vmatpush3.bf16.msra.mxu0 %v5484_v60  ;;  %v6486_v60 = vld [vmem:[%s6823_s4 + $0xb] ss:$0 sm:$0xff] }
 0xad5   :  { %5314 = vmatprep.subr.bf16.mxu0 %v5648_v43 }
 0xad8   :  { %5315 = vmatpush3.bf16.msra.mxu0 %v5485_v45 }
 0xad9   :  { %5334 = vmatprep.subr.bf16.mxu0 %v5648_v43 }
 0xadb   :  { %5289 = vmatmul.mubr.msk.bf16.gmra.mxu0 %vm53_vm0, %v5815_v28 }
 0xadc   :  { %5292 = vmatprep.mubr.msk.bf16.mxu0 %vm5649_vm1, %v5648_v43 }
 0xae3   :  { %5293 = vmatmul.mubr.msk.bf16.gmra.mxu0 %vm53_vm0, %v5817_v29 }
 0xae4   :  { %5316 = vmatprep.mubr.msk.bf16.mxu0 %vm5649_vm1, %v5648_v43 }
 0xaeb   :  { %5317 = vmatmul.mubr.msk.bf16.vlgmr.msra.gmra.mxu0 %vm53_vm0, %v5807_v18 }
 0xaec   :  { %5320 = vmatprep.mubr.msk.bf16.mxu0 %vm5649_vm1, %v5648_v43 }
 0xaf3   :  { %5321 = vmatmul.mubr.msk.bf16.gmra.mxu0 %vm53_vm0, %v5815_v28 }
 0xaf4   :  { %5324 = vmatprep.mubr.msk.bf16.mxu0 %vm5649_vm1, %v5648_v43 }
 0xafb   :  { %5325 = vmatmul.mubr.msk.bf16.gmra.mxu0 %vm53_vm0, %v5817_v29 }
 0xafc   :  { %5336 = vmatprep.mubr.msk.bf16.mxu0 %vm5649_vm1, %v5648_v43 }
 0xb73   :  { %v2786_v59 = vpop.f32.mrf.mxu1 }
 0xb75   :  { %v5234_v3 = vpop.f32.mrf.mxu1 }
 0xb77   :  { %v2789_v52 = vpop.f32.mrf.mxu1 }
 0xb79   :  { %v5235_v51 = vpop.f32.mrf.mxu1 }
 0xb7b   :  { %v2832_v55 = vpop.f32.mrf.mxu0 }
 0xb7c   :  { %v3022_v61 = vpack.c.bf16 %v2832_v55, %v2786_v59 }
 0xb7d   :  { %v5240_v62 = vpop.f32.mrf.mxu0 }
 0xb7e   :  { %5269 = vmatmul.mubr.msk.bf16.vlgmr.msra.gmra.mxu1 %vm431_vm2, %v3022_v61 }
 0xb7f   :  { %v2835_v63 = vpop.f32.mrf.mxu0  ;;  %5272 = vmatprep.mubr.msk.bf16.mxu1 %vm5649_vm1, %v5648_v43  ;;  %5297 = vmatpush3.bf16.msra.mxu1 %v5486_v57 }
 0xb80   :  { %5298 = vmatprep.subr.bf16.mxu1 %v5648_v43  ;;  %v2100_v63 = vadd.f32 %v6234_v31, %v6285_v4  ;;  %v2111_v31 = vadd.f32 %v6254_v50, %v6291_v12  ;;  %v4639_v50 = vld [vmem:[%s6823_s4 + $0x7] ss:$0 sm:$0xff] }
 0xb81   :  { %v5241_v7 = vpop.f32.mrf.mxu0 }
 0xb83   :  { %v2878_v8 = vpop.f32.mrf.mxu1  ;;  %v2924_v5 = vpop.f32.mrf.mxu0  ;;  %5299 = vmatpush3.bf16.msra.mxu1 %v5487_v6 }
 0xb84   :  { %v3023_v9 = vpack.c.bf16 %v2924_v5, %v2878_v8  ;;  %5328 = vmatprep.subr.bf16.mxu1 %v5648_v43  ;;  %v2103_v5 = vadd.f32 %v6241_v34, %v6287_v1  ;;  %v2116_v34 = vadd.f32 %v6258_v41, %v6293_v14  ;;  %v4628_v41 = vld [vmem:[%s6823_s4 + $0x3] ss:$0 sm:$0xff] }
 0xb85   :  { %v5246_v11 = vpop.f32.mrf.mxu1  ;;  %v5252_v13 = vpop.f32.mrf.mxu0 }
 0xb86   :  { %5273 = vmatmul.mubr.msk.bf16.gmra.mxu1 %vm431_vm2, %v3023_v9 }
 0xb87   :  { %v2881_v19 = vpop.f32.mrf.mxu1  ;;  %v2927_v20 = vpop.f32.mrf.mxu0  ;;  %5276 = vmatprep.mubr.msk.bf16.mxu1 %vm5649_vm1, %v5648_v43 }
 0xb88   :  { %v2108_v19 = vadd.f32 %v6249_v23, %v6289_v10  ;;  %v2119_v23 = vadd.f32 %v6262_v42, %v6295_v15 }
 0xb89   :  { %v5247_v27 = vpop.f32.mrf.mxu1  ;;  %v5253_v22 = vpop.f32.mrf.mxu0 }
 0xb8b   :  { %v2970_v16 = vpop.f32.mrf.mxu1  ;;  %v3016_v24 = vpop.f32.mrf.mxu0 }
 0xb8c   :  { %v3024_v25 = vpack.c.bf16 %v3016_v24, %v2970_v16 }
 0xb8d   :  { %v5258_v30 = vpop.f32.mrf.mxu1  ;;  %v5264_v37 = vpop.f32.mrf.mxu0 }
 0xb8e   :  { %5277 = vmatmul.mubr.msk.bf16.gmra.mxu1 %vm431_vm2, %v3024_v25 }
 0xb8f   :  { %v2973_v32 = vpop.f32.mrf.mxu1  ;;  %v3019_v33 = vpop.f32.mrf.mxu0  ;;  %5300 = vmatprep.mubr.msk.bf16.mxu1 %vm5649_vm1, %v5648_v43 }
 0xb91   :  { %v5259_v36 = vpop.f32.mrf.mxu1  ;;  %v5265_v21 = vpop.f32.mrf.mxu0 }
 0xb93   :  { %v6455_v38 = vpop.f32.mrf.mxu0 }
 0xb95   :  { %v5286_v39 = vpop.f32.mrf.mxu0 }
 0xb96   :  { %5301 = vmatmul.mubr.msk.bf16.vlgmr.msra.gmra.mxu1 %vm53_vm0, %v5807_v18 }
 0xb97   :  { %v6459_v46 = vpop.f32.mrf.mxu0  ;;  %5304 = vmatprep.mubr.msk.bf16.mxu1 %vm5649_vm1, %v5648_v43 }
 0xb99   :  { %v5287_v47 = vpop.f32.mrf.mxu0 }
 0xb9a   :  { %v3162_v47 = vadd.f32 %v4628_v41, %v6455_v38 }
 0xb9b   :  { %v6463_v48 = vpop.f32.mrf.mxu0 }
 0xb9d   :  { %v5290_v49 = vpop.f32.mrf.mxu0 }
 0xb9e   :  { %5305 = vmatmul.mubr.msk.bf16.gmra.mxu1 %vm53_vm0, %v5815_v28 }
 0xb9f   :  { %v6467_v53 = vpop.f32.mrf.mxu0  ;;  %5308 = vmatprep.mubr.msk.bf16.mxu1 %vm5649_vm1, %v5648_v43 }
 0xba1   :  { %v5291_v54 = vpop.f32.mrf.mxu0 }
 0xba3   :  { %v6471_v17 = vpop.f32.mrf.mxu0 }
 0xba5   :  { %v5294_v18 = vpop.f32.mrf.mxu0 }
 0xba6   :  { %5309 = vmatmul.mubr.msk.bf16.gmra.mxu1 %vm53_vm0, %v5817_v29 }
 0xba7   :  { %v6475_v26 = vpop.f32.mrf.mxu0  ;;  %5330 = vmatprep.mubr.msk.bf16.mxu1 %vm5649_vm1, %v5648_v43 }
 0xba9   :  { %v5295_v40 = vpop.f32.mrf.mxu0 }
 0xbab   :  { %v6479_v44 = vpop.f32.mrf.mxu0 }
 0xbad   :  { %v5318_v28 = vpop.f32.mrf.mxu0 }
 0xbaf   :  { %v6481_v35 = vpop.f32.mrf.mxu0 }
 0xbb1   :  { %v5319_v58 = vpop.f32.mrf.mxu0 }
 0xbb2   :  { %v3348_v58 = vpack.c.bf16 %v3162_v47, %v3162_v47 }
 0xbb3   :  { %v3333_v45 = vpop.f32.mrf.mxu0 }
 0xbb4   :  { %v6489_v29 = vadd.f32 %v6486_v60, %v3333_v45  ;;  %v3165_v45 = vadd.f32 %v4628_v41, %v6459_v46 }
 0xbb5   :  { %v5322_v0 = vpop.f32.mrf.mxu0 }
 0xbb7   :  { %v3336_v2 = vpop.f32.mrf.mxu0 }
 0xbb8   :  { %v6492_v59 = vadd.f32 %v6486_v60, %v3336_v2 }
 0xbb9   :  { %v5323_v3 = vpop.f32.mrf.mxu0 }
 0xbbb   :  { %v3341_v52 = vpop.f32.mrf.mxu0 }
 0xbbc   :  { %v6495_v51 = vadd.f32 %v6486_v60, %v3341_v52 }
 0xbbd   :  { %v5326_v55 = vpop.f32.mrf.mxu0 }
 0xbbe   :  { %v3349_v55 = vpack.c.bf16 %v3165_v45, %v3165_v45 }
 0xbbf   :  { %v3344_v57 = vpop.f32.mrf.mxu0 }
 0xbc0   :  { %v6498_v61 = vadd.f32 %v6486_v60, %v3344_v57  ;;  %v3170_v57 = vadd.f32 %v4628_v41, %v6463_v48 }
 0xbc1   :  { %v5327_v62 = vpop.f32.mrf.mxu0 }
 0xc3e   :  { %v3073_v6 = vpop.f32.mrf.mxu1 }
 0xc3f   :  { %v6502_v7 = vadd.f32 %v3073_v6, %v2100_v63 }
 0xc40   :  { %v5270_v8 = vpop.f32.mrf.mxu1 }
 0xc42   :  { %v3076_v9 = vpop.f32.mrf.mxu1 }
 0xc43   :  { %v6506_v11 = vadd.f32 %v3076_v9, %v2103_v5  ;;  %v3350_v5 = vpack.c.bf16 %v3170_v57, %v3170_v57  ;;  %v3173_v9 = vadd.f32 %v4628_v41, %v6467_v53  ;;  %v3178_v53 = vadd.f32 %v4628_v41, %v6471_v17 }
 0xc44   :  { %v5271_v13 = vpop.f32.mrf.mxu1 }
 0xc46   :  { %v3081_v20 = vpop.f32.mrf.mxu1 }
 0xc47   :  { %v6510_v27 = vadd.f32 %v3081_v20, %v2108_v19  ;;  %v3326_v19 = vadd.f32 %v6486_v60, %v6479_v44  ;;  %v3329_v44 = vadd.f32 %v6486_v60, %v6481_v35 }
 0xc48   :  { %v5274_v22 = vpop.f32.mrf.mxu1 }
 0xc4a   :  { %v3084_v4 = vpop.f32.mrf.mxu1 }
 0xc4b   :  { %v6514_v16 = vadd.f32 %v3084_v4, %v2111_v31  ;;  %v3351_v4 = vpack.c.bf16 %v3173_v9, %v3173_v9 }
 0xc4c   :  { %v5275_v24 = vpop.f32.mrf.mxu1 }
 0xc4e   :  { %v3089_v1 = vpop.f32.mrf.mxu1 }
 0xc4f   :  { %v6518_v25 = vadd.f32 %v3089_v1, %v2116_v34  ;;  %v3720_v34 = vpack.c.bf16 %v3326_v19, %v3326_v19 }
 0xc50   :  { %v5278_v30 = vpop.f32.mrf.mxu1 }
 0xc51   :  { %v3352_v30 = vpack.c.bf16 %v3178_v53, %v3178_v53  ;;  %v3730_v17 = vsel %vm801_vm3, %v3720_v34, 0 }
 0xc52   :  { %v3092_v10 = vpop.f32.mrf.mxu1 }
 0xc53   :  { %v6522_v37 = vadd.f32 %v3092_v10, %v2119_v23  ;;  %v3181_v23 = vadd.f32 %v4628_v41, %v6475_v26  ;;  %v3721_v10 = vpack.c.bf16 %v3329_v44, %v3329_v44 }
 0xc54   :  { %v5279_v32 = vpop.f32.mrf.mxu1 }
 0xc55   :  { %v3353_v35 = vpack.c.bf16 %v3181_v23, %v3181_v23  ;;  %v3776_v60 = vsel %vm801_vm3, %v3721_v10, 0 }
 0xc56   :  { %v3243_v12 = vpop.f32.mrf.mxu1 }
 0xc57   :  { %v3244_v33 = vadd.f32 %v4639_v50, %v3243_v12 }
 0xc58   :  { %v5302_v36 = vpop.f32.mrf.mxu1 }
 0xc59   :  { %v3354_v21 = vpack.c.bf16 %v3244_v33, %v3244_v33 }
 0xc5a   :  { %v3246_v14 = vpop.f32.mrf.mxu1 }
 0xc5b   :  { %v3364_v39 = vsel %vm431_vm2, %v3354_v21, 0  ;;  %v3247_v42 = vadd.f32 %v4639_v50, %v3246_v14 }
 0xc5c   :  { %v5303_v15 = vpop.f32.mrf.mxu1  ;;  %5329 = vmatpush3.bf16.xpose.msra.mxu1 %v3364_v39 }
 0xc5d   :  { %v3355_v49 = vpack.c.bf16 %v3247_v42, %v3247_v42  ;;  %5340 = vmatprep.subr.bf16.mxu1 %v5648_v43 }
 0xc5e   :  { %v3251_v54 = vpop.f32.mrf.mxu1 }
 0xc5f   :  { %v3410_v18 = vsel %vm431_vm2, %v3355_v49, 0  ;;  %v3252_v40 = vadd.f32 %v4639_v50, %v3251_v54 }
 0xc60   :  { %v5306_v28 = vpop.f32.mrf.mxu1  ;;  %5335 = vmatpush3.bf16.xpose.msra.mxu0 %v3410_v18 }
 0xc61   :  { %v3356_v0 = vpack.c.bf16 %v3252_v40, %v3252_v40  ;;  %5346 = vmatprep.subr.bf16.mxu0 %v5648_v43 }
 0xc62   :  { %v3254_v2 = vpop.f32.mrf.mxu1 }
 0xc63   :  { %v3456_v3 = vsel %vm431_vm2, %v3356_v0, 0  ;;  %v3255_v52 = vadd.f32 %v4639_v50, %v3254_v2  ;;  %5331 = vmatmul.mubr.msk.bf16.vlgmr.msra.gmra.mxu1 %vm431_vm2, %v3348_v58 }
 0xc64   :  { %v5307_v38 = vpop.f32.mrf.mxu1  ;;  %5341 = vmatpush3.bf16.xpose.msra.mxu1 %v3456_v3  ;;  %5342 = vmatprep.mubr.msk.bf16.mxu1 %vm5649_vm1, %v5648_v43 }
 0xc65   :  { %v3357_v62 = vpack.c.bf16 %v3255_v52, %v3255_v52  ;;  %5352 = vmatprep.subr.bf16.mxu1 %v5648_v43 }
 0xc66   :  { %v3259_v46 = vpop.f32.mrf.mxu1 }
 0xc67   :  { %v3502_v63 = vsel %vm431_vm2, %v3357_v62, 0  ;;  %v3260_v6 = vadd.f32 %v4639_v50, %v3259_v46  ;;  %5337 = vmatmul.mubr.msk.bf16.vlgmr.msra.gmra.mxu0 %vm431_vm2, %v3349_v55 }
 0xc68   :  { %v5310_v8 = vpop.f32.mrf.mxu1  ;;  %5347 = vmatpush3.bf16.xpose.msra.mxu0 %v3502_v63  ;;  %5348 = vmatprep.mubr.msk.bf16.mxu0 %vm5649_vm1, %v5648_v43 }
 0xc69   :  { %v3358_v13 = vpack.c.bf16 %v3260_v6, %v3260_v6  ;;  %5358 = vmatprep.subr.bf16.mxu0 %v5648_v43 }
 0xc6a   :  { %v3262_v48 = vpop.f32.mrf.mxu1 }
 0xc6b   :  { %v3548_v20 = vsel %vm431_vm2, %v3358_v13, 0  ;;  %v3263_v22 = vadd.f32 %v4639_v50, %v3262_v48  ;;  %5343 = vmatmul.mubr.msk.bf16.vlgmr.msra.gmra.mxu1 %vm431_vm2, %v3350_v5 }
 0xc6c   :  { %v5311_v31 = vpop.f32.mrf.mxu1  ;;  %5353 = vmatpush3.bf16.xpose.msra.mxu1 %v3548_v20  ;;  %5354 = vmatprep.mubr.msk.bf16.mxu1 %vm5649_vm1, %v5648_v43 }
 0xc6d   :  { %v3359_v24 = vpack.c.bf16 %v3263_v22, %v3263_v22  ;;  %5364 = vmatprep.subr.bf16.mxu1 %v5648_v43 }
 0xc6f   :  { %v3594_v1 = vsel %vm431_vm2, %v3359_v24, 0  ;;  %5349 = vmatmul.mubr.msk.bf16.vlgmr.msra.gmra.mxu0 %vm431_vm2, %v3351_v4 }
 0xc70   :  { %5359 = vmatpush3.bf16.xpose.msra.mxu0 %v3594_v1  ;;  %5360 = vmatprep.mubr.msk.bf16.mxu0 %vm5649_vm1, %v5648_v43 }
 0xc71   :  { %5370 = vmatprep.subr.bf16.mxu0 %v5648_v43 }
 0xc73   :  { %5355 = vmatmul.mubr.msk.bf16.vlgmr.msra.gmra.mxu1 %vm431_vm2, %v3352_v30 }
 0xc74   :  { %5365 = vmatpush3.bf16.msra.mxu1 %v3730_v17  ;;  %5366 = vmatprep.mubr.msk.bf16.mxu1 %vm5649_vm1, %v5648_v43 }
 0xc75   :  { %5376 = vmatprep.subr.bf16.mxu1 %v5648_v43 }
 0xc77   :  { %5361 = vmatmul.mubr.msk.bf16.vlgmr.msra.gmra.mxu0 %vm431_vm2, %v3353_v35 }
 0xc78   :  { %5371 = vmatpush3.bf16.msra.mxu0 %v3776_v60  ;;  %5372 = vmatprep.mubr.msk.bf16.mxu0 %vm5649_vm1, %v5648_v43 }
 0xc79   :  { %5382 = vmatprep.subr.bf16.mxu0 %v5648_v43 }
 0xd23   :  { %v3400_v26 = vpop.f32.mrf.mxu1 }
 0xd24   :  { %v3636_v32 = vmul.f32 0.35355338, %v3400_v26 }
 0xd25   :  { %v5332_v50 = vpop.f32.mrf.mxu1 }
 0xd26   :  { %v3642_v12 = vadd.f32 %v3636_v32, %v5926_v56 }
 0xd27   :  { %v3403_v33 = vpop.f32.mrf.mxu1  ;;  %v3446_v36 = vpop.f32.mrf.mxu0 }
 0xd28   :  { %v3637_v21 = vmul.f32 0.35355338, %v3446_v36  ;;  %v3648_v41 = vsel %vm431_vm2, %v3642_v12, -inf }
 0xd29   :  { %3649 = vmax.xlane.f32.xlu0 %v3648_v41  ;;  %v5333_v14 = vpop.f32.mrf.mxu1  ;;  %v5338_v39 = vpop.f32.mrf.mxu0 }
 0xd2a   :  { %v3643_v42 = vadd.f32 %v3637_v21, %v5926_v56 }
 0xd2b   :  { %v3449_v15 = vpop.f32.mrf.mxu0  ;;  %v3492_v47 = vpop.f32.mrf.mxu1 }
 0xd2c   :  { %v3638_v49 = vmul.f32 0.35355338, %v3492_v47  ;;  %v3651_v54 = vsel %vm431_vm2, %v3643_v42, -inf }
 0xd2d   :  { %v5344_v18 = vpop.f32.mrf.mxu1  ;;  %3652 = vmax.xlane.f32.xlu1 %v3651_v54  ;;  %v5339_v40 = vpop.f32.mrf.mxu0 }
 0xd2e   :  { %v3644_v28 = vadd.f32 %v3638_v49, %v5926_v56 }
 0xd2f   :  { %v3495_v58 = vpop.f32.mrf.mxu1  ;;  %v3538_v45 = vpop.f32.mrf.mxu0 }
 0xd30   :  { %v3639_v0 = vmul.f32 0.35355338, %v3538_v45  ;;  %v3654_v2 = vsel %vm431_vm2, %v3644_v28, -inf }
 0xd31   :  { %3655 = vmax.xlane.f32.xlu0 %v3654_v2  ;;  %v5345_v3 = vpop.f32.mrf.mxu1  ;;  %v5350_v52 = vpop.f32.mrf.mxu0 }
 0xd32   :  { %v3645_v38 = vadd.f32 %v3639_v0, %v5926_v56 }
 0xd33   :  { %v3541_v55 = vpop.f32.mrf.mxu0  ;;  %v3584_v57 = vpop.f32.mrf.mxu1 }
 0xd34   :  { %v3640_v62 = vmul.f32 0.35355338, %v3584_v57  ;;  %v3657_v46 = vsel %vm431_vm2, %v3645_v38, -inf }
 0xd35   :  { %v5356_v63 = vpop.f32.mrf.mxu1  ;;  %3658 = vmax.xlane.f32.xlu1 %v3657_v46  ;;  %v5351_v6 = vpop.f32.mrf.mxu0 }
 0xd36   :  { %v3646_v8 = vadd.f32 %v3640_v62, %v5926_v56  ;;  %v3723_v6 = vpack.c.bf16 %v6492_v59, %v6492_v59 }
 0xd37   :  { %v3587_v5 = vpop.f32.mrf.mxu1  ;;  %v3630_v9 = vpop.f32.mrf.mxu0 }
 0xd38   :  { %v3641_v13 = vmul.f32 0.35355338, %v3630_v9  ;;  %v3660_v48 = vsel %vm431_vm2, %v3646_v8, -inf }
 0xd39   :  { %3661 = vmax.xlane.f32.xlu0 %v3660_v48  ;;  %v5357_v19 = vpop.f32.mrf.mxu1  ;;  %v5362_v20 = vpop.f32.mrf.mxu0  ;;  %v3724_v48 = vpack.c.bf16 %v6495_v51, %v6495_v51 }
 0xd3a   :  { %v3647_v22 = vadd.f32 %v3641_v13, %v5926_v56  ;;  %v3868_v13 = vsel %vm801_vm3, %v3723_v6, 0 }
 0xd3b   :  { %v3633_v31 = vpop.f32.mrf.mxu0 }
 0xd3c   :  { %v3663_v4 = vsel %vm431_vm2, %v3647_v22, -inf  ;;  %v3725_v31 = vpack.c.bf16 %v6498_v61, %v6498_v61 }
 0xd3d   :  { %3664 = vmax.xlane.f32.xlu1 %v3663_v4  ;;  %v5363_v53 = vpop.f32.mrf.mxu0 }
 0xdb2   :  { %v3650_v24 = vpop.xlane.xlu0 %3649 }
 0xdb3   :  { %v3666_v34 = vsub.f32 %v3642_v12, %v3650_v24  ;;  %v3960_v24 = vsel %vm801_vm3, %v3725_v31, 0  ;;  %v5644_v31 = vld [vmem:[%s6819_s0 + $0x10] sm:$0xff] }
 0xdb5   :  { %v3672_v44 = vmul.f32 1.442695, %v3666_v34 }
 0xdb6   :  { %v3653_v1 = vpop.xlane.xlu1 %3652 }
 0xdb7   :  { %5582 = vpow2.f32 %v3672_v44  ;;  %v3667_v30 = vsub.f32 %v3643_v42, %v3653_v1 }
 0xdb9   :  { %v3674_v23 = vmul.f32 1.442695, %v3667_v30 }
 0xdba   :  { %v3656_v17 = vpop.xlane.xlu0 %3655 }
 0xdbb   :  { %5584 = vpow2.f32 %v3674_v23  ;;  %v3668_v10 = vsub.f32 %v3644_v28, %v3656_v17  ;;  %v4668_v23 = vld [vmem:[%s6824_s5 + $0xc] sm:$0xf] }
 0xdbc   :  { %v4017_v17 = vsel %vm801_vm3, %v4668_v23, 0 }
 0xdbd   :  { %v3676_v35 = vmul.f32 1.442695, %v3668_v10 }
 0xdbe   :  { %v3659_v60 = vpop.xlane.xlu1 %3658 }
 0xdbf   :  { %5586 = vpow2.f32 %v3676_v35  ;;  %v3669_v26 = vsub.f32 %v3645_v38, %v3659_v60  ;;  %v3722_v38 = vpack.c.bf16 %v6489_v29, %v6489_v29 }
 0xdc1   :  { %v3678_v56 = vmul.f32 1.442695, %v3669_v26  ;;  %v3822_v63 = vsel %vm801_vm3, %v3722_v38, 0  ;;  %v4672_v38 = vld [vmem:[%s6825_s6] ss:$0 sm:$0xff] }
 0xdc2   :  { %v3662_v32 = vpop.xlane.xlu0 %3661 }
 0xdc3   :  { %5588 = vpow2.f32 %v3678_v56  ;;  %v3670_v50 = vsub.f32 %v3646_v8, %v3662_v32 }
 0xdc4   :  { %v5583_v33 = vpop.eup %5582 }
 0xdc5   :  { %v3680_v36 = vmul.f32 1.442695, %v3670_v50  ;;  %v3684_v12 = vsel %vm431_vm2, %v5583_v33, 0.0 }
 0xdc6   :  { %3685 = vadd.xlane.f32.xlu0 %v3684_v12  ;;  %v3665_v21 = vpop.xlane.xlu1 %3664 }
 0xdc7   :  { %5590 = vpow2.f32 %v3680_v36  ;;  %v3671_v41 = vsub.f32 %v3647_v22, %v3665_v21  ;;  %v3914_v22 = vsel %vm801_vm3, %v3724_v48, 0 }
 0xdc8   :  { %v5585_v14 = vpop.eup %5584 }
 0xdc9   :  { %v3682_v39 = vmul.f32 1.442695, %v3671_v41  ;;  %v3687_v42 = vsel %vm431_vm2, %v5585_v14, 0.0 }
 0xdca   :  { %3688 = vadd.xlane.f32.xlu1 %v3687_v42 }
 0xdcb   :  { %5592 = vpow2.f32 %v3682_v39 }
 0xdcc   :  { %v5587_v15 = vpop.eup %5586 }
 0xdcd   :  { %v3690_v47 = vsel %vm431_vm2, %v5587_v15, 0.0 }
 0xdce   :  { %3691 = vadd.xlane.f32.xlu0 %v3690_v47 }
 0xdd0   :  { %v5589_v49 = vpop.eup %5588 }
 0xdd1   :  { %v3693_v54 = vsel %vm431_vm2, %v5589_v49, 0.0 }
 0xdd2   :  { %3694 = vadd.xlane.f32.xlu1 %v3693_v54 }
 0xdd4   :  { %v5591_v18 = vpop.eup %5590 }
 0xdd5   :  { %v3696_v40 = vsel %vm431_vm2, %v5591_v18, 0.0 }
 0xdd6   :  { %3697 = vadd.xlane.f32.xlu0 %v3696_v40 }
 0xdd8   :  { %v5593_v28 = vpop.eup %5592 }
 0xdd9   :  { %v3699_v58 = vsel %vm431_vm2, %v5593_v28, 0.0 }
 0xdda   :  { %3700 = vadd.xlane.f32.xlu1 %v3699_v58 }
 0xe4f   :  { %v3686_v45 = vpop.xlane.xlu0 %3685 }
 0xe50   :  { %5594 = vrcp.f32 %v3686_v45 }
 0xe53   :  { %v3689_v0 = vpop.xlane.xlu1 %3688 }
 0xe54   :  { %5596 = vrcp.f32 %v3689_v0 }
 0xe57   :  { %v3692_v2 = vpop.xlane.xlu0 %3691 }
 0xe58   :  { %5598 = vrcp.f32 %v3692_v2 }
 0xe5b   :  { %v3695_v3 = vpop.xlane.xlu1 %3694 }
 0xe5c   :  { %5600 = vrcp.f32 %v3695_v3 }
 0xe5d   :  { %v5595_v52 = vpop.eup %5594 }
 0xe5e   :  { %v3708_v55 = vmul.f32 %v5595_v52, %v5583_v33 }
 0xe5f   :  { %v3698_v57 = vpop.xlane.xlu0 %3697 }
 0xe60   :  { %v3714_v62 = vpack.c.bf16 %v3708_v55, %v3708_v55  ;;  %5602 = vrcp.f32 %v3698_v57 }
 0xe61   :  { %v5597_v46 = vpop.eup %5596 }
 0xe62   :  { %v3709_v8 = vmul.f32 %v5597_v46, %v5585_v14  ;;  %5367 = vmatmul.mubr.msk.bf16.vlgmr.msra.gmra.mxu1 %vm431_vm2, %v3714_v62 }
 0xe63   :  { %5377 = vmatpush3.bf16.msra.mxu1 %v3822_v63  ;;  %v3701_v5 = vpop.xlane.xlu1 %3700  ;;  %5378 = vmatprep.mubr.msk.bf16.mxu1 %vm5649_vm1, %v5648_v43  ;;  %v5642_v63 = vld [vmem:[%s6819_s0] sm:$0xff] }
 0xe64   :  { %v3715_v9 = vpack.c.bf16 %v3709_v8, %v3709_v8  ;;  %5604 = vrcp.f32 %v3701_v5  ;;  %5388 = vmatprep.subr.bf16.mxu1 %v5648_v43 }
 0xe65   :  { %v5599_v29 = vpop.eup %5598 }
 0xe66   :  { %v3710_v19 = vmul.f32 %v5599_v29, %v5587_v15  ;;  %5373 = vmatmul.mubr.msk.bf16.vlgmr.msra.gmra.mxu0 %vm431_vm2, %v3715_v9 }
 0xe67   :  { %5383 = vmatpush3.bf16.msra.mxu0 %v3868_v13  ;;  %5384 = vmatprep.mubr.msk.bf16.mxu0 %vm5649_vm1, %v5648_v43 }
 0xe68   :  { %v3716_v59 = vpack.c.bf16 %v3710_v19, %v3710_v19  ;;  %5394 = vmatprep.subr.bf16.mxu0 %v5648_v43 }
 0xe69   :  { %v5601_v20 = vpop.eup %5600 }
 0xe6a   :  { %v3711_v4 = vmul.f32 %v5601_v20, %v5589_v49  ;;  %5379 = vmatmul.mubr.msk.bf16.vlgmr.msra.gmra.mxu1 %vm431_vm2, %v3716_v59 }
 0xe6b   :  { %5389 = vmatpush3.bf16.msra.mxu1 %v3914_v22  ;;  %5390 = vmatprep.mubr.msk.bf16.mxu1 %vm5649_vm1, %v5648_v43 }
 0xe6c   :  { %v3717_v51 = vpack.c.bf16 %v3711_v4, %v3711_v4  ;;  %5400 = vmatprep.subr.bf16.mxu1 %v5648_v43 }
 0xe6d   :  { %v5603_v53 = vpop.eup %5602 }
 0xe6e   :  { %v3712_v34 = vmul.f32 %v5603_v53, %v5591_v18  ;;  %5385 = vmatmul.mubr.msk.bf16.vlgmr.msra.gmra.mxu0 %vm431_vm2, %v3717_v51 }
 0xe6f   :  { %5395 = vmatpush3.bf16.msra.mxu0 %v3960_v24  ;;  %5396 = vmatprep.mubr.msk.bf16.mxu0 %vm5649_vm1, %v5648_v43 }
 0xe70   :  { %v3718_v61 = vpack.c.bf16 %v3712_v34, %v3712_v34  ;;  %5414 = vmatprep.subr.bf16.mxu0 %v5648_v43 }
 0xe71   :  { %v5605_v44 = vpop.eup %5604 }
 0xe72   :  { %v3713_v1 = vmul.f32 %v5605_v44, %v5593_v28  ;;  %5391 = vmatmul.mubr.msk.bf16.vlgmr.msra.gmra.mxu1 %vm431_vm2, %v3718_v61  ;;  %v5645_v61 = vld [vmem:[%s6819_s0 + $0x18] sm:$0xff] }
 0xe73   :  { %5402 = vmatprep.mubr.msk.bf16.mxu1 %vm5649_vm1, %v5648_v43  ;;  %5401 = vmatpush3.bf16.msra.mxu1 %v4017_v17 }
 0xe74   :  { %v3719_v30 = vpack.c.bf16 %v3713_v1, %v3713_v1  ;;  %5430 = vmatprep.subr.bf16.mxu1 %v5648_v43 }
 0xe76   :  { %5397 = vmatmul.mubr.msk.bf16.vlgmr.msra.gmra.mxu0 %vm431_vm2, %v3719_v30 }
 0xe77   :  { %5418 = vmatprep.mubr.msk.bf16.mxu0 %vm5649_vm1, %v5648_v43 }
 0xf22   :  { %v3766_v10 = vpop.f32.mrf.mxu1 }
 0xf24   :  { %v5368_v35 = vpop.f32.mrf.mxu1 }
 0xf26   :  { %v3769_v60 = vpop.f32.mrf.mxu1  ;;  %v3812_v26 = vpop.f32.mrf.mxu0 }
 0xf27   :  { %v4002_v56 = vpack.c.bf16 %v3812_v26, %v3766_v10  ;;  %v5646_v10 = vld [vmem:[%s6819_s0 + $0x20] sm:$0xff] }
 0xf28   :  { %v5369_v32 = vpop.f32.mrf.mxu1  ;;  %v5374_v50 = vpop.f32.mrf.mxu0 }
 0xf29   :  { %5403 = vmatmul.mubr.msk.bf16.vlgmr.msra.gmra.mxu1 %vm431_vm2, %v4002_v56  ;;  %v5647_v32 = vld [vmem:[%s6819_s0 + $0x28] sm:$0xff] }
 0xf2a   :  { %v3815_v33 = vpop.f32.mrf.mxu0  ;;  %v3858_v36 = vpop.f32.mrf.mxu1  ;;  %5406 = vmatprep.mubr.msk.bf16.mxu1 %vm5649_vm1, %v5648_v43 }
 0xf2c   :  { %v5375_v12 = vpop.f32.mrf.mxu0  ;;  %v5380_v21 = vpop.f32.mrf.mxu1 }
 0xf2e   :  { %v3861_v41 = vpop.f32.mrf.mxu1  ;;  %v3904_v14 = vpop.f32.mrf.mxu0 }
 0xf2f   :  { %v4003_v39 = vpack.c.bf16 %v3904_v14, %v3858_v36 }
 0xf30   :  { %v5381_v42 = vpop.f32.mrf.mxu1  ;;  %v5386_v15 = vpop.f32.mrf.mxu0 }
 0xf31   :  { %5407 = vmatmul.mubr.msk.bf16.gmra.mxu1 %vm431_vm2, %v4003_v39 }
 0xf32   :  { %v3907_v47 = vpop.f32.mrf.mxu0  ;;  %v3950_v49 = vpop.f32.mrf.mxu1  ;;  %5410 = vmatprep.mubr.msk.bf16.mxu1 %vm5649_vm1, %v5648_v43 }
 0xf34   :  { %v5387_v54 = vpop.f32.mrf.mxu0  ;;  %v5392_v18 = vpop.f32.mrf.mxu1 }
 0xf36   :  { %v3953_v40 = vpop.f32.mrf.mxu1  ;;  %v3996_v28 = vpop.f32.mrf.mxu0 }
 0xf37   :  { %v4004_v58 = vpack.c.bf16 %v3996_v28, %v3950_v49 }
 0xf38   :  { %v5393_v45 = vpop.f32.mrf.mxu1  ;;  %v5398_v0 = vpop.f32.mrf.mxu0 }
 0xf39   :  { %5411 = vmatmul.mubr.msk.bf16.gmra.mxu1 %vm431_vm2, %v4004_v58 }
 0xf3a   :  { %v3999_v2 = vpop.f32.mrf.mxu0  ;;  %5446 = vmatprep.mubr.msk.bf16.mxu1 %vm5649_vm1, %v5648_v43 }
 0xf3c   :  { %v5399_v3 = vpop.f32.mrf.mxu0 }
 0xfe9   :  { %v4053_v52 = vpop.f32.mrf.mxu1 }
 0xfea   :  { %v4076_v55 = vadd.f32 %v4053_v52, %v6502_v7  ;;  %v5643_v7 = vld [vmem:[%s6819_s0 + $0x8] sm:$0xff] }
 0xfeb   :  { %v5404_v57 = vpop.f32.mrf.mxu1 }
 0xfec   :  { %v4089_v62 = vadd.f32 %v4672_v38, %v4076_v55 }
 0xfed   :  { %v4056_v46 = vpop.f32.mrf.mxu1 }
 0xfee   :  { %v6647_v6 = vadd.f32 %v5642_v63, %v4089_v62  ;;  %v4077_v8 = vadd.f32 %v4056_v46, %v6506_v11 }
 0xfef   :  { %v5405_v5 = vpop.f32.mrf.mxu1 }
 0xff0   :  { %v4090_v9 = vadd.f32 %v4672_v38, %v4077_v8  ;;  %v4103_v29 = vsel %vm53_vm0, %v6647_v6, 0.0 }
 0xff1   :  { %4104 = vadd.xlane.f32.xlu0 %v4103_v29  ;;  %v4061_v13 = vpop.f32.mrf.mxu1  ;;  %v5488_v29 = vld [vmem:[%s6826_s9 + $0x8] sm:$0xff]  }
 0xff2   :  { %v6655_v48 = vadd.f32 %v5643_v7, %v4090_v9  ;;  %v4078_v19 = vadd.f32 %v4061_v13, %v6510_v27  ;;  %5415 = vmatpush3.bf16.msra.mxu0 %v5488_v29  ;;  %v5489_v13 = vld [vmem:[%s6826_s9] sm:$0xff]  }
 0xff3   :  { %v5408_v59 = vpop.f32.mrf.mxu1  ;;  %5416 = vmatprep.subr.bf16.mxu0 %v5648_v43  ;;  %v4675_v29 = vld [vmem:[%s6830_s10] ss:$0 sm:$0xff] }
 0xff4   :  { %v4091_v20 = vadd.f32 %v4672_v38, %v4078_v19  ;;  %v4106_v11 = vsel %vm53_vm0, %v6655_v48, 0.0 }
 0xff5   :  { %4107 = vadd.xlane.f32.xlu1 %v4106_v11  ;;  %v4064_v22 = vpop.f32.mrf.mxu1 }
 0xff6   :  { %v6663_v4 = vadd.f32 %v5644_v31, %v4091_v20  ;;  %v4079_v51 = vadd.f32 %v4064_v22, %v6514_v16  ;;  %5417 = vmatpush3.bf16.msra.mxu0 %v5489_v13 }
 0xff7   :  { %v5409_v53 = vpop.f32.mrf.mxu1 }
 0xff8   :  { %v4092_v24 = vadd.f32 %v4672_v38, %v4079_v51  ;;  %v4109_v27 = vsel %vm53_vm0, %v6663_v4, 0.0 }
 0xff9   :  { %4110 = vadd.xlane.f32.xlu0 %v4109_v27  ;;  %v4069_v34 = vpop.f32.mrf.mxu1 }
 0xffa   :  { %v6671_v44 = vadd.f32 %v5645_v61, %v4092_v24  ;;  %v4080_v1 = vadd.f32 %v4069_v34, %v6518_v25 }
 0xffb   :  { %v5412_v30 = vpop.f32.mrf.mxu1 }
 0xffc   :  { %v4093_v23 = vadd.f32 %v4672_v38, %v4080_v1  ;;  %v4112_v16 = vsel %vm53_vm0, %v6671_v44, 0.0 }
 0xffd   :  { %4113 = vadd.xlane.f32.xlu1 %v4112_v16  ;;  %v4072_v17 = vpop.f32.mrf.mxu1 }
 0xffe   :  { %v6679_v35 = vadd.f32 %v5646_v10, %v4093_v23  ;;  %v4081_v60 = vadd.f32 %v4072_v17, %v6522_v37  ;;  %v4673_v17 = vld [vmem:[%s6827_s7] ss:$0 sm:$0xff] }
 0xfff   :  { %v5413_v26 = vpop.f32.mrf.mxu1 }
0x1000   :  { %v4094_v56 = vadd.f32 %v4672_v38, %v4081_v60  ;;  %v4115_v25 = vsel %vm53_vm0, %v6679_v35, 0.0 }
0x1001   :  { %4116 = vadd.xlane.f32.xlu0 %v4115_v25 }
0x1002   :  { %v6687_v50 = vadd.f32 %v5647_v32, %v4094_v56 }
0x1004   :  { %v4118_v33 = vsel %vm53_vm0, %v6687_v50, 0.0 }
0x1005   :  { %4119 = vadd.xlane.f32.xlu1 %v4118_v33  ;;  %v4674_v33 = vld [vmem:[%s6828_s8] ss:$0 sm:$0xff] }
0x107a   :  { %v4105_v36 = vpop.xlane.xlu0 %4104 }
0x107b   :  { %v4121_v12 = vmul.f32 0.03125, %v4105_v36 }
0x107d   :  { %v4127_v37 = vsub.f32 %v6647_v6, %v4121_v12 }
0x107e   :  { %v4108_v21 = vpop.xlane.xlu1 %4107 }
0x107f   :  { %v4122_v41 = vmul.f32 0.03125, %v4108_v21  ;;  %v4133_v14 = vmul.f32 %v4127_v37, %v4127_v37 }
0x1081   :  { %v6693_v39 = vsub.f32 %v6655_v48, %v4122_v41  ;;  %v4139_v42 = vsel %vm53_vm0, %v4133_v14, 0.0 }
0x1082   :  { %v4111_v15 = vpop.xlane.xlu0 %4110  ;;  %4140 = vadd.xlane.f32.xlu0 %v4139_v42 }
0x1083   :  { %v4123_v47 = vmul.f32 0.03125, %v4111_v15  ;;  %v4134_v49 = vmul.f32 %v6693_v39, %v6693_v39 }
0x1085   :  { %v6699_v54 = vsub.f32 %v6663_v4, %v4123_v47  ;;  %v4142_v18 = vsel %vm53_vm0, %v4134_v49, 0.0 }
0x1086   :  { %v4114_v40 = vpop.xlane.xlu1 %4113  ;;  %4143 = vadd.xlane.f32.xlu1 %v4142_v18 }
0x1087   :  { %v4124_v28 = vmul.f32 0.03125, %v4114_v40  ;;  %v4135_v58 = vmul.f32 %v6699_v54, %v6699_v54 }
0x1089   :  { %v6705_v45 = vsub.f32 %v6671_v44, %v4124_v28  ;;  %v4145_v0 = vsel %vm53_vm0, %v4135_v58, 0.0 }
0x108a   :  { %4146 = vadd.xlane.f32.xlu0 %v4145_v0  ;;  %v4117_v2 = vpop.xlane.xlu0 %4116 }
0x108b   :  { %v4125_v3 = vmul.f32 0.03125, %v4117_v2  ;;  %v4136_v52 = vmul.f32 %v6705_v45, %v6705_v45 }
0x108d   :  { %v6711_v38 = vsub.f32 %v6679_v35, %v4125_v3  ;;  %v4148_v55 = vsel %vm53_vm0, %v4136_v52, 0.0 }
0x108e   :  { %4149 = vadd.xlane.f32.xlu1 %v4148_v55  ;;  %v4120_v57 = vpop.xlane.xlu1 %4119 }
0x108f   :  { %v4126_v62 = vmul.f32 0.03125, %v4120_v57  ;;  %v4137_v46 = vmul.f32 %v6711_v38, %v6711_v38  ;;  %v5491_v57 = vld [vmem:[%s6829_s11 + $0x30] sm:$0xff]  }
0x1091   :  { %v6717_v63 = vsub.f32 %v6687_v50, %v4126_v62  ;;  %v4151_v8 = vsel %vm53_vm0, %v4137_v46, 0.0  ;;  %v5492_v62 = vld [vmem:[%s6829_s11 + $0x28] sm:$0xff]   ;;  %v5493_v46 = vld [vmem:[%s6829_s11 + $0x20] sm:$0xff]  }
0x1092   :  { %4152 = vadd.xlane.f32.xlu0 %v4151_v8  ;;  %v5495_v8 = vld [vmem:[%s6829_s11 + $0x10] sm:$0xff]  }
0x1093   :  { %v4138_v5 = vmul.f32 %v6717_v63, %v6717_v63 }
0x1095   :  { %v4154_v9 = vsel %vm53_vm0, %v4138_v5, 0.0  ;;  %v5496_v5 = vld [vmem:[%s6829_s11 + $0x8] sm:$0xff]  }
0x1096   :  { %4155 = vadd.xlane.f32.xlu1 %v4154_v9  ;;  %v5497_v9 = vld [vmem:[%s6829_s11] sm:$0xff]  }
0x110b   :  { %v4141_v7 = vpop.xlane.xlu0 %4140 }
0x110c   :  { %v4157_v19 = vmul.f32 0.03125, %v4141_v7 }
0x110e   :  { %v4163_v59 = vadd.f32 1e-05, %v4157_v19 }
0x110f   :  { %v4144_v20 = vpop.xlane.xlu1 %4143 }
0x1110   :  { %5606 = vrsqrt.f32 %v4163_v59  ;;  %v4158_v11 = vmul.f32 0.03125, %v4144_v20 }
0x1112   :  { %v4164_v22 = vadd.f32 1e-05, %v4158_v11 }
0x1113   :  { %v4147_v31 = vpop.xlane.xlu0 %4146 }
0x1114   :  { %5608 = vrsqrt.f32 %v4164_v22  ;;  %v4159_v51 = vmul.f32 0.03125, %v4147_v31 }
0x1116   :  { %v4165_v53 = vadd.f32 1e-05, %v4159_v51 }
0x1117   :  { %v4150_v24 = vpop.xlane.xlu1 %4149 }
0x1118   :  { %5610 = vrsqrt.f32 %v4165_v53  ;;  %v4160_v27 = vmul.f32 0.03125, %v4150_v24 }
0x111a   :  { %v4166_v34 = vadd.f32 1e-05, %v4160_v27 }
0x111b   :  { %v4153_v61 = vpop.xlane.xlu0 %4152 }
0x111c   :  { %5612 = vrsqrt.f32 %v4166_v34  ;;  %v4161_v1 = vmul.f32 0.03125, %v4153_v61 }
0x111d   :  { %v5607_v30 = vpop.eup %5606 }
0x111e   :  { %v4175_v23 = vmul.f32 %v5607_v30, %v4127_v37  ;;  %v4167_v16 = vadd.f32 1e-05, %v4161_v1 }
0x111f   :  { %v4156_v10 = vpop.xlane.xlu1 %4155 }
0x1120   :  { %5614 = vrsqrt.f32 %v4167_v16  ;;  %v4162_v60 = vmul.f32 0.03125, %v4156_v10  ;;  %v4187_v56 = vmul.f32 %v4673_v17, %v4175_v23 }
0x1121   :  { %v5609_v26 = vpop.eup %5608 }
0x1122   :  { %v4176_v25 = vmul.f32 %v5609_v26, %v6693_v39  ;;  %v4168_v32 = vadd.f32 1e-05, %v4162_v60  ;;  %v4199_v21 = vadd.f32 %v4674_v33, %v4187_v56 }
0x1124   :  { %v4188_v36 = vmul.f32 %v4673_v17, %v4176_v25  ;;  %5616 = vrsqrt.f32 %v4168_v32 }
0x1125   :  { %v5611_v12 = vpop.eup %5610 }
0x1126   :  { %v4177_v37 = vmul.f32 %v5611_v12, %v6699_v54  ;;  %v4200_v41 = vadd.f32 %v4674_v33, %v4188_v36 }
0x1128   :  { %v4205_v14 = vpack.c.bf16 %v4200_v41, %v4199_v21  ;;  %v4189_v47 = vmul.f32 %v4673_v17, %v4177_v37 }
0x1129   :  { %v5613_v42 = vpop.eup %5612 }
0x112a   :  { %v4178_v15 = vmul.f32 %v5613_v42, %v6705_v45  ;;  %5419 = vmatmul.mubr.msk.bf16.vlgmr.msra.gmra.mxu0 %vm53_vm0, %v4205_v14  ;;  %v4201_v40 = vadd.f32 %v4674_v33, %v4189_v47 }
0x112b   :  { %5422 = vmatprep.mubr.msk.bf16.mxu0 %vm5649_vm1, %v5648_v43 }
0x112c   :  { %v4190_v39 = vmul.f32 %v4673_v17, %v4178_v15 }
0x112d   :  { %v5615_v49 = vpop.eup %5614 }
0x112e   :  { %v4179_v18 = vmul.f32 %v5615_v49, %v6711_v38  ;;  %v4202_v28 = vadd.f32 %v4674_v33, %v4190_v39  ;;  %v5490_v38 = vld [vmem:[%s6829_s11 + $0x38] sm:$0xff]  }
0x112f   :  { %5431 = vmatpush3.bf16.msra.mxu1 %v5490_v38 }
0x1130   :  { %v4206_v58 = vpack.c.bf16 %v4202_v28, %v4201_v40  ;;  %v4191_v2 = vmul.f32 %v4673_v17, %v4179_v18  ;;  %5432 = vmatprep.subr.bf16.mxu1 %v5648_v43 }
0x1131   :  { %v5617_v54 = vpop.eup %5616 }
0x1132   :  { %v4180_v0 = vmul.f32 %v5617_v54, %v6717_v63  ;;  %5423 = vmatmul.mubr.msk.bf16.gmra.mxu0 %vm53_vm0, %v4206_v58  ;;  %v4203_v3 = vadd.f32 %v4674_v33, %v4191_v2  ;;  %v5494_v63 = vld [vmem:[%s6829_s11 + $0x18] sm:$0xff]  }
0x1133   :  { %5426 = vmatprep.mubr.msk.bf16.mxu0 %vm5649_vm1, %v5648_v43  ;;  %5433 = vmatpush3.bf16.msra.mxu1 %v5491_v57 }
0x1134   :  { %v4192_v45 = vmul.f32 %v4673_v17, %v4180_v0  ;;  %5434 = vmatprep.subr.bf16.mxu1 %v5648_v43 }
0x1136   :  { %v4204_v52 = vadd.f32 %v4674_v33, %v4192_v45 }
0x1137   :  { %5435 = vmatpush3.bf16.msra.mxu1 %v5492_v62 }
0x1138   :  { %v4207_v55 = vpack.c.bf16 %v4204_v52, %v4203_v3  ;;  %5436 = vmatprep.subr.bf16.mxu1 %v5648_v43 }
0x113a   :  { %5427 = vmatmul.mubr.msk.bf16.gmra.mxu0 %vm53_vm0, %v4207_v55 }
0x113b   :  { %5437 = vmatpush3.bf16.msra.mxu1 %v5493_v46 }
0x113c   :  { %5438 = vmatprep.subr.bf16.mxu1 %v5648_v43 }
0x113f   :  { %5439 = vmatpush3.bf16.msra.mxu1 %v5494_v63 }
0x1140   :  { %5440 = vmatprep.subr.bf16.mxu1 %v5648_v43 }
0x1143   :  { %5441 = vmatpush3.bf16.msra.mxu1 %v5495_v8 }
0x1144   :  { %5442 = vmatprep.subr.bf16.mxu1 %v5648_v43 }
0x1147   :  { %5443 = vmatpush3.bf16.msra.mxu1 %v5496_v5 }
0x1148   :  { %5444 = vmatprep.subr.bf16.mxu1 %v5648_v43 }
0x114b   :  { %5445 = vmatpush3.bf16.msra.mxu1 %v5497_v9 }
0x11ea   :  { %v4274_v13 = vpop.f32.mrf.mxu0 }
0x11eb   :  { %v4275_v7 = vadd.f32 %v4675_v29, %v4274_v13  ;;  %v4681_v13 = vld [vmem:[%s6831_s12] ss:$0 sm:$0xff] }
0x11ec   :  { %v5420_v19 = vpop.f32.mrf.mxu0 }
0x11ed   :  { %v4297_v59 = vmul.f32 -1.702, %v4275_v7 }
0x11ee   :  { %v4277_v20 = vpop.f32.mrf.mxu0 }
0x11ef   :  { %v4303_v11 = vmul.f32 1.442695, %v4297_v59  ;;  %v4278_v22 = vadd.f32 %v4675_v29, %v4277_v20 }
0x11f0   :  { %v5421_v31 = vpop.f32.mrf.mxu0 }
0x11f1   :  { %5618 = vpow2.f32 %v4303_v11  ;;  %v4298_v51 = vmul.f32 -1.702, %v4278_v22 }
0x11f2   :  { %v4282_v53 = vpop.f32.mrf.mxu0 }
0x11f3   :  { %v4305_v24 = vmul.f32 1.442695, %v4298_v51  ;;  %v4283_v27 = vadd.f32 %v4675_v29, %v4282_v53 }
0x11f4   :  { %v5424_v34 = vpop.f32.mrf.mxu0 }
0x11f5   :  { %5620 = vpow2.f32 %v4305_v24  ;;  %v4299_v61 = vmul.f32 -1.702, %v4283_v27 }
0x11f6   :  { %v4285_v1 = vpop.f32.mrf.mxu0 }
0x11f7   :  { %v4307_v30 = vmul.f32 1.442695, %v4299_v61  ;;  %v4286_v23 = vadd.f32 %v4675_v29, %v4285_v1 }
0x11f8   :  { %v5425_v16 = vpop.f32.mrf.mxu0 }
0x11f9   :  { %5622 = vpow2.f32 %v4307_v30  ;;  %v4300_v17 = vmul.f32 -1.702, %v4286_v23 }
0x11fa   :  { %v4290_v10 = vpop.f32.mrf.mxu0 }
0x11fb   :  { %v4309_v60 = vmul.f32 1.442695, %v4300_v17  ;;  %v4291_v26 = vadd.f32 %v4675_v29, %v4290_v10 }
0x11fc   :  { %v5428_v56 = vpop.f32.mrf.mxu0 }
0x11fd   :  { %5624 = vpow2.f32 %v4309_v60  ;;  %v4301_v25 = vmul.f32 -1.702, %v4291_v26 }
0x11fe   :  { %v5619_v32 = vpop.eup %5618  ;;  %v4293_v33 = vpop.f32.mrf.mxu0 }
0x11ff   :  { %v4315_v36 = vadd.f32 1.0, %v5619_v32  ;;  %v4311_v12 = vmul.f32 1.442695, %v4301_v25  ;;  %v4294_v37 = vadd.f32 %v4675_v29, %v4293_v33 }
0x1200   :  { %v5429_v21 = vpop.f32.mrf.mxu0 }
0x1201   :  { %v4302_v41 = vmul.f32 -1.702, %v4294_v37  ;;  %5626 = vpow2.f32 %v4311_v12 }
0x1202   :  { %v5621_v14 = vpop.eup %5620  ;;  %5628 = vrcp.f32 %v4315_v36 }
0x1203   :  { %v4316_v42 = vadd.f32 1.0, %v5621_v14  ;;  %v4313_v15 = vmul.f32 1.442695, %v4302_v41 }
0x1205   :  { %5630 = vrcp.f32 %v4316_v42 }
0x1206   :  { %v5623_v47 = vpop.eup %5622  ;;  %5632 = vpow2.f32 %v4313_v15 }
0x1207   :  { %v4317_v39 = vadd.f32 1.0, %v5623_v47 }
0x1209   :  { %5634 = vrcp.f32 %v4317_v39 }
0x120a   :  { %v5625_v49 = vpop.eup %5624 }
0x120b   :  { %v4318_v18 = vadd.f32 1.0, %v5625_v49 }
0x120d   :  { %5636 = vrcp.f32 %v4318_v18 }
0x120e   :  { %v5627_v40 = vpop.eup %5626 }
0x120f   :  { %v5629_v28 = vpop.eup %5628  ;;  %v4319_v58 = vadd.f32 1.0, %v5627_v40 }
0x1210   :  { %v4327_v2 = vmul.f32 %v5629_v28, %v4275_v7 }
0x1211   :  { %5638 = vrcp.f32 %v4319_v58 }
0x1212   :  { %v5631_v54 = vpop.eup %5630 }
0x1213   :  { %v5633_v0 = vpop.eup %5632  ;;  %v4328_v45 = vmul.f32 %v5631_v54, %v4278_v22 }
0x1214   :  { %v4320_v3 = vadd.f32 1.0, %v5633_v0 }
0x1215   :  { %v4333_v52 = vpack.c.bf16 %v4328_v45, %v4327_v2 }
0x1216   :  { %5640 = vrcp.f32 %v4320_v3  ;;  %v5635_v55 = vpop.eup %5634 }
0x1217   :  { %5447 = vmatmul.mubr.bf16.vlgmr.msra.gmra.mxu1 %v4333_v52  ;;  %v4329_v57 = vmul.f32 %v5635_v55, %v4283_v27 }
0x1218   :  { %5450 = vmatprep.mubr.msk.bf16.mxu1 %vm5649_vm1, %v5648_v43 }
0x121a   :  { %v5637_v38 = vpop.eup %5636 }
0x121b   :  { %v4330_v62 = vmul.f32 %v5637_v38, %v4286_v23 }
0x121d   :  { %v4334_v46 = vpack.c.bf16 %v4330_v62, %v4329_v57 }
0x121e   :  { %v5639_v63 = vpop.eup %5638 }
0x121f   :  { %5451 = vmatmul.mubr.bf16.gmra.mxu1 %v4334_v46  ;;  %v4331_v5 = vmul.f32 %v5639_v63, %v4291_v26 }
0x1220   :  { %5454 = vmatprep.mubr.msk.bf16.mxu1 %vm5649_vm1, %v5648_v43 }
0x1223   :  { %v5641_v8 = vpop.eup %5640 }
0x1224   :  { %v4332_v9 = vmul.f32 %v5641_v8, %v4294_v37 }
0x1226   :  { %v4335_v29 = vpack.c.bf16 %v4332_v9, %v4331_v5 }
0x1228   :  { %5455 = vmatmul.mubr.bf16.gmra.mxu1 %v4335_v29 }
0x12d7   :  { %v4441_v7 = vpop.f32.mrf.mxu1 }
0x12d8   :  { %v4442_v19 = vadd.f32 %v4681_v13, %v4441_v7 }
0x12d9   :  { %v5448_v59 = vpop.f32.mrf.mxu1 }
0x12da   :  { %v4464_v20 = vadd.f32 %v4442_v19, %v6647_v6 }
0x12db   :  { %v4444_v11 = vpop.f32.mrf.mxu1 }
0x12dc   :  { %4470 = vst.msk [vmem:[%s6832_s13] sm:$0xff] %vm53_vm0, %v4464_v20  ;;  %v4445_v43 = vadd.f32 %v4681_v13, %v4444_v11 }
0x12dd   :  { %v5449_v22 = vpop.f32.mrf.mxu1 }
0x12de   :  { %v4465_v31 = vadd.f32 %v4445_v43, %v6655_v48 }
0x12df   :  { %v4449_v51 = vpop.f32.mrf.mxu1 }
0x12e0   :  { %4471 = vst.msk [vmem:[%s6832_s13 + $0x8] sm:$0xff] %vm53_vm0, %v4465_v31  ;;  %v4450_v53 = vadd.f32 %v4681_v13, %v4449_v51 }
0x12e1   :  { %v5452_v24 = vpop.f32.mrf.mxu1 }
0x12e2   :  { %v4466_v6 = vadd.f32 %v4450_v53, %v6663_v4 }
0x12e3   :  { %v4452_v27 = vpop.f32.mrf.mxu1 }
0x12e4   :  { %4472 = vst.msk [vmem:[%s6832_s13 + $0x10] sm:$0xff] %vm53_vm0, %v4466_v6  ;;  %v4453_v34 = vadd.f32 %v4681_v13, %v4452_v27 }
0x12e5   :  { %v5453_v61 = vpop.f32.mrf.mxu1 }
0x12e6   :  { %v4467_v48 = vadd.f32 %v4453_v34, %v6671_v44 }
0x12e8   :  { %4473 = vst.msk [vmem:[%s6832_s13 + $0x18] sm:$0xff] %vm53_vm0, %v4467_v48  ;;  %v4457_v1 = vpop.f32.mrf.mxu1 }
0x12e9   :  { %v4458_v30 = vadd.f32 %v4681_v13, %v4457_v1 }
0x12ea   :  { %v5456_v23 = vpop.f32.mrf.mxu1 }
0x12eb   :  { %v4468_v4 = vadd.f32 %v4458_v30, %v6679_v35 }
0x12ec   :  { %v4460_v16 = vpop.f32.mrf.mxu1 }
0x12ed   :  { %4474 = vst.msk [vmem:[%s6832_s13 + $0x20] sm:$0xff] %vm53_vm0, %v4468_v4  ;;  %v4461_v17 = vadd.f32 %v4681_v13, %v4460_v16 }
0x12ee   :  { %v5457_v10 = vpop.f32.mrf.mxu1 }
0x12ef   :  { %v4469_v44 = vadd.f32 %v4461_v17, %v6687_v50 }
0x12f1   :  { %4475 = vst.msk [vmem:[%s6832_s13 + $0x28] sm:$0xff] %vm53_vm0, %v4469_v44 }

</bundles_post_ra>
